<compile_context>
chip_gen: v7x
topology: tpu7x:2x2x1
jax: 0.10.0
libtpu: 0.0.40
codegen_flags: <defaults>
</compile_context>

<pallas_src>
import functools

import jax
import jax.numpy as jnp
from jax.experimental import pallas as pl
from jax.experimental.pallas import tpu as pltpu

BN_EPS = 1e-5
K1_PAD = 16          # layer-1 im2col depth: 9 taps (cin=1) zero-padded to 16


def _pick_b_tile(batch):
    """Images folded into one grid step (matmul M dimension).

    Keep >=2 grid steps when possible (v7x has 2 TensorCores fed via the
    "parallel" axis) while blocking as much batch as possible into M, and cap
    the per-step scratch so it fits v7x's 64 MiB VMEM (32 MiB scoped default).
    """
    if batch < 2:
        return 1
    for bt in range(min(8, batch // 2), 0, -1):
        if batch % bt == 0:
            return bt
    return 1


# ----------------------------------------------------------------------------
# Fused kernel: conv1 -> conv2 -> pool -> conv3 -> conv4 -> pool
# ----------------------------------------------------------------------------
def _cnn_fused_kernel(x_ref, w1, s1, t1, w2, s2, t2, w3, s3, t3, w4, s4, t4,
                      o_ref,
                      xpad_b, col_b, xpad_c, col_c, xpad_d, col_d,
                      *, b, H, W):
    Hh, Wh = H // 2, W // 2
    Hq, Wq = H // 4, W // 4

    def zero_halo(xp):
        # Zero only the 1-pixel border (the interior is fully overwritten each
        # step).  ~25 KB of stores total per step; safe under megacore since
        # it is re-done every step on whichever core owns the step.
        bb, hp, wp, c = xp.shape
        zrow = jnp.zeros((bb, 1, wp, c), xp.dtype)
        zcol = jnp.zeros((bb, hp, 1, c), xp.dtype)
        xp[:, 0:1, :, :] = zrow
        xp[:, hp - 1:hp, :, :] = zrow
        xp[:, :, 0:1, :] = zcol
        xp[:, :, wp - 1:wp, :] = zcol

    zero_halo(xpad_b)
    zero_halo(xpad_c)
    zero_halo(xpad_d)

    def im2col(xp, col, hh, ww, cin):
        # 9 shifted copies written ONCE into a lane-dense col buffer
        # (tap offsets are 128-aligned for cin in {128, 256}).
        for tap in range(9):
            ky, kx = divmod(tap, 3)
            col[:, :, :, tap * cin:(tap + 1) * cin] = (
                xp[:, ky:ky + hh, kx:kx + ww, :])

    def conv(col_ref, w_ref, s_ref, t_ref, rows):
        # Single MXU matmul per layer (f32 accumulation) + fused folded-BN /
        # bias + ReLU epilogue on the f32 result.
        y = jnp.dot(col_ref[...].reshape(rows, col_ref.shape[-1]), w_ref[...],
                    preferred_element_type=jnp.float32)
        return jnp.maximum(y * s_ref[...] + t_ref[...], 0.0)

    def pool2x2(y, hh, ww, c):
        # (b*hh*ww, c) -> (b*hh//2, ww//2, c), 2x2 stride-2 max pooling.
        y = y.reshape(b * hh // 2, 2, ww // 2, 2, c)
        y = jnp.max(y, axis=3)
        return jnp.max(y, axis=1)

    # --- layer 1: 1 -> 128 on HxW (input already im2col'ed, K = 16) ---------
    y = jnp.dot(x_ref[...].reshape(b * H * W, K1_PAD), w1[...],
                preferred_element_type=jnp.float32)
    y = jnp.maximum(y * s1[...] + t1[...], 0.0)
    xpad_b[:, 1:H + 1, 1:W + 1, :] = (
        y.reshape(b, H, W, 128).astype(jnp.bfloat16))

    # --- layer 2: 128 -> 128 on HxW, then 2x2 max-pool -> Hh x Wh -----------
    im2col(xpad_b, col_b, H, W, 128)
    y = conv(col_b, w2, s2, t2, b * H * W)
    y = pool2x2(y, H, W, 128)
    xpad_c[:, 1:Hh + 1, 1:Wh + 1, :] = (
        y.reshape(b, Hh, Wh, 128).astype(jnp.bfloat16))

    # --- layer 3: 128 -> 256 on Hh x Wh --------------------------------------
    im2col(xpad_c, col_c, Hh, Wh, 128)
    y = conv(col_c, w3, s3, t3, b * Hh * Wh)
    xpad_d[:, 1:Hh + 1, 1:Wh + 1, :] = (
        y.reshape(b, Hh, Wh, 256).astype(jnp.bfloat16))

    # --- layer 4: 256 -> 256 on Hh x Wh, then 2x2 max-pool -> Hq x Wq --------
    im2col(xpad_d, col_d, Hh, Wh, 256)
    y = conv(col_d, w4, s4, t4, b * Hh * Wh)
    y = pool2x2(y, Hh, Wh, 256)
    o_ref[...] = y.reshape(b, Hq, Wq, 256)


def cnn_net_forward(folded, x_nchw, *, b_tile=None):
    B, C, H, W = x_nchw.shape
    assert C == 1 and H % 4 == 0 and W % 4 == 0
    if b_tile is None:
        b_tile = _pick_b_tile(B)
    assert B % b_tile == 0
    Hq, Wq = H // 4, W // 4

    # One-time boundary formatting (pure input layout prep of the tiny 1-channel
    # image): NCHW -> NHWC and the layer-1 im2col (9 taps padded to K1_PAD
    # lanes).  All convolution math stays inside the fused kernel.
    x = jnp.transpose(x_nchw, (0, 2, 3, 1))[..., 0]                 # (B, H, W)
    xp = jnp.pad(x, ((0, 0), (1, 1), (1, 1)))
    taps = [xp[:, ky:ky + H, kx:kx + W] for ky in range(3) for kx in range(3)]
    x_col = jnp.stack(taps, axis=-1)                                # (B,H,W,9)
    x_col = jnp.pad(x_col, ((0, 0), (0, 0), (0, 0), (0, K1_PAD - 9)))
    x_col = x_col.astype(jnp.bfloat16)

    kernel = functools.partial(_cnn_fused_kernel, b=b_tile, H=H, W=W)

    in_specs = [pl.BlockSpec((b_tile, H, W, K1_PAD), lambda i: (i, 0, 0, 0))]
    for arr in folded:                          # weights / scales / shifts
        in_specs.append(pl.BlockSpec(arr.shape, lambda i: (0, 0)))

    out = pl.pallas_call(
        kernel,
        out_shape=jax.ShapeDtypeStruct((B, Hq, Wq, 256), jnp.float32),
        grid=(B // b_tile,),
        in_specs=in_specs,
        out_specs=pl.BlockSpec((b_tile, Hq, Wq, 256), lambda i: (i, 0, 0, 0)),
        scratch_shapes=[
            pltpu.VMEM((b_tile, H + 2, W + 2, 128), jnp.bfloat16),     # xpad_b
            pltpu.VMEM((b_tile, H, W, 9 * 128), jnp.bfloat16),         # col_b
            pltpu.VMEM((b_tile, Hq * 2 + 2, Wq * 2 + 2, 128), jnp.bfloat16),
            pltpu.VMEM((b_tile, Hq * 2, Wq * 2, 9 * 128), jnp.bfloat16),
            pltpu.VMEM((b_tile, Hq * 2 + 2, Wq * 2 + 2, 256), jnp.bfloat16),
            pltpu.VMEM((b_tile, Hq * 2, Wq * 2, 9 * 256), jnp.bfloat16),
        ],
        compiler_params=pltpu.CompilerParams(
            dimension_semantics=("parallel",),
            vmem_limit_bytes=32 * 1024 * 1024),
    )(x_col, *folded)

    # Flatten exactly like nn.Flatten on NCHW (channel-major ordering).
    out = jnp.transpose(out, (0, 3, 1, 2))
    return out.reshape(B, -1)


# ----------------------------------------------------------------------------
# Parameters (Conv2d weight/bias + BatchNorm2d gamma/beta/running stats)
# ----------------------------------------------------------------------------
def init_raw_params(key):
    cfgs = [(1, 128), (128, 128), (128, 256), (256, 256)]
    keys = jax.random.split(key, len(cfgs))
    params = []
    for k, (cin, cout) in zip(keys, cfgs):
        kw, kb, kg, kbe, km, kv = jax.random.split(k, 6)
        params.append(dict(
            w=jax.random.normal(kw, (3, 3, cin, cout), jnp.float32)
              * (2.0 / (9 * cin)) ** 0.5,                       # HWIO layout
            b=0.1 * jax.random.normal(kb, (cout,), jnp.float32),
            gamma=1.0 + 0.1 * jax.random.normal(kg, (cout,), jnp.float32),
            beta=0.1 * jax.random.normal(kbe, (cout,), jnp.float32),
            mean=0.1 * jax.random.normal(km, (cout,), jnp.float32),
            var=1.0 + 0.1 * jax.random.uniform(kv, (cout,), jnp.float32),
        ))
    return params


def fold_params(raw):
    """Fold conv bias + inference-mode BatchNorm into per-channel scale/shift
    and reshape weights into lane-dense 2-D im2col operands (9*cin, cout)."""
    out = []
    for i, p in enumerate(raw):
        inv = 1.0 / jnp.sqrt(p["var"] + BN_EPS)
        scale = p["gamma"] * inv
        shift = p["beta"] + (p["b"] - p["mean"]) * scale
        kh, kw, cin, cout = p["w"].shape
        w2d = p["w"].reshape(kh * kw * cin, cout)
        if i == 0:                                  # layer 1: pad K 9 -> 16
            w2d = jnp.pad(w2d, ((0, K1_PAD - w2d.shape[0]), (0, 0)))
        out += [w2d.astype(jnp.bfloat16),
                scale.reshape(1, cout).astype(jnp.float32),
                shift.reshape(1, cout).astype(jnp.float32)]
    return tuple(out)


# ----------------------------------------------------------------------------
# Pure-JAX references
# ----------------------------------------------------------------------------
def reference_forward(raw, x_nchw, *, quantize=False):
    """quantize=True mirrors the kernel's numerics (bf16 weights/activations,
    f32 accumulation) so the comparison isolates layout / indexing bugs."""
    cast = ((lambda a: a.astype(jnp.bfloat16).astype(jnp.float32))
            if quantize else (lambda a: a))
    x = cast(jnp.transpose(x_nchw, (0, 2, 3, 1)))
    for i, p in enumerate(raw):
        y = jax.lax.conv_general_dilated(
            x, cast(p["w"]), window_strides=(1, 1), padding="SAME",
            dimension_numbers=("NHWC", "HWIO", "NHWC"),
            precision=jax.lax.Precision.HIGHEST)
        y = y + p["b"]
        y = p["gamma"] * (y - p["mean"]) / jnp.sqrt(p["var"] + BN_EPS) + p["beta"]
        y = jnp.maximum(y, 0.0)
        if i in (1, 3):
            Bq, Hq, Wq, Cq = y.shape
            y = y.reshape(Bq, Hq // 2, 2, Wq // 2, 2, Cq).max(axis=(2, 4))
        x = cast(y) if i < 3 else y
    x = jnp.transpose(x, (0, 3, 1, 2))
    return x.reshape(x.shape[0], -1)


if __name__ == "__main__":
    key = jax.random.PRNGKey(0)
    k_x, k_p = jax.random.split(key)
    B, C, H, W = 2, 1, 16, 16            # CNN_net's first conv expects 1 channel
    x = jax.random.normal(k_x, (B, C, H, W), jnp.float32)

    raw = init_raw_params(k_p)
    folded = fold_params(raw)

    fwd = jax.jit(functools.partial(cnn_net_forward, folded))
    out = jax.block_until_ready(fwd(x))

    assert out.shape == (B, 256 * (H // 4) * (W // 4))
    assert bool(jnp.all(jnp.isfinite(out)))

    # Tight check vs. the numerics-matched (bf16-operand, f32-accumulate)
    # reference: catches layout / indexing / accumulation-order bugs.
    ref_q = reference_forward(raw, x, quantize=True)
    err_q = (float(jnp.max(jnp.abs(out - ref_q)))
             / (float(jnp.max(jnp.abs(ref_q))) + 1e-6))
    assert err_q < 5e-3, f"kernel vs matched reference: norm. max err {err_q}"

    # Looser end-to-end check vs. the full-precision reference (gap is the
    # bf16 operand quantization through four chained conv layers).
    ref = reference_forward(raw, x, quantize=False)
    err = (float(jnp.max(jnp.abs(out - ref)))
           / (float(jnp.max(jnp.abs(ref))) + 1e-6))
    assert err < 0.05, f"kernel vs f32 reference: norm. max err {err}"

    print("KERNEL_OK")
</pallas_src>

<mosaic_0001>
module attributes {stable_mosaic.version = 11 : i64} {
  func.func @_cnn_fused_kernel(%arg0: i32, %arg1: memref<1x16x16x16xbf16, #tpu.memory_space<vmem>>, %arg2: memref<16x128xbf16, #tpu.memory_space<vmem>>, %arg3: memref<1x128xf32, #tpu.memory_space<vmem>>, %arg4: memref<1x128xf32, #tpu.memory_space<vmem>>, %arg5: memref<1152x128xbf16, #tpu.memory_space<vmem>>, %arg6: memref<1x128xf32, #tpu.memory_space<vmem>>, %arg7: memref<1x128xf32, #tpu.memory_space<vmem>>, %arg8: memref<1152x256xbf16, #tpu.memory_space<vmem>>, %arg9: memref<1x256xf32, #tpu.memory_space<vmem>>, %arg10: memref<1x256xf32, #tpu.memory_space<vmem>>, %arg11: memref<2304x256xbf16, #tpu.memory_space<vmem>>, %arg12: memref<1x256xf32, #tpu.memory_space<vmem>>, %arg13: memref<1x256xf32, #tpu.memory_space<vmem>>, %arg14: memref<1x4x4x256xf32, #tpu.memory_space<vmem>>, %arg15: memref<1x18x18x128xbf16, #tpu.memory_space<vmem>>, %arg16: memref<1x16x16x1152xbf16, #tpu.memory_space<vmem>>, %arg17: memref<1x10x10x128xbf16, #tpu.memory_space<vmem>>, %arg18: memref<1x8x8x1152xbf16, #tpu.memory_space<vmem>>, %arg19: memref<1x10x10x256xbf16, #tpu.memory_space<vmem>>, %arg20: memref<1x8x8x2304xbf16, #tpu.memory_space<vmem>>) attributes {dimension_semantics = [#tpu.dimension_semantics<parallel>], iteration_bounds = array<i64: 2>, scalar_prefetch = 0 : i64, scratch_operands = 6 : i64, tpu.core_type = #tpu.core_type<tc>, window_params = [{transform_indices = @transform_0, window_bounds = array<i64: 1, 16, 16, 16>}, {pipeline_mode = #tpu.pipeline_mode<synchronous>, transform_indices = @transform_1, window_bounds = array<i64: 16, 128>}, {pipeline_mode = #tpu.pipeline_mode<synchronous>, transform_indices = @transform_2, window_bounds = array<i64: 1, 128>}, {pipeline_mode = #tpu.pipeline_mode<synchronous>, transform_indices = @transform_3, window_bounds = array<i64: 1, 128>}, {pipeline_mode = #tpu.pipeline_mode<synchronous>, transform_indices = @transform_4, window_bounds = array<i64: 1152, 128>}, {pipeline_mode = #tpu.pipeline_mode<synchronous>, transform_indices = @transform_5, window_bounds = array<i64: 1, 128>}, {pipeline_mode = #tpu.pipeline_mode<synchronous>, transform_indices = @transform_6, window_bounds = array<i64: 1, 128>}, {pipeline_mode = #tpu.pipeline_mode<synchronous>, transform_indices = @transform_7, window_bounds = array<i64: 1152, 256>}, {pipeline_mode = #tpu.pipeline_mode<synchronous>, transform_indices = @transform_8, window_bounds = array<i64: 1, 256>}, {pipeline_mode = #tpu.pipeline_mode<synchronous>, transform_indices = @transform_9, window_bounds = array<i64: 1, 256>}, {pipeline_mode = #tpu.pipeline_mode<synchronous>, transform_indices = @transform_10, window_bounds = array<i64: 2304, 256>}, {pipeline_mode = #tpu.pipeline_mode<synchronous>, transform_indices = @transform_11, window_bounds = array<i64: 1, 256>}, {pipeline_mode = #tpu.pipeline_mode<synchronous>, transform_indices = @transform_12, window_bounds = array<i64: 1, 256>}, {transform_indices = @transform_13, window_bounds = array<i64: 1, 4, 4, 256>}]} {
    %cst = arith.constant 0.000000e+00 : bf16
    %0 = vector.broadcast %cst : bf16 to vector<1x1x18x128xbf16>
    %cst_0 = arith.constant 0.000000e+00 : bf16
    %1 = vector.broadcast %cst_0 : bf16 to vector<1x18x1x128xbf16>
    %c0 = arith.constant 0 : index
    %c0_1 = arith.constant 0 : index
    %c0_2 = arith.constant 0 : index
    %c0_3 = arith.constant 0 : index
    %2 = vector.load %arg15[%c0, %c0_1, %c0_2, %c0_3] : memref<1x18x18x128xbf16, #tpu.memory_space<vmem>>, vector<1x1x18x128xbf16>
    tpu.vector_store %arg15[%c0, %c0_1, %c0_2, %c0_3], %0 {strides = array<i32>} : memref<1x18x18x128xbf16, #tpu.memory_space<vmem>>, vector<1x1x18x128xbf16>,
    %c0_4 = arith.constant 0 : index
    %c17 = arith.constant 17 : index
    %c0_5 = arith.constant 0 : index
    %c0_6 = arith.constant 0 : index
    %3 = vector.load %arg15[%c0_4, %c17, %c0_5, %c0_6] : memref<1x18x18x128xbf16, #tpu.memory_space<vmem>>, vector<1x1x18x128xbf16>
    tpu.vector_store %arg15[%c0_4, %c17, %c0_5, %c0_6], %0 {strides = array<i32>} : memref<1x18x18x128xbf16, #tpu.memory_space<vmem>>, vector<1x1x18x128xbf16>,
    %c0_7 = arith.constant 0 : index
    %c0_8 = arith.constant 0 : index
    %c0_9 = arith.constant 0 : index
    %c0_10 = arith.constant 0 : index
    %4 = vector.load %arg15[%c0_7, %c0_8, %c0_9, %c0_10] : memref<1x18x18x128xbf16, #tpu.memory_space<vmem>>, vector<1x18x1x128xbf16>
    tpu.vector_store %arg15[%c0_7, %c0_8, %c0_9, %c0_10], %1 {strides = array<i32>} : memref<1x18x18x128xbf16, #tpu.memory_space<vmem>>, vector<1x18x1x128xbf16>,
    %c0_11 = arith.constant 0 : index
    %c0_12 = arith.constant 0 : index
    %c17_13 = arith.constant 17 : index
    %c0_14 = arith.constant 0 : index
    %5 = vector.load %arg15[%c0_11, %c0_12, %c17_13, %c0_14] : memref<1x18x18x128xbf16, #tpu.memory_space<vmem>>, vector<1x18x1x128xbf16>
    tpu.vector_store %arg15[%c0_11, %c0_12, %c17_13, %c0_14], %1 {strides = array<i32>} : memref<1x18x18x128xbf16, #tpu.memory_space<vmem>>, vector<1x18x1x128xbf16>,
    %cst_15 = arith.constant 0.000000e+00 : bf16
    %6 = vector.broadcast %cst_15 : bf16 to vector<1x1x10x128xbf16>
    %cst_16 = arith.constant 0.000000e+00 : bf16
    %7 = vector.broadcast %cst_16 : bf16 to vector<1x10x1x128xbf16>
    %c0_17 = arith.constant 0 : index
    %c0_18 = arith.constant 0 : index
    %c0_19 = arith.constant 0 : index
    %c0_20 = arith.constant 0 : index
    %8 = vector.load %arg17[%c0_17, %c0_18, %c0_19, %c0_20] : memref<1x10x10x128xbf16, #tpu.memory_space<vmem>>, vector<1x1x10x128xbf16>
    tpu.vector_store %arg17[%c0_17, %c0_18, %c0_19, %c0_20], %6 {strides = array<i32>} : memref<1x10x10x128xbf16, #tpu.memory_space<vmem>>, vector<1x1x10x128xbf16>,
    %c0_21 = arith.constant 0 : index
    %c9 = arith.constant 9 : index
    %c0_22 = arith.constant 0 : index
    %c0_23 = arith.constant 0 : index
    %9 = vector.load %arg17[%c0_21, %c9, %c0_22, %c0_23] : memref<1x10x10x128xbf16, #tpu.memory_space<vmem>>, vector<1x1x10x128xbf16>
    tpu.vector_store %arg17[%c0_21, %c9, %c0_22, %c0_23], %6 {strides = array<i32>} : memref<1x10x10x128xbf16, #tpu.memory_space<vmem>>, vector<1x1x10x128xbf16>,
    %c0_24 = arith.constant 0 : index
    %c0_25 = arith.constant 0 : index
    %c0_26 = arith.constant 0 : index
    %c0_27 = arith.constant 0 : index
    %10 = vector.load %arg17[%c0_24, %c0_25, %c0_26, %c0_27] : memref<1x10x10x128xbf16, #tpu.memory_space<vmem>>, vector<1x10x1x128xbf16>
    tpu.vector_store %arg17[%c0_24, %c0_25, %c0_26, %c0_27], %7 {strides = array<i32>} : memref<1x10x10x128xbf16, #tpu.memory_space<vmem>>, vector<1x10x1x128xbf16>,
    %c0_28 = arith.constant 0 : index
    %c0_29 = arith.constant 0 : index
    %c9_30 = arith.constant 9 : index
    %c0_31 = arith.constant 0 : index
    %11 = vector.load %arg17[%c0_28, %c0_29, %c9_30, %c0_31] : memref<1x10x10x128xbf16, #tpu.memory_space<vmem>>, vector<1x10x1x128xbf16>
    tpu.vector_store %arg17[%c0_28, %c0_29, %c9_30, %c0_31], %7 {strides = array<i32>} : memref<1x10x10x128xbf16, #tpu.memory_space<vmem>>, vector<1x10x1x128xbf16>,
    %cst_32 = arith.constant 0.000000e+00 : bf16
    %12 = vector.broadcast %cst_32 : bf16 to vector<1x1x10x256xbf16>
    %cst_33 = arith.constant 0.000000e+00 : bf16
    %13 = vector.broadcast %cst_33 : bf16 to vector<1x10x1x256xbf16>
    %c0_34 = arith.constant 0 : index
    %c0_35 = arith.constant 0 : index
    %c0_36 = arith.constant 0 : index
    %c0_37 = arith.constant 0 : index
    %14 = vector.load %arg19[%c0_34, %c0_35, %c0_36, %c0_37] : memref<1x10x10x256xbf16, #tpu.memory_space<vmem>>, vector<1x1x10x256xbf16>
    tpu.vector_store %arg19[%c0_34, %c0_35, %c0_36, %c0_37], %12 {strides = array<i32>} : memref<1x10x10x256xbf16, #tpu.memory_space<vmem>>, vector<1x1x10x256xbf16>,
    %c0_38 = arith.constant 0 : index
    %c9_39 = arith.constant 9 : index
    %c0_40 = arith.constant 0 : index
    %c0_41 = arith.constant 0 : index
    %15 = vector.load %arg19[%c0_38, %c9_39, %c0_40, %c0_41] : memref<1x10x10x256xbf16, #tpu.memory_space<vmem>>, vector<1x1x10x256xbf16>
    tpu.vector_store %arg19[%c0_38, %c9_39, %c0_40, %c0_41], %12 {strides = array<i32>} : memref<1x10x10x256xbf16, #tpu.memory_space<vmem>>, vector<1x1x10x256xbf16>,
    %c0_42 = arith.constant 0 : index
    %c0_43 = arith.constant 0 : index
    %c0_44 = arith.constant 0 : index
    %c0_45 = arith.constant 0 : index
    %16 = vector.load %arg19[%c0_42, %c0_43, %c0_44, %c0_45] : memref<1x10x10x256xbf16, #tpu.memory_space<vmem>>, vector<1x10x1x256xbf16>
    tpu.vector_store %arg19[%c0_42, %c0_43, %c0_44, %c0_45], %13 {strides = array<i32>} : memref<1x10x10x256xbf16, #tpu.memory_space<vmem>>, vector<1x10x1x256xbf16>,
    %c0_46 = arith.constant 0 : index
    %c0_47 = arith.constant 0 : index
    %c9_48 = arith.constant 9 : index
    %c0_49 = arith.constant 0 : index
    %17 = vector.load %arg19[%c0_46, %c0_47, %c9_48, %c0_49] : memref<1x10x10x256xbf16, #tpu.memory_space<vmem>>, vector<1x10x1x256xbf16>
    tpu.vector_store %arg19[%c0_46, %c0_47, %c9_48, %c0_49], %13 {strides = array<i32>} : memref<1x10x10x256xbf16, #tpu.memory_space<vmem>>, vector<1x10x1x256xbf16>,
    %c0_50 = arith.constant 0 : index
    %c0_51 = arith.constant 0 : index
    %c0_52 = arith.constant 0 : index
    %c0_53 = arith.constant 0 : index
    %18 = vector.load %arg1[%c0_50, %c0_51, %c0_52, %c0_53] : memref<1x16x16x16xbf16, #tpu.memory_space<vmem>>, vector<1x16x16x16xbf16>
    %19 = vector.shape_cast %18 : vector<1x16x16x16xbf16> to vector<256x16xbf16>
    %c0_54 = arith.constant 0 : index
    %c0_55 = arith.constant 0 : index
    %20 = vector.load %arg2[%c0_54, %c0_55] : memref<16x128xbf16, #tpu.memory_space<vmem>>, vector<16x128xbf16>
    %cst_56 = arith.constant dense<0.000000e+00> : vector<256x128xf32>
    %21 = tpu.matmul %19, %20, %cst_56 {dimension_numbers = #tpu.dot_dimension_numbers<[1], [0], [0], [1], [0, 0, 1, 1], [], []>} : vector<256x16xbf16>, vector<16x128xbf16>, vector<256x128xf32> -> vector<256x128xf32>
    %c0_57 = arith.constant 0 : index
    %c0_58 = arith.constant 0 : index
    %22 = vector.load %arg3[%c0_57, %c0_58] : memref<1x128xf32, #tpu.memory_space<vmem>>, vector<1x128xf32>
    %23 = vector.broadcast %22 : vector<1x128xf32> to vector<256x128xf32>
    %24 = arith.mulf %21, %23 : vector<256x128xf32>
    %c0_59 = arith.constant 0 : index
    %c0_60 = arith.constant 0 : index
    %25 = vector.load %arg4[%c0_59, %c0_60] : memref<1x128xf32, #tpu.memory_space<vmem>>, vector<1x128xf32>
    %26 = vector.broadcast %25 : vector<1x128xf32> to vector<256x128xf32>
    %27 = arith.addf %24, %26 : vector<256x128xf32>
    %cst_61 = arith.constant 0.000000e+00 : f32
    %28 = vector.broadcast %cst_61 : f32 to vector<256x128xf32>
    %29 = arith.maximumf %27, %28 : vector<256x128xf32>
    %30 = vector.shape_cast %29 : vector<256x128xf32> to vector<1x16x16x128xf32>
    %31 = arith.truncf %30 : vector<1x16x16x128xf32> to vector<1x16x16x128xbf16>
    %c0_62 = arith.constant 0 : index
    %c1 = arith.constant 1 : index
    %c1_63 = arith.constant 1 : index
    %c0_64 = arith.constant 0 : index
    %32 = vector.load %arg15[%c0_62, %c1, %c1_63, %c0_64] : memref<1x18x18x128xbf16, #tpu.memory_space<vmem>>, vector<1x16x16x128xbf16>
    tpu.vector_store %arg15[%c0_62, %c1, %c1_63, %c0_64], %31 {strides = array<i32>} : memref<1x18x18x128xbf16, #tpu.memory_space<vmem>>, vector<1x16x16x128xbf16>,
    %c0_65 = arith.constant 0 : index
    %c0_66 = arith.constant 0 : index
    %c0_67 = arith.constant 0 : index
    %c0_68 = arith.constant 0 : index
    %33 = vector.load %arg15[%c0_65, %c0_66, %c0_67, %c0_68] : memref<1x18x18x128xbf16, #tpu.memory_space<vmem>>, vector<1x16x16x128xbf16>
    %c0_69 = arith.constant 0 : index
    %c0_70 = arith.constant 0 : index
    %c0_71 = arith.constant 0 : index
    %c0_72 = arith.constant 0 : index
    %34 = vector.load %arg16[%c0_69, %c0_70, %c0_71, %c0_72] : memref<1x16x16x1152xbf16, #tpu.memory_space<vmem>>, vector<1x16x16x128xbf16>
    tpu.vector_store %arg16[%c0_69, %c0_70, %c0_71, %c0_72], %33 {strides = array<i32>} : memref<1x16x16x1152xbf16, #tpu.memory_space<vmem>>, vector<1x16x16x128xbf16>,
    %c0_73 = arith.constant 0 : index
    %c0_74 = arith.constant 0 : index
    %c1_75 = arith.constant 1 : index
    %c0_76 = arith.constant 0 : index
    %35 = vector.load %arg15[%c0_73, %c0_74, %c1_75, %c0_76] : memref<1x18x18x128xbf16, #tpu.memory_space<vmem>>, vector<1x16x16x128xbf16>
    %c0_77 = arith.constant 0 : index
    %c0_78 = arith.constant 0 : index
    %c0_79 = arith.constant 0 : index
    %c128 = arith.constant 128 : index
    %36 = vector.load %arg16[%c0_77, %c0_78, %c0_79, %c128] : memref<1x16x16x1152xbf16, #tpu.memory_space<vmem>>, vector<1x16x16x128xbf16>
    tpu.vector_store %arg16[%c0_77, %c0_78, %c0_79, %c128], %35 {strides = array<i32>} : memref<1x16x16x1152xbf16, #tpu.memory_space<vmem>>, vector<1x16x16x128xbf16>,
    %c0_80 = arith.constant 0 : index
    %c0_81 = arith.constant 0 : index
    %c2 = arith.constant 2 : index
    %c0_82 = arith.constant 0 : index
    %37 = vector.load %arg15[%c0_80, %c0_81, %c2, %c0_82] : memref<1x18x18x128xbf16, #tpu.memory_space<vmem>>, vector<1x16x16x128xbf16>
    %c0_83 = arith.constant 0 : index
    %c0_84 = arith.constant 0 : index
    %c0_85 = arith.constant 0 : index
    %c256 = arith.constant 256 : index
    %38 = vector.load %arg16[%c0_83, %c0_84, %c0_85, %c256] : memref<1x16x16x1152xbf16, #tpu.memory_space<vmem>>, vector<1x16x16x128xbf16>
    tpu.vector_store %arg16[%c0_83, %c0_84, %c0_85, %c256], %37 {strides = array<i32>} : memref<1x16x16x1152xbf16, #tpu.memory_space<vmem>>, vector<1x16x16x128xbf16>,
    %c0_86 = arith.constant 0 : index
    %c1_87 = arith.constant 1 : index
    %c0_88 = arith.constant 0 : index
    %c0_89 = arith.constant 0 : index
    %39 = vector.load %arg15[%c0_86, %c1_87, %c0_88, %c0_89] : memref<1x18x18x128xbf16, #tpu.memory_space<vmem>>, vector<1x16x16x128xbf16>
    %c0_90 = arith.constant 0 : index
    %c0_91 = arith.constant 0 : index
    %c0_92 = arith.constant 0 : index
    %c384 = arith.constant 384 : index
    %40 = vector.load %arg16[%c0_90, %c0_91, %c0_92, %c384] : memref<1x16x16x1152xbf16, #tpu.memory_space<vmem>>, vector<1x16x16x128xbf16>
    tpu.vector_store %arg16[%c0_90, %c0_91, %c0_92, %c384], %39 {strides = array<i32>} : memref<1x16x16x1152xbf16, #tpu.memory_space<vmem>>, vector<1x16x16x128xbf16>,
    %c0_93 = arith.constant 0 : index
    %c1_94 = arith.constant 1 : index
    %c1_95 = arith.constant 1 : index
    %c0_96 = arith.constant 0 : index
    %41 = vector.load %arg15[%c0_93, %c1_94, %c1_95, %c0_96] : memref<1x18x18x128xbf16, #tpu.memory_space<vmem>>, vector<1x16x16x128xbf16>
    %c0_97 = arith.constant 0 : index
    %c0_98 = arith.constant 0 : index
    %c0_99 = arith.constant 0 : index
    %c512 = arith.constant 512 : index
    %42 = vector.load %arg16[%c0_97, %c0_98, %c0_99, %c512] : memref<1x16x16x1152xbf16, #tpu.memory_space<vmem>>, vector<1x16x16x128xbf16>
    tpu.vector_store %arg16[%c0_97, %c0_98, %c0_99, %c512], %41 {strides = array<i32>} : memref<1x16x16x1152xbf16, #tpu.memory_space<vmem>>, vector<1x16x16x128xbf16>,
    %c0_100 = arith.constant 0 : index
    %c1_101 = arith.constant 1 : index
    %c2_102 = arith.constant 2 : index
    %c0_103 = arith.constant 0 : index
    %43 = vector.load %arg15[%c0_100, %c1_101, %c2_102, %c0_103] : memref<1x18x18x128xbf16, #tpu.memory_space<vmem>>, vector<1x16x16x128xbf16>
    %c0_104 = arith.constant 0 : index
    %c0_105 = arith.constant 0 : index
    %c0_106 = arith.constant 0 : index
    %c640 = arith.constant 640 : index
    %44 = vector.load %arg16[%c0_104, %c0_105, %c0_106, %c640] : memref<1x16x16x1152xbf16, #tpu.memory_space<vmem>>, vector<1x16x16x128xbf16>
    tpu.vector_store %arg16[%c0_104, %c0_105, %c0_106, %c640], %43 {strides = array<i32>} : memref<1x16x16x1152xbf16, #tpu.memory_space<vmem>>, vector<1x16x16x128xbf16>,
    %c0_107 = arith.constant 0 : index
    %c2_108 = arith.constant 2 : index
    %c0_109 = arith.constant 0 : index
    %c0_110 = arith.constant 0 : index
    %45 = vector.load %arg15[%c0_107, %c2_108, %c0_109, %c0_110] : memref<1x18x18x128xbf16, #tpu.memory_space<vmem>>, vector<1x16x16x128xbf16>
    %c0_111 = arith.constant 0 : index
    %c0_112 = arith.constant 0 : index
    %c0_113 = arith.constant 0 : index
    %c768 = arith.constant 768 : index
    %46 = vector.load %arg16[%c0_111, %c0_112, %c0_113, %c768] : memref<1x16x16x1152xbf16, #tpu.memory_space<vmem>>, vector<1x16x16x128xbf16>
    tpu.vector_store %arg16[%c0_111, %c0_112, %c0_113, %c768], %45 {strides = array<i32>} : memref<1x16x16x1152xbf16, #tpu.memory_space<vmem>>, vector<1x16x16x128xbf16>,
    %c0_114 = arith.constant 0 : index
    %c2_115 = arith.constant 2 : index
    %c1_116 = arith.constant 1 : index
    %c0_117 = arith.constant 0 : index
    %47 = vector.load %arg15[%c0_114, %c2_115, %c1_116, %c0_117] : memref<1x18x18x128xbf16, #tpu.memory_space<vmem>>, vector<1x16x16x128xbf16>
    %c0_118 = arith.constant 0 : index
    %c0_119 = arith.constant 0 : index
    %c0_120 = arith.constant 0 : index
    %c896 = arith.constant 896 : index
    %48 = vector.load %arg16[%c0_118, %c0_119, %c0_120, %c896] : memref<1x16x16x1152xbf16, #tpu.memory_space<vmem>>, vector<1x16x16x128xbf16>
    tpu.vector_store %arg16[%c0_118, %c0_119, %c0_120, %c896], %47 {strides = array<i32>} : memref<1x16x16x1152xbf16, #tpu.memory_space<vmem>>, vector<1x16x16x128xbf16>,
    %c0_121 = arith.constant 0 : index
    %c2_122 = arith.constant 2 : index
    %c2_123 = arith.constant 2 : index
    %c0_124 = arith.constant 0 : index
    %49 = vector.load %arg15[%c0_121, %c2_122, %c2_123, %c0_124] : memref<1x18x18x128xbf16, #tpu.memory_space<vmem>>, vector<1x16x16x128xbf16>
    %c0_125 = arith.constant 0 : index
    %c0_126 = arith.constant 0 : index
    %c0_127 = arith.constant 0 : index
    %c1024 = arith.constant 1024 : index
    %50 = vector.load %arg16[%c0_125, %c0_126, %c0_127, %c1024] : memref<1x16x16x1152xbf16, #tpu.memory_space<vmem>>, vector<1x16x16x128xbf16>
    tpu.vector_store %arg16[%c0_125, %c0_126, %c0_127, %c1024], %49 {strides = array<i32>} : memref<1x16x16x1152xbf16, #tpu.memory_space<vmem>>, vector<1x16x16x128xbf16>,
    %c0_128 = arith.constant 0 : index
    %c0_129 = arith.constant 0 : index
    %c0_130 = arith.constant 0 : index
    %c0_131 = arith.constant 0 : index
    %51 = vector.load %arg16[%c0_128, %c0_129, %c0_130, %c0_131] : memref<1x16x16x1152xbf16, #tpu.memory_space<vmem>>, vector<1x16x16x1152xbf16>
    %52 = vector.shape_cast %51 : vector<1x16x16x1152xbf16> to vector<256x1152xbf16>
    %c0_132 = arith.constant 0 : index
    %c0_133 = arith.constant 0 : index
    %53 = vector.load %arg5[%c0_132, %c0_133] : memref<1152x128xbf16, #tpu.memory_space<vmem>>, vector<1152x128xbf16>
    %cst_134 = arith.constant dense<0.000000e+00> : vector<256x128xf32>
    %54 = tpu.matmul %52, %53, %cst_134 {dimension_numbers = #tpu.dot_dimension_numbers<[1], [0], [0], [1], [0, 0, 1, 1], [], []>} : vector<256x1152xbf16>, vector<1152x128xbf16>, vector<256x128xf32> -> vector<256x128xf32>
    %c0_135 = arith.constant 0 : index
    %c0_136 = arith.constant 0 : index
    %55 = vector.load %arg6[%c0_135, %c0_136] : memref<1x128xf32, #tpu.memory_space<vmem>>, vector<1x128xf32>
    %56 = vector.broadcast %55 : vector<1x128xf32> to vector<256x128xf32>
    %57 = arith.mulf %54, %56 : vector<256x128xf32>
    %c0_137 = arith.constant 0 : index
    %c0_138 = arith.constant 0 : index
    %58 = vector.load %arg7[%c0_137, %c0_138] : memref<1x128xf32, #tpu.memory_space<vmem>>, vector<1x128xf32>
    %59 = vector.broadcast %58 : vector<1x128xf32> to vector<256x128xf32>
    %60 = arith.addf %57, %59 : vector<256x128xf32>
    %cst_139 = arith.constant 0.000000e+00 : f32
    %61 = vector.broadcast %cst_139 : f32 to vector<256x128xf32>
    %62 = arith.maximumf %60, %61 : vector<256x128xf32>
    %63 = vector.shape_cast %62 : vector<256x128xf32> to vector<8x2x8x2x128xf32>
    %cst_140 = arith.constant dense<0xFF800000> : vector<8x2x8x128xf32>
    %64 = vector.multi_reduction <maximumf>, %63, %cst_140 [3] : vector<8x2x8x2x128xf32> to vector<8x2x8x128xf32>
    %cst_141 = arith.constant dense<0xFF800000> : vector<8x8x128xf32>
    %65 = vector.multi_reduction <maximumf>, %64, %cst_141 [1] : vector<8x2x8x128xf32> to vector<8x8x128xf32>
    %66 = vector.shape_cast %65 : vector<8x8x128xf32> to vector<1x8x8x128xf32>
    %67 = arith.truncf %66 : vector<1x8x8x128xf32> to vector<1x8x8x128xbf16>
    %c0_142 = arith.constant 0 : index
    %c1_143 = arith.constant 1 : index
    %c1_144 = arith.constant 1 : index
    %c0_145 = arith.constant 0 : index
    %68 = vector.load %arg17[%c0_142, %c1_143, %c1_144, %c0_145] : memref<1x10x10x128xbf16, #tpu.memory_space<vmem>>, vector<1x8x8x128xbf16>
    tpu.vector_store %arg17[%c0_142, %c1_143, %c1_144, %c0_145], %67 {strides = array<i32>} : memref<1x10x10x128xbf16, #tpu.memory_space<vmem>>, vector<1x8x8x128xbf16>,
    %c0_146 = arith.constant 0 : index
    %c0_147 = arith.constant 0 : index
    %c0_148 = arith.constant 0 : index
    %c0_149 = arith.constant 0 : index
    %69 = vector.load %arg17[%c0_146, %c0_147, %c0_148, %c0_149] : memref<1x10x10x128xbf16, #tpu.memory_space<vmem>>, vector<1x8x8x128xbf16>
    %c0_150 = arith.constant 0 : index
    %c0_151 = arith.constant 0 : index
    %c0_152 = arith.constant 0 : index
    %c0_153 = arith.constant 0 : index
    %70 = vector.load %arg18[%c0_150, %c0_151, %c0_152, %c0_153] : memref<1x8x8x1152xbf16, #tpu.memory_space<vmem>>, vector<1x8x8x128xbf16>
    tpu.vector_store %arg18[%c0_150, %c0_151, %c0_152, %c0_153], %69 {strides = array<i32>} : memref<1x8x8x1152xbf16, #tpu.memory_space<vmem>>, vector<1x8x8x128xbf16>,
    %c0_154 = arith.constant 0 : index
    %c0_155 = arith.constant 0 : index
    %c1_156 = arith.constant 1 : index
    %c0_157 = arith.constant 0 : index
    %71 = vector.load %arg17[%c0_154, %c0_155, %c1_156, %c0_157] : memref<1x10x10x128xbf16, #tpu.memory_space<vmem>>, vector<1x8x8x128xbf16>
    %c0_158 = arith.constant 0 : index
    %c0_159 = arith.constant 0 : index
    %c0_160 = arith.constant 0 : index
    %c128_161 = arith.constant 128 : index
    %72 = vector.load %arg18[%c0_158, %c0_159, %c0_160, %c128_161] : memref<1x8x8x1152xbf16, #tpu.memory_space<vmem>>, vector<1x8x8x128xbf16>
    tpu.vector_store %arg18[%c0_158, %c0_159, %c0_160, %c128_161], %71 {strides = array<i32>} : memref<1x8x8x1152xbf16, #tpu.memory_space<vmem>>, vector<1x8x8x128xbf16>,
    %c0_162 = arith.constant 0 : index
    %c0_163 = arith.constant 0 : index
    %c2_164 = arith.constant 2 : index
    %c0_165 = arith.constant 0 : index
    %73 = vector.load %arg17[%c0_162, %c0_163, %c2_164, %c0_165] : memref<1x10x10x128xbf16, #tpu.memory_space<vmem>>, vector<1x8x8x128xbf16>
    %c0_166 = arith.constant 0 : index
    %c0_167 = arith.constant 0 : index
    %c0_168 = arith.constant 0 : index
    %c256_169 = arith.constant 256 : index
    %74 = vector.load %arg18[%c0_166, %c0_167, %c0_168, %c256_169] : memref<1x8x8x1152xbf16, #tpu.memory_space<vmem>>, vector<1x8x8x128xbf16>
    tpu.vector_store %arg18[%c0_166, %c0_167, %c0_168, %c256_169], %73 {strides = array<i32>} : memref<1x8x8x1152xbf16, #tpu.memory_space<vmem>>, vector<1x8x8x128xbf16>,
    %c0_170 = arith.constant 0 : index
    %c1_171 = arith.constant 1 : index
    %c0_172 = arith.constant 0 : index
    %c0_173 = arith.constant 0 : index
    %75 = vector.load %arg17[%c0_170, %c1_171, %c0_172, %c0_173] : memref<1x10x10x128xbf16, #tpu.memory_space<vmem>>, vector<1x8x8x128xbf16>
    %c0_174 = arith.constant 0 : index
    %c0_175 = arith.constant 0 : index
    %c0_176 = arith.constant 0 : index
    %c384_177 = arith.constant 384 : index
    %76 = vector.load %arg18[%c0_174, %c0_175, %c0_176, %c384_177] : memref<1x8x8x1152xbf16, #tpu.memory_space<vmem>>, vector<1x8x8x128xbf16>
    tpu.vector_store %arg18[%c0_174, %c0_175, %c0_176, %c384_177], %75 {strides = array<i32>} : memref<1x8x8x1152xbf16, #tpu.memory_space<vmem>>, vector<1x8x8x128xbf16>,
    %c0_178 = arith.constant 0 : index
    %c1_179 = arith.constant 1 : index
    %c1_180 = arith.constant 1 : index
    %c0_181 = arith.constant 0 : index
    %77 = vector.load %arg17[%c0_178, %c1_179, %c1_180, %c0_181] : memref<1x10x10x128xbf16, #tpu.memory_space<vmem>>, vector<1x8x8x128xbf16>
    %c0_182 = arith.constant 0 : index
    %c0_183 = arith.constant 0 : index
    %c0_184 = arith.constant 0 : index
    %c512_185 = arith.constant 512 : index
    %78 = vector.load %arg18[%c0_182, %c0_183, %c0_184, %c512_185] : memref<1x8x8x1152xbf16, #tpu.memory_space<vmem>>, vector<1x8x8x128xbf16>
    tpu.vector_store %arg18[%c0_182, %c0_183, %c0_184, %c512_185], %77 {strides = array<i32>} : memref<1x8x8x1152xbf16, #tpu.memory_space<vmem>>, vector<1x8x8x128xbf16>,
    %c0_186 = arith.constant 0 : index
    %c1_187 = arith.constant 1 : index
    %c2_188 = arith.constant 2 : index
    %c0_189 = arith.constant 0 : index
    %79 = vector.load %arg17[%c0_186, %c1_187, %c2_188, %c0_189] : memref<1x10x10x128xbf16, #tpu.memory_space<vmem>>, vector<1x8x8x128xbf16>
    %c0_190 = arith.constant 0 : index
    %c0_191 = arith.constant 0 : index
    %c0_192 = arith.constant 0 : index
    %c640_193 = arith.constant 640 : index
    %80 = vector.load %arg18[%c0_190, %c0_191, %c0_192, %c640_193] : memref<1x8x8x1152xbf16, #tpu.memory_space<vmem>>, vector<1x8x8x128xbf16>
    tpu.vector_store %arg18[%c0_190, %c0_191, %c0_192, %c640_193], %79 {strides = array<i32>} : memref<1x8x8x1152xbf16, #tpu.memory_space<vmem>>, vector<1x8x8x128xbf16>,
    %c0_194 = arith.constant 0 : index
    %c2_195 = arith.constant 2 : index
    %c0_196 = arith.constant 0 : index
    %c0_197 = arith.constant 0 : index
    %81 = vector.load %arg17[%c0_194, %c2_195, %c0_196, %c0_197] : memref<1x10x10x128xbf16, #tpu.memory_space<vmem>>, vector<1x8x8x128xbf16>
    %c0_198 = arith.constant 0 : index
    %c0_199 = arith.constant 0 : index
    %c0_200 = arith.constant 0 : index
    %c768_201 = arith.constant 768 : index
    %82 = vector.load %arg18[%c0_198, %c0_199, %c0_200, %c768_201] : memref<1x8x8x1152xbf16, #tpu.memory_space<vmem>>, vector<1x8x8x128xbf16>
    tpu.vector_store %arg18[%c0_198, %c0_199, %c0_200, %c768_201], %81 {strides = array<i32>} : memref<1x8x8x1152xbf16, #tpu.memory_space<vmem>>, vector<1x8x8x128xbf16>,
    %c0_202 = arith.constant 0 : index
    %c2_203 = arith.constant 2 : index
    %c1_204 = arith.constant 1 : index
    %c0_205 = arith.constant 0 : index
    %83 = vector.load %arg17[%c0_202, %c2_203, %c1_204, %c0_205] : memref<1x10x10x128xbf16, #tpu.memory_space<vmem>>, vector<1x8x8x128xbf16>
    %c0_206 = arith.constant 0 : index
    %c0_207 = arith.constant 0 : index
    %c0_208 = arith.constant 0 : index
    %c896_209 = arith.constant 896 : index
    %84 = vector.load %arg18[%c0_206, %c0_207, %c0_208, %c896_209] : memref<1x8x8x1152xbf16, #tpu.memory_space<vmem>>, vector<1x8x8x128xbf16>
    tpu.vector_store %arg18[%c0_206, %c0_207, %c0_208, %c896_209], %83 {strides = array<i32>} : memref<1x8x8x1152xbf16, #tpu.memory_space<vmem>>, vector<1x8x8x128xbf16>,
    %c0_210 = arith.constant 0 : index
    %c2_211 = arith.constant 2 : index
    %c2_212 = arith.constant 2 : index
    %c0_213 = arith.constant 0 : index
    %85 = vector.load %arg17[%c0_210, %c2_211, %c2_212, %c0_213] : memref<1x10x10x128xbf16, #tpu.memory_space<vmem>>, vector<1x8x8x128xbf16>
    %c0_214 = arith.constant 0 : index
    %c0_215 = arith.constant 0 : index
    %c0_216 = arith.constant 0 : index
    %c1024_217 = arith.constant 1024 : index
    %86 = vector.load %arg18[%c0_214, %c0_215, %c0_216, %c1024_217] : memref<1x8x8x1152xbf16, #tpu.memory_space<vmem>>, vector<1x8x8x128xbf16>
    tpu.vector_store %arg18[%c0_214, %c0_215, %c0_216, %c1024_217], %85 {strides = array<i32>} : memref<1x8x8x1152xbf16, #tpu.memory_space<vmem>>, vector<1x8x8x128xbf16>,
    %c0_218 = arith.constant 0 : index
    %c0_219 = arith.constant 0 : index
    %c0_220 = arith.constant 0 : index
    %c0_221 = arith.constant 0 : index
    %87 = vector.load %arg18[%c0_218, %c0_219, %c0_220, %c0_221] : memref<1x8x8x1152xbf16, #tpu.memory_space<vmem>>, vector<1x8x8x1152xbf16>
    %88 = vector.shape_cast %87 : vector<1x8x8x1152xbf16> to vector<64x1152xbf16>
    %c0_222 = arith.constant 0 : index
    %c0_223 = arith.constant 0 : index
    %89 = vector.load %arg8[%c0_222, %c0_223] : memref<1152x256xbf16, #tpu.memory_space<vmem>>, vector<1152x256xbf16>
    %cst_224 = arith.constant dense<0.000000e+00> : vector<64x256xf32>
    %90 = tpu.matmul %88, %89, %cst_224 {dimension_numbers = #tpu.dot_dimension_numbers<[1], [0], [0], [1], [0, 0, 1, 1], [], []>} : vector<64x1152xbf16>, vector<1152x256xbf16>, vector<64x256xf32> -> vector<64x256xf32>
    %c0_225 = arith.constant 0 : index
    %c0_226 = arith.constant 0 : index
    %91 = vector.load %arg9[%c0_225, %c0_226] : memref<1x256xf32, #tpu.memory_space<vmem>>, vector<1x256xf32>
    %92 = vector.broadcast %91 : vector<1x256xf32> to vector<64x256xf32>
    %93 = arith.mulf %90, %92 : vector<64x256xf32>
    %c0_227 = arith.constant 0 : index
    %c0_228 = arith.constant 0 : index
    %94 = vector.load %arg10[%c0_227, %c0_228] : memref<1x256xf32, #tpu.memory_space<vmem>>, vector<1x256xf32>
    %95 = vector.broadcast %94 : vector<1x256xf32> to vector<64x256xf32>
    %96 = arith.addf %93, %95 : vector<64x256xf32>
    %cst_229 = arith.constant 0.000000e+00 : f32
    %97 = vector.broadcast %cst_229 : f32 to vector<64x256xf32>
    %98 = arith.maximumf %96, %97 : vector<64x256xf32>
    %99 = vector.shape_cast %98 : vector<64x256xf32> to vector<1x8x8x256xf32>
    %100 = arith.truncf %99 : vector<1x8x8x256xf32> to vector<1x8x8x256xbf16>
    %c0_230 = arith.constant 0 : index
    %c1_231 = arith.constant 1 : index
    %c1_232 = arith.constant 1 : index
    %c0_233 = arith.constant 0 : index
    %101 = vector.load %arg19[%c0_230, %c1_231, %c1_232, %c0_233] : memref<1x10x10x256xbf16, #tpu.memory_space<vmem>>, vector<1x8x8x256xbf16>
    tpu.vector_store %arg19[%c0_230, %c1_231, %c1_232, %c0_233], %100 {strides = array<i32>} : memref<1x10x10x256xbf16, #tpu.memory_space<vmem>>, vector<1x8x8x256xbf16>,
    %c0_234 = arith.constant 0 : index
    %c0_235 = arith.constant 0 : index
    %c0_236 = arith.constant 0 : index
    %c0_237 = arith.constant 0 : index
    %102 = vector.load %arg19[%c0_234, %c0_235, %c0_236, %c0_237] : memref<1x10x10x256xbf16, #tpu.memory_space<vmem>>, vector<1x8x8x256xbf16>
    %c0_238 = arith.constant 0 : index
    %c0_239 = arith.constant 0 : index
    %c0_240 = arith.constant 0 : index
    %c0_241 = arith.constant 0 : index
    %103 = vector.load %arg20[%c0_238, %c0_239, %c0_240, %c0_241] : memref<1x8x8x2304xbf16, #tpu.memory_space<vmem>>, vector<1x8x8x256xbf16>
    tpu.vector_store %arg20[%c0_238, %c0_239, %c0_240, %c0_241], %102 {strides = array<i32>} : memref<1x8x8x2304xbf16, #tpu.memory_space<vmem>>, vector<1x8x8x256xbf16>,
    %c0_242 = arith.constant 0 : index
    %c0_243 = arith.constant 0 : index
    %c1_244 = arith.constant 1 : index
    %c0_245 = arith.constant 0 : index
    %104 = vector.load %arg19[%c0_242, %c0_243, %c1_244, %c0_245] : memref<1x10x10x256xbf16, #tpu.memory_space<vmem>>, vector<1x8x8x256xbf16>
    %c0_246 = arith.constant 0 : index
    %c0_247 = arith.constant 0 : index
    %c0_248 = arith.constant 0 : index
    %c256_249 = arith.constant 256 : index
    %105 = vector.load %arg20[%c0_246, %c0_247, %c0_248, %c256_249] : memref<1x8x8x2304xbf16, #tpu.memory_space<vmem>>, vector<1x8x8x256xbf16>
    tpu.vector_store %arg20[%c0_246, %c0_247, %c0_248, %c256_249], %104 {strides = array<i32>} : memref<1x8x8x2304xbf16, #tpu.memory_space<vmem>>, vector<1x8x8x256xbf16>,
    %c0_250 = arith.constant 0 : index
    %c0_251 = arith.constant 0 : index
    %c2_252 = arith.constant 2 : index
    %c0_253 = arith.constant 0 : index
    %106 = vector.load %arg19[%c0_250, %c0_251, %c2_252, %c0_253] : memref<1x10x10x256xbf16, #tpu.memory_space<vmem>>, vector<1x8x8x256xbf16>
    %c0_254 = arith.constant 0 : index
    %c0_255 = arith.constant 0 : index
    %c0_256 = arith.constant 0 : index
    %c512_257 = arith.constant 512 : index
    %107 = vector.load %arg20[%c0_254, %c0_255, %c0_256, %c512_257] : memref<1x8x8x2304xbf16, #tpu.memory_space<vmem>>, vector<1x8x8x256xbf16>
    tpu.vector_store %arg20[%c0_254, %c0_255, %c0_256, %c512_257], %106 {strides = array<i32>} : memref<1x8x8x2304xbf16, #tpu.memory_space<vmem>>, vector<1x8x8x256xbf16>,
    %c0_258 = arith.constant 0 : index
    %c1_259 = arith.constant 1 : index
    %c0_260 = arith.constant 0 : index
    %c0_261 = arith.constant 0 : index
    %108 = vector.load %arg19[%c0_258, %c1_259, %c0_260, %c0_261] : memref<1x10x10x256xbf16, #tpu.memory_space<vmem>>, vector<1x8x8x256xbf16>
    %c0_262 = arith.constant 0 : index
    %c0_263 = arith.constant 0 : index
    %c0_264 = arith.constant 0 : index
    %c768_265 = arith.constant 768 : index
    %109 = vector.load %arg20[%c0_262, %c0_263, %c0_264, %c768_265] : memref<1x8x8x2304xbf16, #tpu.memory_space<vmem>>, vector<1x8x8x256xbf16>
    tpu.vector_store %arg20[%c0_262, %c0_263, %c0_264, %c768_265], %108 {strides = array<i32>} : memref<1x8x8x2304xbf16, #tpu.memory_space<vmem>>, vector<1x8x8x256xbf16>,
    %c0_266 = arith.constant 0 : index
    %c1_267 = arith.constant 1 : index
    %c1_268 = arith.constant 1 : index
    %c0_269 = arith.constant 0 : index
    %110 = vector.load %arg19[%c0_266, %c1_267, %c1_268, %c0_269] : memref<1x10x10x256xbf16, #tpu.memory_space<vmem>>, vector<1x8x8x256xbf16>
    %c0_270 = arith.constant 0 : index
    %c0_271 = arith.constant 0 : index
    %c0_272 = arith.constant 0 : index
    %c1024_273 = arith.constant 1024 : index
    %111 = vector.load %arg20[%c0_270, %c0_271, %c0_272, %c1024_273] : memref<1x8x8x2304xbf16, #tpu.memory_space<vmem>>, vector<1x8x8x256xbf16>
    tpu.vector_store %arg20[%c0_270, %c0_271, %c0_272, %c1024_273], %110 {strides = array<i32>} : memref<1x8x8x2304xbf16, #tpu.memory_space<vmem>>, vector<1x8x8x256xbf16>,
    %c0_274 = arith.constant 0 : index
    %c1_275 = arith.constant 1 : index
    %c2_276 = arith.constant 2 : index
    %c0_277 = arith.constant 0 : index
    %112 = vector.load %arg19[%c0_274, %c1_275, %c2_276, %c0_277] : memref<1x10x10x256xbf16, #tpu.memory_space<vmem>>, vector<1x8x8x256xbf16>
    %c0_278 = arith.constant 0 : index
    %c0_279 = arith.constant 0 : index
    %c0_280 = arith.constant 0 : index
    %c1280 = arith.constant 1280 : index
    %113 = vector.load %arg20[%c0_278, %c0_279, %c0_280, %c1280] : memref<1x8x8x2304xbf16, #tpu.memory_space<vmem>>, vector<1x8x8x256xbf16>
    tpu.vector_store %arg20[%c0_278, %c0_279, %c0_280, %c1280], %112 {strides = array<i32>} : memref<1x8x8x2304xbf16, #tpu.memory_space<vmem>>, vector<1x8x8x256xbf16>,
    %c0_281 = arith.constant 0 : index
    %c2_282 = arith.constant 2 : index
    %c0_283 = arith.constant 0 : index
    %c0_284 = arith.constant 0 : index
    %114 = vector.load %arg19[%c0_281, %c2_282, %c0_283, %c0_284] : memref<1x10x10x256xbf16, #tpu.memory_space<vmem>>, vector<1x8x8x256xbf16>
    %c0_285 = arith.constant 0 : index
    %c0_286 = arith.constant 0 : index
    %c0_287 = arith.constant 0 : index
    %c1536 = arith.constant 1536 : index
    %115 = vector.load %arg20[%c0_285, %c0_286, %c0_287, %c1536] : memref<1x8x8x2304xbf16, #tpu.memory_space<vmem>>, vector<1x8x8x256xbf16>
    tpu.vector_store %arg20[%c0_285, %c0_286, %c0_287, %c1536], %114 {strides = array<i32>} : memref<1x8x8x2304xbf16, #tpu.memory_space<vmem>>, vector<1x8x8x256xbf16>,
    %c0_288 = arith.constant 0 : index
    %c2_289 = arith.constant 2 : index
    %c1_290 = arith.constant 1 : index
    %c0_291 = arith.constant 0 : index
    %116 = vector.load %arg19[%c0_288, %c2_289, %c1_290, %c0_291] : memref<1x10x10x256xbf16, #tpu.memory_space<vmem>>, vector<1x8x8x256xbf16>
    %c0_292 = arith.constant 0 : index
    %c0_293 = arith.constant 0 : index
    %c0_294 = arith.constant 0 : index
    %c1792 = arith.constant 1792 : index
    %117 = vector.load %arg20[%c0_292, %c0_293, %c0_294, %c1792] : memref<1x8x8x2304xbf16, #tpu.memory_space<vmem>>, vector<1x8x8x256xbf16>
    tpu.vector_store %arg20[%c0_292, %c0_293, %c0_294, %c1792], %116 {strides = array<i32>} : memref<1x8x8x2304xbf16, #tpu.memory_space<vmem>>, vector<1x8x8x256xbf16>,
    %c0_295 = arith.constant 0 : index
    %c2_296 = arith.constant 2 : index
    %c2_297 = arith.constant 2 : index
    %c0_298 = arith.constant 0 : index
    %118 = vector.load %arg19[%c0_295, %c2_296, %c2_297, %c0_298] : memref<1x10x10x256xbf16, #tpu.memory_space<vmem>>, vector<1x8x8x256xbf16>
    %c0_299 = arith.constant 0 : index
    %c0_300 = arith.constant 0 : index
    %c0_301 = arith.constant 0 : index
    %c2048 = arith.constant 2048 : index
    %119 = vector.load %arg20[%c0_299, %c0_300, %c0_301, %c2048] : memref<1x8x8x2304xbf16, #tpu.memory_space<vmem>>, vector<1x8x8x256xbf16>
    tpu.vector_store %arg20[%c0_299, %c0_300, %c0_301, %c2048], %118 {strides = array<i32>} : memref<1x8x8x2304xbf16, #tpu.memory_space<vmem>>, vector<1x8x8x256xbf16>,
    %c0_302 = arith.constant 0 : index
    %c0_303 = arith.constant 0 : index
    %c0_304 = arith.constant 0 : index
    %c0_305 = arith.constant 0 : index
    %120 = vector.load %arg20[%c0_302, %c0_303, %c0_304, %c0_305] : memref<1x8x8x2304xbf16, #tpu.memory_space<vmem>>, vector<1x8x8x2304xbf16>
    %121 = vector.shape_cast %120 : vector<1x8x8x2304xbf16> to vector<64x2304xbf16>
    %c0_306 = arith.constant 0 : index
    %c0_307 = arith.constant 0 : index
    %122 = vector.load %arg11[%c0_306, %c0_307] : memref<2304x256xbf16, #tpu.memory_space<vmem>>, vector<2304x256xbf16>
    %cst_308 = arith.constant dense<0.000000e+00> : vector<64x256xf32>
    %123 = tpu.matmul %121, %122, %cst_308 {dimension_numbers = #tpu.dot_dimension_numbers<[1], [0], [0], [1], [0, 0, 1, 1], [], []>} : vector<64x2304xbf16>, vector<2304x256xbf16>, vector<64x256xf32> -> vector<64x256xf32>
    %c0_309 = arith.constant 0 : index
    %c0_310 = arith.constant 0 : index
    %124 = vector.load %arg12[%c0_309, %c0_310] : memref<1x256xf32, #tpu.memory_space<vmem>>, vector<1x256xf32>
    %125 = vector.broadcast %124 : vector<1x256xf32> to vector<64x256xf32>
    %126 = arith.mulf %123, %125 : vector<64x256xf32>
    %c0_311 = arith.constant 0 : index
    %c0_312 = arith.constant 0 : index
    %127 = vector.load %arg13[%c0_311, %c0_312] : memref<1x256xf32, #tpu.memory_space<vmem>>, vector<1x256xf32>
    %128 = vector.broadcast %127 : vector<1x256xf32> to vector<64x256xf32>
    %129 = arith.addf %126, %128 : vector<64x256xf32>
    %cst_313 = arith.constant 0.000000e+00 : f32
    %130 = vector.broadcast %cst_313 : f32 to vector<64x256xf32>
    %131 = arith.maximumf %129, %130 : vector<64x256xf32>
    %132 = vector.shape_cast %131 : vector<64x256xf32> to vector<4x2x4x2x256xf32>
    %cst_314 = arith.constant dense<0xFF800000> : vector<4x2x4x256xf32>
    %133 = vector.multi_reduction <maximumf>, %132, %cst_314 [3] : vector<4x2x4x2x256xf32> to vector<4x2x4x256xf32>
    %cst_315 = arith.constant dense<0xFF800000> : vector<4x4x256xf32>
    %134 = vector.multi_reduction <maximumf>, %133, %cst_315 [1] : vector<4x2x4x256xf32> to vector<4x4x256xf32>
    %135 = vector.shape_cast %134 : vector<4x4x256xf32> to vector<1x4x4x256xf32>
    %c0_316 = arith.constant 0 : index
    %c0_317 = arith.constant 0 : index
    %c0_318 = arith.constant 0 : index
    %c0_319 = arith.constant 0 : index
    %136 = vector.load %arg14[%c0_316, %c0_317, %c0_318, %c0_319] : memref<1x4x4x256xf32, #tpu.memory_space<vmem>>, vector<1x4x4x256xf32>
    tpu.vector_store %arg14[%c0_316, %c0_317, %c0_318, %c0_319], %135 {strides = array<i32>} : memref<1x4x4x256xf32, #tpu.memory_space<vmem>>, vector<1x4x4x256xf32>,
    return
  }
  func.func @transform_0(%arg0: i32) -> (i32, i32, i32, i32) {
    %c0_i32 = arith.constant 0 : i32
    %c0_i32_0 = arith.constant 0 : i32
    %c0_i32_1 = arith.constant 0 : i32
    %c0_i32_2 = arith.constant 0 : i32
    return %arg0, %c0_i32, %c0_i32_0, %c0_i32_1 : i32, i32, i32, i32
  }
  func.func @transform_1(%arg0: i32) -> (i32, i32) {
    %c0_i32 = arith.constant 0 : i32
    %c0_i32_0 = arith.constant 0 : i32
    %c0_i32_1 = arith.constant 0 : i32
    return %c0_i32, %c0_i32_0 : i32, i32
  }
  func.func @transform_2(%arg0: i32) -> (i32, i32) {
    %c0_i32 = arith.constant 0 : i32
    %c0_i32_0 = arith.constant 0 : i32
    %c0_i32_1 = arith.constant 0 : i32
    return %c0_i32, %c0_i32_0 : i32, i32
  }
  func.func @transform_3(%arg0: i32) -> (i32, i32) {
    %c0_i32 = arith.constant 0 : i32
    %c0_i32_0 = arith.constant 0 : i32
    %c0_i32_1 = arith.constant 0 : i32
    return %c0_i32, %c0_i32_0 : i32, i32
  }
  func.func @transform_4(%arg0: i32) -> (i32, i32) {
    %c0_i32 = arith.constant 0 : i32
    %c0_i32_0 = arith.constant 0 : i32
    %c0_i32_1 = arith.constant 0 : i32
    return %c0_i32, %c0_i32_0 : i32, i32
  }
  func.func @transform_5(%arg0: i32) -> (i32, i32) {
    %c0_i32 = arith.constant 0 : i32
    %c0_i32_0 = arith.constant 0 : i32
    %c0_i32_1 = arith.constant 0 : i32
    return %c0_i32, %c0_i32_0 : i32, i32
  }
  func.func @transform_6(%arg0: i32) -> (i32, i32) {
    %c0_i32 = arith.constant 0 : i32
    %c0_i32_0 = arith.constant 0 : i32
    %c0_i32_1 = arith.constant 0 : i32
    return %c0_i32, %c0_i32_0 : i32, i32
  }
  func.func @transform_7(%arg0: i32) -> (i32, i32) {
    %c0_i32 = arith.constant 0 : i32
    %c0_i32_0 = arith.constant 0 : i32
    %c0_i32_1 = arith.constant 0 : i32
    return %c0_i32, %c0_i32_0 : i32, i32
  }
  func.func @transform_8(%arg0: i32) -> (i32, i32) {
    %c0_i32 = arith.constant 0 : i32
    %c0_i32_0 = arith.constant 0 : i32
    %c0_i32_1 = arith.constant 0 : i32
    return %c0_i32, %c0_i32_0 : i32, i32
  }
  func.func @transform_9(%arg0: i32) -> (i32, i32) {
    %c0_i32 = arith.constant 0 : i32
    %c0_i32_0 = arith.constant 0 : i32
    %c0_i32_1 = arith.constant 0 : i32
    return %c0_i32, %c0_i32_0 : i32, i32
  }
  func.func @transform_10(%arg0: i32) -> (i32, i32) {
    %c0_i32 = arith.constant 0 : i32
    %c0_i32_0 = arith.constant 0 : i32
    %c0_i32_1 = arith.constant 0 : i32
    return %c0_i32, %c0_i32_0 : i32, i32
  }
  func.func @transform_11(%arg0: i32) -> (i32, i32) {
    %c0_i32 = arith.constant 0 : i32
    %c0_i32_0 = arith.constant 0 : i32
    %c0_i32_1 = arith.constant 0 : i32
    return %c0_i32, %c0_i32_0 : i32, i32
  }
  func.func @transform_12(%arg0: i32) -> (i32, i32) {
    %c0_i32 = arith.constant 0 : i32
    %c0_i32_0 = arith.constant 0 : i32
    %c0_i32_1 = arith.constant 0 : i32
    return %c0_i32, %c0_i32_0 : i32, i32
  }
  func.func @transform_13(%arg0: i32) -> (i32, i32, i32, i32) {
    %c0_i32 = arith.constant 0 : i32
    %c0_i32_0 = arith.constant 0 : i32
    %c0_i32_1 = arith.constant 0 : i32
    %c0_i32_2 = arith.constant 0 : i32
    return %arg0, %c0_i32, %c0_i32_0, %c0_i32_1 : i32, i32, i32, i32
  }
}

</mosaic_0001>

<bundles_post_ra>
// kernel: cnn_net_forward.1
= control target key start
LH: loop header
LB: loop body
LE: loop exit
PB: predicated region body
PF: predicated region fallthrough
CT: control target
= control target key end

     0   :  { %s18131_s25 = smov 0   ;;  %s22398_s0 = inlined_call_operand.vmem [shape: bf16[2,16,16,16], index: 0, kind: input, shape index: {}]   ;;  %s22399_s1 = inlined_call_operand.vmem [shape: bf16[16,128], index: 1, kind: input, shape index: {}]   ;;  %s22400_s2 = inlined_call_operand.vmem [shape: f32[1,128], index: 2, kind: input, shape index: {}]   ;;  %s22401_s3 = inlined_call_operand.vmem [shape: f32[1,128], index: 3, kind: input, shape index: {}]   ;;  %s22402_s4 = inlined_call_operand.vmem [shape: bf16[1152,128], index: 4, kind: input, shape index: {}]   ;;  %s22403_s5 = inlined_call_operand.vmem [shape: f32[1,128], index: 5, kind: input, shape index: {}]   ;;  %s22404_s6 = inlined_call_operand.vmem [shape: f32[1,128], index: 6, kind: input, shape index: {}]   ;;  %s22405_s7 = inlined_call_operand.vmem [shape: bf16[1152,256], index: 7, kind: input, shape index: {}]   ;;  %s22406_s8 = inlined_call_operand.vmem [shape: f32[1,256], index: 8, kind: input, shape index: {}]   ;;  %s22407_s9 = inlined_call_operand.vmem [shape: f32[1,256], index: 9, kind: input, shape index: {}]   ;;  %s22408_s10 = inlined_call_operand.vmem [shape: bf16[2304,256], index: 10, kind: input, shape index: {}]   ;;  %s22409_s11 = inlined_call_operand.vmem [shape: f32[1,256], index: 11, kind: input, shape index: {}]   ;;  %s22410_s12 = inlined_call_operand.vmem [shape: f32[1,256], index: 12, kind: input, shape index: {}]   ;;  %s22411_s13 = inlined_call_operand.vmem [shape: f32[2,4,4,256], index: 13, kind: output, shape index: {}]  }
   0x1 LB: > { %s14988_s26 = sadd.s32 4294967295, %s18057_s25   ;;  %p14992_p0 = scmp.ge.s32.totalorder %s18057_s25, 1  ;;  %s18057_s25 = sphi %s18131_s25, %s23_s25  }
   0x2   : > { %p387_p1 = scmp.lt.s32.totalorder %s18057_s25, 3 }
   0x4   : > { %p388_p2 = pnand %p14992_p0, %p387_p1 }
   0x6   : > { %391 = sbr.rel (%p388_p2) target bundleno = 2452 (0x994), region = 72 }
   0xd   : > { %v16967_v0 = vld [vmem:[%s22399_s1] sm:$0xff]   ;;  %p431_p3 = scmp.lt.s32.totalorder %s14988_s26, 1  ;;  %vm819_vm0 = vcmask 130048   ;;  %v16986_v3 = vld [vmem:[%s22402_s4 + $0x48] sm:$0xff]   ;;  %v16988_v8 = vld [vmem:[%s22402_s4 + $0x50] sm:$0xff]   ;;  %vm449_vm1 = vcmask 1040384  }
   0xe   : > { %v16984_v1 = vld [vmem:[%s22402_s4 + $0x40] sm:$0xff]   ;;  %16651 = vmatprep.subr.bf16.mxu0 %v16967_v0  ;;  %v16987_v7 = vld [vmem:[%s22402_s4 + $0x8] sm:$0xff]   ;;  %v16989_v13 = vld [vmem:[%s22402_s4 + $0x10] sm:$0xff]   ;;  %vm450_vm2 = vsmask.f32 256  ;;  %v18059_v33 = vmov 0  }
   0xf   : > { %s22583_s26 = smov (!%p431_p3, %s14988_s26), 1  ;;  %16652 = vmatpush3.bf16.msra.mxu0 %v16967_v0  ;;  %v16985_v2 = vld [vmem:[%s22402_s4] sm:$0xff]   ;;  %v16990_v14 = vld [vmem:[%s22402_s4 + $0x58] sm:$0xff]   ;;  %vm18198_vm3 = vmand %vm449_vm1, %vm450_vm2  ;;  %vm506_vm4 = vsmask.f32 7938  ;;  %627 = vst [vmem:[#allocation6] sm:$0xff] %v18059_v33 }
  0x10   : > { %s16048_s14 = sshll.u32 %s22583_s26, 7  ;;  %16179 = vmatprep.subr.bf16.mxu0 %v16984_v1  ;;  %v16991_v15 = vld [vmem:[%s22402_s4 + $0x18] sm:$0xff]   ;;  %v16992_v16 = vld [vmem:[%s22402_s4 + $0x60] sm:$0xff]   ;;  %v16998_v32 = vld [vmem:[%s22402_s4 + $0x148] sm:$0xff]   ;;  %442 = vst [vmem:[#allocation2] sm:$0xf] %v18059_v33 }
  0x11   : > { %s18154_s19 = scalar_lea.vmem %s22398_s0, %s16048_s14  ;;  %v16993_v18 = vld [vmem:[%s22402_s4 + $0x20] sm:$0xff]   ;;  %v458_v19 = vld [vmem:[#allocation2 + $0x18] sm:$0x1]  ;;  %443 = vst [vmem:[#allocation2 + $0x4] sm:$0xf] %v18059_v33  ;;  %630 = vst [vmem:[#allocation6 + $0x90] sm:$0xff] %v18059_v33 }
  0x12   : > { %v16968_v4 = vld [vmem:[%s18154_s19] sm:$0xff]   ;;  %v16969_v5 = vld [vmem:[%s18154_s19 + $0x8] sm:$0xff]   ;;  %v16970_v6 = vld [vmem:[%s18154_s19 + $0x10] sm:$0xff]   ;;  %v459_v22 = vsel %vm18198_vm3, 0, %v458_v19  ;;  %444 = vst [vmem:[#allocation2 + $0x8] sm:$0x1] %v18059_v33 }
  0x13   : > { %16653 = vmatprep.mubr.msk.bf16.mxu0 %vm819_vm0, %v16968_v4  ;;  %v16971_v9 = vld [vmem:[%s18154_s19 + $0x18] sm:$0xff]   ;;  %v16972_v10 = vld [vmem:[%s18154_s19 + $0x20] sm:$0xff]   ;;  %v16973_v11 = vld [vmem:[%s18154_s19 + $0x28] sm:$0xff]   ;;  %460 = vst [vmem:[#allocation2 + $0x18] sm:$0x1] %v459_v22  ;;  %vm1558_vm7 = vcmask 1043456  }
  0x14   : > { %16654 = vmatmul.mubr.msk.bf16.vlgmr.msra.gmra.mrb[0].mxu0 %vm819_vm0, %v16969_v5  ;;  %v16974_v12 = vld [vmem:[%s18154_s19 + $0x30] sm:$0xff]   ;;  %v16975_v17 = vld [vmem:[%s18154_s19 + $0x38] sm:$0xff]   ;;  %v16976_v20 = vld [vmem:[%s18154_s19 + $0x40] sm:$0xff]   ;;  %446 = vst [vmem:[#allocation2 + $0xcc] sm:$0xf] %v18059_v33  ;;  %vm2393_vm11 = vcmask 1046528  }
  0x15   : > { %16657 = vmatprep.mubr.msk.bf16.mxu0 %vm819_vm0, %v16970_v6  ;;  %16180 = vmatpush3.bf16.msra.mxu0 %v16985_v2  ;;  %v16977_v23 = vld [vmem:[%s18154_s19 + $0x48] sm:$0xff]   ;;  %v16978_v24 = vld [vmem:[%s18154_s19 + $0x50] sm:$0xff]   ;;  %v16979_v25 = vld [vmem:[%s18154_s19 + $0x58] sm:$0xff]   ;;  %447 = vst [vmem:[#allocation2 + $0xd0] sm:$0xf] %v18059_v33  ;;  %vm6414_vm12 = vcmask 1041408  }
  0x16   : > { %16181 = vmatprep.subr.bf16.mxu0 %v16986_v3  ;;  %v16980_v26 = vld [vmem:[%s18154_s19 + $0x60] sm:$0xff]   ;;  %v16981_v27 = vld [vmem:[%s18154_s19 + $0x68] sm:$0xff]   ;;  %v16982_v28 = vld [vmem:[%s18154_s19 + $0x70] sm:$0xff]   ;;  %448 = vst [vmem:[#allocation2 + $0xd4] sm:$0x1] %v18059_v33  ;;  %vm7695_vm13 = vcmask 1042434  }
  0x17   : > { %v16983_v29 = vld [vmem:[%s18154_s19 + $0x78] sm:$0xff]   ;;  %v16994_v30 = vld [vmem:[%s22402_s4 + $0x140] sm:$0xff]   ;;  %562 = vst [vmem:[#allocation4] sm:$0xf] %v18059_v33  ;;  %563 = vst [vmem:[#allocation4 + $0x4] sm:$0x1] %v18059_v33 }
  0x18   : > { %v16996_v31 = vld [vmem:[%s22402_s4 + $0x100] sm:$0xff]   ;;  %16403 = vmatprep.subr.bf16.mxu1 %v16994_v30  ;;  %565 = vst [vmem:[#allocation4 + $0x48] sm:$0xf] %v18059_v33  ;;  %566 = vst [vmem:[#allocation4 + $0x4c] sm:$0x1] %v18059_v33  ;;  %v16999_v35 = vld [vmem:[%s22402_s4 + $0x108] sm:$0xff]  }
  0x19   : > { %16182 = vmatpush3.bf16.msra.mxu0 %v16987_v7  ;;  %16404 = vmatpush3.bf16.msra.mxu1 %v16996_v31  ;;  %628 = vst [vmem:[#allocation6 + $0x8] sm:$0x11] %v18059_v33  ;;  %631 = vst [vmem:[#allocation6 + $0x98] sm:$0x11] %v18059_v33  ;;  %v455_v34 = vld [vmem:[#allocation2 + $0xc] sm:$0x1] }
  0x1a   : > { %16183 = vmatprep.subr.bf16.mxu0 %v16988_v8  ;;  %v456_v36 = vsel %vm18198_vm3, 0, %v455_v34  ;;  %vm18236_vm5 = vmand %vm449_vm1, %vm506_vm4  ;;  %v514_v38 = vld [vmem:[#allocation2 + $0x20] sm:$0x1]  ;;  %16405 = vmatprep.subr.bf16.mxu1 %v16998_v32  ;;  %v511_v40 = vld [vmem:[#allocation2 + $0x14] sm:$0x1]  ;;  %vm22417_vm14 = vcmask 1043459  }
  0x1b   : > { %457 = vst [vmem:[#allocation2 + $0xc] sm:$0x1] %v456_v36  ;;  %v515_v39 = vsel %vm18236_vm5, 0, %v514_v38  ;;  %v512_v41 = vsel %vm18236_vm5, 0, %v511_v40  ;;  %v16995_v42 = vld [vmem:[%s22402_s4 + $0x68] sm:$0xff]   ;;  %v17000_v47 = vld [vmem:[%s22402_s4 + $0x150] sm:$0xff]   ;;  %vm18412_vm9 = vmand %vm1558_vm7, %vm506_vm4 }
  0x1c   : > { %16658 = vmatmul.mubr.msk.bf16.gmra.mrb[4].mxu0 %vm819_vm0, %v16971_v9  ;;  %516 = vst [vmem:[#allocation2 + $0x20] sm:$0x1] %v515_v39  ;;  %513 = vst [vmem:[#allocation2 + $0x14] sm:$0x1] %v512_v41  ;;  %v16997_v43 = vld [vmem:[%s22402_s4 + $0x28] sm:$0xff]   ;;  %v17002_v49 = vld [vmem:[%s22402_s4 + $0x110] sm:$0xff]  }
  0x1d   : > { %16661 = vmatprep.mubr.msk.bf16.mxu0 %vm819_vm0, %v16972_v10  ;;  %16184 = vmatpush3.bf16.msra.mxu0 %v16989_v13  ;;  %v452_v44 = vld [vmem:[#allocation2] sm:$0x1]  ;;  %v508_v46 = vld [vmem:[#allocation2 + $0x8] sm:$0x1]  ;;  %v464_v50 = vld [vmem:[#allocation2 + $0x30] sm:$0x1] }
  0x1e   : > { %16185 = vmatprep.subr.bf16.mxu0 %v16990_v14  ;;  %16406 = vmatpush3.bf16.msra.mxu1 %v16999_v35  ;;  %v453_v45 = vsel %vm18198_vm3, 0, %v452_v44  ;;  %v509_v48 = vsel %vm18236_vm5, 0, %v508_v46  ;;  %v461_v51 = vld [vmem:[#allocation2 + $0x24] sm:$0x1]  ;;  %v465_v52 = vsel %vm18198_vm3, 0, %v464_v50  ;;  %v17004_v55 = vld [vmem:[%s22402_s4 + $0x158] sm:$0xff]  }
  0x1f   : > { %454 = vst [vmem:[#allocation2] sm:$0x1] %v453_v45  ;;  %510 = vst [vmem:[#allocation2 + $0x8] sm:$0x1] %v509_v48  ;;  %16407 = vmatprep.subr.bf16.mxu1 %v17000_v47  ;;  %v462_v53 = vsel %vm18198_vm3, 0, %v461_v51  ;;  %v17005_v57 = vld [vmem:[%s22402_s4 + $0x118] sm:$0xff]  }
  0x20   : > { %466 = vst [vmem:[#allocation2 + $0x30] sm:$0x1] %v465_v52  ;;  %463 = vst [vmem:[#allocation2 + $0x24] sm:$0x1] %v462_v53  ;;  %v520_v54 = vld [vmem:[#allocation2 + $0x38] sm:$0x1] }
  0x21   : > { %16186 = vmatpush3.bf16.msra.mxu0 %v16991_v15  ;;  %v521_v56 = vsel %vm18236_vm5, 0, %v520_v54  ;;  %v17001_v58 = vld [vmem:[%s22402_s4 + $0x70] sm:$0xff]   ;;  %v17006_v61 = vld [vmem:[%s22402_s4 + $0x160] sm:$0xff]   ;;  %v517_v1 = vld [vmem:[#allocation2 + $0x2c] sm:$0x1]  ;;  %vm632_vm15 = vcmask 1044484  }
  0x22   : > { %16187 = vmatprep.subr.bf16.mxu0 %v16992_v16  ;;  %16408 = vmatpush3.bf16.msra.mxu1 %v17002_v49  ;;  %522 = vst [vmem:[#allocation2 + $0x38] sm:$0x1] %v521_v56  ;;  %v17003_v60 = vld [vmem:[%s22402_s4 + $0x30] sm:$0xff]   ;;  %v17008_v63 = vld [vmem:[%s22402_s4 + $0x120] sm:$0xff]   ;;  %v17007_v2 = vld [vmem:[%s22402_s4 + $0x78] sm:$0xff]   ;;  %v518_v5 = vsel %vm18236_vm5, 0, %v517_v1 }
  0x23   : > { %16409 = vmatprep.subr.bf16.mxu1 %v17004_v55  ;;  %v17009_v6 = vld [vmem:[%s22402_s4 + $0x38] sm:$0xff]   ;;  %519 = vst [vmem:[#allocation2 + $0x2c] sm:$0x1] %v518_v5  ;;  %v17010_v7 = vld [vmem:[%s22402_s4 + $0x168] sm:$0xff]   ;;  %vm1992_vm6 = vsmask.f32 7424 }
  0x24   : > { %16662 = vmatmul.mubr.msk.bf16.gmra.mrb[8].mxu0 %vm819_vm0, %v16973_v11  ;;  %v17013_v10 = vld [vmem:[%s22402_s4 + $0x128] sm:$0xff]   ;;  %v17015_v14 = vld [vmem:[%s22402_s4 + $0x170] sm:$0xff]   ;;  %v529_v35 = vld [vmem:[#allocation2 + $0x5c] sm:$0x1]  ;;  %vm1235_vm8 = vsmask.f32 4368 }
  0x25   : > { %16665 = vmatprep.mubr.msk.bf16.mxu0 %vm819_vm0, %v16974_v12  ;;  %16188 = vmatpush3.bf16.msra.mxu0 %v16993_v18  ;;  %v17017_v15 = vld [vmem:[%s22402_s4 + $0x130] sm:$0xff]   ;;  %v470_v16 = vld [vmem:[#allocation2 + $0x48] sm:$0x1]  ;;  %v467_v18 = vld [vmem:[#allocation2 + $0x3c] sm:$0x1]  ;;  %v530_v38 = vsel %vm18236_vm5, 0, %v529_v35 }
  0x26   : > { %16189 = vmatprep.subr.bf16.mxu0 %v16995_v42  ;;  %v17011_v59 = vld [vmem:[#allocation2] sm:$0xff]   ;;  %16410 = vmatpush3.bf16.msra.mxu1 %v17005_v57  ;;  %v17012_v62 = vld [vmem:[#allocation2 + $0x8] ss:$0 sps:$4 sm:$0x11]   ;;  %v526_v19 = vld [vmem:[#allocation2 + $0x50] sm:$0x1] }
  0x27   : > { %v1996_v0 = vshll.u32 %v17011_v59, 16  ;;  %16411 = vmatprep.subr.bf16.mxu1 %v17006_v61  ;;  %v1994_v3 = vshrl.u32 %v17011_v59, 16  ;;  %v2001_v4 = vshll.u32 %v17012_v62, 16  ;;  %v17014_v12 = vld [vmem:[#allocation2] sm:$0xff]   ;;  %v468_v22 = vsel %vm18198_vm3, 0, %v467_v18  ;;  %v17035_v36 = vld [vmem:[%s22402_s4 + $0xc8] sm:$0xff]   ;;  %vm18423_vm10 = vmor %vm450_vm2, %vm1235_vm8 }
  0x28   : > { %469 = vst [vmem:[#allocation2 + $0x3c] sm:$0x1] %v468_v22  ;;  %v473_v31 = vld [vmem:[#allocation2 + $0x54] sm:$0x1]  ;;  %v532_v32 = vld [vmem:[#allocation2 + $0x68] sm:$0x1] }
  0x29   : > { %16190 = vmatpush3.bf16.msra.mxu0 %v16997_v43  ;;  %v1998_v8 = vrot.slane %v1996_v0, 1  ;;  %v2003_v9 = vrot.slane %v2001_v4, 1  ;;  %v474_v33 = vsel %vm18198_vm3, 0, %v473_v31  ;;  %v533_v34 = vsel %vm18236_vm5, 0, %v532_v32  ;;  %v17040_v39 = vld [vmem:[%s22402_s4 + $0x88] sm:$0xff]   ;;  %v17051_v48 = vld [vmem:[%s22402_s4 + $0xd0] sm:$0xff]  }
  0x2a   : > { %16191 = vmatprep.subr.bf16.mxu0 %v17001_v58  ;;  %16412 = vmatpush3.bf16.msra.mxu1 %v17008_v63  ;;  %475 = vst [vmem:[#allocation2 + $0x54] sm:$0x1] %v474_v33  ;;  %534 = vst [vmem:[#allocation2 + $0x68] sm:$0x1] %v533_v34  ;;  %v482_v40 = vld [vmem:[#allocation2 + $0x78] sm:$0x1] }
  0x2b   : > { %16413 = vmatprep.subr.bf16.mxu1 %v17010_v7  ;;  %v1999_v11 = vor.u32 %v1998_v8, %v1994_v3  ;;  %531 = vst [vmem:[#allocation2 + $0x5c] sm:$0x1] %v530_v38  ;;  %v483_v41 = vsel %vm18198_vm3, 0, %v482_v40  ;;  %v479_v42 = vld [vmem:[#allocation2 + $0x6c] sm:$0x1]  ;;  %v17056_v49 = vld [vmem:[%s22402_s4 + $0x90] sm:$0xff]  }
  0x2c   : > { %16666 = vmatmul.mubr.msk.bf16.gmra.mrb[12].mxu0 %vm819_vm0, %v16975_v17  ;;  %v471_v17 = vsel %vm18198_vm3, 0, %v470_v16  ;;  %484 = vst [vmem:[#allocation2 + $0x78] sm:$0x1] %v483_v41  ;;  %v480_v43 = vsel %vm18198_vm3, 0, %v479_v42  ;;  %v538_v44 = vld [vmem:[#allocation2 + $0x80] sm:$0x1] }
  0x2d   : > { %16669 = vmatprep.mubr.msk.bf16.mxu0 %vm819_vm0, %v16976_v20  ;;  %16192 = vmatpush3.bf16.msra.mxu0 %v17003_v60  ;;  %v2004_v13 = vsel %vm1992_vm6, %v1999_v11, %v2003_v9  ;;  %v17019_v20 = vld [vmem:[%s22402_s4 + $0x178] sm:$0xff]   ;;  %472 = vst [vmem:[#allocation2 + $0x48] sm:$0x1] %v471_v17  ;;  %v535_v45 = vld [vmem:[#allocation2 + $0x74] sm:$0x1]  ;;  %v539_v46 = vsel %vm18236_vm5, 0, %v538_v44 }
  0x2e   : > { %16193 = vmatprep.subr.bf16.mxu0 %v17007_v2  ;;  %16414 = vmatpush3.bf16.msra.mxu1 %v17013_v10  ;;  %481 = vst [vmem:[#allocation2 + $0x6c] sm:$0x1] %v480_v43  ;;  %v536_v47 = vsel %vm18236_vm5, 0, %v535_v45  ;;  %540 = vst [vmem:[#allocation2 + $0x80] sm:$0x1] %v539_v46  ;;  %v17067_v58 = vld [vmem:[%s22402_s4 + $0xd8] sm:$0xff]  }
  0x2f   : > { %16415 = vmatprep.subr.bf16.mxu1 %v17015_v14  ;;  %537 = vst [vmem:[#allocation2 + $0x74] sm:$0x1] %v536_v47  ;;  %v488_v50 = vld [vmem:[#allocation2 + $0x90] sm:$0x1]  ;;  %v485_v52 = vld [vmem:[#allocation2 + $0x84] sm:$0x1] }
  0x30   : > { %v489_v51 = vsel %vm18198_vm3, 0, %v488_v50  ;;  %v486_v53 = vsel %vm18198_vm3, 0, %v485_v52  ;;  %v544_v54 = vld [vmem:[#allocation2 + $0x98] sm:$0x1]  ;;  %v541_v55 = vld [vmem:[#allocation2 + $0x8c] sm:$0x1] }
  0x31   : > { %16194 = vmatpush3.bf16.msra.mxu0 %v17009_v6  ;;  %490 = vst [vmem:[#allocation2 + $0x90] sm:$0x1] %v489_v51  ;;  %487 = vst [vmem:[#allocation2 + $0x84] sm:$0x1] %v486_v53  ;;  %v545_v56 = vsel %vm18236_vm5, 0, %v544_v54  ;;  %v542_v57 = vsel %vm18236_vm5, 0, %v541_v55 }
  0x32   : > { %16416 = vmatpush3.bf16.msra.mxu1 %v17017_v15  ;;  %546 = vst [vmem:[#allocation2 + $0x98] sm:$0x1] %v545_v56  ;;  %543 = vst [vmem:[#allocation2 + $0x8c] sm:$0x1] %v542_v57  ;;  %v17072_v59 = vld [vmem:[%s22402_s4 + $0x98] sm:$0xff]   ;;  %v17083_v4 = vld [vmem:[%s22402_s4 + $0xe0] sm:$0xff]  }
  0x33   : > { %16417 = vmatprep.subr.bf16.mxu1 %v17019_v20  ;;  %v494_v60 = vld [vmem:[#allocation2 + $0xa8] sm:$0x1]  ;;  %v491_v62 = vld [vmem:[#allocation2 + $0x9c] sm:$0x1]  ;;  %v550_v0 = vld [vmem:[#allocation2 + $0xb0] sm:$0x1] }
  0x34   : > { %16670 = vmatmul.mubr.msk.bf16.gmra.mrb[16].mxu0 %vm819_vm0, %v16977_v23  ;;  %v527_v23 = vsel %vm18236_vm5, 0, %v526_v19  ;;  %v495_v61 = vsel %vm18198_vm3, 0, %v494_v60  ;;  %v492_v63 = vsel %vm18198_vm3, 0, %v491_v62  ;;  %v551_v1 = vsel %vm18236_vm5, 0, %v550_v0  ;;  %v547_v2 = vld [vmem:[#allocation2 + $0xa4] sm:$0x1] }
  0x35   : > { %16673 = vmatprep.mubr.msk.bf16.mxu0 %vm819_vm0, %v16978_v24  ;;  %528 = vst [vmem:[#allocation2 + $0x50] sm:$0x1] %v527_v23  ;;  %v17022_v24 = vld [vmem:[%s22402_s4 + $0x138] sm:$0xff]   ;;  %496 = vst [vmem:[#allocation2 + $0xa8] sm:$0x1] %v495_v61  ;;  %v548_v3 = vsel %vm18236_vm5, 0, %v547_v2 }
  0x36   : > { %16418 = vmatpush3.bf16.msra.mxu1 %v17022_v24  ;;  %493 = vst [vmem:[#allocation2 + $0x9c] sm:$0x1] %v492_v63  ;;  %552 = vst [vmem:[#allocation2 + $0xb0] sm:$0x1] %v551_v1  ;;  %v17088_v5 = vld [vmem:[%s22402_s4 + $0xa0] sm:$0xff]   ;;  %v17099_v46 = vld [vmem:[%s22402_s4 + $0xe8] sm:$0xff]  }
  0x37   : > { %549 = vst [vmem:[#allocation2 + $0xa4] sm:$0x1] %v548_v3  ;;  %v18384_v6 = vld [vmem:[%s22400_s2] ss:$0 sm:$0xff]  ;;  %v497_v23 = vld [vmem:[#allocation2 + $0xb4] sm:$0x1] }
  0x38   : > { %v18389_v7 = vld [vmem:[%s22401_s3] ss:$0 sm:$0xff]  ;;  %v1567_v40 = vld [vmem:[#allocation2 + $0x18] sm:$0xf]  ;;  %v17104_v63 = vld [vmem:[%s22402_s4 + $0xa8] sm:$0xff]   ;;  %vm7703_vm1 = vcmask 1046534  }
  0x39   : > { %v500_v8 = vld [vmem:[#allocation2 + $0xc0] sm:$0x1]  ;;  %vm22416_vm2 = vcmask 1047559   ;;  %vm7862_vm4 = vsmask.f32 3328  ;;  %vm8025_vm8 = vcmask 1042432  }
  0x3a   : > { %v501_v10 = vsel %vm18198_vm3, 0, %v500_v8  ;;  %v1571_v55 = vld [vmem:[#allocation2 + $0x20] sm:$0x1]  ;;  %s16049_s28 = sshll.u32 %s22583_s26, 5 }
  0x3b   : > { %502 = vst [vmem:[#allocation2 + $0xc0] sm:$0x1] %v501_v10  ;;  %v17615_v37 = vld [vmem:[%s22408_s10 + $0xa0] ss:$8 sps:$4 sm:$0xff]   ;;  %s22139_s30 = scalar_lea.vmem %s22411_s13, %s16049_s28 }
  0x3c   : > { %16674 = vmatmul.mubr.msk.bf16.gmra.mrb[20].mxu0 %vm819_vm0, %v16979_v25  ;;  %v523_v25 = vld [vmem:[#allocation2 + $0x44] sm:$0x1] }
  0x3d   : > { %16677 = vmatprep.mubr.msk.bf16.mxu0 %vm819_vm0, %v16980_v26  ;;  %v524_v26 = vsel %vm18236_vm5, 0, %v523_v25 }
  0x3e   : > { %525 = vst [vmem:[#allocation2 + $0x44] sm:$0x1] %v524_v26  ;;  %v498_v26 = vsel %vm18198_vm3, 0, %v497_v23 }
  0x3f   : > { %499 = vst [vmem:[#allocation2 + $0xb4] sm:$0x1] %v498_v26 }
  0x44   : > { %16678 = vmatmul.mubr.msk.bf16.gmra.mrb[24].mxu0 %vm819_vm0, %v16981_v27  ;;  %v17016_v27 = vld [vmem:[%s22402_s4 + $0xc0] sm:$0xff]  }
  0x45   : > { %16681 = vmatprep.mubr.msk.bf16.mxu0 %vm819_vm0, %v16982_v28  ;;  %v17018_v28 = vld [vmem:[%s22402_s4 + $0x80] sm:$0xff]   ;;  %16291 = vmatprep.subr.bf16.mxu0 %v17016_v27 }
  0x4c   : > { %16682 = vmatmul.mubr.msk.bf16.gmra.mrb[28].mxu0 %vm819_vm0, %v16983_v29  ;;  %v476_v29 = vld [vmem:[#allocation2 + $0x60] sm:$0x1]  ;;  %vm7701_vm0 = vcmask 1045509  }
  0x4d   : > { %4827 = vmatprep.mubr.bf16.mxu0 %v2004_v13  ;;  %v477_v30 = vsel %vm18198_vm3, 0, %v476_v29  ;;  %v556_v29 = vld [vmem:[#allocation2 + $0xc8] sm:$0x1] }
  0x4e   : > { %478 = vst [vmem:[#allocation2 + $0x60] sm:$0x1] %v477_v30  ;;  %v557_v33 = vsel %vm18236_vm5, 0, %v556_v29 }
  0x4f   : > { %558 = vst [vmem:[#allocation2 + $0xc8] sm:$0x1] %v557_v33 }
  0x54   : > { %4828 = vmatmul.mubr.bf16.vlgmr.msra.gmra.mrb[32].mxu0 %v17014_v12 }
  0x55   : > { %16292 = vmatpush3.bf16.msra.mxu0 %v17018_v28 }
  0x56   : > { %16293 = vmatprep.subr.bf16.mxu0 %v17035_v36 }
  0x59   : > { %16294 = vmatpush3.bf16.msra.mxu0 %v17040_v39 }
  0x5a   : > { %16295 = vmatprep.subr.bf16.mxu0 %v17051_v48  ;;  %v22422_v48 = vmov 0 }
  0x5b   : > { %v22423_v48 = vsel %vm18412_vm9, 4294967295, %v22422_v48 }
  0x5c   : > { %22424 = vst [vmem:[#allocation8_spill] sm:$0xff] %v22423_v48 }
  0x5d   : > { %16296 = vmatpush3.bf16.msra.mxu0 %v17056_v49  ;;  %v1560_v49 = vld [vmem:[#allocation2 + $0xc] sm:$0xf] }
  0x5e   : > { %16297 = vmatprep.subr.bf16.mxu0 %v17067_v58 }
  0x61   : > { %16298 = vmatpush3.bf16.msra.mxu0 %v17072_v59 }
  0x62   : > { %16299 = vmatprep.subr.bf16.mxu0 %v17083_v4  ;;  %v1564_v4 = vld [vmem:[#allocation2 + $0x14] sm:$0x1] }
  0x65   : > { %16300 = vmatpush3.bf16.msra.mxu0 %v17088_v5 }
  0x66   : > { %16301 = vmatprep.subr.bf16.mxu0 %v17099_v46 }
  0x69   : > { %16302 = vmatpush3.bf16.msra.mxu0 %v17104_v63 }
  0xe7   : > { %v16655_v9 = vpop.f32.mrb[0].mxu0 }
  0xe8   : > { %v1038_v11 = vmul.f32 %v16655_v9, %v18384_v6  ;;  %v902_v12 = vpop.f32.mrb[1].mxu0 }
  0xe9   : > { %v1036_v13 = vmul.f32 %v18384_v6, %v902_v12  ;;  %v16656_v14 = vpop.f32.mrb[2].mxu0 }
  0xea   : > { %v1077_v15 = vadd.f32 %v18389_v7, %v1038_v11  ;;  %v1039_v16 = vmul.f32 %v16656_v14, %v18384_v6  ;;  %v905_v17 = vpop.f32.mrb[3].mxu0 }
  0xeb   : > { %v1075_v18 = vadd.f32 %v18389_v7, %v1036_v13  ;;  %v1037_v19 = vmul.f32 %v18384_v6, %v905_v17 }
  0xec   : > { %v1109_v20 = vmax.f32 %v1077_v15, 0.0  ;;  %v1078_v22 = vadd.f32 %v18389_v7, %v1039_v16 }
  0xed   : > { %v1107_v24 = vmax.f32 %v1075_v18, 0.0  ;;  %v1076_v25 = vadd.f32 %v18389_v7, %v1037_v19 }
  0xee   : > { %v16052_v27 = vpack.c.bf16 %v1109_v20, %v1109_v20  ;;  %v1110_v28 = vmax.f32 %v1078_v22, 0.0 }
  0xef   : > { %v16050_v30 = vpack.c.bf16 %v1107_v24, %v1107_v24  ;;  %v1108_v31 = vmax.f32 %v1076_v25, 0.0  ;;  %v16659_v32 = vpop.f32.mrb[4].mxu0  ;;  %v1581_v25 = vld [vmem:[#allocation2 + $0x30] sm:$0xf] }
  0xf0   : > { %v1255_v34 = vshrl.u32 %v16052_v27, 16  ;;  %v1258_v35 = vshll.u32 %v16052_v27, 16  ;;  %v16053_v36 = vpack.c.bf16 %v1110_v28, %v1110_v28  ;;  %v1042_v38 = vmul.f32 %v16659_v32, %v18384_v6  ;;  %v918_v39 = vpop.f32.mrb[5].mxu0 }
  0xf1   : > { %v1238_v41 = vshrl.u32 %v16050_v30, 16  ;;  %v1241_v42 = vshll.u32 %v16050_v30, 16  ;;  %v16051_v43 = vpack.c.bf16 %v1108_v31, %v1108_v31  ;;  %v1040_v44 = vmul.f32 %v18384_v6, %v918_v39  ;;  %v16660_v45 = vpop.f32.mrb[6].mxu0  ;;  %v1574_v30 = vld [vmem:[#allocation2 + $0x24] sm:$0xf] }
  0xf2   : > { %v1257_v47 = vrot.slane %v1255_v34, 7  ;;  %v1263_v50 = vshrl.u32 %v16053_v36, 16  ;;  %v1266_v51 = vshll.u32 %v16053_v36, 16  ;;  %v1081_v52 = vadd.f32 %v18389_v7, %v1042_v38  ;;  %v921_v53 = vpop.f32.mrb[7].mxu0 }
  0xf3   : > { %v1240_v54 = vrot.slane %v1238_v41, 7  ;;  %v1246_v56 = vshrl.u32 %v16051_v43, 16  ;;  %v1249_v57 = vshll.u32 %v16051_v43, 16  ;;  %v1079_v58 = vadd.f32 %v18389_v7, %v1040_v44 }
  0xf4   : > { %v1260_v59 = vor.u32 %v1258_v35, %v1257_v47  ;;  %v1261_v60 = vrot.slane %v1257_v47, 4  ;;  %v1265_v61 = vrot.slane %v1263_v50, 7  ;;  %v1113_v62 = vmax.f32 %v1081_v52, 0.0 }
  0xf5   : > { %v1243_v0 = vor.u32 %v1241_v42, %v1240_v54  ;;  %v1244_v1 = vrot.slane %v1240_v54, 4  ;;  %v1248_v3 = vrot.slane %v1246_v56, 7  ;;  %v1111_v5 = vmax.f32 %v1079_v58, 0.0 }
  0xf6   : > { %v1568_v8 = vsel %vm18412_vm9, %v1260_v59, %v1567_v40  ;;  %v1268_v9 = vor.u32 %v1266_v51, %v1265_v61  ;;  %v1270_v10 = vrot.slane %v1265_v61, 4  ;;  %v16056_v11 = vpack.c.bf16 %v1113_v62, %v1113_v62 }
  0xf7   : > { %1569 = vst [vmem:[#allocation2 + $0x18] sm:$0xf] %v1568_v8  ;;  %v1561_v12 = vsel %vm18412_vm9, %v1243_v0, %v1560_v49  ;;  %v1251_v13 = vor.u32 %v1249_v57, %v1248_v3  ;;  %v1253_v14 = vrot.slane %v1248_v3, 4  ;;  %v16054_v15 = vpack.c.bf16 %v1111_v5, %v1111_v5  ;;  %v16663_v16 = vpop.f32.mrb[8].mxu0  ;;  %v1585_v8 = vld [vmem:[#allocation2 + $0x38] sm:$0x1] }
  0xf8   : > { %1562 = vst [vmem:[#allocation2 + $0xc] sm:$0xf] %v1561_v12  ;;  %v1269_v17 = vsel %vm18423_vm10, %v1261_v60, %v1268_v9  ;;  %v1572_v18 = vsel %vm18198_vm3, %v1270_v10, %v1571_v55  ;;  %v1289_v19 = vshrl.u32 %v16056_v11, 16  ;;  %v1292_v20 = vshll.u32 %v16056_v11, 16  ;;  %v934_v22 = vpop.f32.mrb[9].mxu0 }
  0xf9   : > { %1570 = vst [vmem:[#allocation2 + $0x1c] sm:$0xf] %v1269_v17  ;;  %1573 = vst [vmem:[#allocation2 + $0x20] sm:$0x1] %v1572_v18  ;;  %v1252_v23 = vsel %vm18423_vm10, %v1244_v1, %v1251_v13  ;;  %v1565_v24 = vsel %vm18198_vm3, %v1253_v14, %v1564_v4  ;;  %v1272_v26 = vshrl.u32 %v16054_v15, 16  ;;  %v1275_v27 = vshll.u32 %v16054_v15, 16 }
  0xfa   : > { %v16664_v28 = vpop.f32.mrb[10].mxu0  ;;  %1563 = vst [vmem:[#allocation2 + $0x10] sm:$0xf] %v1252_v23  ;;  %1566 = vst [vmem:[#allocation2 + $0x14] sm:$0x1] %v1565_v24  ;;  %v18439_v29 = vrot.slane %v1289_v19, 7  ;;  %v1043_v31 = vmul.f32 %v16660_v45, %v18384_v6  ;;  %v1041_v32 = vmul.f32 %v18384_v6, %v921_v53  ;;  %v1046_v33 = vmul.f32 %v16663_v16, %v18384_v6 }
  0xfb   : > { %v937_v34 = vpop.f32.mrb[11].mxu0  ;;  %v18444_v35 = vrot.slane %v1272_v26, 7  ;;  %v1044_v36 = vmul.f32 %v18384_v6, %v934_v22  ;;  %v1047_v38 = vmul.f32 %v16664_v28, %v18384_v6  ;;  %v1578_v9 = vld [vmem:[#allocation2 + $0x2c] sm:$0x1]  ;;  %v1595_v16 = vld [vmem:[#allocation2 + $0x48] sm:$0xf] }
  0xfc   : > { %v1045_v39 = vmul.f32 %v18384_v6, %v937_v34  ;;  %v1294_v40 = vor.u32 %v1292_v20, %v18439_v29  ;;  %v1082_v41 = vadd.f32 %v18389_v7, %v1043_v31  ;;  %v1080_v42 = vadd.f32 %v18389_v7, %v1041_v32  ;;  %v1588_v17 = vld [vmem:[#allocation2 + $0x3c] sm:$0xf] }
  0xfd   : > { %v1295_v43 = vrot.slane %v18439_v29, 4  ;;  %v1277_v44 = vor.u32 %v1275_v27, %v18444_v35  ;;  %v1085_v45 = vadd.f32 %v18389_v7, %v1046_v33  ;;  %v1083_v46 = vadd.f32 %v18389_v7, %v1044_v36 }
  0xfe   : > { %v1582_v47 = vsel %vm18412_vm9, %v1294_v40, %v1581_v25  ;;  %v1114_v49 = vmax.f32 %v1082_v41, 0.0  ;;  %v1112_v50 = vmax.f32 %v1080_v42, 0.0  ;;  %v1086_v51 = vadd.f32 %v18389_v7, %v1047_v38 }
  0xff   : > { %1583 = vst [vmem:[#allocation2 + $0x30] sm:$0xf] %v1582_v47  ;;  %v1575_v52 = vsel %vm18412_vm9, %v1277_v44, %v1574_v30  ;;  %v1117_v53 = vmax.f32 %v1085_v45, 0.0  ;;  %v1115_v54 = vmax.f32 %v1083_v46, 0.0  ;;  %v1084_v55 = vadd.f32 %v18389_v7, %v1045_v39  ;;  %v18478_v42 = vpop.f32.mrb[12].mxu0 }
 0x100   : > { %v1278_v56 = vrot.slane %v18444_v35, 4  ;;  %1576 = vst [vmem:[#allocation2 + $0x24] sm:$0xf] %v1575_v52  ;;  %v16057_v57 = vpack.c.bf16 %v1114_v49, %v1114_v49  ;;  %v16055_v58 = vpack.c.bf16 %v1112_v50, %v1112_v50  ;;  %v1118_v59 = vmax.f32 %v1086_v51, 0.0  ;;  %v1599_v47 = vld [vmem:[#allocation2 + $0x50] sm:$0x1] }
 0x101   : > { %v16060_v60 = vpack.c.bf16 %v1117_v53, %v1117_v53  ;;  %v16058_v61 = vpack.c.bf16 %v1115_v54, %v1115_v54  ;;  %v1116_v62 = vmax.f32 %v1084_v55, 0.0  ;;  %v18463_v63 = vld [vmem:[#allocation2 + $0xc] sm:$0xff]   ;;  %v17021_v20 = vld [vmem:[#allocation2 + $0x14] ss:$0 sps:$4 sm:$0x11]  }
 0x102   : > { %v1297_v0 = vshrl.u32 %v16057_v57, 16  ;;  %v1300_v1 = vshll.u32 %v16057_v57, 16  ;;  %v1280_v3 = vshrl.u32 %v16055_v58, 16  ;;  %v1283_v4 = vshll.u32 %v16055_v58, 16  ;;  %v17020_v5 = vld [vmem:[#allocation2 + $0xc] sm:$0xfe]  }
 0x103   : > { %v1323_v10 = vshrl.u32 %v16060_v60, 16  ;;  %v1326_v11 = vshll.u32 %v16060_v60, 16  ;;  %v1306_v12 = vshrl.u32 %v16058_v61, 16  ;;  %v1309_v13 = vshll.u32 %v16058_v61, 16  ;;  %v17025_v31 = vld [vmem:[#allocation2 + $0xc] sm:$0xff]  }
 0x104   : > { %v1299_v14 = vrot.slane %v1297_v0, 7  ;;  %v1282_v15 = vrot.slane %v1280_v3, 7  ;;  %v16061_v18 = vpack.c.bf16 %v1118_v59, %v1118_v59  ;;  %v16059_v19 = vpack.c.bf16 %v1116_v62, %v1116_v62  ;;  %v17024_v30 = vld [vmem:[#allocation2 + $0x14] ss:$0 sps:$4 sm:$0x11]   ;;  %v17030_v59 = vld [vmem:[#allocation2 + $0x18] sm:$0xff]  }
 0x105   : > { %v1325_v22 = vrot.slane %v1323_v10, 7  ;;  %v18465_v23 = vrot.slane %v1306_v12, 7  ;;  %v3194_v24 = vrot.slane %v17020_v5, 1  ;;  %v2006_v25 = vshrl.u32 %v18463_v63, 16  ;;  %v17028_v53 = vld [vmem:[#allocation2 + $0x18] sm:$0xfe]  }
 0x106   : > { %v1302_v26 = vor.u32 %v1300_v1, %v1299_v14  ;;  %v1304_v27 = vrot.slane %v1299_v14, 4  ;;  %v1285_v28 = vor.u32 %v1283_v4, %v1282_v15  ;;  %v1287_v29 = vrot.slane %v1282_v15, 4  ;;  %v17026_v41 = vld [vmem:[#allocation2 + $0x14] ss:$0 sps:$4 sm:$0x11]  }
 0x107   : > { %v1328_v32 = vor.u32 %v1326_v11, %v1325_v22  ;;  %v1329_v33 = vrot.slane %v1325_v22, 4  ;;  %v1311_v34 = vor.u32 %v1309_v13, %v18465_v23  ;;  %v1312_v35 = vrot.slane %v18465_v23, 4  ;;  %v1592_v55 = vld [vmem:[#allocation2 + $0x44] sm:$0x1]  ;;  %v17027_v13 = vld [vmem:[#allocation2 + $0xc] sm:$0xff]  }
 0x108   : > { %v1303_v36 = vsel %vm18423_vm10, %v1295_v43, %v1302_v26  ;;  %v1586_v38 = vsel %vm18198_vm3, %v1304_v27, %v1585_v8  ;;  %v1286_v39 = vsel %vm18423_vm10, %v1278_v56, %v1285_v28  ;;  %v1579_v40 = vsel %vm18198_vm3, %v1287_v29, %v1578_v9  ;;  %v17029_v1 = vld [vmem:[#allocation2 + $0x20] ss:$0 sps:$4 sm:$0x11]   ;;  %v950_v9 = vpop.f32.mrb[13].mxu0  ;;  %v17032_v26 = vld [vmem:[#allocation2 + $0x18] sm:$0xff]  }
 0x109   : > { %1584 = vst [vmem:[#allocation2 + $0x34] sm:$0xf] %v1303_v36  ;;  %1587 = vst [vmem:[#allocation2 + $0x38] sm:$0x1] %v1586_v38  ;;  %v1596_v44 = vsel %vm18412_vm9, %v1328_v32, %v1595_v16  ;;  %v1589_v43 = vsel %vm18412_vm9, %v1311_v34, %v1588_v17  ;;  %v1331_v45 = vshrl.u32 %v16061_v18, 16  ;;  %v1334_v46 = vshll.u32 %v16061_v18, 16 }
 0x10a   : > { %1577 = vst [vmem:[#allocation2 + $0x28] sm:$0xf] %v1286_v39  ;;  %1580 = vst [vmem:[#allocation2 + $0x2c] sm:$0x1] %v1579_v40  ;;  %v1314_v49 = vshrl.u32 %v16059_v19, 16  ;;  %v1317_v50 = vshll.u32 %v16059_v19, 16  ;;  %v1048_v34 = vmul.f32 %v18384_v6, %v950_v9 }
 0x10b   : > { %1597 = vst [vmem:[#allocation2 + $0x48] sm:$0xf] %v1596_v44  ;;  %1590 = vst [vmem:[#allocation2 + $0x3c] sm:$0xf] %v1589_v43  ;;  %v3195_v51 = vrot.slane %v17021_v20, 1  ;;  %v2008_v52 = vshll.u32 %v18463_v63, 16 }
 0x10c   : > { %v1333_v54 = vrot.slane %v1331_v45, 7  ;;  %v2013_v56 = vshll.u32 %v17024_v30, 16  ;;  %v2795_v57 = vshrl.u32 %v17025_v31, 16  ;;  %v2797_v58 = vshll.u32 %v17025_v31, 16  ;;  %v16668_v15 = vpop.f32.mrb[14].mxu0 }
 0x10d   : > { %v1316_v60 = vrot.slane %v1314_v49, 7  ;;  %v3196_v61 = vsel %vm2393_vm11, %v3194_v24, %v3195_v51  ;;  %v2010_v62 = vrot.slane %v2008_v52, 1  ;;  %v2802_v0 = vshll.u32 %v17026_v41, 16  ;;  %v17031_v14 = vld [vmem:[#allocation2 + $0x20] ss:$0 sps:$4 sm:$0x11]  }
 0x10e   : > { %v1336_v3 = vor.u32 %v1334_v46, %v1333_v54  ;;  %v1338_v4 = vrot.slane %v1333_v54, 4  ;;  %5149 = vmatprep.mubr.bf16.mxu1 %v3196_v61  ;;  %v2015_v5 = vrot.slane %v2013_v56, 1  ;;  %v2799_v8 = vrot.slane %v2797_v58, 1  ;;  %v953_v20 = vpop.f32.mrb[15].mxu0 }
 0x10f   : > { %v1319_v63 = vor.u32 %v1317_v50, %v1316_v60  ;;  %v1321_v10 = vrot.slane %v1316_v60, 4  ;;  %v2011_v11 = vor.u32 %v2010_v62, %v2006_v25  ;;  %v2804_v12 = vrot.slane %v2802_v0, 1  ;;  %v17033_v31 = vld [vmem:[#allocation2 + $0x20] ss:$0 sps:$4 sm:$0x11]  }
 0x110   : > { %v1337_v16 = vsel %vm18423_vm10, %v1329_v33, %v1336_v3  ;;  %v1600_v17 = vsel %vm18198_vm3, %v1338_v4, %v1599_v47  ;;  %v2800_v18 = vor.u32 %v2799_v8, %v2795_v57  ;;  %v3197_v19 = vrot.slane %v17028_v53, 1 }
 0x111   : > { %1598 = vst [vmem:[#allocation2 + $0x4c] sm:$0xf] %v1337_v16  ;;  %1601 = vst [vmem:[#allocation2 + $0x50] sm:$0x1] %v1600_v17  ;;  %v1320_v22 = vsel %vm18423_vm10, %v1312_v35, %v1319_v63  ;;  %v1593_v23 = vsel %vm18198_vm3, %v1321_v10, %v1592_v55  ;;  %v2016_v24 = vsel %vm1992_vm6, %v2011_v11, %v2015_v5  ;;  %v3198_v25 = vrot.slane %v17029_v1, 1  ;;  %v17038_v51 = vld [vmem:[#allocation2 + $0x24] sm:$0xff]  }
 0x112   : > { %1591 = vst [vmem:[#allocation2 + $0x40] sm:$0xf] %v1320_v22  ;;  %1594 = vst [vmem:[#allocation2 + $0x44] sm:$0x1] %v1593_v23  ;;  %4835 = vmatprep.mubr.bf16.mxu0 %v2016_v24  ;;  %v2805_v27 = vsel %vm1992_vm6, %v2800_v18, %v2804_v12  ;;  %v2018_v28 = vshrl.u32 %v17030_v59, 16  ;;  %v2020_v29 = vshll.u32 %v17030_v59, 16  ;;  %v1050_v33 = vmul.f32 %v18478_v42, %v18384_v6 }
 0x113   : > { %v2025_v30 = vshll.u32 %v17031_v14, 16  ;;  %5150 = vmatmul.mubr.bf16.vlgmr.msra.gmra.mrb[0].mxu1 %v2805_v27  ;;  %4836 = vmatmul.mubr.bf16.gmra.mrb[36].mxu0 %v17027_v13  ;;  %v3199_v32 = vsel %vm2393_vm11, %v3197_v19, %v3198_v25  ;;  %v2807_v35 = vshrl.u32 %v17032_v26, 16  ;;  %v1051_v39 = vmul.f32 %v16668_v15, %v18384_v6  ;;  %v17036_v46 = vld [vmem:[#allocation2 + $0x24] sm:$0xfe]   ;;  %v17034_v1 = vld [vmem:[#allocation2 + $0x18] sm:$0xff]  }
 0x114   : > { %5157 = vmatprep.mubr.bf16.mxu1 %v3199_v32  ;;  %v2022_v36 = vrot.slane %v2020_v29, 1  ;;  %v1049_v40 = vmul.f32 %v18384_v6, %v953_v20  ;;  %v1089_v41 = vadd.f32 %v18389_v7, %v1050_v33  ;;  %v1087_v44 = vadd.f32 %v18389_v7, %v1048_v34  ;;  %v17037_v50 = vld [vmem:[#allocation2 + $0x2c] ss:$0 sps:$4 sm:$0x11]   ;;  %v1609_v13 = vld [vmem:[#allocation2 + $0x60] sm:$0xf] }
 0x115   : > { %v2027_v38 = vrot.slane %v2025_v30, 1  ;;  %v2809_v43 = vshll.u32 %v17032_v26, 16  ;;  %v2814_v45 = vshll.u32 %v17033_v31, 16  ;;  %v1090_v42 = vadd.f32 %v18389_v7, %v1051_v39  ;;  %v17039_v60 = vld [vmem:[#allocation2 + $0x2c] ss:$0 sps:$4 sm:$0x11]  }
 0x116   : > { %v2023_v47 = vor.u32 %v2022_v36, %v2018_v28  ;;  %v1088_v49 = vadd.f32 %v18389_v7, %v1049_v40  ;;  %v1121_v52 = vmax.f32 %v1089_v41, 0.0  ;;  %v1119_v53 = vmax.f32 %v1087_v44, 0.0  ;;  %v1602_v14 = vld [vmem:[#allocation2 + $0x54] sm:$0xf]  ;;  %v1613_v22 = vld [vmem:[#allocation2 + $0x68] sm:$0x1] }
 0x117   : > { %v2811_v54 = vrot.slane %v2809_v43, 1  ;;  %v2816_v55 = vrot.slane %v2814_v45, 1  ;;  %v1122_v57 = vmax.f32 %v1090_v42, 0.0  ;;  %v3200_v59 = vrot.slane %v17036_v46, 1  ;;  %v1606_v23 = vld [vmem:[#allocation2 + $0x5c] sm:$0x1] }
 0x118   : > { %v2028_v56 = vsel %vm1992_vm6, %v2023_v47, %v2027_v38  ;;  %v1120_v58 = vmax.f32 %v1088_v49, 0.0  ;;  %v16064_v61 = vpack.c.bf16 %v1121_v52, %v1121_v52  ;;  %v16062_v62 = vpack.c.bf16 %v1119_v53, %v1119_v53  ;;  %v17041_v26 = vld [vmem:[#allocation2 + $0x24] sm:$0xff]   ;;  %v17042_v27 = vld [vmem:[#allocation2 + $0x2c] ss:$0 sps:$4 sm:$0x11]   ;;  %v16671_v28 = vpop.f32.mrb[16].mxu0 }
 0x119   : > { %4843 = vmatprep.mubr.bf16.mxu0 %v2028_v56  ;;  %v2812_v0 = vor.u32 %v2811_v54, %v2807_v35  ;;  %v3201_v3 = vrot.slane %v17037_v50, 1  ;;  %v16065_v4 = vpack.c.bf16 %v1122_v57, %v1122_v57  ;;  %v2030_v8 = vshrl.u32 %v17038_v51, 16  ;;  %v17046_v33 = vld [vmem:[#allocation2 + $0x30] sm:$0xff]   ;;  %v17043_v49 = vld [vmem:[#allocation2 + $0x24] sm:$0xff]   ;;  %v966_v56 = vpop.f32.mrb[17].mxu0 }
 0x11a   : > { %v16063_v5 = vpack.c.bf16 %v1120_v58, %v1120_v58  ;;  %v2032_v9 = vshll.u32 %v17038_v51, 16  ;;  %v1357_v63 = vshrl.u32 %v16064_v61, 16  ;;  %v1360_v10 = vshll.u32 %v16064_v61, 16  ;;  %v17044_v43 = vld [vmem:[#allocation2 + $0x30] sm:$0xfe]   ;;  %v16672_v61 = vpop.f32.mrb[18].mxu0 }
 0x11b   : > { %v1340_v11 = vshrl.u32 %v16062_v62, 16  ;;  %v1343_v12 = vshll.u32 %v16062_v62, 16  ;;  %4844 = vmatmul.mubr.bf16.gmra.mrb[40].mxu0 %v17034_v1  ;;  %v1365_v15 = vshrl.u32 %v16065_v4, 16  ;;  %v1368_v16 = vshll.u32 %v16065_v4, 16  ;;  %v969_v4 = vpop.f32.mrb[19].mxu0 }
 0x11c   : > { %v1348_v17 = vshrl.u32 %v16063_v5, 16  ;;  %v1351_v18 = vshll.u32 %v16063_v5, 16  ;;  %v1359_v19 = vrot.slane %v1357_v63, 7  ;;  %v2817_v24 = vsel %vm1992_vm6, %v2812_v0, %v2816_v55  ;;  %v17045_v50 = vld [vmem:[#allocation2 + $0x38] ss:$0 sps:$4 sm:$0x11]  }
 0x11d   : > { %v1342_v20 = vrot.slane %v1340_v11, 7  ;;  %v3202_v25 = vsel %vm2393_vm11, %v3200_v59, %v3201_v3  ;;  %v1367_v29 = vrot.slane %v1365_v15, 7  ;;  %5158 = vmatmul.mubr.bf16.gmra.mrb[4].mxu1 %v2817_v24  ;;  %v2034_v31 = vrot.slane %v2032_v9, 1  ;;  %v17047_v55 = vld [vmem:[#allocation2 + $0x38] ss:$0 sps:$4 sm:$0x11]  }
 0x11e   : > { %v1350_v30 = vrot.slane %v1348_v17, 7  ;;  %v2037_v32 = vshll.u32 %v17039_v60, 16  ;;  %v1362_v34 = vor.u32 %v1360_v10, %v1359_v19  ;;  %v1363_v35 = vrot.slane %v1359_v19, 4  ;;  %5165 = vmatprep.mubr.bf16.mxu1 %v3202_v25  ;;  %v17048_v10 = vld [vmem:[#allocation2 + $0x30] sm:$0xff]  }
 0x11f   : > { %v1345_v36 = vor.u32 %v1343_v12, %v1342_v20  ;;  %v1346_v38 = vrot.slane %v1342_v20, 4  ;;  %v1370_v39 = vor.u32 %v1368_v16, %v1367_v29  ;;  %v1372_v40 = vrot.slane %v1367_v29, 4  ;;  %v17049_v15 = vld [vmem:[#allocation2 + $0x38] ss:$0 sps:$4 sm:$0x11]  }
 0x120   : > { %v1353_v41 = vor.u32 %v1351_v18, %v1350_v30  ;;  %v1355_v44 = vrot.slane %v1350_v30, 4  ;;  %v1610_v45 = vsel %vm18412_vm9, %v1362_v34, %v1609_v13  ;;  %v2035_v47 = vor.u32 %v2034_v31, %v2030_v8  ;;  %v17052_v29 = vld [vmem:[#allocation2 + $0x3c] sm:$0xfe]  }
 0x121   : > { %v1603_v46 = vsel %vm18412_vm9, %v1345_v36, %v1602_v14  ;;  %v2039_v42 = vrot.slane %v2037_v32, 1  ;;  %1611 = vst [vmem:[#allocation2 + $0x60] sm:$0xf] %v1610_v45  ;;  %v1371_v51 = vsel %vm18423_vm10, %v1363_v35, %v1370_v39  ;;  %v1614_v52 = vsel %vm18198_vm3, %v1372_v40, %v1613_v22 }
 0x122   : > { %1604 = vst [vmem:[#allocation2 + $0x54] sm:$0xf] %v1603_v46  ;;  %v1354_v53 = vsel %vm18423_vm10, %v1346_v38, %v1353_v41  ;;  %v1607_v54 = vsel %vm18198_vm3, %v1355_v44, %v1606_v23  ;;  %1612 = vst [vmem:[#allocation2 + $0x64] sm:$0xf] %v1371_v51  ;;  %v2819_v58 = vshrl.u32 %v17041_v26, 16  ;;  %v2821_v59 = vshll.u32 %v17041_v26, 16 }
 0x123   : > { %1615 = vst [vmem:[#allocation2 + $0x68] sm:$0x1] %v1614_v52  ;;  %1605 = vst [vmem:[#allocation2 + $0x58] sm:$0xf] %v1354_v53  ;;  %v2040_v57 = vsel %vm1992_vm6, %v2035_v47, %v2039_v42  ;;  %v2826_v60 = vshll.u32 %v17042_v27, 16  ;;  %v3203_v62 = vrot.slane %v17044_v43, 1  ;;  %v1054_v63 = vmul.f32 %v16671_v28, %v18384_v6 }
 0x124   : > { %1608 = vst [vmem:[#allocation2 + $0x5c] sm:$0x1] %v1607_v54  ;;  %4851 = vmatprep.mubr.bf16.mxu0 %v2040_v57  ;;  %v3204_v0 = vrot.slane %v17045_v50, 1  ;;  %v2042_v1 = vshrl.u32 %v17046_v33, 16  ;;  %v2044_v3 = vshll.u32 %v17046_v33, 16  ;;  %v2823_v5 = vrot.slane %v2821_v59, 1 }
 0x125   : > { %v2828_v8 = vrot.slane %v2826_v60, 1  ;;  %4852 = vmatmul.mubr.bf16.gmra.mrb[44].mxu0 %v17043_v49  ;;  %v2049_v9 = vshll.u32 %v17047_v55, 16  ;;  %v1052_v13 = vmul.f32 %v18384_v6, %v966_v56  ;;  %v1055_v14 = vmul.f32 %v16672_v61, %v18384_v6  ;;  %v17050_v38 = vld [vmem:[#allocation2 + $0x30] sm:$0xff]   ;;  %v17054_v42 = vld [vmem:[#allocation2 + $0x3c] sm:$0xff]   ;;  %v1623_v49 = vld [vmem:[#allocation2 + $0x78] sm:$0xf] }
 0x126   : > { %v3205_v11 = vsel %vm2393_vm11, %v3203_v62, %v3204_v0  ;;  %v2046_v12 = vrot.slane %v2044_v3, 1  ;;  %v2824_v16 = vor.u32 %v2823_v5, %v2819_v58  ;;  %v1093_v18 = vadd.f32 %v18389_v7, %v1054_v63  ;;  %v17055_v54 = vld [vmem:[#allocation2 + $0x44] ss:$0 sps:$4 sm:$0x11]   ;;  %v1616_v56 = vld [vmem:[#allocation2 + $0x6c] sm:$0xf] }
 0x127   : > { %v2051_v17 = vrot.slane %v2049_v9, 1  ;;  %v1053_v19 = vmul.f32 %v18384_v6, %v969_v4  ;;  %v1091_v22 = vadd.f32 %v18389_v7, %v1052_v13  ;;  %v1094_v23 = vadd.f32 %v18389_v7, %v1055_v14  ;;  %v17053_v6 = vld [vmem:[#allocation2 + $0x44] ss:$0 sps:$4 sm:$0x11]   ;;  %v1627_v57 = vld [vmem:[#allocation2 + $0x80] sm:$0x1] }
 0x128   : > { %v2047_v20 = vor.u32 %v2046_v12, %v2042_v1  ;;  %v2831_v24 = vshrl.u32 %v17048_v10, 16  ;;  %v2829_v25 = vsel %vm1992_vm6, %v2824_v16, %v2828_v8  ;;  %v1125_v26 = vmax.f32 %v1093_v18, 0.0  ;;  %v16675_v61 = vpop.f32.mrb[20].mxu0  ;;  %v1620_v1 = vld [vmem:[#allocation2 + $0x74] sm:$0x1]  ;;  %v17057_v5 = vld [vmem:[#allocation2 + $0x3c] sm:$0xff]  }
 0x129   : > { %v1092_v27 = vadd.f32 %v18389_v7, %v1053_v19  ;;  %v2833_v28 = vshll.u32 %v17048_v10, 16  ;;  %5166 = vmatmul.mubr.bf16.gmra.mrb[8].mxu1 %v2829_v25  ;;  %v1123_v31 = vmax.f32 %v1091_v22, 0.0  ;;  %v1126_v32 = vmax.f32 %v1094_v23, 0.0  ;;  %v982_v8 = vpop.f32.mrb[21].mxu0  ;;  %v17062_v22 = vld [vmem:[#allocation2 + $0x48] sm:$0xff]  }
 0x12a   : > { %v2052_v30 = vsel %vm1992_vm6, %v2047_v20, %v2051_v17  ;;  %v2838_v33 = vshll.u32 %v17049_v15, 16  ;;  %5173 = vmatprep.mubr.bf16.mxu1 %v3205_v11  ;;  %v16068_v34 = vpack.c.bf16 %v1125_v26, %v1125_v26  ;;  %v3206_v39 = vrot.slane %v17052_v29, 1  ;;  %v17058_v12 = vld [vmem:[#allocation2 + $0x44] ss:$0 sps:$4 sm:$0x11]  }
 0x12b   : > { %4859 = vmatprep.mubr.bf16.mxu0 %v2052_v30  ;;  %v1124_v35 = vmax.f32 %v1092_v27, 0.0  ;;  %v2835_v36 = vrot.slane %v2833_v28, 1  ;;  %v16066_v40 = vpack.c.bf16 %v1123_v31, %v1123_v31  ;;  %v16069_v41 = vpack.c.bf16 %v1126_v32, %v1126_v32  ;;  %v17060_v27 = vld [vmem:[#allocation2 + $0x48] sm:$0xfe]   ;;  %v16676_v28 = vpop.f32.mrb[22].mxu0 }
 0x12c   : > { %v2840_v44 = vrot.slane %v2838_v33, 1  ;;  %v3207_v7 = vrot.slane %v17053_v6, 1  ;;  %v1391_v43 = vshrl.u32 %v16068_v34, 16  ;;  %v1394_v45 = vshll.u32 %v16068_v34, 16 }
 0x12d   : > { %v16067_v46 = vpack.c.bf16 %v1124_v35, %v1124_v35  ;;  %v2836_v47 = vor.u32 %v2835_v36, %v2831_v24  ;;  %4860 = vmatmul.mubr.bf16.gmra.mrb[48].mxu0 %v17050_v38  ;;  %v1374_v50 = vshrl.u32 %v16066_v40, 16  ;;  %v1377_v51 = vshll.u32 %v16066_v40, 16  ;;  %v17061_v33 = vld [vmem:[#allocation2 + $0x50] ss:$0 sps:$4 sm:$0x11]   ;;  %v17059_v36 = vld [vmem:[#allocation2 + $0x3c] sm:$0xff]  }
 0x12e   : > { %v1399_v52 = vshrl.u32 %v16069_v41, 16  ;;  %v1402_v53 = vshll.u32 %v16069_v41, 16  ;;  %v1393_v55 = vrot.slane %v1391_v43, 7  ;;  %v3208_v3 = vsel %vm2393_vm11, %v3206_v39, %v3207_v7  ;;  %v17063_v40 = vld [vmem:[#allocation2 + $0x50] ss:$0 sps:$4 sm:$0x11]  }
 0x12f   : > { %v1382_v58 = vshrl.u32 %v16067_v46, 16  ;;  %v1385_v59 = vshll.u32 %v16067_v46, 16  ;;  %v2841_v60 = vsel %vm1992_vm6, %v2836_v47, %v2840_v44  ;;  %v1376_v62 = vrot.slane %v1374_v50, 7  ;;  %v18550_v41 = vld [vmem:[%s22400_s2] ss:$0 sm:$0xff] }
 0x130   : > { %v1401_v0 = vrot.slane %v1399_v52, 7  ;;  %v2054_v4 = vshrl.u32 %v17054_v42, 16  ;;  %v1396_v9 = vor.u32 %v1394_v45, %v1393_v55  ;;  %v1397_v63 = vrot.slane %v1393_v55, 4  ;;  %v18559_v52 = vld [vmem:[%s22401_s3] ss:$0 sm:$0xff] }
 0x131   : > { %v1384_v10 = vrot.slane %v1382_v58, 7  ;;  %v2056_v11 = vshll.u32 %v17054_v42, 16  ;;  %v1379_v13 = vor.u32 %v1377_v51, %v1376_v62  ;;  %v1380_v14 = vrot.slane %v1376_v62, 4  ;;  %5174 = vmatmul.mubr.bf16.gmra.mrb[12].mxu1 %v2841_v60  ;;  %v17064_v58 = vld [vmem:[#allocation2 + $0x48] sm:$0xff]  }
 0x132   : > { %v1404_v15 = vor.u32 %v1402_v53, %v1401_v0  ;;  %v1406_v16 = vrot.slane %v1401_v0, 4  ;;  %v1624_v17 = vsel %vm18412_vm9, %v1396_v9, %v1623_v49  ;;  %5181 = vmatprep.mubr.bf16.mxu1 %v3208_v3  ;;  %v2061_v26 = vshll.u32 %v17055_v54, 16  ;;  %v985_v49 = vpop.f32.mrb[23].mxu0 }
 0x133   : > { %v1387_v18 = vor.u32 %v1385_v59, %v1384_v10  ;;  %v1389_v19 = vrot.slane %v1384_v10, 4  ;;  %v2058_v20 = vrot.slane %v2056_v11, 1  ;;  %1625 = vst [vmem:[#allocation2 + $0x78] sm:$0xf] %v1624_v17  ;;  %v1617_v23 = vsel %vm18412_vm9, %v1379_v13, %v1616_v56  ;;  %v17068_v11 = vld [vmem:[#allocation2 + $0x54] sm:$0xfe]  }
 0x134   : > { %v1405_v24 = vsel %vm18423_vm10, %v1397_v63, %v1404_v15  ;;  %v1628_v25 = vsel %vm18198_vm3, %v1406_v16, %v1627_v57  ;;  %1618 = vst [vmem:[#allocation2 + $0x6c] sm:$0xf] %v1617_v23  ;;  %v2843_v32 = vshrl.u32 %v17057_v5, 16  ;;  %v2063_v6 = vrot.slane %v2061_v26, 1  ;;  %v1637_v23 = vld [vmem:[#allocation2 + $0x90] sm:$0xf] }
 0x135   : > { %1626 = vst [vmem:[#allocation2 + $0x7c] sm:$0xf] %v1405_v24  ;;  %1629 = vst [vmem:[#allocation2 + $0x80] sm:$0x1] %v1628_v25  ;;  %v1388_v29 = vsel %vm18423_vm10, %v1380_v14, %v1387_v18  ;;  %v1621_v30 = vsel %vm18198_vm3, %v1389_v19, %v1620_v1  ;;  %v2059_v31 = vor.u32 %v2058_v20, %v2054_v4  ;;  %v2845_v34 = vshll.u32 %v17057_v5, 16 }
 0x136   : > { %1619 = vst [vmem:[#allocation2 + $0x70] sm:$0xf] %v1388_v29  ;;  %1622 = vst [vmem:[#allocation2 + $0x74] sm:$0x1] %v1621_v30  ;;  %v2850_v35 = vshll.u32 %v17058_v12, 16  ;;  %v3209_v38 = vrot.slane %v17060_v27, 1  ;;  %v1058_v44 = vmul.f32 %v18550_v41, %v16675_v61  ;;  %v1056_v7 = vmul.f32 %v18550_v41, %v982_v8 }
 0x137   : > { %v3210_v39 = vrot.slane %v17061_v33, 1  ;;  %v1059_v43 = vmul.f32 %v18550_v41, %v16676_v28  ;;  %v2064_v45 = vsel %vm1992_vm6, %v2059_v31, %v2063_v6  ;;  %v2847_v46 = vrot.slane %v2845_v34, 1  ;;  %v17065_v59 = vld [vmem:[#allocation2 + $0x50] ss:$0 sps:$4 sm:$0x11]   ;;  %v17070_v6 = vld [vmem:[#allocation2 + $0x54] sm:$0xff]  }
 0x138   : > { %v2852_v47 = vrot.slane %v2850_v35, 1  ;;  %v2066_v42 = vshrl.u32 %v17062_v22, 16  ;;  %4867 = vmatprep.mubr.bf16.mxu0 %v2064_v45  ;;  %v2068_v50 = vshll.u32 %v17062_v22, 16  ;;  %v2073_v51 = vshll.u32 %v17063_v40, 16  ;;  %v17066_v22 = vld [vmem:[#allocation2 + $0x48] sm:$0xff]  }
 0x139   : > { %v1097_v53 = vadd.f32 %v18559_v52, %v1058_v44  ;;  %v2848_v54 = vor.u32 %v2847_v46, %v2843_v32  ;;  %4868 = vmatmul.mubr.bf16.gmra.mrb[52].mxu0 %v17059_v36  ;;  %v1095_v55 = vadd.f32 %v18559_v52, %v1056_v7  ;;  %v1098_v56 = vadd.f32 %v18559_v52, %v1059_v43  ;;  %v17069_v16 = vld [vmem:[#allocation2 + $0x5c] ss:$0 sps:$4 sm:$0x11]   ;;  %v1630_v29 = vld [vmem:[#allocation2 + $0x84] sm:$0xf] }
 0x13a   : > { %v1057_v57 = vmul.f32 %v18550_v41, %v985_v49  ;;  %v3211_v60 = vsel %vm2393_vm11, %v3209_v38, %v3210_v39  ;;  %v2070_v61 = vrot.slane %v2068_v50, 1  ;;  %v2075_v62 = vrot.slane %v2073_v51, 1  ;;  %v1641_v30 = vld [vmem:[#allocation2 + $0x98] sm:$0x1]  ;;  %v1634_v50 = vld [vmem:[#allocation2 + $0x8c] sm:$0x1] }
 0x13b   : > { %v1129_v0 = vmax.f32 %v1097_v53, 0.0  ;;  %v2853_v1 = vsel %vm1992_vm6, %v2848_v54, %v2852_v47  ;;  %v1127_v3 = vmax.f32 %v1095_v55, 0.0  ;;  %v1130_v4 = vmax.f32 %v1098_v56, 0.0  ;;  %v17073_v39 = vld [vmem:[#allocation2 + $0x54] sm:$0xff]  }
 0x13c   : > { %v1096_v5 = vadd.f32 %v18559_v52, %v1057_v57  ;;  %5182 = vmatmul.mubr.bf16.gmra.mrb[16].mxu1 %v2853_v1  ;;  %v2071_v8 = vor.u32 %v2070_v61, %v2066_v42  ;;  %v2855_v63 = vshrl.u32 %v17064_v58, 16  ;;  %v2857_v10 = vshll.u32 %v17064_v58, 16  ;;  %v17071_v45 = vld [vmem:[#allocation2 + $0x5c] ss:$0 sps:$4 sm:$0x11]  }
 0x13d   : > { %v16072_v9 = vpack.c.bf16 %v1129_v0, %v1129_v0  ;;  %5189 = vmatprep.mubr.bf16.mxu1 %v3211_v60  ;;  %v16070_v12 = vpack.c.bf16 %v1127_v3, %v1127_v3  ;;  %v16073_v13 = vpack.c.bf16 %v1130_v4, %v1130_v4  ;;  %v2862_v15 = vshll.u32 %v17065_v59, 16  ;;  %v17074_v56 = vld [vmem:[#allocation2 + $0x5c] ss:$0 sps:$4 sm:$0x11]   ;;  %v17078_v3 = vld [vmem:[#allocation2 + $0x60] sm:$0xff]  }
 0x13e   : > { %v1128_v14 = vmax.f32 %v1096_v5, 0.0  ;;  %v2076_v17 = vsel %vm1992_vm6, %v2071_v8, %v2075_v62  ;;  %v2859_v20 = vrot.slane %v2857_v10, 1  ;;  %v3212_v36 = vrot.slane %v17068_v11, 1 }
 0x13f   : > { %v1425_v18 = vshrl.u32 %v16072_v9, 16  ;;  %v1428_v19 = vshll.u32 %v16072_v9, 16  ;;  %4875 = vmatprep.mubr.bf16.mxu0 %v2076_v17  ;;  %v1408_v24 = vshrl.u32 %v16070_v12, 16  ;;  %v1411_v25 = vshll.u32 %v16070_v12, 16  ;;  %v17076_v9 = vld [vmem:[#allocation2 + $0x60] sm:$0xfe]  }
 0x140   : > { %v1433_v26 = vshrl.u32 %v16073_v13, 16  ;;  %v1436_v27 = vshll.u32 %v16073_v13, 16  ;;  %v16071_v31 = vpack.c.bf16 %v1128_v14, %v1128_v14  ;;  %v2860_v32 = vor.u32 %v2859_v20, %v2855_v63  ;;  %v16679_v63 = vpop.f32.mrb[24].mxu0  ;;  %v17077_v14 = vld [vmem:[#allocation2 + $0x68] ss:$0 sps:$4 sm:$0x11]  }
 0x141   : > { %v1427_v28 = vrot.slane %v1425_v18, 7  ;;  %v2864_v33 = vrot.slane %v2862_v15, 1  ;;  %v1410_v34 = vrot.slane %v1408_v24, 7  ;;  %4876 = vmatmul.mubr.bf16.gmra.mrb[56].mxu0 %v17066_v22  ;;  %v3213_v38 = vrot.slane %v17069_v16, 1  ;;  %v998_v15 = vpop.f32.mrb[25].mxu0  ;;  %v17075_v22 = vld [vmem:[#allocation2 + $0x54] sm:$0xff]  }
 0x142   : > { %v1435_v35 = vrot.slane %v1433_v26, 7  ;;  %v1416_v7 = vshrl.u32 %v16071_v31, 16  ;;  %v1419_v43 = vshll.u32 %v16071_v31, 16  ;;  %v2078_v60 = vshrl.u32 %v17070_v6, 16 }
 0x143   : > { %v1430_v40 = vor.u32 %v1428_v19, %v1427_v28  ;;  %v1431_v44 = vrot.slane %v1427_v28, 4  ;;  %v1413_v46 = vor.u32 %v1411_v25, %v1410_v34  ;;  %v1414_v47 = vrot.slane %v1410_v34, 4 }
 0x144   : > { %v1438_v42 = vor.u32 %v1436_v27, %v1435_v35  ;;  %v1440_v49 = vrot.slane %v1435_v35, 4  ;;  %v1418_v53 = vrot.slane %v1416_v7, 7  ;;  %v2865_v54 = vsel %vm1992_vm6, %v2860_v32, %v2864_v33  ;;  %v17079_v27 = vld [vmem:[#allocation2 + $0x68] ss:$0 sps:$4 sm:$0x11]  }
 0x145   : > { %v1638_v51 = vsel %vm18412_vm9, %v1430_v40, %v1637_v23  ;;  %v3214_v55 = vsel %vm2393_vm11, %v3212_v36, %v3213_v38  ;;  %v1631_v57 = vsel %vm18412_vm9, %v1413_v46, %v1630_v29  ;;  %5190 = vmatmul.mubr.bf16.gmra.mrb[20].mxu1 %v2865_v54  ;;  %v2080_v0 = vshll.u32 %v17070_v6, 16  ;;  %v16680_v29 = vpop.f32.mrb[26].mxu0  ;;  %v17080_v38 = vld [vmem:[#allocation2 + $0x60] sm:$0xff]  }
 0x146   : > { %1639 = vst [vmem:[#allocation2 + $0x90] sm:$0xf] %v1638_v51  ;;  %v1439_v58 = vsel %vm18423_vm10, %v1431_v44, %v1438_v42  ;;  %v1642_v59 = vsel %vm18198_vm3, %v1440_v49, %v1641_v30  ;;  %1632 = vst [vmem:[#allocation2 + $0x84] sm:$0xf] %v1631_v57  ;;  %v1421_v61 = vor.u32 %v1419_v43, %v1418_v53  ;;  %v1423_v62 = vrot.slane %v1418_v53, 4  ;;  %v1001_v33 = vpop.f32.mrb[27].mxu0 }
 0x147   : > { %1640 = vst [vmem:[#allocation2 + $0x94] sm:$0xf] %v1439_v58  ;;  %1643 = vst [vmem:[#allocation2 + $0x98] sm:$0x1] %v1642_v59  ;;  %5197 = vmatprep.mubr.bf16.mxu1 %v3214_v55  ;;  %v2085_v1 = vshll.u32 %v17071_v45, 16  ;;  %v2867_v4 = vshrl.u32 %v17073_v39, 16  ;;  %v1062_v25 = vmul.f32 %v18550_v41, %v16679_v63  ;;  %v1060_v28 = vmul.f32 %v18550_v41, %v998_v15 }
 0x148   : > { %v2869_v5 = vshll.u32 %v17073_v39, 16  ;;  %v2874_v8 = vshll.u32 %v17074_v56, 16  ;;  %v1422_v10 = vsel %vm18423_vm10, %v1414_v47, %v1421_v61  ;;  %v1635_v11 = vsel %vm18198_vm3, %v1423_v62, %v1634_v50  ;;  %v17081_v39 = vld [vmem:[#allocation2 + $0x68] ss:$0 sps:$4 sm:$0x11]  }
 0x149   : > { %v2082_v12 = vrot.slane %v2080_v0, 1  ;;  %v2087_v13 = vrot.slane %v2085_v1, 1  ;;  %1633 = vst [vmem:[#allocation2 + $0x88] sm:$0xf] %v1422_v10  ;;  %1636 = vst [vmem:[#allocation2 + $0x8c] sm:$0x1] %v1635_v11  ;;  %v1101_v32 = vadd.f32 %v18559_v52, %v1062_v25  ;;  %v1099_v35 = vadd.f32 %v18559_v52, %v1060_v28 }
 0x14a   : > { %v2871_v16 = vrot.slane %v2869_v5, 1  ;;  %v2876_v17 = vrot.slane %v2874_v8, 1  ;;  %v3215_v18 = vrot.slane %v17076_v9, 1  ;;  %v2090_v19 = vshrl.u32 %v17078_v3, 16  ;;  %v17084_v57 = vld [vmem:[#allocation2 + $0x6c] sm:$0xfe]  }
 0x14b   : > { %v2083_v20 = vor.u32 %v2082_v12, %v2078_v60  ;;  %v3216_v23 = vrot.slane %v17077_v14, 1  ;;  %v2092_v24 = vshll.u32 %v17078_v3, 16  ;;  %v2097_v34 = vshll.u32 %v17079_v27, 16  ;;  %v17085_v58 = vld [vmem:[#allocation2 + $0x74] ss:$0 sps:$4 sm:$0x11]  }
 0x14c   : > { %v2872_v26 = vor.u32 %v2871_v16, %v2867_v4  ;;  %v1063_v36 = vmul.f32 %v18550_v41, %v16680_v29  ;;  %v1133_v7 = vmax.f32 %v1101_v32, 0.0  ;;  %v1061_v43 = vmul.f32 %v18550_v41, %v1001_v33  ;;  %v17082_v0 = vld [vmem:[#allocation2 + $0x60] sm:$0xff]   ;;  %v1651_v1 = vld [vmem:[#allocation2 + $0xa8] sm:$0xf]  ;;  %v17086_v9 = vld [vmem:[#allocation2 + $0x6c] sm:$0xff]  }
 0x14d   : > { %v2088_v30 = vsel %vm1992_vm6, %v2083_v20, %v2087_v13  ;;  %v2094_v31 = vrot.slane %v2092_v24, 1  ;;  %v3217_v40 = vsel %vm2393_vm11, %v3215_v18, %v3216_v23  ;;  %v2099_v45 = vrot.slane %v2097_v34, 1  ;;  %v1644_v10 = vld [vmem:[#allocation2 + $0x9c] sm:$0xf]  ;;  %v17089_v18 = vld [vmem:[#allocation2 + $0x6c] sm:$0xff]  }
 0x14e   : > { %4883 = vmatprep.mubr.bf16.mxu0 %v2088_v30  ;;  %v2877_v6 = vsel %vm1992_vm6, %v2872_v26, %v2876_v17  ;;  %v1131_v46 = vmax.f32 %v1099_v35, 0.0  ;;  %v1102_v47 = vadd.f32 %v18559_v52, %v1063_v36  ;;  %v2879_v42 = vshrl.u32 %v17080_v38, 16  ;;  %v17087_v25 = vld [vmem:[#allocation2 + $0x74] ss:$0 sps:$4 sm:$0x11]   ;;  %v17094_v35 = vld [vmem:[#allocation2 + $0x78] sm:$0xff]  }
 0x14f   : > { %5198 = vmatmul.mubr.bf16.gmra.mrb[24].mxu1 %v2877_v6  ;;  %4884 = vmatmul.mubr.bf16.gmra.mrb[60].mxu0 %v17075_v22  ;;  %v2095_v44 = vor.u32 %v2094_v31, %v2090_v19  ;;  %v16076_v49 = vpack.c.bf16 %v1133_v7, %v1133_v7  ;;  %v1100_v50 = vadd.f32 %v18559_v52, %v1061_v43  ;;  %v2881_v51 = vshll.u32 %v17080_v38, 16  ;;  %v1655_v22 = vld [vmem:[#allocation2 + $0xb0] sm:$0x1]  ;;  %v1648_v29 = vld [vmem:[#allocation2 + $0xa4] sm:$0x1] }
 0x150   : > { %5205 = vmatprep.mubr.bf16.mxu1 %v3217_v40  ;;  %v2886_v53 = vshll.u32 %v17081_v39, 16  ;;  %v16074_v55 = vpack.c.bf16 %v1131_v46, %v1131_v46  ;;  %v1134_v56 = vmax.f32 %v1102_v47, 0.0  ;;  %v3218_v13 = vrot.slane %v17084_v57, 1  ;;  %v17090_v34 = vld [vmem:[#allocation2 + $0x74] ss:$0 sps:$4 sm:$0x11]  }
 0x151   : > { %v2100_v54 = vsel %vm1992_vm6, %v2095_v44, %v2099_v45  ;;  %v1459_v59 = vshrl.u32 %v16076_v49, 16  ;;  %v1462_v60 = vshll.u32 %v16076_v49, 16  ;;  %v1132_v61 = vmax.f32 %v1100_v50, 0.0  ;;  %v16683_v46 = vpop.f32.mrb[28].mxu0 }
 0x152   : > { %4891 = vmatprep.mubr.bf16.mxu0 %v2100_v54  ;;  %v2883_v62 = vrot.slane %v2881_v51, 1  ;;  %v1442_v3 = vshrl.u32 %v16074_v55, 16  ;;  %v1445_v4 = vshll.u32 %v16074_v55, 16  ;;  %v16077_v5 = vpack.c.bf16 %v1134_v56, %v1134_v56  ;;  %v17092_v51 = vld [vmem:[#allocation2 + $0x78] sm:$0xfe]  }
 0x153   : > { %v2888_v8 = vrot.slane %v2886_v53, 1  ;;  %v1461_v63 = vrot.slane %v1459_v59, 7  ;;  %v16075_v11 = vpack.c.bf16 %v1132_v61, %v1132_v61  ;;  %v3219_v17 = vrot.slane %v17085_v58, 1  ;;  %v553_v53 = vld [vmem:[#allocation2 + $0xbc] sm:$0x1]  ;;  %v1014_v59 = vpop.f32.mrb[29].mxu0 }
 0x154   : > { %v2884_v12 = vor.u32 %v2883_v62, %v2879_v42  ;;  %v1444_v14 = vrot.slane %v1442_v3, 7  ;;  %v1467_v15 = vshrl.u32 %v16077_v5, 16  ;;  %v1470_v16 = vshll.u32 %v16077_v5, 16  ;;  %v17093_v58 = vld [vmem:[#allocation2 + $0x80] ss:$0 sps:$4 sm:$0x11]  }
 0x155   : > { %v1464_v19 = vor.u32 %v1462_v60, %v1461_v63  ;;  %v1465_v20 = vrot.slane %v1461_v63, 4  ;;  %v1450_v23 = vshrl.u32 %v16075_v11, 16  ;;  %v1453_v24 = vshll.u32 %v16075_v11, 16  ;;  %v17091_v62 = vld [vmem:[#allocation2 + $0x6c] sm:$0xff]  }
 0x156   : > { %v1447_v26 = vor.u32 %v1445_v4, %v1444_v14  ;;  %v1448_v27 = vrot.slane %v1444_v14, 4  ;;  %v1469_v28 = vrot.slane %v1467_v15, 7  ;;  %v2889_v30 = vsel %vm1992_vm6, %v2884_v12, %v2888_v8  ;;  %v17111_v2 = vld [vmem:[#allocation2 + $0x98] ss:$0 sps:$4 sm:$0x11]  }
 0x157   : > { %4892 = vmatmul.mubr.bf16.gmra.mrb[64].mxu0 %v17082_v0  ;;  %v1652_v31 = vsel %vm18412_vm9, %v1464_v19, %v1651_v1  ;;  %v1452_v32 = vrot.slane %v1450_v23, 7  ;;  %5206 = vmatmul.mubr.bf16.gmra.mrb[28].mxu1 %v2889_v30  ;;  %v3220_v33 = vsel %vm2393_vm11, %v3218_v13, %v3219_v17  ;;  %v2102_v6 = vshrl.u32 %v17086_v9, 16  ;;  %v16684_v13 = vpop.f32.mrb[30].mxu0  ;;  %v17096_v19 = vld [vmem:[#allocation2 + $0x78] sm:$0xff]  }
 0x158   : > { %1653 = vst [vmem:[#allocation2 + $0xa8] sm:$0xf] %v1652_v31  ;;  %v1645_v36 = vsel %vm18412_vm9, %v1447_v26, %v1644_v10  ;;  %v1472_v38 = vor.u32 %v1470_v16, %v1469_v28  ;;  %v1474_v39 = vrot.slane %v1469_v28, 4  ;;  %5213 = vmatprep.mubr.bf16.mxu1 %v3220_v33  ;;  %v2104_v40 = vshll.u32 %v17086_v9, 16 }
 0x159   : > { %1646 = vst [vmem:[#allocation2 + $0x9c] sm:$0xf] %v1645_v36  ;;  %v1455_v44 = vor.u32 %v1453_v24, %v1452_v32  ;;  %v1457_v7 = vrot.slane %v1452_v32, 4  ;;  %v2109_v43 = vshll.u32 %v17087_v25, 16  ;;  %v2891_v45 = vshrl.u32 %v17089_v18, 16 }
 0x15a   : > { %v1473_v47 = vsel %vm18423_vm10, %v1465_v20, %v1472_v38  ;;  %v1656_v42 = vsel %vm18198_vm3, %v1474_v39, %v1655_v22  ;;  %v2106_v49 = vrot.slane %v2104_v40, 1  ;;  %v2893_v50 = vshll.u32 %v17089_v18, 16  ;;  %v17095_v10 = vld [vmem:[#allocation2 + $0x80] ss:$0 sps:$4 sm:$0x11]   ;;  %v1017_v18 = vpop.f32.mrb[31].mxu0 }
 0x15b   : > { %1654 = vst [vmem:[#allocation2 + $0xac] sm:$0xf] %v1473_v47  ;;  %1657 = vst [vmem:[#allocation2 + $0xb0] sm:$0x1] %v1656_v42  ;;  %v1456_v54 = vsel %vm18423_vm10, %v1448_v27, %v1455_v44  ;;  %v1649_v55 = vsel %vm18198_vm3, %v1457_v7, %v1648_v29  ;;  %v2111_v56 = vrot.slane %v2109_v43, 1  ;;  %v2898_v57 = vshll.u32 %v17090_v34, 16 }
 0x15c   : > { %1647 = vst [vmem:[#allocation2 + $0xa0] sm:$0xf] %v1456_v54  ;;  %1650 = vst [vmem:[#allocation2 + $0xa4] sm:$0x1] %v1649_v55  ;;  %v2107_v60 = vor.u32 %v2106_v49, %v2102_v6  ;;  %v2895_v61 = vrot.slane %v2893_v50, 1  ;;  %v3221_v0 = vrot.slane %v17092_v51, 1  ;;  %v1066_v1 = vmul.f32 %v18550_v41, %v16683_v46 }
 0x15d   : > { %v2900_v3 = vrot.slane %v2898_v57, 1  ;;  %v3222_v4 = vrot.slane %v17093_v58, 1  ;;  %v2114_v5 = vshrl.u32 %v17094_v35, 16  ;;  %v2116_v8 = vshll.u32 %v17094_v35, 16  ;;  %v17098_v44 = vld [vmem:[#allocation2 + $0x78] sm:$0xff]  }
 0x15e   : > { %v2112_v9 = vsel %vm1992_vm6, %v2107_v60, %v2111_v56  ;;  %v2896_v63 = vor.u32 %v2895_v61, %v2891_v45  ;;  %v1105_v11 = vadd.f32 %v18559_v52, %v1066_v1  ;;  %v1064_v12 = vmul.f32 %v18550_v41, %v1014_v59  ;;  %v17097_v28 = vld [vmem:[#allocation2 + $0x80] ss:$0 sps:$4 sm:$0x11]   ;;  %v17100_v7 = vld [vmem:[#allocation2 + $0x84] sm:$0xfe]  }
 0x15f   : > { %4899 = vmatprep.mubr.bf16.mxu0 %v2112_v9  ;;  %v3223_v14 = vsel %vm2393_vm11, %v3221_v0, %v3222_v4  ;;  %v2118_v15 = vrot.slane %v2116_v8, 1  ;;  %v1067_v16 = vmul.f32 %v18550_v41, %v16684_v13  ;;  %v554_v17 = vsel %vm18236_vm5, 0, %v553_v53  ;;  %v17101_v42 = vld [vmem:[#allocation2 + $0x8c] ss:$0 sps:$4 sm:$0x11]   ;;  %v17102_v0 = vld [vmem:[#allocation2 + $0x84] sm:$0xff]  }
 0x160   : > { %v2901_v20 = vsel %vm1992_vm6, %v2896_v63, %v2900_v3  ;;  %4900 = vmatmul.mubr.bf16.gmra.mrb[68].mxu0 %v17091_v62  ;;  %v2121_v22 = vshll.u32 %v17095_v10, 16  ;;  %v1137_v23 = vmax.f32 %v1105_v11, 0.0  ;;  %v1103_v24 = vadd.f32 %v18559_v52, %v1064_v12  ;;  %555 = vst [vmem:[#allocation2 + $0xbc] sm:$0x1] %v554_v17  ;;  %v1669_v61 = vld [vmem:[#allocation2 + $0xc8] sm:$0x1] }
 0x161   : > { %5214 = vmatmul.mubr.bf16.gmra.mrb[32].mxu1 %v2901_v20  ;;  %v2119_v25 = vor.u32 %v2118_v15, %v2114_v5  ;;  %v1106_v26 = vadd.f32 %v18559_v52, %v1067_v16  ;;  %v1065_v27 = vmul.f32 %v18550_v41, %v1017_v18  ;;  %v2903_v29 = vshrl.u32 %v17096_v19, 16  ;;  %v1665_v41 = vld [vmem:[#allocation2 + $0xc0] sm:$0xf]  ;;  %v17103_v8 = vld [vmem:[#allocation2 + $0x8c] ss:$0 sps:$4 sm:$0x11]  }
 0x162   : > { %5221 = vmatprep.mubr.bf16.mxu1 %v3223_v14  ;;  %v2123_v30 = vrot.slane %v2121_v22, 1  ;;  %v16080_v31 = vpack.c.bf16 %v1137_v23, %v1137_v23  ;;  %v1135_v32 = vmax.f32 %v1103_v24, 0.0  ;;  %v2905_v33 = vshll.u32 %v17096_v19, 16  ;;  %v17105_v13 = vld [vmem:[#allocation2 + $0x84] sm:$0xff]  }
 0x163   : > { %v1138_v6 = vmax.f32 %v1106_v26, 0.0  ;;  %v1104_v34 = vadd.f32 %v18559_v52, %v1065_v27  ;;  %v2910_v35 = vshll.u32 %v17097_v28, 16  ;;  %v3224_v53 = vrot.slane %v17100_v7, 1  ;;  %v1658_v52 = vld [vmem:[#allocation2 + $0xb4] sm:$0xf] }
 0x164   : > { %v2124_v36 = vsel %vm1992_vm6, %v2119_v25, %v2123_v30  ;;  %v1493_v38 = vshrl.u32 %v16080_v31, 16  ;;  %v1496_v39 = vshll.u32 %v16080_v31, 16  ;;  %v16078_v40 = vpack.c.bf16 %v1135_v32, %v1135_v32  ;;  %v17106_v18 = vld [vmem:[#allocation2 + $0x8c] ss:$0 sps:$4 sm:$0x11]   ;;  %v17110_v28 = vld [vmem:[#allocation2 + $0x90] sm:$0xff]  }
 0x165   : > { %4907 = vmatprep.mubr.bf16.mxu0 %v2124_v36  ;;  %v16081_v43 = vpack.c.bf16 %v1138_v6, %v1138_v6  ;;  %v1136_v45 = vmax.f32 %v1104_v34, 0.0  ;;  %v2907_v46 = vrot.slane %v2905_v33, 1  ;;  %v2912_v47 = vrot.slane %v2910_v35, 1  ;;  %v17108_v34 = vld [vmem:[#allocation2 + $0x90] sm:$0xfe]  }
 0x166   : > { %v1495_v49 = vrot.slane %v1493_v38, 7  ;;  %v1476_v50 = vshrl.u32 %v16078_v40, 16  ;;  %v1479_v51 = vshll.u32 %v16078_v40, 16  ;;  %v3225_v62 = vrot.slane %v17101_v42, 1  ;;  %v17112_v42 = vld [vmem:[#allocation2 + $0x90] sm:$0xff]  }
 0x167   : > { %v1501_v54 = vshrl.u32 %v16081_v43, 16  ;;  %v1504_v55 = vshll.u32 %v16081_v43, 16  ;;  %v16079_v56 = vpack.c.bf16 %v1136_v45, %v1136_v45  ;;  %v2908_v57 = vor.u32 %v2907_v46, %v2903_v29  ;;  %v1662_v11 = vld [vmem:[#allocation2 + $0xbc] sm:$0x1] }
 0x168   : > { %v1498_v58 = vor.u32 %v1496_v39, %v1495_v49  ;;  %v1499_v59 = vrot.slane %v1495_v49, 4  ;;  %v1478_v60 = vrot.slane %v1476_v50, 7  ;;  %4908 = vmatmul.mubr.bf16.gmra.mrb[72].mxu0 %v17098_v44  ;;  %v3226_v12 = vsel %vm2393_vm11, %v3224_v53, %v3225_v62  ;;  %v17107_v39 = vld [vmem:[#allocation2 + $0x84] sm:$0xff]   ;;  %v17109_v40 = vld [vmem:[#allocation2 + $0x98] ss:$0 sps:$4 sm:$0x11]  }
 0x169   : > { %v1503_v1 = vrot.slane %v1501_v54, 7  ;;  %v1484_v3 = vshrl.u32 %v16079_v56, 16  ;;  %v1487_v4 = vshll.u32 %v16079_v56, 16  ;;  %v2913_v5 = vsel %vm1992_vm6, %v2908_v57, %v2912_v47  ;;  %v17115_v56 = vld [vmem:[%s22402_s4 + $0xf0] sm:$0xff]  }
 0x16a   : > { %v1666_v9 = vsel %vm18412_vm9, %v1498_v58, %v1665_v41  ;;  %v1481_v63 = vor.u32 %v1479_v51, %v1478_v60  ;;  %v1482_v10 = vrot.slane %v1478_v60, 4  ;;  %5222 = vmatmul.mubr.bf16.gmra.mrb[36].mxu1 %v2913_v5  ;;  %v2126_v17 = vshrl.u32 %v17102_v0, 16  ;;  %v17113_v51 = vld [vmem:[#allocation2 + $0x98] ss:$0 sps:$4 sm:$0x11]   ;;  %16303 = vmatprep.subr.bf16.mxu0 %v17115_v56 }
 0x16b   : > { %1667 = vst [vmem:[#allocation2 + $0xc0] sm:$0xf] %v1666_v9  ;;  %v1506_v14 = vor.u32 %v1504_v55, %v1503_v1  ;;  %v1508_v15 = vrot.slane %v1503_v1, 4  ;;  %v1486_v16 = vrot.slane %v1484_v3, 7  ;;  %5229 = vmatprep.mubr.bf16.mxu1 %v3226_v12  ;;  %v2128_v20 = vshll.u32 %v17102_v0, 16  ;;  %v17114_v1 = vld [vmem:[#allocation2 + $0x90] sm:$0xff]  }
 0x16c   : > { %v1659_v19 = vsel %vm18412_vm9, %v1481_v63, %v1658_v52  ;;  %v2133_v22 = vshll.u32 %v17103_v8, 16  ;;  %v2915_v23 = vshrl.u32 %v17105_v13, 16  ;;  %v2917_v31 = vshll.u32 %v17105_v13, 16  ;;  %v17116_v60 = vld [vmem:[#allocation2 + $0x9c] sm:$0xfe]  }
 0x16d   : > { %1660 = vst [vmem:[#allocation2 + $0xb4] sm:$0xf] %v1659_v19  ;;  %v1507_v24 = vsel %vm18423_vm10, %v1499_v59, %v1506_v14  ;;  %v1670_v25 = vsel %vm18198_vm3, %v1508_v15, %v1669_v61  ;;  %v1489_v26 = vor.u32 %v1487_v4, %v1486_v16  ;;  %v1491_v27 = vrot.slane %v1486_v16, 4  ;;  %v17118_v61 = vld [vmem:[#allocation2 + $0x9c] sm:$0xff]   ;;  %v16195_v19 = vpop.f32.mrb[32].mxu0 }
 0x16e   : > { %1668 = vst [vmem:[#allocation2 + $0xc4] sm:$0xf] %v1507_v24  ;;  %1671 = vst [vmem:[#allocation2 + $0xc8] sm:$0x1] %v1670_v25  ;;  %v2130_v29 = vrot.slane %v2128_v20, 1  ;;  %v2135_v30 = vrot.slane %v2133_v22, 1 }
 0x16f   : > { %v2922_v32 = vshll.u32 %v17106_v18, 16  ;;  %v1490_v33 = vsel %vm18423_vm10, %v1482_v10, %v1489_v26  ;;  %v1663_v6 = vsel %vm18198_vm3, %v1491_v27, %v1662_v11  ;;  %v2919_v36 = vrot.slane %v2917_v31, 1  ;;  %v17117_v3 = vld [vmem:[#allocation2 + $0xa4] ss:$0 sps:$4 sm:$0x11]   ;;  %v17120_v11 = vld [vmem:[%s22402_s4 + $0xb0] sm:$0xff]  }
 0x170   : > { %1661 = vst [vmem:[#allocation2 + $0xb8] sm:$0xf] %v1490_v33  ;;  %1664 = vst [vmem:[#allocation2 + $0xbc] sm:$0x1] %v1663_v6  ;;  %v2131_v35 = vor.u32 %v2130_v29, %v2126_v17  ;;  %v2138_v44 = vshrl.u32 %v17110_v28, 16  ;;  %v3227_v7 = vrot.slane %v17108_v34, 1  ;;  %16304 = vmatpush3.bf16.msra.mxu0 %v17120_v11 }
 0x171   : > { %v2924_v38 = vrot.slane %v2922_v32, 1  ;;  %v2140_v41 = vshll.u32 %v17110_v28, 16  ;;  %v2920_v45 = vor.u32 %v2919_v36, %v2915_v23  ;;  %v3228_v46 = vrot.slane %v17109_v40, 1  ;;  %v17119_v63 = vld [vmem:[#allocation2 + $0xa4] ss:$0 sps:$4 sm:$0x11]  }
 0x172   : > { %v2136_v43 = vsel %vm1992_vm6, %v2131_v35, %v2135_v30  ;;  %v2145_v50 = vshll.u32 %v17111_v2, 16  ;;  %v2927_v54 = vshrl.u32 %v17112_v42, 16  ;;  %v2929_v55 = vshll.u32 %v17112_v42, 16  ;;  %v17121_v15 = vld [vmem:[#allocation2 + $0x9c] sm:$0xff]   ;;  %v17127_v26 = vld [vmem:[#allocation2 + $0xa8] sm:$0xff]  }
 0x173   : > { %4915 = vmatprep.mubr.bf16.mxu0 %v2136_v43  ;;  %v2142_v47 = vrot.slane %v2140_v41, 1  ;;  %v2925_v49 = vsel %vm1992_vm6, %v2920_v45, %v2924_v38  ;;  %v3229_v53 = vsel %vm2393_vm11, %v3227_v7, %v3228_v46  ;;  %v2934_v58 = vshll.u32 %v17113_v51, 16  ;;  %v17122_v16 = vld [vmem:[#allocation2 + $0xa4] ss:$0 sps:$4 sm:$0x11]   ;;  %v17124_v29 = vld [vmem:[#allocation2 + $0x9c] sm:$0xff]  }
 0x174   : > { %4916 = vmatmul.mubr.bf16.gmra.mrb[76].mxu0 %v17107_v39  ;;  %5230 = vmatmul.mubr.bf16.gmra.mrb[40].mxu1 %v2925_v49  ;;  %v2147_v57 = vrot.slane %v2145_v50, 1  ;;  %v2931_v59 = vrot.slane %v2929_v55, 1  ;;  %v3230_v5 = vrot.slane %v17116_v60, 1  ;;  %v2150_v8 = vshrl.u32 %v17118_v61, 16  ;;  %v17123_v18 = vld [vmem:[%s22402_s4 + $0x200] sm:$0xff]   ;;  %v17129_v38 = vld [vmem:[%s22402_s4 + $0x208] sm:$0xff]  }
 0x175   : > { %v2143_v52 = vor.u32 %v2142_v47, %v2138_v44  ;;  %5237 = vmatprep.mubr.bf16.mxu1 %v3229_v53  ;;  %v2936_v0 = vrot.slane %v2934_v58, 1  ;;  %v3231_v9 = vrot.slane %v17117_v3, 1  ;;  %v2152_v10 = vshll.u32 %v17118_v61, 16  ;;  %16685 = vmatprep.subr.bf16.mxu1 %v17123_v18  ;;  %v17125_v30 = vld [vmem:[#allocation2 + $0xa8] sm:$0xfe]   ;;  %v17132_v41 = vld [vmem:[%s22402_s4 + $0x210] sm:$0xff]  }
 0x176   : > { %v2932_v4 = vor.u32 %v2931_v59, %v2927_v54  ;;  %v2157_v14 = vshll.u32 %v17119_v63, 16  ;;  %v2939_v23 = vshrl.u32 %v17121_v15, 16  ;;  %v2941_v24 = vshll.u32 %v17121_v15, 16  ;;  %v17126_v31 = vld [vmem:[#allocation2 + $0xb0] ss:$0 sps:$4 sm:$0x11]   ;;  %16686 = vmatpush3.bf16.msra.mxu1 %v17123_v18 }
 0x177   : > { %v2148_v62 = vsel %vm1992_vm6, %v2143_v52, %v2147_v57  ;;  %v2154_v13 = vrot.slane %v2152_v10, 1  ;;  %v3232_v17 = vsel %vm2393_vm11, %v3230_v5, %v3231_v9  ;;  %v2946_v25 = vshll.u32 %v17122_v16, 16  ;;  %v17128_v39 = vld [vmem:[#allocation2 + $0xb0] ss:$0 sps:$4 sm:$0x11]   ;;  %v17130_v40 = vld [vmem:[#allocation2 + $0xa8] sm:$0xff]   ;;  %16687 = vmatprep.subr.bf16.mxu1 %v17129_v38 }
 0x178   : > { %4923 = vmatprep.mubr.bf16.mxu0 %v2148_v62  ;;  %v2937_v12 = vsel %vm1992_vm6, %v2932_v4, %v2936_v0  ;;  %v2159_v22 = vrot.slane %v2157_v14, 1  ;;  %v2943_v28 = vrot.slane %v2941_v24, 1  ;;  %v2162_v33 = vshrl.u32 %v17127_v26, 16  ;;  %v17131_v46 = vld [vmem:[#allocation2 + $0xb0] ss:$0 sps:$4 sm:$0x11]  }
 0x179   : > { %v2155_v20 = vor.u32 %v2154_v13, %v2150_v8  ;;  %v2948_v32 = vrot.slane %v2946_v25, 1  ;;  %v3233_v34 = vrot.slane %v17125_v30, 1  ;;  %v3234_v35 = vrot.slane %v17126_v31, 1  ;;  %v16196_v49 = vpop.f32.mrb[33].mxu0  ;;  %v17134_v52 = vld [vmem:[%s22402_s4 + $0xf8] sm:$0xff]   ;;  %v17133_v55 = vld [vmem:[#allocation2 + $0xa8] sm:$0xff]  }
 0x17a   : > { %v2944_v6 = vor.u32 %v2943_v28, %v2939_v23  ;;  %v2164_v36 = vshll.u32 %v17127_v26, 16  ;;  %v2169_v45 = vshll.u32 %v17128_v39, 16  ;;  %v2951_v2 = vshrl.u32 %v17130_v40, 16  ;;  %16688 = vmatpush3.bf16.msra.mxu1 %v17129_v38  ;;  %v17135_v56 = vld [vmem:[#allocation2 + $0xb4] sm:$0xfe]   ;;  %16305 = vmatprep.subr.bf16.mxu0 %v17134_v52  ;;  %v16198_v13 = vpop.f32.mrb[34].mxu0 }
 0x17b   : > { %v2160_v27 = vsel %vm1992_vm6, %v2155_v20, %v2159_v22  ;;  %v3235_v43 = vsel %vm2393_vm11, %v3233_v34, %v3234_v35  ;;  %v2953_v47 = vshll.u32 %v17130_v40, 16  ;;  %v2958_v53 = vshll.u32 %v17131_v46, 16  ;;  %16689 = vmatprep.subr.bf16.mxu1 %v17132_v41  ;;  %v17136_v60 = vld [vmem:[#allocation2 + $0xbc] ss:$0 sps:$4 sm:$0x11]   ;;  %v17137_v62 = vld [vmem:[#allocation2 + $0xb4] sm:$0xff]  }
 0x17c   : > { %4924 = vmatmul.mubr.bf16.gmra.mrb[80].mxu0 %v17114_v1  ;;  %5238 = vmatmul.mubr.bf16.gmra.mrb[44].mxu1 %v2937_v12  ;;  %v2949_v44 = vsel %vm1992_vm6, %v2944_v6, %v2948_v32  ;;  %v2166_v7 = vrot.slane %v2164_v36, 1  ;;  %v2171_v50 = vrot.slane %v2169_v45, 1  ;;  %v18664_v54 = vadd.f32 %v16196_v49, %v16195_v19  ;;  %v17138_v1 = vld [vmem:[#allocation2 + $0xbc] ss:$0 sps:$4 sm:$0x11]   ;;  %v17141_v11 = vld [vmem:[#allocation2 + $0xb4] sm:$0xff]  }
 0x17d   : > { %5245 = vmatprep.mubr.bf16.mxu1 %v3232_v17  ;;  %4931 = vmatprep.mubr.bf16.mxu0 %v2160_v27  ;;  %v2955_v51 = vrot.slane %v2953_v47, 1  ;;  %v2960_v59 = vrot.slane %v2958_v53, 1  ;;  %v3236_v61 = vrot.slane %v17135_v56, 1  ;;  %v3237_v0 = vrot.slane %v17136_v60, 1  ;;  %v17139_v3 = vld [vmem:[%s22402_s4 + $0xb8] sm:$0xff]   ;;  %v17143_v12 = vld [vmem:[%s22402_s4 + $0x220] sm:$0xff]  }
 0x17e   : > { %v2167_v42 = vor.u32 %v2166_v7, %v2162_v33  ;;  %16690 = vmatpush3.bf16.msra.mxu1 %v17132_v41  ;;  %v17140_v4 = vld [vmem:[%s22402_s4 + $0x218] sm:$0xff]   ;;  %v2174_v8 = vshrl.u32 %v17137_v62, 16  ;;  %v2176_v9 = vshll.u32 %v17137_v62, 16  ;;  %v2181_v10 = vshll.u32 %v17138_v1, 16  ;;  %16306 = vmatpush3.bf16.msra.mxu0 %v17139_v3  ;;  %v17145_v24 = vld [vmem:[#allocation2 + $0xc0] sm:$0xfe]  }
 0x17f   : > { %v2956_v58 = vor.u32 %v2955_v51, %v2951_v2  ;;  %v3238_v63 = vsel %vm2393_vm11, %v3236_v61, %v3237_v0  ;;  %16691 = vmatprep.subr.bf16.mxu1 %v17140_v4  ;;  %v17142_v15 = vld [vmem:[#allocation2 + $0xbc] ss:$0 sps:$4 sm:$0x11]   ;;  %v2963_v17 = vshrl.u32 %v17141_v11, 16  ;;  %v2965_v18 = vshll.u32 %v17141_v11, 16  ;;  %v17144_v22 = vld [vmem:[#allocation2 + $0xb4] sm:$0xff]  }
 0x180   : > { %v2172_v57 = vsel %vm1992_vm6, %v2167_v42, %v2171_v50  ;;  %v2178_v14 = vrot.slane %v2176_v9, 1  ;;  %v2183_v16 = vrot.slane %v2181_v10, 1  ;;  %v2970_v20 = vshll.u32 %v17142_v15, 16  ;;  %v17147_v25 = vld [vmem:[#allocation2 + $0xc] sm:$0xff]   ;;  %v17149_v32 = vld [vmem:[#allocation2 + $0xc0] sm:$0xff]   ;;  %v17159_v52 = vld [vmem:[%s22402_s4 + $0x238] sm:$0xff]  }
 0x181   : > { %v2961_v5 = vsel %vm1992_vm6, %v2956_v58, %v2960_v59  ;;  %v2967_v23 = vrot.slane %v2965_v18, 1  ;;  %v17148_v26 = vld [vmem:[%s22402_s4 + $0x228] sm:$0xff]   ;;  %v3239_v31 = vrot.slane %v17145_v24, 1  ;;  %v17151_v6 = vld [vmem:[%s22402_s4 + $0x230] sm:$0xff]   ;;  %v2975_v36 = vshrl.u32 %v17149_v32, 16  ;;  %v17154_v39 = vld [vmem:[%s22402_s4 + $0x1c0] sm:$0xff]  }
 0x182   : > { %16692 = vmatpush3.bf16.msra.mxu1 %v17140_v4  ;;  %v2179_v19 = vor.u32 %v2178_v14, %v2174_v8  ;;  %v2972_v28 = vrot.slane %v2970_v20, 1  ;;  %v17150_v35 = vld [vmem:[#allocation2 + $0xc8] ss:$0 sps:$4 sm:$0x11]   ;;  %v2977_v38 = vshll.u32 %v17149_v32, 16  ;;  %16515 = vmatprep.subr.bf16.mxu0 %v17154_v39  ;;  %v17158_v53 = vld [vmem:[%s22402_s4 + $0x180] sm:$0xff]  }
 0x183   : > { %16693 = vmatprep.subr.bf16.mxu1 %v17143_v12  ;;  %v2968_v30 = vor.u32 %v2967_v23, %v2963_v17  ;;  %v17153_v7 = vld [vmem:[#allocation2 + $0x8] ss:$0 sps:$4 sm:$0x11]   ;;  %v17155_v2 = vld [vmem:[#allocation2 + $0x18] sm:$0xfe]   ;;  %v17187_v24 = vld [vmem:[%s22402_s4 + $0x1d0] sm:$0xff]  }
 0x184   : > { %4932 = vmatmul.mubr.bf16.gmra.mrb[84].mxu0 %v17124_v29  ;;  %5246 = vmatmul.mubr.bf16.gmra.mrb[48].mxu1 %v2949_v44  ;;  %v2184_v27 = vsel %vm1992_vm6, %v2179_v19, %v2183_v16  ;;  %v17146_v29 = vld [vmem:[#allocation2 + $0xc8] ss:$0 sps:$4 sm:$0x11]   ;;  %v17152_v44 = vld [vmem:[#allocation2] sm:$0xfe]   ;;  %v2979_v41 = vrot.slane %v2977_v38, 1 }
 0x185   : > { %5253 = vmatprep.mubr.bf16.mxu1 %v3235_v43  ;;  %4939 = vmatprep.mubr.bf16.mxu0 %v2172_v57  ;;  %v3240_v33 = vrot.slane %v17146_v29, 1  ;;  %v2973_v34 = vsel %vm1992_vm6, %v2968_v30, %v2972_v28  ;;  %v2982_v43 = vshll.u32 %v17150_v35, 16  ;;  %v2394_v45 = vrot.slane %v17152_v44, 1  ;;  %v17156_v49 = vld [vmem:[#allocation2 + $0x20] ss:$0 sps:$4 sm:$0x11]  }
 0x186   : > { %16694 = vmatpush3.bf16.msra.mxu1 %v17143_v12  ;;  %v2395_v46 = vrot.slane %v17153_v7, 1  ;;  %v2980_v47 = vor.u32 %v2979_v41, %v2975_v36  ;;  %v3995_v51 = vrot.slane %v17155_v2, 1  ;;  %v3996_v56 = vrot.slane %v17156_v49, 1  ;;  %v17157_v57 = vld [vmem:[#allocation2 + $0x18] sm:$0xff]   ;;  %v17160_v59 = vld [vmem:[#allocation2 + $0x24] sm:$0xfe]  }
 0x187   : > { %16695 = vmatprep.subr.bf16.mxu1 %v17148_v26  ;;  %v3241_v40 = vsel %vm2393_vm11, %v3239_v31, %v3240_v33  ;;  %v2984_v42 = vrot.slane %v2982_v43, 1  ;;  %v17161_v61 = vld [vmem:[#allocation2 + $0x2c] ss:$0 sps:$4 sm:$0x11]   ;;  %v3998_v1 = vrot.slane %v17160_v59, 1  ;;  %v17166_v12 = vld [vmem:[#allocation2 + $0x24] sm:$0xff]  }
 0x188   : > { %v2396_v50 = vsel %vm2393_vm11, %v2394_v45, %v2395_v46  ;;  %v17171_v62 = vld [vmem:[%s22402_s4 + $0x1c8] sm:$0xff]   ;;  %v3997_v0 = vsel %vm2393_vm11, %v3995_v51, %v3996_v56  ;;  %v3999_v4 = vrot.slane %v17161_v61, 1  ;;  %v17164_v10 = vld [vmem:[#allocation2 + $0x30] sm:$0xfe]   ;;  %v17167_v16 = vld [vmem:[#allocation2 + $0x3c] sm:$0xfe]  }
 0x189   : > { %v2985_v60 = vsel %vm1992_vm6, %v2980_v47, %v2984_v42  ;;  %v17162_v3 = vld [vmem:[#allocation2 + $0xc] sm:$0xfe]   ;;  %v17165_v11 = vld [vmem:[#allocation2 + $0x38] ss:$0 sps:$4 sm:$0x11]   ;;  %v4001_v14 = vrot.slane %v17164_v10, 1 }
 0x18a   : > { %16696 = vmatpush3.bf16.msra.mxu1 %v17148_v26  ;;  %v2397_v8 = vrot.slane %v17162_v3, 1  ;;  %v17175_v9 = vld [vmem:[%s22402_s4 + $0x188] sm:$0xff]   ;;  %v4002_v15 = vrot.slane %v17165_v11, 1  ;;  %v17168_v17 = vld [vmem:[#allocation2 + $0x44] ss:$0 sps:$4 sm:$0x11]   ;;  %v4000_v18 = vsel %vm2393_vm11, %v3998_v1, %v3999_v4 }
 0x18b   : > { %16697 = vmatprep.subr.bf16.mxu1 %v17151_v6  ;;  %v4004_v20 = vrot.slane %v17167_v16, 1  ;;  %v17170_v23 = vld [vmem:[#allocation2 + $0x20] ss:$0 sps:$4 sm:$0x11]   ;;  %v17191_v31 = vld [vmem:[%s22402_s4 + $0x190] sm:$0xff]   ;;  %v17203_v36 = vld [vmem:[%s22402_s4 + $0x1d8] sm:$0xff]  }
 0x18c   : > { %4940 = vmatmul.mubr.bf16.gmra.mrb[88].mxu0 %v17133_v55  ;;  %5254 = vmatmul.mubr.bf16.gmra.mrb[52].mxu1 %v2961_v5  ;;  %v16199_v55 = vpop.f32.mrb[35].mxu0  ;;  %v17163_v5 = vld [vmem:[#allocation2 + $0x14] ss:$0 sps:$4 sm:$0x11]   ;;  %v4003_v19 = vsel %vm2393_vm11, %v4001_v14, %v4002_v15  ;;  %v2401_v28 = vrot.slane %v17170_v23, 1  ;;  %v17207_v46 = vld [vmem:[%s22402_s4 + $0x198] sm:$0xff]  }
 0x18d   : > { %5261 = vmatprep.mubr.bf16.mxu1 %v3238_v63  ;;  %4947 = vmatprep.mubr.bf16.mxu0 %v2184_v27  ;;  %v18697_v58 = vadd.f32 %v16199_v55, %v16198_v13  ;;  %v2398_v63 = vrot.slane %v17163_v5, 1  ;;  %v17172_v27 = vld [vmem:[#allocation2 + $0x48] sm:$0xfe]   ;;  %v17173_v29 = vld [vmem:[#allocation2 + $0x50] ss:$0 sps:$4 sm:$0x11]  }
 0x18e   : > { %16698 = vmatpush3.bf16.msra.mxu1 %v17151_v6  ;;  %v4007_v30 = vrot.slane %v17172_v27, 1  ;;  %v4008_v33 = vrot.slane %v17173_v29, 1  ;;  %v17174_v6 = vld [vmem:[#allocation2 + $0x30] sm:$0xff]   ;;  %v17177_v35 = vld [vmem:[#allocation2 + $0x5c] ss:$0 sps:$4 sm:$0x11]  }
 0x18f   : > { %16699 = vmatprep.subr.bf16.mxu1 %v17159_v52  ;;  %v2399_v13 = vsel %vm2393_vm11, %v2397_v8, %v2398_v63  ;;  %v17178_v44 = vld [vmem:[#allocation2 + $0x24] sm:$0xfe]   ;;  %v4011_v7 = vrot.slane %v17177_v35, 1  ;;  %v17179_v41 = vld [vmem:[#allocation2 + $0x2c] ss:$0 sps:$4 sm:$0x11]  }
 0x190   : > { %v4009_v39 = vsel %vm2393_vm11, %v4007_v30, %v4008_v33  ;;  %v2403_v43 = vrot.slane %v17178_v44, 1  ;;  %v17180_v45 = vld [vmem:[#allocation2 + $0x60] sm:$0xfe]   ;;  %v2404_v2 = vrot.slane %v17179_v41, 1  ;;  %v17188_v3 = vld [vmem:[#allocation2 + $0x78] sm:$0xfe]  }
 0x191   : > { %v17181_v47 = vld [vmem:[#allocation2 + $0x68] ss:$0 sps:$4 sm:$0x11]   ;;  %v4013_v42 = vrot.slane %v17180_v45, 1  ;;  %v17182_v49 = vld [vmem:[#allocation2 + $0x3c] sm:$0xff]   ;;  %v4019_v8 = vrot.slane %v17188_v3, 1 }
 0x192   : > { %16700 = vmatpush3.bf16.msra.mxu1 %v17159_v52  ;;  %v4014_v51 = vrot.slane %v17181_v47, 1  ;;  %v17183_v52 = vld [vmem:[#allocation2 + $0x6c] sm:$0xfe]   ;;  %v17184_v55 = vld [vmem:[#allocation2 + $0x74] ss:$0 sps:$4 sm:$0x11]  }
 0x193   : > { %v4016_v59 = vrot.slane %v17183_v52, 1  ;;  %v17186_v61 = vld [vmem:[#allocation2 + $0x38] ss:$0 sps:$4 sm:$0x11]   ;;  %v17190_v11 = vld [vmem:[#allocation2 + $0x48] sm:$0xff]   ;;  %vm8026_vm10 = vcmask 1046532  }
 0x194   : > { %4948 = vmatmul.mubr.bf16.gmra.mrb[92].mxu0 %v17144_v22  ;;  %5262 = vmatmul.mubr.bf16.gmra.mrb[56].mxu1 %v2973_v34  ;;  %v17169_v22 = vld [vmem:[#allocation2 + $0x18] sm:$0xfe]   ;;  %v2407_v4 = vrot.slane %v17186_v61, 1  ;;  %v17189_v5 = vld [vmem:[#allocation2 + $0x80] ss:$0 sps:$4 sm:$0x11]  }
 0x195   : > { %4988 = vmatprep.mubr.bf16.mxu0 %v17147_v25  ;;  %5269 = vmatprep.mubr.bf16.mxu1 %v3241_v40  ;;  %v4005_v25 = vrot.slane %v17168_v17, 1  ;;  %v2400_v26 = vrot.slane %v17169_v22, 1  ;;  %v17176_v34 = vld [vmem:[#allocation2 + $0x54] sm:$0xfe]   ;;  %v4020_v10 = vrot.slane %v17189_v5, 1  ;;  %v17227_v14 = vld [vmem:[%s22402_s4 + $0x1a8] sm:$0xff]  }
 0x196   : > { %v4010_v40 = vrot.slane %v17176_v34, 1  ;;  %v17196_v23 = vld [vmem:[#allocation2 + $0x90] sm:$0xfe]   ;;  %v17200_v33 = vld [vmem:[#allocation2 + $0xa4] ss:$0 sps:$4 sm:$0x11]  }
 0x197   : > { %v2402_v32 = vsel %vm2393_vm11, %v2400_v26, %v2401_v28  ;;  %v4006_v38 = vsel %vm2393_vm11, %v4004_v20, %v4005_v25  ;;  %v4021_v16 = vsel %vm2393_vm11, %v4019_v8, %v4020_v10  ;;  %v17195_v20 = vld [vmem:[#allocation2 + $0x44] ss:$0 sps:$4 sm:$0x11]   ;;  %v17197_v26 = vld [vmem:[#allocation2 + $0x98] ss:$0 sps:$4 sm:$0x11]  }
 0x198   : > { %v4012_v56 = vsel %vm2393_vm11, %v4010_v40, %v4011_v7  ;;  %v2410_v25 = vrot.slane %v17195_v20, 1  ;;  %v4025_v27 = vrot.slane %v17196_v23, 1  ;;  %v17198_v28 = vld [vmem:[#allocation2 + $0x54] sm:$0xff]   ;;  %v4026_v30 = vrot.slane %v17197_v26, 1  ;;  %v17204_v7 = vld [vmem:[#allocation2 + $0xa8] sm:$0xfe]  }
 0x199   : > { %v4029_v40 = vrot.slane %v17200_v33, 1  ;;  %v4031_v45 = vrot.slane %v17204_v7, 1  ;;  %v17210_v52 = vld [vmem:[#allocation2 + $0x54] sm:$0xfe]   ;;  %v17215_v5 = vld [vmem:[#allocation2 + $0x60] sm:$0xfe]  }
 0x19a   : > { %v4027_v34 = vsel %vm2393_vm11, %v4025_v27, %v4026_v30  ;;  %v17216_v8 = vld [vmem:[#allocation2 + $0x68] ss:$0 sps:$4 sm:$0x11]   ;;  %v2418_v10 = vrot.slane %v17215_v5, 1  ;;  %v17223_v20 = vld [vmem:[#allocation2 + $0x78] sm:$0xfe]  }
 0x19c   : > { %4989 = vmatmul.mubr.bf16.vlgmr.msra.gmra.mrb[96].mxu0 %v2396_v50  ;;  %5270 = vmatmul.mubr.bf16.gmra.mrb[60].mxu1 %v2985_v60  ;;  %v2405_v50 = vsel %vm2393_vm11, %v2403_v43, %v2404_v2  ;;  %v17185_v60 = vld [vmem:[#allocation2 + $0x30] sm:$0xfe]   ;;  %v17205_v43 = vld [vmem:[#allocation2 + $0xb0] ss:$0 sps:$4 sm:$0x11]  }
 0x19d   : > { %4996 = vmatprep.mubr.bf16.mxu0 %v17157_v57  ;;  %16516 = vmatpush3.bf16.msra.mxu0 %v17158_v53  ;;  %v17217_v53 = vld [vmem:[%s22402_s4 + $0x1e0] sm:$0xff]   ;;  %v4015_v57 = vsel %vm2393_vm11, %v4013_v42, %v4014_v51  ;;  %v2406_v1 = vrot.slane %v17185_v60, 1  ;;  %v4032_v47 = vrot.slane %v17205_v43, 1 }
 0x19e   : > { %16701 = vmatprep.mubr.bf16.mxu1 %v3997_v0  ;;  %16517 = vmatprep.subr.bf16.mxu0 %v17171_v62  ;;  %v17219_v62 = vld [vmem:[%s22402_s4 + $0x1a0] sm:$0xff]   ;;  %v4017_v0 = vrot.slane %v17184_v55, 1 }
 0x19f   : > { %v2408_v63 = vsel %vm2393_vm11, %v2406_v1, %v2407_v4  ;;  %v17206_v42 = vld [vmem:[#allocation2 + $0x60] sm:$0xff]   ;;  %v17214_v4 = vld [vmem:[#allocation2 + $0x6c] sm:$0xff]  }
 0x1a0   : > { %v4018_v15 = vsel %vm2393_vm11, %v4016_v59, %v4017_v0  ;;  %v2415_v59 = vrot.slane %v17210_v52, 1  ;;  %v17212_v60 = vld [vmem:[#allocation2 + $0xc0] sm:$0xfe]  }
 0x1a1   : > { %16518 = vmatpush3.bf16.msra.mxu0 %v17175_v9  ;;  %v17225_v9 = vld [vmem:[%s22402_s4 + $0x1e8] sm:$0xff]   ;;  %v4037_v0 = vrot.slane %v17212_v60, 1  ;;  %v17230_v52 = vld [vmem:[#allocation2 + $0x9c] sm:$0xff]  }
 0x1a2   : > { %16519 = vmatprep.subr.bf16.mxu0 %v17187_v24  ;;  %v17233_v24 = vld [vmem:[%s22402_s4 + $0x1f0] sm:$0xff]  }
 0x1a4   : > { %4997 = vmatmul.mubr.bf16.gmra.mrb[100].mxu0 %v2399_v13  ;;  %16702 = vmatmul.mubr.bf16.vlgmr.msra.gmra.mrb[64].mxu1 %v4000_v18  ;;  %v17193_v13 = vld [vmem:[#allocation2 + $0x8c] ss:$0 sps:$4 sm:$0x11]   ;;  %v17194_v18 = vld [vmem:[#allocation2 + $0x3c] sm:$0xfe]  }
 0x1a5   : > { %5004 = vmatprep.mubr.bf16.mxu0 %v17166_v12  ;;  %16705 = vmatprep.mubr.bf16.mxu1 %v4003_v19  ;;  %v17192_v12 = vld [vmem:[#allocation2 + $0x84] sm:$0xfe]   ;;  %v4023_v19 = vrot.slane %v17193_v13, 1  ;;  %v2409_v22 = vrot.slane %v17194_v18, 1  ;;  %v17220_v13 = vld [vmem:[#allocation2 + $0x6c] sm:$0xfe]  }
 0x1a6   : > { %16520 = vmatpush3.bf16.msra.mxu0 %v17191_v31  ;;  %v4022_v17 = vrot.slane %v17192_v12, 1  ;;  %v17235_v31 = vld [vmem:[%s22402_s4 + $0x1b0] sm:$0xff]   ;;  %v17218_v12 = vld [vmem:[#allocation2 + $0x78] sm:$0xff]  }
 0x1a7   : > { %16521 = vmatprep.subr.bf16.mxu0 %v17203_v36  ;;  %v2411_v29 = vsel %vm2393_vm11, %v2409_v22, %v2410_v25  ;;  %v17201_v36 = vld [vmem:[#allocation2 + $0x48] sm:$0xfe]   ;;  %v17224_v22 = vld [vmem:[#allocation2 + $0x80] ss:$0 sps:$4 sm:$0x11]  }
 0x1a8   : > { %v2412_v44 = vrot.slane %v17201_v36, 1  ;;  %v17228_v36 = vld [vmem:[#allocation2 + $0x84] sm:$0xfe]  }
 0x1aa   : > { %16522 = vmatpush3.bf16.msra.mxu0 %v17207_v46  ;;  %v17243_v46 = vld [vmem:[%s22402_s4 + $0x1b8] sm:$0xff]  }
 0x1ab   : > { %16523 = vmatprep.subr.bf16.mxu0 %v17217_v53  ;;  %v4033_v53 = vsel %vm2393_vm11, %v4031_v45, %v4032_v47  ;;  %v2427_v45 = vrot.slane %v17228_v36, 1 }
 0x1ac   : > { %5005 = vmatmul.mubr.bf16.gmra.mrb[104].mxu0 %v2402_v32  ;;  %16706 = vmatmul.mubr.bf16.gmra.mrb[68].mxu1 %v4006_v38  ;;  %v17199_v32 = vld [vmem:[#allocation2 + $0x9c] sm:$0xfe]   ;;  %v17202_v38 = vld [vmem:[#allocation2 + $0x50] ss:$0 sps:$4 sm:$0x11]  }
 0x1ad   : > { %5012 = vmatprep.mubr.bf16.mxu0 %v17174_v6  ;;  %16709 = vmatprep.mubr.bf16.mxu1 %v4009_v39  ;;  %v4024_v6 = vsel %vm2393_vm11, %v4022_v17, %v4023_v19  ;;  %v4028_v35 = vrot.slane %v17199_v32, 1  ;;  %v17241_v39 = vld [vmem:[%s22402_s4 + $0x1f8] sm:$0xff]   ;;  %v2413_v41 = vrot.slane %v17202_v38, 1  ;;  %v17222_v19 = vld [vmem:[#allocation2 + $0x84] sm:$0xff]   ;;  %v2425_v32 = vrot.slane %v17224_v22, 1 }
 0x1ae   : > { %16524 = vmatpush3.bf16.msra.mxu0 %v17219_v62  ;;  %v17213_v62 = vld [vmem:[#allocation2 + $0xc8] ss:$0 sps:$4 sm:$0x11]  }
 0x1af   : > { %16525 = vmatprep.subr.bf16.mxu0 %v17225_v9  ;;  %v2414_v2 = vsel %vm2393_vm11, %v2412_v44, %v2413_v41  ;;  %v4030_v51 = vsel %vm2393_vm11, %v4028_v35, %v4029_v40  ;;  %v4038_v3 = vrot.slane %v17213_v62, 1  ;;  %v17229_v40 = vld [vmem:[#allocation2 + $0x8c] ss:$0 sps:$4 sm:$0x11]  }
 0x1b2   : > { %16526 = vmatpush3.bf16.msra.mxu0 %v17227_v14  ;;  %v17221_v14 = vld [vmem:[#allocation2 + $0x74] ss:$0 sps:$4 sm:$0x11]  }
 0x1b3   : > { %16527 = vmatprep.subr.bf16.mxu0 %v17233_v24  ;;  %v2422_v17 = vrot.slane %v17221_v14, 1 }
 0x1b4   : > { %5013 = vmatmul.mubr.bf16.gmra.mrb[108].mxu0 %v2405_v50  ;;  %16710 = vmatmul.mubr.bf16.gmra.mrb[72].mxu1 %v4012_v56  ;;  %v17209_v50 = vld [vmem:[#allocation2 + $0xbc] ss:$0 sps:$4 sm:$0x11]  }
 0x1b5   : > { %5020 = vmatprep.mubr.bf16.mxu0 %v17182_v49  ;;  %16713 = vmatprep.mubr.bf16.mxu1 %v4015_v57  ;;  %v17208_v49 = vld [vmem:[#allocation2 + $0xb4] sm:$0xfe]   ;;  %v17211_v56 = vld [vmem:[#allocation2 + $0x5c] ss:$0 sps:$4 sm:$0x11]   ;;  %v4035_v57 = vrot.slane %v17209_v50, 1 }
 0x1b6   : > { %16528 = vmatpush3.bf16.msra.mxu0 %v17235_v31  ;;  %v4034_v55 = vrot.slane %v17208_v49, 1  ;;  %v2416_v61 = vrot.slane %v17211_v56, 1  ;;  %v2424_v31 = vrot.slane %v17223_v20, 1  ;;  %v17232_v50 = vld [vmem:[#allocation2 + $0x98] ss:$0 sps:$4 sm:$0x11]  }
 0x1b7   : > { %16529 = vmatprep.subr.bf16.mxu0 %v17241_v39  ;;  %v17226_v39 = vld [vmem:[#allocation2 + $0x90] sm:$0xff]   ;;  %v2431_v62 = vrot.slane %v17232_v50, 1 }
 0x1b8   : > { %v2417_v1 = vsel %vm2393_vm11, %v2415_v59, %v2416_v61  ;;  %v4036_v9 = vsel %vm2393_vm11, %v4034_v55, %v4035_v57  ;;  %v2426_v38 = vsel %vm2393_vm11, %v2424_v31, %v2425_v32  ;;  %v17231_v57 = vld [vmem:[#allocation2 + $0x90] sm:$0xfe]   ;;  %v17240_v32 = vld [vmem:[#allocation2 + $0xb0] ss:$0 sps:$4 sm:$0x11]  }
 0x1b9   : > { %v2430_v61 = vrot.slane %v17231_v57, 1 }
 0x1ba   : > { %16530 = vmatpush3.bf16.msra.mxu0 %v17243_v46  ;;  %v2428_v46 = vrot.slane %v17229_v40, 1 }
 0x1bc   : > { %5021 = vmatmul.mubr.bf16.gmra.mrb[112].mxu0 %v2408_v63  ;;  %16714 = vmatmul.mubr.bf16.gmra.mrb[76].mxu1 %v4018_v15  ;;  %v4039_v63 = vsel %vm2393_vm11, %v4037_v0, %v4038_v3  ;;  %v2429_v56 = vsel %vm2393_vm11, %v2427_v45, %v2428_v46  ;;  %v17245_v45 = vld [vmem:[#allocation2 + $0xbc] ss:$0 sps:$4 sm:$0x11]   ;;  %v17244_v46 = vld [vmem:[#allocation2 + $0xb4] sm:$0xfe]  }
 0x1bd   : > { %5028 = vmatprep.mubr.bf16.mxu0 %v17190_v11  ;;  %16717 = vmatprep.mubr.bf16.mxu1 %v4021_v16  ;;  %v2419_v11 = vrot.slane %v17216_v8, 1  ;;  %v2421_v16 = vrot.slane %v17220_v13, 1  ;;  %v17237_v8 = vld [vmem:[#allocation2 + $0xa4] ss:$0 sps:$4 sm:$0x11]   ;;  %v2439_v57 = vrot.slane %v17244_v46, 1 }
 0x1bf   : > { %v2420_v15 = vsel %vm2393_vm11, %v2418_v10, %v2419_v11  ;;  %v2423_v18 = vsel %vm2393_vm11, %v2421_v16, %v2422_v17  ;;  %v17234_v10 = vld [vmem:[#allocation2 + $0xa8] sm:$0xff]  }
 0x1c4   : > { %5029 = vmatmul.mubr.bf16.gmra.mrb[116].mxu0 %v2411_v29  ;;  %16718 = vmatmul.mubr.bf16.gmra.mrb[80].mxu1 %v4024_v6 }
 0x1c5   : > { %5036 = vmatprep.mubr.bf16.mxu0 %v17198_v28  ;;  %16721 = vmatprep.mubr.bf16.mxu1 %v4027_v34 }
 0x1cc   : > { %5037 = vmatmul.mubr.bf16.gmra.mrb[120].mxu0 %v2414_v2  ;;  %16722 = vmatmul.mubr.bf16.gmra.mrb[84].mxu1 %v4030_v51 }
 0x1cd   : > { %5044 = vmatprep.mubr.bf16.mxu0 %v17206_v42  ;;  %16725 = vmatprep.mubr.bf16.mxu1 %v4033_v53 }
 0x1d4   : > { %5045 = vmatmul.mubr.bf16.gmra.mrb[124].mxu0 %v2417_v1  ;;  %16726 = vmatmul.mubr.bf16.gmra.mrb[88].mxu1 %v4036_v9  ;;  %v17236_v1 = vld [vmem:[#allocation2 + $0x9c] sm:$0xfe]  }
 0x1d5   : > { %5052 = vmatprep.mubr.bf16.mxu0 %v17214_v4  ;;  %16729 = vmatprep.mubr.bf16.mxu1 %v4039_v63  ;;  %v2432_v63 = vsel %vm2393_vm11, %v2430_v61, %v2431_v62 }
 0x1dc   : > { %5053 = vmatmul.mubr.bf16.gmra.mrb[128].mxu0 %v2420_v15  ;;  %v2433_v15 = vrot.slane %v17236_v1, 1 }
 0x1dd   : > { %5060 = vmatprep.mubr.bf16.mxu0 %v17218_v12 }
 0x1e4   : > { %5061 = vmatmul.mubr.bf16.gmra.mrb[132].mxu0 %v2423_v18  ;;  %v2434_v18 = vrot.slane %v17237_v8, 1 }
 0x1e5   : > { %5068 = vmatprep.mubr.bf16.mxu0 %v17222_v19 }
 0x1e6   : > { %v16419_v23 = vpop.f32.mrb[0].mxu1  ;;  %v16201_v24 = vpop.f32.mrb[36].mxu0  ;;  %v2435_v31 = vsel %vm2393_vm11, %v2433_v15, %v2434_v18 }
 0x1e7   : > { %v16420_v25 = vpop.f32.mrb[1].mxu1  ;;  %v16202_v26 = vpop.f32.mrb[37].mxu0 }
 0x1e8   : > { %v18766_v27 = vadd.f32 %v16420_v25, %v16419_v23  ;;  %v18768_v28 = vadd.f32 %v16202_v26, %v16201_v24  ;;  %v16422_v29 = vpop.f32.mrb[2].mxu1  ;;  %v16204_v30 = vpop.f32.mrb[38].mxu0  ;;  %v17238_v24 = vld [vmem:[#allocation2 + $0xb4] sm:$0xff]   ;;  %v17239_v26 = vld [vmem:[#allocation2 + $0xa8] sm:$0xfe]  }
 0x1e9   : > { %v16423_v33 = vpop.f32.mrb[3].mxu1  ;;  %v16205_v6 = vpop.f32.mrb[39].mxu0 }
 0x1ea   : > { %v18770_v34 = vadd.f32 %v16423_v33, %v16422_v29  ;;  %v18772_v35 = vadd.f32 %v16205_v6, %v16204_v30  ;;  %v17246_v30 = vld [vmem:[#allocation2 + $0x18] sm:$0xff]  }
 0x1eb   : > { %v3598_v40 = vshll.u32 %v17246_v30, 16  ;;  %v3596_v50 = vshrl.u32 %v17246_v30, 16 }
 0x1ec   : > { %5069 = vmatmul.mubr.bf16.gmra.mrb[136].mxu0 %v2426_v38 }
 0x1ed   : > { %5076 = vmatprep.mubr.bf16.mxu0 %v17226_v39 }
 0x1ee   : > { %v16207_v44 = vpop.f32.mrb[40].mxu0 }
 0x1ef   : > { %v16208_v7 = vpop.f32.mrb[41].mxu0 }
 0x1f0   : > { %v18775_v41 = vadd.f32 %v16208_v7, %v16207_v44  ;;  %v16210_v43 = vpop.f32.mrb[42].mxu0  ;;  %v16425_v2 = vpop.f32.mrb[4].mxu1  ;;  %v2436_v44 = vrot.slane %v17239_v26, 1  ;;  %v2437_v7 = vrot.slane %v17240_v32, 1 }
 0x1f1   : > { %v16211_v47 = vpop.f32.mrb[43].mxu0  ;;  %v16426_v42 = vpop.f32.mrb[5].mxu1 }
 0x1f2   : > { %v18777_v49 = vadd.f32 %v16211_v47, %v16210_v43  ;;  %v18779_v51 = vadd.f32 %v16426_v42, %v16425_v2  ;;  %v16428_v53 = vpop.f32.mrb[6].mxu1  ;;  %v17247_v2 = vld [vmem:[#allocation2 + $0x20] ss:$0 sps:$4 sm:$0x11]   ;;  %v2438_v47 = vsel %vm2393_vm11, %v2436_v44, %v2437_v7 }
 0x1f3   : > { %v16429_v55 = vpop.f32.mrb[7].mxu1  ;;  %v17242_v42 = vld [vmem:[#allocation2 + $0xc0] sm:$0xff]   ;;  %v3603_v61 = vshll.u32 %v17247_v2, 16 }
 0x1f4   : > { %v18782_v59 = vadd.f32 %v16429_v55, %v16428_v53  ;;  %5077 = vmatmul.mubr.bf16.gmra.mrb[140].mxu0 %v2429_v56  ;;  %v3600_v53 = vrot.slane %v3598_v40, 1  ;;  %v17249_v56 = vld [vmem:[#allocation2 + $0x24] sm:$0xff]  }
 0x1f5   : > { %5084 = vmatprep.mubr.bf16.mxu0 %v17230_v52 }
 0x1f8   : > { %v16213_v60 = vpop.f32.mrb[44].mxu0 }
 0x1f9   : > { %v16214_v0 = vpop.f32.mrb[45].mxu0 }
 0x1fa   : > { %v18784_v3 = vadd.f32 %v16214_v0, %v16213_v60  ;;  %v16216_v4 = vpop.f32.mrb[46].mxu0  ;;  %v2440_v60 = vrot.slane %v17245_v45, 1 }
 0x1fb   : > { %v16217_v5 = vpop.f32.mrb[47].mxu0 }
 0x1fc   : > { %v18786_v9 = vadd.f32 %v16217_v5, %v16216_v4  ;;  %v16431_v11 = vpop.f32.mrb[8].mxu1  ;;  %5085 = vmatmul.mubr.bf16.gmra.mrb[144].mxu0 %v2432_v63  ;;  %v17250_v63 = vld [vmem:[#allocation2 + $0x2c] ss:$0 sps:$4 sm:$0x11]   ;;  %v2441_v18 = vsel %vm2393_vm11, %v2439_v57, %v2440_v60 }
 0x1fd   : > { %v16432_v12 = vpop.f32.mrb[9].mxu1  ;;  %5092 = vmatprep.mubr.bf16.mxu0 %v17234_v10  ;;  %v3601_v10 = vor.u32 %v3600_v53, %v3596_v50  ;;  %v3615_v30 = vshll.u32 %v17250_v63, 16  ;;  %v17255_v53 = vld [vmem:[#allocation2 + $0x3c] sm:$0xff]  }
 0x1fe   : > { %v18789_v13 = vadd.f32 %v16432_v12, %v16431_v11  ;;  %v16434_v14 = vpop.f32.mrb[10].mxu1 }
 0x1ff   : > { %v16435_v16 = vpop.f32.mrb[11].mxu1  ;;  %v3617_v45 = vrot.slane %v3615_v30, 1 }
 0x200   : > { %v16219_v17 = vpop.f32.mrb[48].mxu0  ;;  %v18791_v19 = vadd.f32 %v16435_v16, %v16434_v14  ;;  %v3610_v14 = vshll.u32 %v17249_v56, 16  ;;  %v3605_v16 = vrot.slane %v3603_v61, 1  ;;  %v17256_v61 = vld [vmem:[#allocation2 + $0x44] ss:$0 sps:$4 sm:$0x11]  }
 0x201   : > { %v16220_v20 = vpop.f32.mrb[49].mxu0 }
 0x202   : > { %v18793_v22 = vadd.f32 %v16220_v20, %v16219_v17  ;;  %v16222_v23 = vpop.f32.mrb[50].mxu0  ;;  %v3612_v26 = vrot.slane %v3610_v14, 1 }
 0x203   : > { %v16223_v25 = vpop.f32.mrb[51].mxu0 }
 0x204   : > { %v18795_v29 = vadd.f32 %v16223_v25, %v16222_v23  ;;  %v16437_v33 = vpop.f32.mrb[12].mxu1  ;;  %5093 = vmatmul.mubr.bf16.gmra.mrb[148].mxu0 %v2435_v31  ;;  %v17252_v23 = vld [vmem:[#allocation2 + $0x30] sm:$0xff]   ;;  %v3608_v25 = vshrl.u32 %v17249_v56, 16 }
 0x205   : > { %v16438_v6 = vpop.f32.mrb[13].mxu1  ;;  %5100 = vmatprep.mubr.bf16.mxu0 %v17238_v24  ;;  %v3606_v24 = vsel %vm1992_vm6, %v3601_v10, %v3605_v16  ;;  %v3622_v44 = vshll.u32 %v17252_v23, 16  ;;  %v3620_v56 = vshrl.u32 %v17252_v23, 16  ;;  %v17258_v16 = vld [vmem:[#allocation2 + $0x48] sm:$0xff]  }
 0x206   : > { %v18798_v36 = vadd.f32 %v16438_v6, %v16437_v33  ;;  %v16440_v38 = vpop.f32.mrb[14].mxu1  ;;  %v3613_v7 = vor.u32 %v3612_v26, %v3608_v25 }
 0x207   : > { %v16441_v39 = vpop.f32.mrb[15].mxu1  ;;  %v3624_v57 = vrot.slane %v3622_v44, 1  ;;  %v17259_v44 = vld [vmem:[#allocation2 + $0x50] ss:$0 sps:$4 sm:$0x11]  }
 0x208   : > { %v18800_v43 = vadd.f32 %v16441_v39, %v16440_v38  ;;  %v17253_v38 = vld [vmem:[#allocation2 + $0x38] ss:$0 sps:$4 sm:$0x11]  }
 0x209   : > { %v3627_v60 = vshll.u32 %v17253_v38, 16 }
 0x20c   : > { %v16225_v52 = vpop.f32.mrb[52].mxu0  ;;  %5101 = vmatmul.mubr.bf16.gmra.mrb[152].mxu0 %v2438_v47 }
 0x20d   : > { %v16226_v55 = vpop.f32.mrb[53].mxu0  ;;  %5108 = vmatprep.mubr.bf16.mxu0 %v17242_v42  ;;  %v17248_v42 = vld [vmem:[#allocation2 + $0x18] sm:$0xff]  }
 0x20e   : > { %v18803_v62 = vadd.f32 %v16226_v55, %v16225_v52  ;;  %v16228_v0 = vpop.f32.mrb[54].mxu0  ;;  %v3618_v55 = vsel %vm1992_vm6, %v3613_v7, %v3617_v45  ;;  %v503_v45 = vld [vmem:[#allocation2 + $0xcc] sm:$0x1] }
 0x20f   : > { %v16443_v1 = vpop.f32.mrb[16].mxu1  ;;  %v16229_v4 = vpop.f32.mrb[55].mxu0 }
 0x210   : > { %v16444_v5 = vpop.f32.mrb[17].mxu1  ;;  %v18805_v8 = vadd.f32 %v16229_v4, %v16228_v0  ;;  %v3634_v0 = vshll.u32 %v17255_v53, 16  ;;  %v3625_v4 = vor.u32 %v3624_v57, %v3620_v56 }
 0x211   : > { %v18807_v11 = vadd.f32 %v16444_v5, %v16443_v1  ;;  %v16446_v12 = vpop.f32.mrb[18].mxu1  ;;  %v17251_v1 = vld [vmem:[#allocation2 + $0x24] sm:$0xff]   ;;  %v3629_v5 = vrot.slane %v3627_v60, 1  ;;  %v3644_v60 = vshrl.u32 %v17258_v16, 16 }
 0x212   : > { %v16447_v15 = vpop.f32.mrb[19].mxu1  ;;  %v3636_v25 = vrot.slane %v3634_v0, 1 }
 0x213   : > { %22427 = vst [vmem:[#allocation9_spill] sm:$0xff] %v18807_v11  ;;  %v18809_v17 = vadd.f32 %v16447_v15, %v16446_v12  ;;  %v3632_v12 = vshrl.u32 %v17255_v53, 16 }
 0x214   : > { %v16231_v20 = vpop.f32.mrb[56].mxu0  ;;  %5109 = vmatmul.mubr.bf16.gmra.mrb[156].mxu0 %v2441_v18 }
 0x215   : > { %22428 = vst [vmem:[#allocation10_spill] sm:$0xff] %v18809_v17  ;;  %v16232_v31 = vpop.f32.mrb[57].mxu0  ;;  %5310 = vmatprep.mubr.bf16.mxu0 %v3606_v24  ;;  %v3637_v53 = vor.u32 %v3636_v25, %v3632_v12 }
 0x216   : > { %v18813_v32 = vadd.f32 %v16232_v31, %v16231_v20  ;;  %v16234_v33 = vpop.f32.mrb[58].mxu0  ;;  %v3639_v31 = vshll.u32 %v17256_v61, 16 }
 0x217   : > { %v16235_v6 = vpop.f32.mrb[59].mxu0 }
 0x218   : > { %v16449_v39 = vpop.f32.mrb[20].mxu1  ;;  %v18815_v40 = vadd.f32 %v16235_v6, %v16234_v33  ;;  %v559_v33 = vld [vmem:[#allocation2 + $0xd4] sm:$0x1]  ;;  %v3630_v6 = vsel %vm1992_vm6, %v3625_v4, %v3629_v5  ;;  %v3651_v5 = vshll.u32 %v17259_v44, 16 }
 0x219   : > { %v16450_v46 = vpop.f32.mrb[21].mxu1  ;;  %v560_v7 = vsel %vm18236_vm5, 0, %v559_v33  ;;  %v17262_v33 = vld [vmem:[#allocation2 + $0x5c] ss:$0 sps:$4 sm:$0x11]  }
 0x21a   : > { %v18817_v2 = vadd.f32 %v16450_v46, %v16449_v39  ;;  %v16452_v47 = vpop.f32.mrb[22].mxu1  ;;  %v3646_v46 = vshll.u32 %v17258_v16, 16  ;;  %561 = vst [vmem:[#allocation2 + $0xd4] sm:$0x1] %v560_v7  ;;  %v3653_v7 = vrot.slane %v3651_v5, 1 }
 0x21b   : > { %v16453_v50 = vpop.f32.mrb[23].mxu1 }
 0x21c   : > { %22429 = vst [vmem:[#allocation11_spill] sm:$0xff] %v18817_v2  ;;  %v18819_v52 = vadd.f32 %v16453_v50, %v16452_v47  ;;  %5311 = vmatmul.mubr.bf16.vlgmr.msra.gmra.mrb[160].mxu0 %v17248_v42  ;;  %v17291_v47 = vld [vmem:[#allocation2 + $0xcc] sm:$0xfe]   ;;  %v504_v42 = vsel %vm18198_vm3, 0, %v503_v45  ;;  %v3648_v61 = vrot.slane %v3646_v46, 1 }
 0x21d   : > { %5318 = vmatprep.mubr.bf16.mxu0 %v3618_v55  ;;  %505 = vst [vmem:[#allocation2 + $0xcc] sm:$0x1] %v504_v42  ;;  %v17254_v50 = vld [vmem:[#allocation2 + $0x30] sm:$0xff]   ;;  %v3641_v55 = vrot.slane %v3639_v31, 1 }
 0x21e   : > { %22430 = vst [vmem:[#allocation12_spill] sm:$0xff] %v18819_v52  ;;  %v3649_v44 = vor.u32 %v3648_v61, %v3644_v60  ;;  %v17280_v52 = vld [vmem:[#allocation2 + $0xa4] ss:$0 sps:$4 sm:$0x11]  }
 0x220   : > { %v3654_v42 = vsel %vm1992_vm6, %v3649_v44, %v3653_v7 }
 0x222   : > { %v16455_v63 = vpop.f32.mrb[24].mxu1  ;;  %v16237_v10 = vpop.f32.mrb[60].mxu0 }
 0x223   : > { %v16456_v14 = vpop.f32.mrb[25].mxu1  ;;  %v16238_v15 = vpop.f32.mrb[61].mxu0 }
 0x224   : > { %v18822_v18 = vadd.f32 %v16456_v14, %v16455_v63  ;;  %v18824_v20 = vadd.f32 %v16238_v15, %v16237_v10  ;;  %v16458_v24 = vpop.f32.mrb[26].mxu1  ;;  %v16240_v23 = vpop.f32.mrb[62].mxu0  ;;  %5319 = vmatmul.mubr.bf16.gmra.mrb[164].mxu0 %v17251_v1  ;;  %v17261_v63 = vld [vmem:[#allocation2 + $0x54] sm:$0xff]   ;;  %v4040_v15 = vrot.slane %v17291_v47, 1 }
 0x225   : > { %v16459_v26 = vpop.f32.mrb[27].mxu1  ;;  %v16241_v30 = vpop.f32.mrb[63].mxu0  ;;  %5326 = vmatprep.mubr.bf16.mxu0 %v3630_v6  ;;  %v17257_v6 = vld [vmem:[#allocation2 + $0x3c] sm:$0xff]   ;;  %v3658_v45 = vshll.u32 %v17261_v63, 16 }
 0x226   : > { %22431 = vst [vmem:[#allocation13_spill] sm:$0xff] %v18822_v18  ;;  %v18827_v38 = vadd.f32 %v16459_v26, %v16458_v24  ;;  %v18829_v39 = vadd.f32 %v16241_v30, %v16240_v23  ;;  %v3642_v24 = vsel %vm1992_vm6, %v3637_v53, %v3641_v55  ;;  %v17292_v26 = vld [vmem:[#allocation2 + $0xd4] ss:$0 sps:$4 sm:$0x11]   ;;  %v3656_v55 = vshrl.u32 %v17261_v63, 16 }
 0x227   : > { %v4041_v31 = vrot.slane %v17292_v26, 1  ;;  %v17265_v63 = vld [vmem:[#allocation2 + $0x68] ss:$0 sps:$4 sm:$0x11]  }
 0x228   : > { %22432 = vst [vmem:[#allocation14_spill] sm:$0xff] %v18827_v38 }
 0x229   : > { %v4042_v46 = vsel %vm2393_vm11, %v4040_v15, %v4041_v31  ;;  %vm20266_vm11 = vmor %vm8025_vm8, %vm8026_vm10 }
 0x22a   : > { %v16243_v56 = vpop.f32.mrb[64].mxu0  ;;  %v16461_v0 = vpop.f32.mrb[28].mxu1  ;;  %16730 = vmatmul.mubr.bf16.gmra.mrb[92].mxu1 %v4042_v46 }
 0x22b   : > { %v16244_v57 = vpop.f32.mrb[65].mxu0  ;;  %v16462_v10 = vpop.f32.mrb[29].mxu1 }
 0x22c   : > { %v18835_v1 = vadd.f32 %v16244_v57, %v16243_v56  ;;  %v16246_v4 = vpop.f32.mrb[66].mxu0  ;;  %5327 = vmatmul.mubr.bf16.gmra.mrb[168].mxu0 %v17254_v50  ;;  %v18838_v23 = vadd.f32 %v16462_v10, %v16461_v0  ;;  %v16464_v12 = vpop.f32.mrb[30].mxu1  ;;  %v3660_v56 = vrot.slane %v3658_v45, 1  ;;  %v3663_v57 = vshll.u32 %v17262_v33, 16  ;;  %v17264_v0 = vld [vmem:[#allocation2 + $0x60] sm:$0xff]   ;;  %v17260_v33 = vld [vmem:[#allocation2 + $0x48] sm:$0xff]  }
 0x22d   : > { %v16247_v14 = vpop.f32.mrb[67].mxu0  ;;  %5334 = vmatprep.mubr.bf16.mxu0 %v3642_v24  ;;  %v16465_v16 = vpop.f32.mrb[31].mxu1  ;;  %v3670_v31 = vshll.u32 %v17264_v0, 16  ;;  %v3668_v45 = vshrl.u32 %v17264_v0, 16 }
 0x22e   : > { %22433 = vst [vmem:[#allocation15_spill] sm:$0xff] %v18838_v23  ;;  %v18840_v25 = vadd.f32 %v16247_v14, %v16246_v4  ;;  %v18842_v30 = vadd.f32 %v16465_v16, %v16464_v12  ;;  %v3661_v26 = vor.u32 %v3660_v56, %v3656_v55  ;;  %v3665_v16 = vrot.slane %v3663_v57, 1 }
 0x22f   : > { %v3672_v46 = vrot.slane %v3670_v31, 1 }
 0x230   : > { %22434 = vst [vmem:[#allocation16_spill] sm:$0xff] %v18842_v30  ;;  %v3666_v44 = vsel %vm1992_vm6, %v3661_v26, %v3665_v16  ;;  %v17268_v16 = vld [vmem:[#allocation2 + $0x74] ss:$0 sps:$4 sm:$0x11]  }
 0x233   : > { %v16249_v47 = vpop.f32.mrb[68].mxu0 }
 0x234   : > { %5335 = vmatmul.mubr.bf16.gmra.mrb[172].mxu0 %v17257_v6  ;;  %v16467_v50 = vpop.f32.mrb[32].mxu1  ;;  %v16250_v53 = vpop.f32.mrb[69].mxu0 }
 0x235   : > { %5342 = vmatprep.mubr.bf16.mxu0 %v3654_v42  ;;  %v16468_v4 = vpop.f32.mrb[33].mxu1  ;;  %v18846_v10 = vadd.f32 %v16250_v53, %v16249_v47  ;;  %v16252_v60 = vpop.f32.mrb[70].mxu0  ;;  %v3675_v47 = vshll.u32 %v17265_v63, 16  ;;  %v17267_v42 = vld [vmem:[#allocation2 + $0x6c] sm:$0xff]   ;;  %v17263_v63 = vld [vmem:[#allocation2 + $0x54] sm:$0xff]  }
 0x236   : > { %v18848_v61 = vadd.f32 %v16468_v4, %v16467_v50  ;;  %v16470_v5 = vpop.f32.mrb[34].mxu1  ;;  %v16253_v14 = vpop.f32.mrb[71].mxu0  ;;  %v3682_v0 = vshll.u32 %v17267_v42, 16 }
 0x237   : > { %v16471_v15 = vpop.f32.mrb[35].mxu1  ;;  %v18850_v24 = vadd.f32 %v16253_v14, %v16252_v60  ;;  %v3677_v26 = vrot.slane %v3675_v47, 1 }
 0x238   : > { %22435 = vst [vmem:[#allocation17_spill] sm:$0xff] %v18848_v61  ;;  %v18852_v12 = vadd.f32 %v16471_v15, %v16470_v5  ;;  %v3673_v15 = vor.u32 %v3672_v46, %v3668_v45 }
 0x23a   : > { %22436 = vst [vmem:[#allocation18_spill] sm:$0xff] %v18852_v12  ;;  %v17270_v12 = vld [vmem:[#allocation2 + $0x78] sm:$0xff]  }
 0x23b   : > { %v16255_v6 = vpop.f32.mrb[72].mxu0  ;;  %v3694_v46 = vshll.u32 %v17270_v12, 16 }
 0x23c   : > { %5343 = vmatmul.mubr.bf16.gmra.mrb[176].mxu0 %v17260_v33  ;;  %v16256_v7 = vpop.f32.mrb[73].mxu0  ;;  %v3678_v33 = vsel %vm1992_vm6, %v3673_v15, %v3677_v26 }
 0x23d   : > { %5350 = vmatprep.mubr.bf16.mxu0 %v3666_v44  ;;  %v16473_v50 = vpop.f32.mrb[36].mxu1  ;;  %v18855_v53 = vadd.f32 %v16256_v7, %v16255_v6  ;;  %v16258_v4 = vpop.f32.mrb[74].mxu0  ;;  %v3680_v6 = vshrl.u32 %v17267_v42, 16  ;;  %v3684_v44 = vrot.slane %v3682_v0, 1  ;;  %v3687_v7 = vshll.u32 %v17268_v16, 16  ;;  %v17266_v42 = vld [vmem:[#allocation2 + $0x60] sm:$0xff]  }
 0x23e   : > { %v16474_v60 = vpop.f32.mrb[37].mxu1  ;;  %v16259_v55 = vpop.f32.mrb[75].mxu0  ;;  %v3692_v0 = vshrl.u32 %v17270_v12, 16 }
 0x23f   : > { %v18857_v56 = vadd.f32 %v16474_v60, %v16473_v50  ;;  %v16476_v57 = vpop.f32.mrb[38].mxu1  ;;  %v18859_v5 = vadd.f32 %v16259_v55, %v16258_v4  ;;  %v17271_v60 = vld [vmem:[#allocation2 + $0x80] ss:$0 sps:$4 sm:$0x11]   ;;  %v3689_v45 = vrot.slane %v3687_v7, 1 }
 0x240   : > { %v16477_v14 = vpop.f32.mrb[39].mxu1  ;;  %v3699_v7 = vshll.u32 %v17271_v60, 16 }
 0x241   : > { %22437 = vst [vmem:[#allocation19_spill] sm:$0xff] %v18857_v56  ;;  %v18861_v31 = vadd.f32 %v16477_v14, %v16476_v57  ;;  %v3685_v56 = vor.u32 %v3684_v44, %v3680_v6  ;;  %v3696_v44 = vrot.slane %v3694_v46, 1 }
 0x242   : > { %v3701_v30 = vrot.slane %v3699_v7, 1  ;;  %v17276_v7 = vld [vmem:[#allocation2 + $0x90] sm:$0xff]  }
 0x243   : > { %22438 = vst [vmem:[#allocation20_spill] sm:$0xff] %v18861_v31  ;;  %v3690_v6 = vsel %vm1992_vm6, %v3685_v56, %v3689_v45  ;;  %v17273_v31 = vld [vmem:[#allocation2 + $0x84] sm:$0xff]   ;;  %v17269_v56 = vld [vmem:[#allocation2 + $0x6c] sm:$0xff]   ;;  %v3718_v38 = vshll.u32 %v17276_v7, 16 }
 0x244   : > { %5351 = vmatmul.mubr.bf16.gmra.mrb[180].mxu0 %v17263_v63  ;;  %v3706_v23 = vshll.u32 %v17273_v31, 16 }
 0x245   : > { %5358 = vmatprep.mubr.bf16.mxu0 %v3678_v33 }
 0x247   : > { %v16261_v50 = vpop.f32.mrb[76].mxu0  ;;  %v16479_v4 = vpop.f32.mrb[40].mxu1 }
 0x248   : > { %v16262_v55 = vpop.f32.mrb[77].mxu0  ;;  %v16480_v47 = vpop.f32.mrb[41].mxu1 }
 0x249   : > { %v18864_v61 = vadd.f32 %v16262_v55, %v16261_v50  ;;  %v16264_v57 = vpop.f32.mrb[78].mxu0  ;;  %v18866_v14 = vadd.f32 %v16480_v47, %v16479_v4  ;;  %v16482_v63 = vpop.f32.mrb[42].mxu1  ;;  %v17274_v55 = vld [vmem:[#allocation2 + $0x8c] ss:$0 sps:$4 sm:$0x11]  }
 0x24a   : > { %v16265_v15 = vpop.f32.mrb[79].mxu0  ;;  %v16483_v26 = vpop.f32.mrb[43].mxu1  ;;  %v3711_v46 = vshll.u32 %v17274_v55, 16 }
 0x24b   : > { %22439 = vst [vmem:[#allocation21_spill] sm:$0xff] %v18866_v14  ;;  %v18868_v16 = vadd.f32 %v16265_v15, %v16264_v57  ;;  %v18870_v33 = vadd.f32 %v16483_v26, %v16482_v63  ;;  %v3697_v14 = vor.u32 %v3696_v44, %v3692_v0  ;;  %v3708_v44 = vrot.slane %v3706_v23, 1 }
 0x24c   : > { %5359 = vmatmul.mubr.bf16.gmra.mrb[184].mxu0 %v17266_v42 }
 0x24d   : > { %22440 = vst [vmem:[#allocation22_spill] sm:$0xff] %v18870_v33  ;;  %5366 = vmatprep.mubr.bf16.mxu0 %v3690_v6  ;;  %v3702_v0 = vsel %vm1992_vm6, %v3697_v14, %v3701_v30  ;;  %v3704_v6 = vshrl.u32 %v17273_v31, 16  ;;  %v17277_v33 = vld [vmem:[#allocation2 + $0x98] ss:$0 sps:$4 sm:$0x11]   ;;  %v3716_v14 = vshrl.u32 %v17276_v7, 16 }
 0x24e   : > { %v17272_v30 = vld [vmem:[#allocation2 + $0x78] sm:$0xff]  }
 0x24f   : > { %v16267_v50 = vpop.f32.mrb[80].mxu0  ;;  %v16485_v4 = vpop.f32.mrb[44].mxu1 }
 0x250   : > { %v16268_v47 = vpop.f32.mrb[81].mxu0  ;;  %v16486_v48 = vpop.f32.mrb[45].mxu1 }
 0x251   : > { %v18873_v57 = vadd.f32 %v16268_v47, %v16267_v50  ;;  %v16270_v12 = vpop.f32.mrb[82].mxu0  ;;  %v18875_v63 = vadd.f32 %v16486_v48, %v16485_v4  ;;  %v16488_v15 = vpop.f32.mrb[46].mxu1  ;;  %v3713_v47 = vrot.slane %v3711_v46, 1 }
 0x252   : > { %v16271_v42 = vpop.f32.mrb[83].mxu0  ;;  %v16489_v45 = vpop.f32.mrb[47].mxu1 }
 0x253   : > { %22441 = vst [vmem:[#allocation23_spill] sm:$0xff] %v18875_v63  ;;  %v18877_v60 = vadd.f32 %v16271_v42, %v16270_v12  ;;  %v18879_v26 = vadd.f32 %v16489_v45, %v16488_v15  ;;  %v3709_v63 = vor.u32 %v3708_v44, %v3704_v6  ;;  %v17279_v45 = vld [vmem:[#allocation2 + $0x9c] sm:$0xff]   ;;  %v3720_v6 = vrot.slane %v3718_v38, 1 }
 0x254   : > { %5367 = vmatmul.mubr.bf16.gmra.mrb[188].mxu0 %v17269_v56  ;;  %v3723_v44 = vshll.u32 %v17277_v33, 16  ;;  %v3728_v33 = vshrl.u32 %v17279_v45, 16 }
 0x255   : > { %22442 = vst [vmem:[#allocation24_spill] sm:$0xff] %v18879_v26  ;;  %5374 = vmatprep.mubr.bf16.mxu0 %v3702_v0  ;;  %v3714_v0 = vsel %vm1992_vm6, %v3709_v63, %v3713_v47 }
 0x256   : > { %v3725_v26 = vrot.slane %v3723_v44, 1  ;;  %v17282_v44 = vld [vmem:[#allocation2 + $0xa8] sm:$0xff]  }
 0x257   : > { %v16273_v50 = vpop.f32.mrb[84].mxu0  ;;  %v16491_v48 = vpop.f32.mrb[48].mxu1 }
 0x258   : > { %v16274_v4 = vpop.f32.mrb[85].mxu0  ;;  %v16492_v18 = vpop.f32.mrb[49].mxu1 }
 0x259   : > { %v18882_v12 = vadd.f32 %v16274_v4, %v16273_v50  ;;  %v16276_v55 = vpop.f32.mrb[86].mxu0  ;;  %v18884_v15 = vadd.f32 %v16492_v18, %v16491_v48  ;;  %v16494_v42 = vpop.f32.mrb[50].mxu1  ;;  %v3730_v4 = vshll.u32 %v17279_v45, 16 }
 0x25a   : > { %v16277_v56 = vpop.f32.mrb[87].mxu0  ;;  %v16495_v31 = vpop.f32.mrb[51].mxu1 }
 0x25b   : > { %22443 = vst [vmem:[#allocation25_spill] sm:$0xff] %v18884_v15  ;;  %v18886_v23 = vadd.f32 %v16277_v56, %v16276_v55  ;;  %v18888_v46 = vadd.f32 %v16495_v31, %v16494_v42  ;;  %v3721_v15 = vor.u32 %v3720_v6, %v3716_v14  ;;  %v17275_v31 = vld [vmem:[#allocation2 + $0x84] sm:$0xff]   ;;  %v3735_v6 = vshll.u32 %v17280_v52, 16 }
 0x25c   : > { %5375 = vmatmul.mubr.bf16.gmra.mrb[192].mxu0 %v17272_v30  ;;  %v17296_v52 = vld [vmem:[%s22405_s7] ss:$8 sps:$4 sm:$0xff]  }
 0x25d   : > { %22444 = vst [vmem:[#allocation26_spill] sm:$0xff] %v18888_v46  ;;  %5382 = vmatprep.mubr.bf16.mxu0 %v3714_v0  ;;  %v3726_v14 = vsel %vm1992_vm6, %v3721_v15, %v3725_v26  ;;  %v3732_v0 = vrot.slane %v3730_v4, 1  ;;  %v3742_v46 = vshll.u32 %v17282_v44, 16  ;;  %v17298_v4 = vld [vmem:[%s22405_s7 + $0x4] ss:$8 sps:$4 sm:$0xff]  }
 0x25e   : > { %9645 = vmatprep.subr.bf16.mxu0 %v17298_v4 }
 0x25f   : > { %v16279_v50 = vpop.f32.mrb[88].mxu0  ;;  %v16497_v18 = vpop.f32.mrb[52].mxu1  ;;  %9646 = vmatpush1.bf16.msra.mxu0 %v17296_v52 }
 0x260   : > { %v16280_v48 = vpop.f32.mrb[89].mxu0  ;;  %v16498_v2 = vpop.f32.mrb[53].mxu1 }
 0x261   : > { %v18891_v55 = vadd.f32 %v16280_v48, %v16279_v50  ;;  %v16282_v7 = vpop.f32.mrb[90].mxu0  ;;  %v18893_v56 = vadd.f32 %v16498_v2, %v16497_v18  ;;  %v16500_v42 = vpop.f32.mrb[54].mxu1  ;;  %v3733_v2 = vor.u32 %v3732_v0, %v3728_v33  ;;  %v3737_v18 = vrot.slane %v3735_v6, 1 }
 0x262   : > { %v16283_v30 = vpop.f32.mrb[91].mxu0  ;;  %v16501_v63 = vpop.f32.mrb[55].mxu1  ;;  %v3744_v0 = vrot.slane %v3742_v46, 1 }
 0x263   : > { %22445 = vst [vmem:[#allocation27_spill] sm:$0xff] %v18893_v56  ;;  %v18895_v38 = vadd.f32 %v16283_v30, %v16282_v7  ;;  %v18897_v47 = vadd.f32 %v16501_v63, %v16500_v42  ;;  %v17283_v56 = vld [vmem:[#allocation2 + $0xb0] ss:$0 sps:$4 sm:$0x11]   ;;  %v3738_v33 = vsel %vm1992_vm6, %v3733_v2, %v3737_v18 }
 0x264   : > { %5383 = vmatmul.mubr.bf16.gmra.mrb[196].mxu0 %v17275_v31  ;;  %v17278_v30 = vld [vmem:[#allocation2 + $0x90] sm:$0xff]   ;;  %v3747_v6 = vshll.u32 %v17283_v56, 16 }
 0x265   : > { %22446 = vst [vmem:[#allocation28_spill] sm:$0xff] %v18895_v38  ;;  %22447 = vst [vmem:[#allocation29_spill] sm:$0xff] %v18897_v47  ;;  %5390 = vmatprep.mubr.bf16.mxu0 %v3726_v14  ;;  %v3740_v14 = vshrl.u32 %v17282_v44, 16  ;;  %v17281_v44 = vld [vmem:[#allocation2 + $0x9c] sm:$0xff]  }
 0x267   : > { %v16285_v50 = vpop.f32.mrb[92].mxu0  ;;  %v16503_v17 = vpop.f32.mrb[56].mxu1 }
 0x268   : > { %v16286_v48 = vpop.f32.mrb[93].mxu0  ;;  %v16504_v45 = vpop.f32.mrb[57].mxu1 }
 0x269   : > { %v18900_v11 = vadd.f32 %v16286_v48, %v16285_v50  ;;  %v16288_v7 = vpop.f32.mrb[94].mxu0  ;;  %v18902_v31 = vadd.f32 %v16504_v45, %v16503_v17  ;;  %v16506_v26 = vpop.f32.mrb[58].mxu1  ;;  %v17285_v17 = vld [vmem:[#allocation2 + $0xb4] sm:$0xff]   ;;  %v3745_v45 = vor.u32 %v3744_v0, %v3740_v14  ;;  %v17288_v0 = vld [vmem:[#allocation2 + $0xc0] sm:$0xff]  }
 0x26a   : > { %v16289_v42 = vpop.f32.mrb[95].mxu0  ;;  %v16507_v63 = vpop.f32.mrb[59].mxu1  ;;  %v3754_v47 = vshll.u32 %v17285_v17, 16 }
 0x26b   : > { %22448 = vst [vmem:[#allocation30_spill] sm:$0xff] %v18900_v11  ;;  %22449 = vst [vmem:[#allocation31_spill] sm:$0xff] %v18902_v31  ;;  %v18904_v15 = vadd.f32 %v16289_v42, %v16288_v7  ;;  %v18913_v50 = vadd.f32 %v16507_v63, %v16506_v26  ;;  %v3749_v42 = vrot.slane %v3747_v6, 1  ;;  %v17286_v31 = vld [vmem:[#allocation2 + $0xbc] ss:$0 sps:$4 sm:$0x11]  }
 0x26c   : > { %5391 = vmatmul.mubr.bf16.gmra.mrb[200].mxu0 %v17278_v30  ;;  %v3752_v63 = vshrl.u32 %v17285_v17, 16  ;;  %v3759_v14 = vshll.u32 %v17286_v31, 16 }
 0x26d   : > { %22450 = vst [vmem:[#allocation32_spill] sm:$0xff] %v18904_v15  ;;  %22451 = vst [vmem:[#allocation33_spill] sm:$0xff] %v18913_v50  ;;  %5398 = vmatprep.mubr.bf16.mxu0 %v3738_v33  ;;  %v3750_v52 = vsel %vm1992_vm6, %v3745_v45, %v3749_v42  ;;  %v3756_v33 = vrot.slane %v3754_v47, 1 }
 0x26f   : > { %v16307_v48 = vpop.f32.mrb[96].mxu0  ;;  %v16509_v15 = vpop.f32.mrb[60].mxu1 }
 0x270   : > { %v16308_v7 = vpop.f32.mrb[97].mxu0  ;;  %v16510_v38 = vpop.f32.mrb[61].mxu1 }
 0x271   : > { %v16309_v11 = vadd.f32 %v16308_v7, %v16307_v48  ;;  %v16310_v30 = vpop.f32.mrb[98].mxu0  ;;  %v18915_v46 = vadd.f32 %v16510_v38, %v16509_v15  ;;  %v16512_v18 = vpop.f32.mrb[62].mxu1  ;;  %v3757_v15 = vor.u32 %v3756_v33, %v3752_v63  ;;  %v3761_v7 = vrot.slane %v3759_v14, 1 }
 0x272   : > { %v16311_v2 = vpop.f32.mrb[99].mxu0  ;;  %v16513_v4 = vpop.f32.mrb[63].mxu1 }
 0x273   : > { %22452 = vst [vmem:[#allocation34_spill] sm:$0xff] %v18915_v46  ;;  %v4991_v56 = vadd.f32 %v16309_v11, %v18664_v54  ;;  %v16312_v26 = vadd.f32 %v16311_v2, %v16310_v30  ;;  %v18919_v6 = vadd.f32 %v16513_v4, %v16512_v18  ;;  %v17289_v30 = vld [vmem:[#allocation2 + $0xc8] ss:$0 sps:$4 sm:$0x11]   ;;  %v3766_v2 = vshll.u32 %v17288_v0, 16 }
 0x274   : > { %5399 = vmatmul.mubr.bf16.gmra.mrb[204].mxu0 %v17281_v44  ;;  %v17284_v44 = vld [vmem:[#allocation2 + $0xa8] sm:$0xff]   ;;  %v3762_v4 = vsel %vm1992_vm6, %v3757_v15, %v3761_v7  ;;  %v3771_v33 = vshll.u32 %v17289_v30, 16 }
 0x275   : > { %22453 = vst [vmem:[#allocation35_spill] sm:$0xff] %v18919_v6  ;;  %v18922_v48 = vadd.f32 %v16312_v26, %v18697_v58  ;;  %5406 = vmatprep.mubr.bf16.mxu0 %v3750_v52  ;;  %v18925_v38 = vadd.f32 %v18766_v27, %v4991_v56  ;;  %v17293_v58 = vld [vmem:[#allocation2 + $0xcc] sm:$0xff]   ;;  %v3764_v52 = vshrl.u32 %v17288_v0, 16  ;;  %v3768_v63 = vrot.slane %v3766_v2, 1  ;;  %v17287_v0 = vld [vmem:[#allocation2 + $0xb4] sm:$0xff]  }
 0x276   : > { %v3773_v46 = vrot.slane %v3771_v33, 1  ;;  %v3776_v7 = vshrl.u32 %v17293_v58, 16 }
 0x277   : > { %v16313_v54 = vpop.f32.mrb[100].mxu0  ;;  %v18927_v45 = vpop.f32.mrb[64].mxu1 }
 0x278   : > { %v16314_v11 = vpop.f32.mrb[101].mxu0  ;;  %v18929_v17 = vpop.f32.mrb[65].mxu1 }
 0x279   : > { %v16315_v47 = vadd.f32 %v16314_v11, %v16313_v54  ;;  %v16316_v31 = vpop.f32.mrb[102].mxu0  ;;  %v18934_v27 = vpop.f32.mrb[66].mxu1  ;;  %v17294_v54 = vld [vmem:[#allocation2 + $0xd4] ss:$0 sps:$4 sm:$0x11]   ;;  %v3778_v11 = vshll.u32 %v17293_v58, 16 }
 0x27a   : > { %v16317_v42 = vpop.f32.mrb[103].mxu0  ;;  %22454 = vst [vmem:[#allocation36_spill] sm:$0xff] %v18934_v27  ;;  %v18936_v26 = vpop.f32.mrb[67].mxu1  ;;  %v3783_v2 = vshll.u32 %v17294_v54, 16 }
 0x27b   : > { %v18932_v18 = vadd.f32 %v16315_v47, %v18768_v28  ;;  %v16318_v56 = vadd.f32 %v16317_v42, %v16316_v31  ;;  %v3769_v47 = vor.u32 %v3768_v63, %v3764_v52  ;;  %v3780_v30 = vrot.slane %v3778_v11, 1 }
 0x27c   : > { %5407 = vmatmul.mubr.bf16.gmra.mrb[208].mxu0 %v17284_v44  ;;  %v3785_v33 = vrot.slane %v3783_v2, 1  ;;  %v17299_v2 = vld [vmem:[%s22405_s7 + $0x10] ss:$8 sps:$4 sm:$0xff]  }
 0x27d   : > { %v18940_v14 = vadd.f32 %v16318_v56, %v18772_v35  ;;  %5414 = vmatprep.mubr.bf16.mxu0 %v3762_v4  ;;  %v3774_v52 = vsel %vm1992_vm6, %v3769_v47, %v3773_v46  ;;  %v3781_v63 = vor.u32 %v3780_v30, %v3776_v7 }
 0x27f   : > { %v16319_v6 = vpop.f32.mrb[104].mxu0  ;;  %v18942_v50 = vpop.f32.mrb[68].mxu1 }
 0x280   : > { %v16320_v28 = vpop.f32.mrb[105].mxu0  ;;  %v18944_v44 = vpop.f32.mrb[69].mxu1 }
 0x281   : > { %v16321_v31 = vadd.f32 %v16320_v28, %v16319_v6  ;;  %v16322_v42 = vpop.f32.mrb[106].mxu0  ;;  %v18949_v56 = vpop.f32.mrb[70].mxu1 }
 0x282   : > { %v16323_v15 = vpop.f32.mrb[107].mxu0  ;;  %v18951_v27 = vpop.f32.mrb[71].mxu1 }
 0x283   : > { %v18947_v35 = vadd.f32 %v16321_v31, %v18775_v41  ;;  %v16324_v4 = vadd.f32 %v16323_v15, %v16322_v42  ;;  %v17290_v15 = vld [vmem:[#allocation2 + $0xc0] sm:$0xff]  }
 0x284   : > { %5415 = vmatmul.mubr.bf16.gmra.mrb[212].mxu0 %v17287_v0  ;;  %v3786_v0 = vsel %vm1992_vm6, %v3781_v63, %v3785_v33  ;;  %v17295_v33 = vld [vmem:[#allocation2 + $0xcc] sm:$0xff]   ;;  %vm7863_vm6 = vsmask.f32 7440 }
 0x285   : > { %v18955_v6 = vadd.f32 %v16324_v4, %v18777_v49  ;;  %5422 = vmatprep.mubr.bf16.mxu0 %v3774_v52  ;;  %v17301_v4 = vld [vmem:[%s22405_s7 + $0x14] ss:$8 sps:$4 sm:$0xff]   ;;  %vm19859_vm7 = vmor %vm7862_vm4, %vm7863_vm6  ;;  %vm633_vm4 = vsmask.f32 4352  ;;  %vm666_vm6 = vsmask.f32 7954 }
 0x286   : > { %9647 = vmatprep.subr.bf16.mxu0 %v17301_v4  ;;  %vm634_vm8 = vmand %vm632_vm15, %vm633_vm4 }
 0x287   : > { %v16325_v58 = vpop.f32.mrb[108].mxu0  ;;  %v18957_v54 = vpop.f32.mrb[72].mxu1  ;;  %9648 = vmatpush1.bf16.msra.mxu0 %v17299_v2  ;;  %vm20706_vm10 = vmor %vm634_vm8, %vm18198_vm3 }
 0x288   : > { %v16326_v11 = vpop.f32.mrb[109].mxu0  ;;  %v18959_v31 = vpop.f32.mrb[73].mxu1 }
 0x289   : > { %v16327_v41 = vadd.f32 %v16326_v11, %v16325_v58  ;;  %v16328_v28 = vpop.f32.mrb[110].mxu0  ;;  %v18965_v49 = vpop.f32.mrb[74].mxu1 }
 0x28a   : > { %v16329_v42 = vpop.f32.mrb[111].mxu0  ;;  %22455 = vst [vmem:[#allocation37_spill] sm:$0xff] %v18965_v49  ;;  %v18967_v7 = vpop.f32.mrb[75].mxu1 }
 0x28b   : > { %v18963_v46 = vadd.f32 %v16327_v41, %v18784_v3  ;;  %v16330_v47 = vadd.f32 %v16329_v42, %v16328_v28  ;;  %v18980_v3 = vadd.f32 %v18770_v34, %v18922_v48  ;;  %v18986_v41 = vadd.f32 %v18779_v51, %v18932_v18 }
 0x28c   : > { %5423 = vmatmul.mubr.bf16.gmra.mrb[216].mxu0 %v17290_v15 }
 0x28d   : > { %v18970_v30 = vadd.f32 %v16330_v47, %v18786_v9  ;;  %5430 = vmatprep.mubr.bf16.mxu0 %v3786_v0 }
 0x28f   : > { %v16331_v52 = vpop.f32.mrb[112].mxu0  ;;  %v18982_v58 = vpop.f32.mrb[76].mxu1 }
 0x290   : > { %v16332_v63 = vpop.f32.mrb[113].mxu0  ;;  %22456 = vst [vmem:[#allocation38_spill] sm:$0xff] %v18982_v58  ;;  %v18988_v28 = vpop.f32.mrb[77].mxu1 }
 0x291   : > { %v16333_v9 = vadd.f32 %v16332_v63, %v16331_v52  ;;  %v16334_v11 = vpop.f32.mrb[114].mxu0  ;;  %22457 = vst [vmem:[#allocation39_spill] sm:$0xff] %v18988_v28  ;;  %v18993_v34 = vpop.f32.mrb[78].mxu1 }
 0x292   : > { %v16335_v42 = vpop.f32.mrb[115].mxu0  ;;  %22458 = vst [vmem:[#allocation40_spill] sm:$0xff] %v18993_v34  ;;  %v18995_v0 = vpop.f32.mrb[79].mxu1 }
 0x293   : > { %v18991_v15 = vadd.f32 %v16333_v9, %v18793_v22  ;;  %v16336_v48 = vadd.f32 %v16335_v42, %v16334_v11  ;;  %22459 = vst [vmem:[#allocation41_spill] sm:$0xff] %v18995_v0 }
 0x294   : > { %5431 = vmatmul.mubr.bf16.gmra.mrb[220].mxu0 %v17295_v33 }
 0x295   : > { %v18998_v47 = vadd.f32 %v16336_v48, %v18795_v29 }
 0x297   : > { %v16337_v2 = vpop.f32.mrb[116].mxu0  ;;  %v19000_v52 = vpop.f32.mrb[80].mxu1 }
 0x298   : > { %v16338_v4 = vpop.f32.mrb[117].mxu0  ;;  %22460 = vst [vmem:[#allocation42_spill] sm:$0xff] %v19000_v52  ;;  %v19002_v63 = vpop.f32.mrb[81].mxu1 }
 0x299   : > { %v16339_v51 = vadd.f32 %v16338_v4, %v16337_v2  ;;  %v16340_v18 = vpop.f32.mrb[118].mxu0  ;;  %22461 = vst [vmem:[#allocation43_spill] sm:$0xff] %v19002_v63  ;;  %v19007_v9 = vpop.f32.mrb[82].mxu1 }
 0x29a   : > { %v16341_v58 = vpop.f32.mrb[119].mxu0  ;;  %22462 = vst [vmem:[#allocation44_spill] sm:$0xff] %v19007_v9  ;;  %v19009_v42 = vpop.f32.mrb[83].mxu1 }
 0x29b   : > { %v19005_v22 = vadd.f32 %v16339_v51, %v18803_v62  ;;  %v16342_v11 = vadd.f32 %v16341_v58, %v16340_v18  ;;  %22463 = vst [vmem:[#allocation45_spill] sm:$0xff] %v19009_v42 }
 0x29d   : > { %v19012_v29 = vadd.f32 %v16342_v11, %v18805_v8 }
 0x29f   : > { %v16343_v33 = vpop.f32.mrb[120].mxu0  ;;  %v19014_v34 = vpop.f32.mrb[84].mxu1 }
 0x2a0   : > { %v16344_v48 = vpop.f32.mrb[121].mxu0  ;;  %22464 = vst [vmem:[#allocation46_spill] sm:$0xff] %v19014_v34  ;;  %v19016_v52 = vpop.f32.mrb[85].mxu1 }
 0x2a1   : > { %v16345_v2 = vadd.f32 %v16344_v48, %v16343_v33  ;;  %v16346_v4 = vpop.f32.mrb[122].mxu0  ;;  %22465 = vst [vmem:[#allocation47_spill] sm:$0xff] %v19016_v52  ;;  %v19021_v51 = vpop.f32.mrb[86].mxu1  ;;  %v17302_v33 = vld [vmem:[%s22405_s7 + $0x20] ss:$8 sps:$4 sm:$0xff]  }
 0x2a2   : > { %v16347_v63 = vpop.f32.mrb[123].mxu0  ;;  %22466 = vst [vmem:[#allocation48_spill] sm:$0xff] %v19021_v51  ;;  %v19023_v18 = vpop.f32.mrb[87].mxu1  ;;  %v17304_v48 = vld [vmem:[%s22405_s7 + $0x24] ss:$8 sps:$4 sm:$0xff]  }
 0x2a3   : > { %v19019_v62 = vadd.f32 %v16345_v2, %v18813_v32  ;;  %v16348_v58 = vadd.f32 %v16347_v63, %v16346_v4  ;;  %22467 = vst [vmem:[#allocation49_spill] sm:$0xff] %v19023_v18  ;;  %v19036_v32 = vadd.f32 %v18782_v59, %v18940_v14  ;;  %9649 = vmatprep.subr.bf16.mxu0 %v17304_v48 }
 0x2a4   : > { %9650 = vmatpush1.bf16.msra.mxu0 %v17302_v33 }
 0x2a5   : > { %v19026_v8 = vadd.f32 %v16348_v58, %v18815_v40  ;;  %v570_v40 = vld [vmem:[#allocation4 + $0x8] sm:$0x1]  ;;  %v600_v58 = vld [vmem:[#allocation4 + $0xc] sm:$0x1] }
 0x2a6   : > { %v571_v18 = vsel %vm18198_vm3, 0, %v570_v40  ;;  %v601_v52 = vsel %vm18236_vm5, 0, %v600_v58 }
 0x2a7   : > { %v16349_v11 = vpop.f32.mrb[124].mxu0  ;;  %v19038_v63 = vpop.f32.mrb[88].mxu1  ;;  %572 = vst [vmem:[#allocation4 + $0x8] sm:$0x1] %v571_v18  ;;  %602 = vst [vmem:[#allocation4 + $0xc] sm:$0x1] %v601_v52 }
 0x2a8   : > { %v16350_v9 = vpop.f32.mrb[125].mxu0  ;;  %22468 = vst [vmem:[#allocation50_spill] sm:$0xff] %v19038_v63  ;;  %v19040_v51 = vpop.f32.mrb[89].mxu1 }
 0x2a9   : > { %v16351_v2 = vadd.f32 %v16350_v9, %v16349_v11  ;;  %v16352_v4 = vpop.f32.mrb[126].mxu0  ;;  %22469 = vst [vmem:[#allocation51_spill] sm:$0xff] %v19040_v51  ;;  %v19049_v59 = vpop.f32.mrb[90].mxu1 }
 0x2aa   : > { %v16353_v34 = vpop.f32.mrb[127].mxu0  ;;  %22471 = vst [vmem:[#allocation53_spill] sm:$0xff] %v19049_v59  ;;  %v19051_v9 = vpop.f32.mrb[91].mxu1 }
 0x2ab   : > { %v19047_v42 = vadd.f32 %v16351_v2, %v18824_v20  ;;  %v16354_v14 = vadd.f32 %v16353_v34, %v16352_v4  ;;  %22472 = vst [vmem:[#allocation54_spill] sm:$0xff] %v19051_v9  ;;  %v19061_v34 = vadd.f32 %v18789_v13, %v18947_v35  ;;  %v17307_v13 = vld [vmem:[%s22405_s7 + $0x34] ss:$8 sps:$4 sm:$0xff]  }
 0x2ac   : > { %9651 = vmatprep.subr.bf16.mxu0 %v17307_v13 }
 0x2ad   : > { %22470 = vst [vmem:[#allocation52_spill] sm:$0xff] %v19047_v42  ;;  %v19054_v11 = vadd.f32 %v16354_v14, %v18829_v39 }
 0x2af   : > { %22473 = vst [vmem:[#allocation55_spill] sm:$0xff] %v19054_v11  ;;  %v16355_v48 = vpop.f32.mrb[128].mxu0 }
 0x2b0   : > { %v16356_v63 = vpop.f32.mrb[129].mxu0 }
 0x2b1   : > { %v16357_v40 = vadd.f32 %v16356_v63, %v16355_v48  ;;  %v16358_v51 = vpop.f32.mrb[130].mxu0 }
 0x2b2   : > { %v16359_v0 = vpop.f32.mrb[131].mxu0 }
 0x2b3   : > { %v19057_v58 = vadd.f32 %v16357_v40, %v18835_v1  ;;  %v16360_v20 = vadd.f32 %v16359_v0, %v16358_v51  ;;  %v17305_v1 = vld [vmem:[%s22405_s7 + $0x30] ss:$8 sps:$4 sm:$0xff]   ;;  %v19084_v40 = vadd.f32 %v18798_v36, %v18963_v46 }
 0x2b4   : > { %9652 = vmatpush1.bf16.msra.mxu0 %v17305_v1 }
 0x2b5   : > { %22474 = vst [vmem:[#allocation56_spill] sm:$0xff] %v19057_v58  ;;  %v19064_v52 = vadd.f32 %v16360_v20, %v18840_v25  ;;  %v19077_v25 = vadd.f32 %v18791_v19, %v18955_v6 }
 0x2b7   : > { %22475 = vst [vmem:[#allocation57_spill] sm:$0xff] %v19064_v52  ;;  %v16361_v18 = vpop.f32.mrb[132].mxu0 }
 0x2b8   : > { %v16362_v33 = vpop.f32.mrb[133].mxu0 }
 0x2b9   : > { %v16363_v39 = vadd.f32 %v16362_v33, %v16361_v18  ;;  %v16364_v2 = vpop.f32.mrb[134].mxu0 }
 0x2ba   : > { %v16365_v4 = vpop.f32.mrb[135].mxu0 }
 0x2bb   : > { %v19067_v63 = vadd.f32 %v16363_v39, %v18846_v10  ;;  %v16366_v14 = vadd.f32 %v16365_v4, %v16364_v2 }
 0x2bd   : > { %22476 = vst [vmem:[#allocation58_spill] sm:$0xff] %v19067_v63  ;;  %v19080_v35 = vadd.f32 %v16366_v14, %v18850_v24 }
 0x2bf   : > { %22477 = vst [vmem:[#allocation59_spill] sm:$0xff] %v19080_v35  ;;  %v16367_v10 = vpop.f32.mrb[136].mxu0 }
 0x2c0   : > { %v16368_v0 = vpop.f32.mrb[137].mxu0 }
 0x2c1   : > { %v16369_v51 = vadd.f32 %v16368_v0, %v16367_v10  ;;  %v16370_v48 = vpop.f32.mrb[138].mxu0 }
 0x2c2   : > { %v16371_v20 = vpop.f32.mrb[139].mxu0 }
 0x2c3   : > { %v19087_v18 = vadd.f32 %v16369_v51, %v18855_v53  ;;  %v16372_v33 = vadd.f32 %v16371_v20, %v16370_v48 }
 0x2c5   : > { %22478 = vst [vmem:[#allocation60_spill] sm:$0xff] %v19087_v18  ;;  %v19090_v19 = vadd.f32 %v16372_v33, %v18859_v5 }
 0x2c7   : > { %22479 = vst [vmem:[#allocation61_spill] sm:$0xff] %v19090_v19  ;;  %v16373_v24 = vpop.f32.mrb[140].mxu0 }
 0x2c8   : > { %v16374_v6 = vpop.f32.mrb[141].mxu0 }
 0x2c9   : > { %v16375_v39 = vadd.f32 %v16374_v6, %v16373_v24  ;;  %v16376_v2 = vpop.f32.mrb[142].mxu0  ;;  %v19112_v24 = vadd.f32 %v18800_v43, %v18970_v30 }
 0x2ca   : > { %v16377_v4 = vpop.f32.mrb[143].mxu0 }
 0x2cb   : > { %v19093_v14 = vadd.f32 %v16375_v39, %v18864_v61  ;;  %v16378_v1 = vadd.f32 %v16377_v4, %v16376_v2  ;;  %v17308_v61 = vld [vmem:[%s22405_s7 + $0x40] ss:$8 sps:$4 sm:$0xff]   ;;  %v603_v2 = vld [vmem:[#allocation4 + $0x14] sm:$0x1] }
 0x2cc   : > { %v573_v39 = vld [vmem:[#allocation4 + $0x10] sm:$0x1] }
 0x2cd   : > { %22480 = vst [vmem:[#allocation62_spill] sm:$0xff] %v19093_v14  ;;  %v19096_v36 = vadd.f32 %v16378_v1, %v18868_v16  ;;  %v17310_v16 = vld [vmem:[%s22405_s7 + $0x44] ss:$8 sps:$4 sm:$0xff]   ;;  %v574_v4 = vsel %vm18198_vm3, 0, %v573_v39  ;;  %v604_v1 = vsel %vm18236_vm5, 0, %v603_v2 }
 0x2ce   : > { %9653 = vmatprep.subr.bf16.mxu0 %v17310_v16  ;;  %575 = vst [vmem:[#allocation4 + $0x10] sm:$0x1] %v574_v4  ;;  %605 = vst [vmem:[#allocation4 + $0x14] sm:$0x1] %v604_v1  ;;  %v22487_v16 = vld [vmem:[#allocation9_spill] sm:$0xff] }
 0x2cf   : > { %22481 = vst [vmem:[#allocation63_spill] sm:$0xff] %v19096_v36  ;;  %v16379_v46 = vpop.f32.mrb[144].mxu0  ;;  %9654 = vmatpush1.bf16.msra.mxu0 %v17308_v61  ;;  %v17313_v39 = vld [vmem:[%s22405_s7 + $0x54] ss:$8 sps:$4 sm:$0xff]  }
 0x2d0   : > { %v16380_v13 = vpop.f32.mrb[145].mxu0  ;;  %9655 = vmatprep.subr.bf16.mxu0 %v17313_v39 }
 0x2d1   : > { %v16381_v53 = vadd.f32 %v16380_v13, %v16379_v46  ;;  %v16382_v10 = vpop.f32.mrb[146].mxu0 }
 0x2d2   : > { %v16383_v0 = vpop.f32.mrb[147].mxu0 }
 0x2d3   : > { %v19099_v5 = vadd.f32 %v16381_v53, %v18873_v57  ;;  %v16384_v51 = vadd.f32 %v16383_v0, %v16382_v10 }
 0x2d5   : > { %22482 = vst [vmem:[#allocation64_spill] sm:$0xff] %v19099_v5  ;;  %v19102_v48 = vadd.f32 %v16384_v51, %v18877_v60 }
 0x2d7   : > { %22483 = vst [vmem:[#allocation65_spill] sm:$0xff] %v19102_v48  ;;  %v16385_v20 = vpop.f32.mrb[148].mxu0 }
 0x2d8   : > { %v16386_v33 = vpop.f32.mrb[149].mxu0 }
 0x2d9   : > { %v16387_v57 = vadd.f32 %v16386_v33, %v16385_v20  ;;  %v16388_v6 = vpop.f32.mrb[150].mxu0 }
 0x2da   : > { %v16389_v60 = vpop.f32.mrb[151].mxu0 }
 0x2db   : > { %v19119_v46 = vadd.f32 %v16387_v57, %v18882_v12  ;;  %v16390_v13 = vadd.f32 %v16389_v60, %v16388_v6  ;;  %v19129_v12 = vadd.f32 %v22487_v16, %v18991_v15  ;;  %v22488_v57 = vld [vmem:[#allocation28_spill] sm:$0xff] }
 0x2dd   : > { %22484 = vst [vmem:[#allocation66_spill] sm:$0xff] %v19119_v46  ;;  %v19122_v43 = vadd.f32 %v16390_v13, %v18886_v23  ;;  %v17311_v23 = vld [vmem:[%s22405_s7 + $0x50] ss:$8 sps:$4 sm:$0xff]  }
 0x2de   : > { %9656 = vmatpush1.bf16.msra.mxu0 %v17311_v23  ;;  %v22491_v13 = vld [vmem:[#allocation30_spill] sm:$0xff] }
 0x2df   : > { %22485 = vst [vmem:[#allocation67_spill] sm:$0xff] %v19122_v43  ;;  %v16391_v30 = vpop.f32.mrb[152].mxu0 }
 0x2e0   : > { %v16392_v53 = vpop.f32.mrb[153].mxu0 }
 0x2e1   : > { %v16393_v10 = vadd.f32 %v16392_v53, %v16391_v30  ;;  %v16394_v0 = vpop.f32.mrb[154].mxu0 }
 0x2e2   : > { %v16395_v51 = vpop.f32.mrb[155].mxu0 }
 0x2e3   : > { %v19125_v20 = vadd.f32 %v16393_v10, %v18891_v55  ;;  %v16396_v33 = vadd.f32 %v16395_v51, %v16394_v0  ;;  %v22490_v55 = vld [vmem:[#allocation10_spill] sm:$0xff]  ;;  %v22493_v10 = vld [vmem:[#allocation32_spill] sm:$0xff] }
 0x2e4   : > { %v19142_v2 = vadd.f32 %v22490_v55, %v18998_v47  ;;  %v5746_v47 = vlaneseq }
 0x2e5   : > { %22486 = vst [vmem:[#allocation68_spill] sm:$0xff] %v19125_v20  ;;  %v19132_v6 = vadd.f32 %v16396_v33, %v22488_v57  ;;  %v18060_v57 = vmov 1983009808  }
 0x2e7   : > { %22489 = vst [vmem:[#allocation9_spill] sm:$0xff] %v19132_v6  ;;  %v16397_v61 = vpop.f32.mrb[156].mxu0  ;;  %v5744_v6 = vunpack.c.l.s4 %v18060_v57 }
 0x2e8   : > { %v16398_v60 = vpop.f32.mrb[157].mxu0 }
 0x2e9   : > { %v16399_v4 = vadd.f32 %v16398_v60, %v16397_v61  ;;  %v16400_v15 = vpop.f32.mrb[158].mxu0  ;;  %v22495_v61 = vld [vmem:[#allocation11_spill] sm:$0xff] }
 0x2ea   : > { %v16401_v1 = vpop.f32.mrb[159].mxu0  ;;  %v19152_v39 = vadd.f32 %v22495_v61, %v19005_v22  ;;  %v19167_v22 = vld [vmem:[%s22404_s6] ss:$0 sm:$0xff] }
 0x2eb   : > { %v19145_v30 = vadd.f32 %v16399_v4, %v22491_v13  ;;  %v16402_v53 = vadd.f32 %v16401_v1, %v16400_v15  ;;  %v19158_v4 = vld [vmem:[%s22403_s5] ss:$0 sm:$0xff]  ;;  %v5745_v1 = vunpack.c.0.s8 %v5744_v6  ;;  %v19161_v13 = vshrl.u32 %v5746_v47, 7 }
 0x2ed   : > { %22492 = vst [vmem:[#allocation28_spill] sm:$0xff] %v19145_v30  ;;  %v19148_v0 = vadd.f32 %v16402_v53, %v22493_v10  ;;  %22496 = vst [vmem:[#allocation30_spill] sm:$0xff] %v19161_v13 }
 0x2ef   : > { %22494 = vst [vmem:[#allocation10_spill] sm:$0xff] %v19148_v0  ;;  %v16531_v51 = vpop.f32.mrb[160].mxu0 }
 0x2f0   : > { %v16532_v33 = vpop.f32.mrb[161].mxu0 }
 0x2f1   : > { %v16533_v16 = vadd.f32 %v16532_v33, %v16531_v51  ;;  %v16534_v55 = vpop.f32.mrb[162].mxu0 }
 0x2f2   : > { %v16535_v20 = vpop.f32.mrb[163].mxu0 }
 0x2f3   : > { %v5313_v23 = vadd.f32 %v16533_v16, %v18925_v38  ;;  %v16536_v60 = vadd.f32 %v16535_v20, %v16534_v55  ;;  %v22497_v38 = vld [vmem:[#allocation12_spill] sm:$0xff]  ;;  %v19177_v16 = vsub.s32 %v5745_v1, %v19161_v13 }
 0x2f4   : > { %v19171_v20 = vadd.f32 %v22497_v38, %v19012_v29 }
 0x2f5   : > { %v5474_v15 = vadd.f32 %v18929_v17, %v5313_v23  ;;  %v5316_v53 = vadd.f32 %v16536_v60, %v18980_v3 }
 0x2f6   : > { %22498 = vst [vmem:[#allocation32_spill] sm:$0xff] %v19171_v20 }
 0x2f7   : > { %v5607_v10 = vmul.f32 %v19158_v4, %v5474_v15  ;;  %v5477_v51 = vadd.f32 %v18936_v26, %v5316_v53  ;;  %v16537_v33 = vpop.f32.mrb[164].mxu0  ;;  %v22499_v26 = vld [vmem:[#allocation13_spill] sm:$0xff] }
 0x2f8   : > { %v16538_v17 = vpop.f32.mrb[165].mxu0  ;;  %v19184_v15 = vadd.f32 %v22499_v26, %v19019_v62 }
 0x2f9   : > { %v5646_v6 = vadd.f32 %v19167_v22, %v5607_v10  ;;  %v5608_v3 = vmul.f32 %v19158_v4, %v5477_v51  ;;  %v16539_v57 = vadd.f32 %v16538_v17, %v16537_v33  ;;  %v16540_v47 = vpop.f32.mrb[166].mxu0  ;;  %v22501_v33 = vld [vmem:[#allocation14_spill] sm:$0xff] }
 0x2fa   : > { %v16541_v55 = vpop.f32.mrb[167].mxu0  ;;  %22500 = vst [vmem:[#allocation11_spill] sm:$0xff] %v19184_v15  ;;  %v19191_v17 = vadd.f32 %v22501_v33, %v19026_v8 }
 0x2fb   : > { %v5678_v61 = vmax.f32 %v5646_v6, 0.0  ;;  %v5647_v29 = vadd.f32 %v19167_v22, %v5608_v3  ;;  %v5321_v23 = vadd.f32 %v16539_v57, %v18986_v41  ;;  %v16542_v60 = vadd.f32 %v16541_v55, %v16540_v47 }
 0x2fc   : > { %22502 = vst [vmem:[#allocation12_spill] sm:$0xff] %v19191_v17 }
 0x2fd   : > { %v5742_v53 = vcombine.high %v5678_v61, %v5678_v61  ;;  %v5749_v1 = vrot.slane %v5678_v61, %v19177_v16  ;;  %v5679_v38 = vmax.f32 %v5647_v29, 0.0  ;;  %v5482_v10 = vadd.f32 %v18927_v45, %v5321_v23  ;;  %v22503_v45 = vld [vmem:[#allocation36_spill] sm:$0xff] }
 0x2fe   : > { %v5324_v51 = vadd.f32 %v16542_v60, %v19036_v32 }
 0x2ff   : > { %v5756_v41 = vrot.slane %v5742_v53, %v19177_v16  ;;  %v5757_v6 = vcombine.high %v5749_v1, %v5749_v1  ;;  %v6415_v3 = vsel %vm6414_vm12, %v5749_v1, -inf  ;;  %v5759_v57 = vcombine.high %v5679_v38, %v5679_v38  ;;  %v19195_v62 = vpop.f32.mrb[168].mxu0 }
 0x300   : > { %v6416_v47 = vrot.slane %v6415_v3, 4  ;;  %v5766_v55 = vrot.slane %v5679_v38, %v19177_v16  ;;  %v5609_v61 = vmul.f32 %v19158_v4, %v5482_v10  ;;  %v19200_v29 = vadd.f32 %v22503_v45, %v5324_v51  ;;  %v19202_v32 = vpop.f32.mrb[169].mxu0 }
 0x301   : > { %v5758_v8 = vcombine.high %v5756_v41, %v5756_v41  ;;  %v6422_v23 = vsel %vm6414_vm12, %v5757_v6, -inf  ;;  %v6429_v60 = vsel %vm6414_vm12, %v5756_v41, -inf  ;;  %v5773_v26 = vrot.slane %v5759_v57, %v19177_v16  ;;  %v19207_v53 = vpop.f32.mrb[170].mxu0  ;;  %v17314_v41 = vld [vmem:[%s22405_s7 + $0x60] ss:$8 sps:$4 sm:$0xff]  }
 0x302   : > { %v6417_v1 = vmax.f32 %v6415_v3, %v6416_v47  ;;  %v6423_v33 = vrot.slane %v6422_v23, 4  ;;  %v6430_v13 = vrot.slane %v6429_v60, 4  ;;  %v5774_v38 = vcombine.high %v5766_v55, %v5766_v55  ;;  %v19209_v0 = vpop.f32.mrb[171].mxu0  ;;  %v17316_v47 = vld [vmem:[%s22405_s7 + $0x64] ss:$8 sps:$4 sm:$0xff]  }
 0x303   : > { %v6436_v10 = vsel %vm6414_vm12, %v5758_v8, -inf  ;;  %v5775_v51 = vcombine.high %v5773_v26, %v5773_v26  ;;  %v6443_v45 = vsel %vm6414_vm12, %v5766_v55, -inf  ;;  %v6457_v30 = vsel %vm6414_vm12, %v5773_v26, -inf  ;;  %9657 = vmatprep.subr.bf16.mxu0 %v17316_v47 }
 0x304   : > { %v6418_v6 = vrot.slane %v6417_v1, 2  ;;  %v6424_v57 = vmax.f32 %v6422_v23, %v6423_v33  ;;  %v6431_v59 = vmax.f32 %v6429_v60, %v6430_v13  ;;  %v6437_v3 = vrot.slane %v6436_v10, 4  ;;  %9658 = vmatpush1.bf16.msra.mxu0 %v17314_v41 }
 0x305   : > { %v6444_v43 = vrot.slane %v6443_v45, 4  ;;  %v6450_v8 = vsel %vm6414_vm12, %v5774_v38, -inf  ;;  %v6458_v9 = vrot.slane %v6457_v30, 4  ;;  %v6464_v55 = vsel %vm6414_vm12, %v5775_v51, -inf }
 0x306   : > { %v6419_v46 = vmax.f32 %v6417_v1, %v6418_v6  ;;  %v6425_v26 = vrot.slane %v6424_v57, 2  ;;  %v6432_v48 = vrot.slane %v6431_v59, 2  ;;  %v6438_v5 = vmax.f32 %v6436_v10, %v6437_v3 }
 0x307   : > { %v6445_v36 = vmax.f32 %v6443_v45, %v6444_v43  ;;  %v6451_v14 = vrot.slane %v6450_v8, 4  ;;  %v6459_v23 = vmax.f32 %v6457_v30, %v6458_v9  ;;  %v6465_v13 = vrot.slane %v6464_v55, 4  ;;  %v16549_v60 = vpop.f32.mrb[172].mxu0 }
 0x308   : > { %v6420_v33 = vrot.slane %v6419_v46, 1  ;;  %v6426_v19 = vmax.f32 %v6424_v57, %v6425_v26  ;;  %v6433_v18 = vmax.f32 %v6431_v59, %v6432_v48  ;;  %v6439_v35 = vrot.slane %v6438_v5, 2  ;;  %v16550_v63 = vpop.f32.mrb[173].mxu0 }
 0x309   : > { %v6446_v38 = vrot.slane %v6445_v36, 2  ;;  %v6452_v52 = vmax.f32 %v6450_v8, %v6451_v14  ;;  %v6460_v58 = vrot.slane %v6459_v23, 2  ;;  %v6466_v51 = vmax.f32 %v6464_v55, %v6465_v13  ;;  %v19222_v1 = vpop.f32.mrb[174].mxu0 }
 0x30a   : > { %v19224_v6 = vmax.f32 %v6419_v46, %v6420_v33  ;;  %v6427_v10 = vrot.slane %v6426_v19, 1  ;;  %v6434_v43 = vrot.slane %v6433_v18, 1  ;;  %v6440_v45 = vmax.f32 %v6438_v5, %v6439_v35  ;;  %v19226_v9 = vpop.f32.mrb[175].mxu0 }
 0x30b   : > { %v6447_v30 = vmax.f32 %v6445_v36, %v6446_v38  ;;  %v6453_v41 = vrot.slane %v6452_v52, 2  ;;  %v6461_v3 = vmax.f32 %v6459_v23, %v6460_v58  ;;  %v6467_v57 = vrot.slane %v6466_v51, 2 }
 0x30c   : > { %v19228_v59 = vmax.f32 %v6426_v19, %v6427_v10  ;;  %v19230_v48 = vmax.f32 %v6433_v18, %v6434_v43  ;;  %v6441_v14 = vrot.slane %v6440_v45, 1  ;;  %v5648_v47 = vadd.f32 %v19167_v22, %v5609_v61 }
 0x30d   : > { %v6448_v8 = vrot.slane %v6447_v30, 1  ;;  %v6454_v55 = vmax.f32 %v6452_v52, %v6453_v41  ;;  %v6462_v46 = vrot.slane %v6461_v3, 1  ;;  %v6468_v26 = vmax.f32 %v6466_v51, %v6467_v57 }
 0x30e   : > { %v19233_v13 = vmax.f32 %v6440_v45, %v6441_v14  ;;  %v5680_v35 = vmax.f32 %v5648_v47, 0.0  ;;  %v5610_v36 = vmul.f32 %v19158_v4, %v19200_v29  ;;  %v16545_v58 = vadd.f32 %v19202_v32, %v19195_v62 }
 0x30f   : > { %v19239_v19 = vmax.f32 %v6447_v30, %v6448_v8  ;;  %v6455_v18 = vrot.slane %v6454_v55, 1  ;;  %v19241_v5 = vmax.f32 %v6461_v3, %v6462_v46  ;;  %v6469_v23 = vrot.slane %v6468_v26, 1  ;;  %v19243_v61 = vpop.f32.mrb[176].mxu0  ;;  %v17317_v46 = vld [vmem:[%s22405_s7 + $0x70] ss:$8 sps:$4 sm:$0xff]  }
 0x310   : > { %v5776_v52 = vcombine.high %v5680_v35, %v5680_v35  ;;  %v5783_v33 = vrot.slane %v5680_v35, %v19177_v16  ;;  %v5649_v38 = vadd.f32 %v19167_v22, %v5610_v36  ;;  %v5329_v51 = vadd.f32 %v16545_v58, %v19061_v34  ;;  %v19248_v10 = vpop.f32.mrb[177].mxu0  ;;  %v17322_v36 = vld [vmem:[%s22405_s7 + $0x84] ss:$8 sps:$4 sm:$0xff]  }
 0x311   : > { %v19250_v29 = vmax.f32 %v6454_v55, %v6455_v18  ;;  %v19252_v62 = vmax.f32 %v6468_v26, %v6469_v23  ;;  %v16548_v32 = vadd.f32 %v19209_v0, %v19207_v53  ;;  %v16551_v43 = vadd.f32 %v16550_v63, %v16549_v60  ;;  %v19256_v45 = vpop.f32.mrb[178].mxu0  ;;  %v17319_v26 = vld [vmem:[%s22405_s7 + $0x74] ss:$8 sps:$4 sm:$0xff]  }
 0x312   : > { %v5790_v30 = vrot.slane %v5776_v52, %v19177_v16  ;;  %v5791_v41 = vcombine.high %v5783_v33, %v5783_v33  ;;  %v6471_v3 = vsel %vm6414_vm12, %v5783_v33, -inf  ;;  %v5681_v57 = vmax.f32 %v5649_v38, 0.0  ;;  %v19260_v14 = vpop.f32.mrb[179].mxu0  ;;  %9659 = vmatprep.subr.bf16.mxu0 %v17319_v26 }
 0x313   : > { %v6472_v34 = vrot.slane %v6471_v3, 4  ;;  %v5490_v47 = vadd.f32 %v18944_v44, %v5329_v51  ;;  %v5332_v8 = vadd.f32 %v16548_v32, %v19077_v25  ;;  %v19265_v55 = vadd.f32 %v16551_v43, %v19084_v40  ;;  %9660 = vmatpush1.bf16.msra.mxu0 %v17317_v46 }
 0x314   : > { %v5792_v0 = vcombine.high %v5790_v30, %v5790_v30  ;;  %v6478_v63 = vsel %vm6414_vm12, %v5791_v41, -inf  ;;  %v6485_v53 = vsel %vm6414_vm12, %v5790_v30, -inf  ;;  %v5793_v60 = vcombine.high %v5681_v57, %v5681_v57  ;;  %v17320_v30 = vld [vmem:[%s22405_s7 + $0x80] ss:$8 sps:$4 sm:$0xff]   ;;  %9661 = vmatprep.subr.bf16.mxu0 %v17322_v36 }
 0x315   : > { %v6473_v44 = vmax.f32 %v6471_v3, %v6472_v34  ;;  %v6479_v35 = vrot.slane %v6478_v63, 4  ;;  %v6486_v25 = vrot.slane %v6485_v53, 4  ;;  %v5800_v40 = vrot.slane %v5681_v57, %v19177_v16 }
 0x316   : > { %v6492_v58 = vsel %vm6414_vm12, %v5792_v0, -inf  ;;  %v5807_v18 = vrot.slane %v5793_v60, %v19177_v16  ;;  %v19282_v23 = vmul.f32 %v19158_v4, %v5490_v47  ;;  %v19285_v52 = vadd.f32 %v18951_v27, %v5332_v8 }
 0x317   : > { %v6474_v33 = vrot.slane %v6473_v44, 2  ;;  %v6480_v38 = vmax.f32 %v6478_v63, %v6479_v35  ;;  %v6487_v51 = vmax.f32 %v6485_v53, %v6486_v25  ;;  %v6493_v32 = vrot.slane %v6492_v58, 4  ;;  %v19287_v43 = vpop.f32.mrb[180].mxu0  ;;  %9662 = vmatpush1.bf16.msra.mxu0 %v17320_v30 }
 0x318   : > { %v5808_v41 = vcombine.high %v5800_v40, %v5800_v40  ;;  %v5809_v3 = vcombine.high %v5807_v18, %v5807_v18  ;;  %v6499_v57 = vsel %vm6414_vm12, %v5800_v40, -inf  ;;  %v6513_v34 = vsel %vm6414_vm12, %v5807_v18, -inf  ;;  %v19294_v27 = vpop.f32.mrb[181].mxu0 }
 0x319   : > { %v6475_v47 = vmax.f32 %v6473_v44, %v6474_v33  ;;  %v6481_v8 = vrot.slane %v6480_v38, 2  ;;  %v6488_v0 = vrot.slane %v6487_v51, 2  ;;  %v6494_v63 = vmax.f32 %v6492_v58, %v6493_v32  ;;  %v19296_v53 = vpop.f32.mrb[182].mxu0 }
 0x31a   : > { %v6500_v60 = vrot.slane %v6499_v57, 4  ;;  %v6506_v46 = vsel %vm6414_vm12, %v5808_v41, -inf  ;;  %v6514_v26 = vrot.slane %v6513_v34, 4  ;;  %v6520_v35 = vsel %vm6414_vm12, %v5809_v3, -inf  ;;  %v19300_v25 = vpop.f32.mrb[183].mxu0 }
 0x31b   : > { %22504 = vst [vmem:[#allocation13_spill] sm:$0xff] %v19300_v25  ;;  %v6476_v40 = vrot.slane %v6475_v47, 1  ;;  %v6482_v11 = vmax.f32 %v6480_v38, %v6481_v8  ;;  %v6489_v18 = vmax.f32 %v6487_v51, %v6488_v0  ;;  %v6495_v17 = vrot.slane %v6494_v63, 2 }
 0x31c   : > { %v6501_v44 = vmax.f32 %v6499_v57, %v6500_v60  ;;  %v6507_v36 = vrot.slane %v6506_v46, 4  ;;  %v6515_v33 = vmax.f32 %v6513_v34, %v6514_v26  ;;  %v6521_v58 = vrot.slane %v6520_v35, 4 }
 0x31d   : > { %v6477_v32 = vmax.f32 %v6475_v47, %v6476_v40  ;;  %v6483_v42 = vrot.slane %v6482_v11, 1  ;;  %v6490_v28 = vrot.slane %v6489_v18, 1  ;;  %v6496_v15 = vmax.f32 %v6494_v63, %v6495_v17 }
 0x31e   : > { %v6502_v41 = vrot.slane %v6501_v44, 2  ;;  %v6508_v3 = vmax.f32 %v6506_v46, %v6507_v36  ;;  %v6516_v49 = vrot.slane %v6515_v33, 2  ;;  %v6522_v20 = vmax.f32 %v6520_v35, %v6521_v58 }
 0x31f   : > { %v6484_v25 = vmax.f32 %v6482_v11, %v6483_v42  ;;  %v6491_v38 = vmax.f32 %v6489_v18, %v6490_v28  ;;  %v6497_v51 = vrot.slane %v6496_v15, 1  ;;  %v7311_v30 = vmax.f32 %v19224_v6, %v6477_v32  ;;  %v19303_v8 = vpop.f32.mrb[184].mxu0 }
 0x320   : > { %v6503_v57 = vmax.f32 %v6501_v44, %v6502_v41  ;;  %v6509_v34 = vrot.slane %v6508_v3, 2  ;;  %v6517_v0 = vmax.f32 %v6515_v33, %v6516_v49  ;;  %v6523_v47 = vrot.slane %v6522_v20, 2  ;;  %v19305_v60 = vpop.f32.mrb[185].mxu0 }
 0x321   : > { %v6498_v17 = vmax.f32 %v6496_v15, %v6497_v51  ;;  %v7312_v63 = vmax.f32 %v19228_v59, %v6484_v25  ;;  %v7313_v46 = vmax.f32 %v19230_v48, %v6491_v38  ;;  %v16082_v26 = vpack.c.bf16 %v7311_v30, %v7311_v30  ;;  %v19309_v42 = vpop.f32.mrb[186].mxu0  ;;  %v17323_v51 = vld [vmem:[%s22405_s7 + $0x90] ss:$8 sps:$4 sm:$0xff]   ;;  %v17325_v30 = vld [vmem:[%s22405_s7 + $0x94] ss:$8 sps:$4 sm:$0xff]  }
 0x322   : > { %v6504_v28 = vrot.slane %v6503_v57, 1  ;;  %v6510_v11 = vmax.f32 %v6508_v3, %v6509_v34  ;;  %v6518_v6 = vrot.slane %v6517_v0, 1  ;;  %v6524_v35 = vmax.f32 %v6522_v20, %v6523_v47  ;;  %v19311_v40 = vpop.f32.mrb[187].mxu0  ;;  %9663 = vmatprep.subr.bf16.mxu0 %v17325_v30 }
 0x323   : > { %v7314_v49 = vmax.f32 %v19233_v13, %v6498_v17  ;;  %v16083_v18 = vpack.c.bf16 %v7312_v63, %v7312_v63  ;;  %v16084_v44 = vpack.c.bf16 %v7313_v46, %v7313_v46  ;;  %v7631_v36 = vunpack.c.l.b16 %v16082_v26  ;;  %9664 = vmatpush1.bf16.msra.mxu0 %v17323_v51 }
 0x324   : > { %v6505_v15 = vmax.f32 %v6503_v57, %v6504_v28  ;;  %v6511_v59 = vrot.slane %v6510_v11, 1  ;;  %v6519_v25 = vmax.f32 %v6517_v0, %v6518_v6  ;;  %v6525_v48 = vrot.slane %v6524_v35, 1 }
 0x325   : > { %v16085_v33 = vpack.c.bf16 %v7314_v49, %v7314_v49  ;;  %v7632_v58 = vunpack.c.l.b16 %v16083_v18  ;;  %v7633_v32 = vunpack.c.l.b16 %v16084_v44  ;;  %v5650_v41 = vadd.f32 %v19167_v22, %v19282_v23 }
 0x326   : > { %v6512_v20 = vmax.f32 %v6510_v11, %v6511_v59  ;;  %v6526_v3 = vmax.f32 %v6524_v35, %v6525_v48  ;;  %v7315_v38 = vmax.f32 %v19239_v19, %v6505_v15  ;;  %v7317_v13 = vmax.f32 %v19241_v5, %v6519_v25  ;;  %v7785_v11 = vld [vmem:[#allocation4 + $0xc] sm:$0x1] }
 0x327   : > { %v7634_v57 = vunpack.c.l.b16 %v16085_v33  ;;  %v7696_v34 = vsel %vm7695_vm13, %v7632_v58, %v7631_v36  ;;  %v5682_v0 = vmax.f32 %v5650_v41, 0.0  ;;  %v5612_v23 = vmul.f32 %v19158_v4, %v19285_v52  ;;  %v19327_v47 = vpop.f32.mrb[188].mxu0 }
 0x328   : > { %v7698_v19 = vsel %vm22417_vm14, %v7633_v32, %v7696_v34  ;;  %v7316_v5 = vmax.f32 %v19250_v29, %v6512_v20  ;;  %v7318_v17 = vmax.f32 %v19252_v62, %v6526_v3  ;;  %v16086_v63 = vpack.c.bf16 %v7315_v38, %v7315_v38  ;;  %v19332_v46 = vpop.f32.mrb[189].mxu0 }
 0x329   : > { %v16088_v26 = vpack.c.bf16 %v7317_v13, %v7317_v13  ;;  %v7700_v28 = vsel %vm632_vm15, %v7634_v57, %v7698_v19  ;;  %v5810_v6 = vcombine.high %v5682_v0, %v5682_v0  ;;  %v5817_v35 = vrot.slane %v5682_v0, %v19177_v16  ;;  %v7782_v57 = vld [vmem:[#allocation4 + $0x8] sm:$0xf] }
 0x32a   : > { %v16087_v52 = vpack.c.bf16 %v7316_v5, %v7316_v5  ;;  %v7635_v49 = vunpack.c.l.b16 %v16086_v63  ;;  %v16146_v18 = vpack.c.bf16 %v7318_v17, %v7318_v17  ;;  %v5651_v44 = vadd.f32 %v19167_v22, %v5612_v23 }
 0x32b   : > { %v7637_v29 = vunpack.c.l.b16 %v16088_v26  ;;  %v5824_v62 = vrot.slane %v5810_v6, %v19177_v16  ;;  %v5825_v36 = vcombine.high %v5817_v35, %v5817_v35  ;;  %v6527_v15 = vsel %vm6414_vm12, %v5817_v35, -inf }
 0x32c   : > { %v7636_v59 = vunpack.c.l.b16 %v16087_v52  ;;  %v7702_v25 = vsel %vm7701_vm0, %v7635_v49, %v7700_v28  ;;  %v7786_v48 = vsel %vm18198_vm3, %v16146_v18, %v7785_v11  ;;  %v6528_v33 = vrot.slane %v6527_v15, 4 }
 0x32d   : > { %7787 = vst [vmem:[#allocation4 + $0xc] sm:$0x1] %v7786_v48  ;;  %v5826_v58 = vcombine.high %v5824_v62, %v5824_v62  ;;  %v6534_v32 = vsel %vm6414_vm12, %v5825_v36, -inf  ;;  %v6541_v41 = vsel %vm6414_vm12, %v5824_v62, -inf  ;;  %v5683_v20 = vmax.f32 %v5651_v44, 0.0 }
 0x32e   : > { %v7704_v3 = vsel %vm7703_vm1, %v7636_v59, %v7702_v25  ;;  %v6529_v38 = vmax.f32 %v6527_v15, %v6528_v33  ;;  %v6535_v13 = vrot.slane %v6534_v32, 4  ;;  %v6542_v51 = vrot.slane %v6541_v41, 4 }
 0x32f   : > { %v7706_v30 = vsel %vm22416_vm2, %v7637_v29, %v7704_v3  ;;  %v6548_v34 = vsel %vm6414_vm12, %v5826_v58, -inf  ;;  %v5827_v0 = vcombine.high %v5683_v20, %v5683_v20  ;;  %v5834_v23 = vrot.slane %v5683_v20, %v19177_v16 }
 0x330   : > { %v7749_v19 = vpack.c.b16 %v7706_v30, %v7706_v30  ;;  %v6530_v5 = vrot.slane %v6529_v38, 2  ;;  %v6536_v17 = vmax.f32 %v6534_v32, %v6535_v13  ;;  %v6543_v63 = vmax.f32 %v6541_v41, %v6542_v51  ;;  %v19357_v30 = vpop.f32.mrb[190].mxu0 }
 0x331   : > { %v6549_v26 = vrot.slane %v6548_v34, 4  ;;  %v5841_v28 = vrot.slane %v5827_v0, %v19177_v16  ;;  %v5842_v11 = vcombine.high %v5834_v23, %v5834_v23  ;;  %v6555_v6 = vsel %vm6414_vm12, %v5834_v23, -inf }
 0x332   : > { %v7783_v52 = vsel %vm18412_vm9, %v7749_v19, %v7782_v57  ;;  %v6531_v49 = vmax.f32 %v6529_v38, %v6530_v5  ;;  %v6537_v18 = vrot.slane %v6536_v17, 2  ;;  %v6544_v44 = vrot.slane %v6543_v63, 2  ;;  %v17326_v57 = vld [vmem:[%s22405_s7 + $0xa0] ss:$8 sps:$4 sm:$0xff]   ;;  %v17328_v5 = vld [vmem:[%s22405_s7 + $0xa4] ss:$8 sps:$4 sm:$0xff]  }
 0x333   : > { %7784 = vst [vmem:[#allocation4 + $0x8] sm:$0xf] %v7783_v52  ;;  %v6550_v29 = vmax.f32 %v6548_v34, %v6549_v26  ;;  %v5843_v62 = vcombine.high %v5841_v28, %v5841_v28  ;;  %v6556_v36 = vrot.slane %v6555_v6, 4  ;;  %v6562_v15 = vsel %vm6414_vm12, %v5842_v11, -inf  ;;  %9665 = vmatprep.subr.bf16.mxu0 %v17328_v5  ;;  %v17329_v5 = vld [vmem:[%s22405_s7 + $0xb0] ss:$8 sps:$4 sm:$0xff]  }
 0x334   : > { %v6532_v59 = vrot.slane %v6531_v49, 1  ;;  %v6538_v25 = vmax.f32 %v6536_v17, %v6537_v18  ;;  %v6545_v48 = vmax.f32 %v6543_v63, %v6544_v44  ;;  %v6563_v33 = vrot.slane %v6562_v15, 4  ;;  %v19365_v17 = vpop.f32.mrb[191].mxu0  ;;  %9666 = vmatpush1.bf16.msra.mxu0 %v17326_v57 }
 0x335   : > { %v6551_v58 = vrot.slane %v6550_v29, 2  ;;  %v6557_v32 = vmax.f32 %v6555_v6, %v6556_v36  ;;  %v6569_v41 = vsel %vm6414_vm12, %v5841_v28, -inf  ;;  %v6576_v20 = vsel %vm6414_vm12, %v5843_v62, -inf }
 0x336   : > { %v19355_v3 = vmax.f32 %v6531_v49, %v6532_v59  ;;  %v6539_v38 = vrot.slane %v6538_v25, 1  ;;  %v6546_v13 = vrot.slane %v6545_v48, 1  ;;  %v6564_v51 = vmax.f32 %v6562_v15, %v6563_v33 }
 0x337   : > { %v6552_v34 = vmax.f32 %v6550_v29, %v6551_v58  ;;  %v6558_v0 = vrot.slane %v6557_v32, 2  ;;  %v6570_v23 = vrot.slane %v6569_v41, 4  ;;  %v6577_v19 = vrot.slane %v6576_v20, 4 }
 0x338   : > { %v19367_v63 = vmax.f32 %v6538_v25, %v6539_v38  ;;  %v19369_v26 = vmax.f32 %v6545_v48, %v6546_v13  ;;  %v6565_v28 = vrot.slane %v6564_v51, 2  ;;  %v5498_v11 = vadd.f32 %v18942_v50, %v19265_v55 }
 0x339   : > { %v6553_v6 = vrot.slane %v6552_v34, 1  ;;  %v6559_v52 = vmax.f32 %v6557_v32, %v6558_v0  ;;  %v6571_v49 = vmax.f32 %v6569_v41, %v6570_v23  ;;  %v6578_v18 = vmax.f32 %v6576_v20, %v6577_v19 }
 0x33a   : > { %v6566_v44 = vmax.f32 %v6564_v51, %v6565_v28  ;;  %v5613_v29 = vmul.f32 %v19158_v4, %v5498_v11  ;;  %v16554_v62 = vadd.f32 %v19226_v9, %v19222_v1  ;;  %v16557_v36 = vadd.f32 %v19248_v10, %v19243_v61  ;;  %v17331_v28 = vld [vmem:[%s22405_s7 + $0xb4] ss:$8 sps:$4 sm:$0xff]   ;;  %v19412_v11 = vpop.f32.mrb[192].mxu0 }
 0x33b   : > { %v19378_v15 = vmax.f32 %v6552_v34, %v6553_v6  ;;  %v6560_v59 = vrot.slane %v6559_v52, 1  ;;  %v6572_v25 = vrot.slane %v6571_v49, 2  ;;  %v6579_v50 = vrot.slane %v6578_v18, 2  ;;  %9667 = vmatprep.subr.bf16.mxu0 %v17331_v28 }
 0x33c   : > { %v6567_v55 = vrot.slane %v6566_v44, 1  ;;  %v5652_v48 = vadd.f32 %v19167_v22, %v5613_v29  ;;  %v5340_v33 = vadd.f32 %v16554_v62, %v19112_v24  ;;  %v5345_v58 = vadd.f32 %v16557_v36, %v19129_v12  ;;  %9668 = vmatpush1.bf16.msra.mxu0 %v17329_v5 }
 0x33d   : > { %v19383_v32 = vmax.f32 %v6559_v52, %v6560_v59  ;;  %v6573_v41 = vmax.f32 %v6571_v49, %v6572_v25  ;;  %v6580_v1 = vmax.f32 %v6578_v18, %v6579_v50  ;;  %v16560_v9 = vadd.f32 %v19260_v14, %v19256_v45  ;;  %v19419_v49 = vpop.f32.mrb[193].mxu0 }
 0x33e   : > { %v19387_v61 = vmax.f32 %v6566_v44, %v6567_v55  ;;  %v5684_v10 = vmax.f32 %v5652_v48, 0.0  ;;  %v5501_v20 = vadd.f32 %v18949_v56, %v5340_v33  ;;  %v5506_v38 = vadd.f32 %v18959_v31, %v5345_v58  ;;  %v19425_v55 = vpop.f32.mrb[194].mxu0 }
 0x33f   : > { %v6574_v13 = vrot.slane %v6573_v41, 1  ;;  %v6581_v51 = vrot.slane %v6580_v1, 1  ;;  %v5348_v24 = vadd.f32 %v16560_v9, %v19142_v2  ;;  %v16563_v12 = vadd.f32 %v19294_v27, %v19287_v43  ;;  %v19438_v9 = vpop.f32.mrb[195].mxu0 }
 0x340   : > { %v5844_v57 = vcombine.high %v5684_v10, %v5684_v10  ;;  %v5851_v34 = vrot.slane %v5684_v10, %v19177_v16  ;;  %v5614_v0 = vmul.f32 %v19158_v4, %v5501_v20  ;;  %v5615_v45 = vmul.f32 %v19158_v4, %v5506_v38 }
 0x341   : > { %v19397_v14 = vmax.f32 %v6573_v41, %v6574_v13  ;;  %v19399_v23 = vmax.f32 %v6580_v1, %v6581_v51  ;;  %v5509_v56 = vadd.f32 %v18967_v7, %v5348_v24  ;;  %v5353_v31 = vadd.f32 %v16563_v12, %v19152_v39  ;;  %v17334_v1 = vld [vmem:[%s22405_s7 + $0xc4] ss:$8 sps:$4 sm:$0xff]  }
 0x342   : > { %v5858_v2 = vrot.slane %v5844_v57, %v19177_v16  ;;  %v5859_v19 = vcombine.high %v5851_v34, %v5851_v34  ;;  %v6583_v43 = vsel %vm6414_vm12, %v5851_v34, -inf  ;;  %v5653_v27 = vadd.f32 %v19167_v22, %v5614_v0  ;;  %9669 = vmatprep.subr.bf16.mxu0 %v17334_v1 }
 0x343   : > { %v6584_v7 = vrot.slane %v6583_v43, 4  ;;  %v5654_v39 = vadd.f32 %v19167_v22, %v5615_v45  ;;  %v5616_v6 = vmul.f32 %v19158_v4, %v5509_v56  ;;  %v19417_v52 = vadd.f32 %v18957_v54, %v5353_v31  ;;  %v17332_v54 = vld [vmem:[%s22405_s7 + $0xc0] ss:$8 sps:$4 sm:$0xff]  }
 0x344   : > { %v5860_v18 = vcombine.high %v5858_v2, %v5858_v2  ;;  %v6590_v44 = vsel %vm6414_vm12, %v5859_v19, -inf  ;;  %v6597_v29 = vsel %vm6414_vm12, %v5858_v2, -inf  ;;  %v5685_v62 = vmax.f32 %v5653_v27, 0.0  ;;  %9670 = vmatpush1.bf16.msra.mxu0 %v17332_v54 }
 0x345   : > { %v6585_v36 = vmax.f32 %v6583_v43, %v6584_v7  ;;  %v6591_v59 = vrot.slane %v6590_v44, 4  ;;  %v6598_v25 = vrot.slane %v6597_v29, 4  ;;  %v19423_v50 = vmax.f32 %v5654_v39, 0.0 }
 0x346   : > { %v6604_v48 = vsel %vm6414_vm12, %v5860_v18, -inf  ;;  %v5861_v33 = vcombine.high %v5685_v62, %v5685_v62  ;;  %v5868_v58 = vrot.slane %v5685_v62, %v19177_v16  ;;  %v19433_v41 = vadd.f32 %v19167_v22, %v5616_v6 }
 0x347   : > { %v6586_v10 = vrot.slane %v6585_v36, 2  ;;  %v6592_v20 = vmax.f32 %v6590_v44, %v6591_v59  ;;  %v6599_v38 = vmax.f32 %v6597_v29, %v6598_v25  ;;  %v6605_v13 = vrot.slane %v6604_v48, 4 }
 0x348   : > { %v5875_v51 = vrot.slane %v5861_v33, %v19177_v16  ;;  %v5876_v24 = vcombine.high %v5868_v58, %v5868_v58  ;;  %v6611_v12 = vsel %vm6414_vm12, %v5868_v58, -inf  ;;  %v5878_v57 = vcombine.high %v19423_v50, %v19423_v50 }
 0x349   : > { %v6587_v22 = vmax.f32 %v6585_v36, %v6586_v10  ;;  %v6593_v34 = vrot.slane %v6592_v20, 2  ;;  %v6600_v0 = vrot.slane %v6599_v38, 2  ;;  %v6606_v45 = vmax.f32 %v6604_v48, %v6605_v13 }
 0x34a   : > { %v5877_v56 = vcombine.high %v5875_v51, %v5875_v51  ;;  %v6612_v31 = vrot.slane %v6611_v12, 4  ;;  %v6618_v2 = vsel %vm6414_vm12, %v5876_v24, -inf  ;;  %v6625_v19 = vsel %vm6414_vm12, %v5875_v51, -inf }
 0x34b   : > { %v6588_v43 = vrot.slane %v6587_v22, 1  ;;  %v6594_v27 = vmax.f32 %v6592_v20, %v6593_v34  ;;  %v6601_v5 = vmax.f32 %v6599_v38, %v6600_v0  ;;  %v6607_v28 = vrot.slane %v6606_v45, 2 }
 0x34c   : > { %v6613_v7 = vmax.f32 %v6611_v12, %v6612_v31  ;;  %v6619_v39 = vrot.slane %v6618_v2, 4  ;;  %v6626_v6 = vrot.slane %v6625_v19, 4  ;;  %v6632_v18 = vsel %vm6414_vm12, %v5877_v56, -inf }
 0x34d   : > { %v6589_v44 = vmax.f32 %v6587_v22, %v6588_v43  ;;  %v6595_v29 = vrot.slane %v6594_v27, 1  ;;  %v6602_v62 = vrot.slane %v6601_v5, 1  ;;  %v6608_v36 = vmax.f32 %v6606_v45, %v6607_v28 }
 0x34e   : > { %v6614_v59 = vrot.slane %v6613_v7, 2  ;;  %v6620_v25 = vmax.f32 %v6618_v2, %v6619_v39  ;;  %v6627_v54 = vmax.f32 %v6625_v19, %v6626_v6  ;;  %v6633_v48 = vrot.slane %v6632_v18, 4 }
 0x34f   : > { %v6596_v33 = vmax.f32 %v6594_v27, %v6595_v29  ;;  %v6603_v58 = vmax.f32 %v6601_v5, %v6602_v62  ;;  %v6609_v1 = vrot.slane %v6608_v36, 1  ;;  %v7319_v10 = vmax.f32 %v19355_v3, %v6589_v44  ;;  %v19459_v44 = vpop.f32.mrb[196].mxu0 }
 0x350   : > { %v6615_v20 = vmax.f32 %v6613_v7, %v6614_v59  ;;  %v6621_v38 = vrot.slane %v6620_v25, 2  ;;  %v6628_v13 = vrot.slane %v6627_v54, 2  ;;  %v6634_v51 = vmax.f32 %v6632_v18, %v6633_v48 }
 0x351   : > { %v6610_v24 = vmax.f32 %v6608_v36, %v6609_v1  ;;  %v7320_v12 = vmax.f32 %v19367_v63, %v6596_v33  ;;  %v7321_v22 = vmax.f32 %v19369_v26, %v6603_v58  ;;  %v16090_v34 = vpack.c.bf16 %v7319_v10, %v7319_v10  ;;  %v17335_v26 = vld [vmem:[%s22405_s7 + $0xd0] ss:$8 sps:$4 sm:$0xff]  }
 0x352   : > { %v6616_v0 = vrot.slane %v6615_v20, 1  ;;  %v6622_v45 = vmax.f32 %v6620_v25, %v6621_v38  ;;  %v6629_v56 = vmax.f32 %v6627_v54, %v6628_v13  ;;  %v6635_v31 = vrot.slane %v6634_v51, 2  ;;  %v19462_v25 = vpop.f32.mrb[197].mxu0 }
 0x353   : > { %v7322_v2 = vmax.f32 %v19378_v15, %v6610_v24  ;;  %v16091_v19 = vpack.c.bf16 %v7320_v12, %v7320_v12  ;;  %v16092_v43 = vpack.c.bf16 %v7321_v22, %v7321_v22  ;;  %v7639_v27 = vunpack.c.l.b16 %v16090_v34  ;;  %v17337_v15 = vld [vmem:[%s22405_s7 + $0xd4] ss:$8 sps:$4 sm:$0xff]  }
 0x354   : > { %v6617_v3 = vmax.f32 %v6615_v20, %v6616_v0  ;;  %v6623_v5 = vrot.slane %v6622_v45, 1  ;;  %v6630_v28 = vrot.slane %v6629_v56, 1  ;;  %v6636_v7 = vmax.f32 %v6634_v51, %v6635_v31  ;;  %9671 = vmatprep.subr.bf16.mxu0 %v17337_v15  ;;  %v7791_v0 = vld [vmem:[#allocation4 + $0x14] sm:$0x1] }
 0x355   : > { %v16093_v39 = vpack.c.bf16 %v7322_v2, %v7322_v2  ;;  %v7640_v6 = vunpack.c.l.b16 %v16091_v19  ;;  %v7641_v18 = vunpack.c.l.b16 %v16092_v43  ;;  %v5885_v63 = vrot.slane %v19423_v50, %v19177_v16  ;;  %9672 = vmatpush1.bf16.msra.mxu0 %v17335_v26 }
 0x356   : > { %v6624_v29 = vmax.f32 %v6622_v45, %v6623_v5  ;;  %v6631_v62 = vmax.f32 %v6629_v56, %v6630_v28  ;;  %v6637_v36 = vrot.slane %v6636_v7, 1  ;;  %v7323_v59 = vmax.f32 %v19383_v32, %v6617_v3 }
 0x357   : > { %v7642_v54 = vunpack.c.l.b16 %v16093_v39  ;;  %v7707_v48 = vsel %vm7695_vm13, %v7640_v6, %v7639_v27  ;;  %v5892_v33 = vrot.slane %v5878_v57, %v19177_v16  ;;  %v5893_v58 = vcombine.high %v5885_v63, %v5885_v63 }
 0x358   : > { %v7708_v1 = vsel %vm22417_vm14, %v7641_v18, %v7707_v48  ;;  %v6638_v10 = vmax.f32 %v6636_v7, %v6637_v36  ;;  %v7324_v20 = vmax.f32 %v19387_v61, %v6624_v29  ;;  %v7325_v38 = vmax.f32 %v19397_v14, %v6631_v62  ;;  %v7788_v18 = vld [vmem:[#allocation4 + $0x10] sm:$0xf] }
 0x359   : > { %v16094_v32 = vpack.c.bf16 %v7323_v59, %v7323_v59  ;;  %v7709_v13 = vsel %vm632_vm15, %v7642_v54, %v7708_v1  ;;  %v5894_v51 = vcombine.high %v5892_v33, %v5892_v33  ;;  %v6639_v24 = vsel %vm6414_vm12, %v5885_v63, -inf }
 0x35a   : > { %v7326_v12 = vmax.f32 %v19399_v23, %v6638_v10  ;;  %v16095_v50 = vpack.c.bf16 %v7324_v20, %v7324_v20  ;;  %v16096_v57 = vpack.c.bf16 %v7325_v38, %v7325_v38  ;;  %v6640_v22 = vrot.slane %v6639_v24, 4 }
 0x35b   : > { %v7643_v34 = vunpack.c.l.b16 %v16094_v32  ;;  %v6646_v45 = vsel %vm6414_vm12, %v5893_v58, -inf  ;;  %v6653_v61 = vsel %vm6414_vm12, %v5892_v33, -inf  ;;  %v6660_v14 = vsel %vm6414_vm12, %v5894_v51, -inf }
 0x35c   : > { %v7644_v56 = vunpack.c.l.b16 %v16095_v50  ;;  %v7645_v31 = vunpack.c.l.b16 %v16096_v57  ;;  %v16147_v2 = vpack.c.bf16 %v7326_v12, %v7326_v12  ;;  %v6641_v19 = vmax.f32 %v6639_v24, %v6640_v22 }
 0x35d   : > { %v7710_v43 = vsel %vm7701_vm0, %v7643_v34, %v7709_v13  ;;  %v6647_v27 = vrot.slane %v6646_v45, 4  ;;  %v6654_v3 = vrot.slane %v6653_v61, 4  ;;  %v6661_v23 = vrot.slane %v6660_v14, 4 }
 0x35e   : > { %v7711_v5 = vsel %vm7703_vm1, %v7644_v56, %v7710_v43  ;;  %v7792_v28 = vsel %vm18198_vm3, %v16147_v2, %v7791_v0  ;;  %v6642_v7 = vrot.slane %v6641_v19, 2  ;;  %v5687_v39 = vmax.f32 %v19433_v41, 0.0  ;;  %v19501_v2 = vld [vmem:[%s22404_s6] ss:$0 sm:$0xff] }
 0x35f   : > { %v7712_v6 = vsel %vm22416_vm2, %v7645_v31, %v7711_v5  ;;  %7793 = vst [vmem:[#allocation4 + $0x14] sm:$0x1] %v7792_v28  ;;  %v6648_v63 = vmax.f32 %v6646_v45, %v6647_v27  ;;  %v6655_v26 = vmax.f32 %v6653_v61, %v6654_v3  ;;  %v6662_v15 = vmax.f32 %v6660_v14, %v6661_v23  ;;  %v19494_v61 = vpop.f32.mrb[198].mxu0  ;;  %v17338_v43 = vld [vmem:[%s22405_s7 + $0xe0] ss:$8 sps:$4 sm:$0xff]  }
 0x360   : > { %v7751_v29 = vpack.c.b16 %v7712_v6, %v7712_v6  ;;  %v6643_v62 = vmax.f32 %v6641_v19, %v6642_v7  ;;  %v5895_v36 = vcombine.high %v5687_v39, %v5687_v39  ;;  %v5902_v59 = vrot.slane %v5687_v39, %v19177_v16  ;;  %v17340_v27 = vld [vmem:[%s22405_s7 + $0xe4] ss:$8 sps:$4 sm:$0xff]   ;;  %v19516_v7 = vpop.f32.mrb[199].mxu0 }
 0x361   : > { %v6649_v54 = vrot.slane %v6648_v63, 2  ;;  %v6656_v48 = vrot.slane %v6655_v26, 2  ;;  %v6663_v33 = vrot.slane %v6662_v15, 2  ;;  %v5617_v58 = vmul.f32 %v19158_v4, %v19417_v52  ;;  %v576_v4 = vld [vmem:[#allocation4 + $0x18] sm:$0x1]  ;;  %9673 = vmatprep.subr.bf16.mxu0 %v17340_v27 }
 0x362   : > { %v7789_v41 = vsel %vm18412_vm9, %v7751_v29, %v7788_v18  ;;  %v6644_v1 = vrot.slane %v6643_v62, 1  ;;  %v5909_v10 = vrot.slane %v5895_v36, %v19177_v16  ;;  %v5910_v20 = vcombine.high %v5902_v59, %v5902_v59  ;;  %v606_v52 = vld [vmem:[#allocation4 + $0x1c] sm:$0x1]  ;;  %9674 = vmatpush1.bf16.msra.mxu0 %v17338_v43 }
 0x363   : > { %7790 = vst [vmem:[#allocation4 + $0x10] sm:$0xf] %v7789_v41  ;;  %v6650_v38 = vmax.f32 %v6648_v63, %v6649_v54  ;;  %v6657_v32 = vmax.f32 %v6655_v26, %v6656_v48  ;;  %v6664_v13 = vmax.f32 %v6662_v15, %v6663_v33  ;;  %v6667_v51 = vsel %vm6414_vm12, %v5902_v59, -inf }
 0x364   : > { %v19491_v24 = vmax.f32 %v6643_v62, %v6644_v1  ;;  %v5911_v12 = vcombine.high %v5909_v10, %v5909_v10  ;;  %v6668_v50 = vrot.slane %v6667_v51, 4  ;;  %v6674_v57 = vsel %vm6414_vm12, %v5910_v20, -inf  ;;  %v22506_v62 = vld [vmem:[#allocation13_spill] sm:$0xff]  ;;  %v22507_v1 = vld [vmem:[#allocation32_spill] sm:$0xff] }
 0x365   : > { %v6651_v22 = vrot.slane %v6650_v38, 1  ;;  %v6658_v34 = vrot.slane %v6657_v32, 1  ;;  %v6665_v0 = vrot.slane %v6664_v13, 1  ;;  %v6675_v45 = vrot.slane %v6674_v57, 4 }
 0x366   : > { %v6669_v14 = vmax.f32 %v6667_v51, %v6668_v50  ;;  %v6681_v56 = vsel %vm6414_vm12, %v5909_v10, -inf  ;;  %v6688_v31 = vsel %vm6414_vm12, %v5911_v12, -inf  ;;  %v5656_v19 = vadd.f32 %v19501_v2, %v5617_v58 }
 0x367   : > { %v19510_v3 = vmax.f32 %v6650_v38, %v6651_v22  ;;  %v19512_v23 = vmax.f32 %v6657_v32, %v6658_v34  ;;  %v19514_v5 = vmax.f32 %v6664_v13, %v6665_v0  ;;  %v6676_v28 = vmax.f32 %v6674_v57, %v6675_v45  ;;  %v22508_v57 = vld [vmem:[#allocation37_spill] sm:$0xff] }
 0x368   : > { %v6670_v39 = vrot.slane %v6669_v14, 2  ;;  %v6682_v6 = vrot.slane %v6681_v56, 4  ;;  %v6689_v18 = vrot.slane %v6688_v31, 4  ;;  %v5688_v63 = vmax.f32 %v5656_v19, 0.0 }
 0x369   : > { %v6677_v26 = vrot.slane %v6676_v28, 2  ;;  %v577_v15 = vsel %vm18198_vm3, 0, %v576_v4  ;;  %v607_v29 = vsel %vm18236_vm5, 0, %v606_v52  ;;  %v16566_v36 = vadd.f32 %v22506_v62, %v19296_v53 }
 0x36a   : > { %v6671_v59 = vmax.f32 %v6669_v14, %v6670_v39  ;;  %v6683_v54 = vmax.f32 %v6681_v56, %v6682_v6  ;;  %v6690_v48 = vmax.f32 %v6688_v31, %v6689_v18  ;;  %v5912_v33 = vcombine.high %v5688_v63, %v5688_v63  ;;  %578 = vst [vmem:[#allocation4 + $0x18] sm:$0x1] %v577_v15  ;;  %v19541_v39 = vld [vmem:[%s22403_s5] ss:$0 sm:$0xff] }
 0x36b   : > { %608 = vst [vmem:[#allocation4 + $0x1c] sm:$0x1] %v607_v29  ;;  %v6678_v58 = vmax.f32 %v6676_v28, %v6677_v26  ;;  %v5919_v41 = vrot.slane %v5688_v63, %v19177_v16  ;;  %v5356_v10 = vadd.f32 %v16566_v36, %v22507_v1  ;;  %v16569_v20 = vadd.f32 %v19305_v60, %v19303_v8  ;;  %v22509_v18 = vld [vmem:[#allocation11_spill] sm:$0xff] }
 0x36c   : > { %v6672_v38 = vrot.slane %v6671_v59, 1  ;;  %v6684_v32 = vrot.slane %v6683_v54, 2  ;;  %v6691_v13 = vrot.slane %v6690_v48, 2  ;;  %v5926_v53 = vrot.slane %v5912_v33, %v19177_v16 }
 0x36d   : > { %v6679_v51 = vrot.slane %v6678_v58, 1  ;;  %v5927_v12 = vcombine.high %v5919_v41, %v5919_v41  ;;  %v6695_v50 = vsel %vm6414_vm12, %v5919_v41, -inf  ;;  %v5517_v4 = vadd.f32 %v22508_v57, %v5356_v10  ;;  %v17343_v41 = vld [vmem:[%s22405_s7 + $0xf4] ss:$8 sps:$4 sm:$0xff]  }
 0x36e   : > { %v19531_v52 = vmax.f32 %v6671_v59, %v6672_v38  ;;  %v6685_v22 = vmax.f32 %v6683_v54, %v6684_v32  ;;  %v6692_v34 = vmax.f32 %v6690_v48, %v6691_v13  ;;  %v5928_v0 = vcombine.high %v5926_v53, %v5926_v53  ;;  %v22510_v48 = vld [vmem:[#allocation39_spill] sm:$0xff]  ;;  %v22511_v38 = vld [vmem:[#allocation52_spill] sm:$0xff]  ;;  %9675 = vmatprep.subr.bf16.mxu0 %v17343_v41 }
 0x36f   : > { %v19533_v45 = vmax.f32 %v6678_v58, %v6679_v51  ;;  %v6696_v14 = vrot.slane %v6695_v50, 4  ;;  %v6702_v8 = vsel %vm6414_vm12, %v5927_v12, -inf  ;;  %v6709_v60 = vsel %vm6414_vm12, %v5926_v53, -inf  ;;  %v17341_v58 = vld [vmem:[%s22405_s7 + $0xf0] ss:$8 sps:$4 sm:$0xff]   ;;  %v22512_v32 = vld [vmem:[#allocation15_spill] sm:$0xff] }
 0x370   : > { %v6686_v56 = vrot.slane %v6685_v22, 1  ;;  %v6693_v31 = vrot.slane %v6692_v34, 1  ;;  %v6703_v19 = vrot.slane %v6702_v8, 4  ;;  %v6710_v43 = vrot.slane %v6709_v60, 4  ;;  %v19563_v53 = vpop.f32.mrb[200].mxu0  ;;  %9676 = vmatpush1.bf16.msra.mxu0 %v17341_v58 }
 0x371   : > { %v6697_v27 = vmax.f32 %v6695_v50, %v6696_v14  ;;  %v6716_v28 = vsel %vm6414_vm12, %v5928_v0, -inf  ;;  %v5618_v6 = vmul.f32 %v19541_v39, %v5517_v4  ;;  %v5361_v63 = vadd.f32 %v16569_v20, %v22509_v18  ;;  %v19566_v4 = vpop.f32.mrb[201].mxu0  ;;  %v22513_v0 = vld [vmem:[#allocation12_spill] sm:$0xff] }
 0x372   : > { %v19545_v26 = vmax.f32 %v6685_v22, %v6686_v56  ;;  %v19547_v15 = vmax.f32 %v6692_v34, %v6693_v31  ;;  %v6704_v29 = vmax.f32 %v6702_v8, %v6703_v19  ;;  %v6711_v62 = vmax.f32 %v6709_v60, %v6710_v43 }
 0x373   : > { %v6698_v36 = vrot.slane %v6697_v27, 2  ;;  %v6717_v59 = vrot.slane %v6716_v28, 4  ;;  %v5657_v54 = vadd.f32 %v19501_v2, %v5618_v6  ;;  %v5522_v33 = vadd.f32 %v22510_v48, %v5361_v63 }
 0x374   : > { %v6705_v1 = vrot.slane %v6704_v29, 2  ;;  %v6712_v10 = vrot.slane %v6711_v62, 2  ;;  %v16572_v20 = vadd.f32 %v19311_v40, %v19309_v42  ;;  %v19561_v13 = vadd.f32 %v22512_v32, %v22511_v38  ;;  %v7831_v40 = vld [vmem:[#allocation4 + $0x8] sm:$0xf] }
 0x375   : > { %v6699_v51 = vmax.f32 %v6697_v27, %v6698_v36  ;;  %v6718_v12 = vmax.f32 %v6716_v28, %v6717_v59  ;;  %v5689_v50 = vmax.f32 %v5657_v54, 0.0  ;;  %v5619_v57 = vmul.f32 %v19541_v39, %v5522_v33  ;;  %7839 = vst [vmem:[#allocation5 + $0x24] sm:$0xf] %v7831_v40  ;;  %v22514_v28 = vld [vmem:[#allocation41_spill] sm:$0xff] }
 0x376   : > { %v6706_v22 = vmax.f32 %v6704_v29, %v6705_v1  ;;  %v6713_v34 = vmax.f32 %v6711_v62, %v6712_v10  ;;  %v5364_v14 = vadd.f32 %v16572_v20, %v22513_v0  ;;  %v19571_v42 = vadd.f32 %v19332_v46, %v19327_v47 }
 0x377   : > { %v6700_v8 = vrot.slane %v6699_v51, 1  ;;  %v6719_v60 = vrot.slane %v6718_v12, 2  ;;  %v5929_v56 = vcombine.high %v5689_v50, %v5689_v50  ;;  %v5936_v31 = vrot.slane %v5689_v50, %v19177_v16 }
 0x378   : > { %v6707_v19 = vrot.slane %v6706_v22, 1  ;;  %v6714_v43 = vrot.slane %v6713_v34, 1  ;;  %v5658_v27 = vadd.f32 %v19501_v2, %v5619_v57  ;;  %v19576_v6 = vadd.f32 %v22514_v28, %v5364_v14 }
 0x379   : > { %v6701_v18 = vmax.f32 %v6699_v51, %v6700_v8  ;;  %v6720_v63 = vmax.f32 %v6718_v12, %v6719_v60  ;;  %v5943_v47 = vrot.slane %v5929_v56, %v19177_v16  ;;  %v5944_v46 = vcombine.high %v5936_v31, %v5936_v31 }
 0x37a   : > { %v6708_v29 = vmax.f32 %v6706_v22, %v6707_v19  ;;  %v6715_v62 = vmax.f32 %v6713_v34, %v6714_v43  ;;  %v6723_v36 = vsel %vm6414_vm12, %v5936_v31, -inf  ;;  %v5690_v59 = vmax.f32 %v5658_v27, 0.0 }
 0x37b   : > { %v6721_v54 = vrot.slane %v6720_v63, 1  ;;  %v7327_v48 = vmax.f32 %v19491_v24, %v6701_v18  ;;  %v5945_v33 = vcombine.high %v5943_v47, %v5943_v47  ;;  %v6724_v58 = vrot.slane %v6723_v36, 4 }
 0x37c   : > { %v7328_v41 = vmax.f32 %v19510_v3, %v6708_v29  ;;  %v7329_v1 = vmax.f32 %v19512_v23, %v6715_v62  ;;  %v6730_v10 = vsel %vm6414_vm12, %v5944_v46, -inf  ;;  %v6737_v20 = vsel %vm6414_vm12, %v5943_v47, -inf }
 0x37d   : > { %v6722_v38 = vmax.f32 %v6720_v63, %v6721_v54  ;;  %v16098_v32 = vpack.c.bf16 %v7327_v48, %v7327_v48  ;;  %v6725_v51 = vmax.f32 %v6723_v36, %v6724_v58  ;;  %v6731_v12 = vrot.slane %v6730_v10, 4 }
 0x37e   : > { %v16099_v50 = vpack.c.bf16 %v7328_v41, %v7328_v41  ;;  %v16100_v57 = vpack.c.bf16 %v7329_v1, %v7329_v1  ;;  %v6738_v22 = vrot.slane %v6737_v20, 4  ;;  %v6744_v34 = vsel %vm6414_vm12, %v5945_v33, -inf }
 0x37f   : > { %v7330_v24 = vmax.f32 %v19514_v5, %v6722_v38  ;;  %v7647_v0 = vunpack.c.l.b16 %v16098_v32  ;;  %v6726_v14 = vrot.slane %v6725_v51, 2  ;;  %v6732_v3 = vmax.f32 %v6730_v10, %v6731_v12  ;;  %v19593_v32 = vpop.f32.mrb[202].mxu0 }
 0x380   : > { %v7648_v40 = vunpack.c.l.b16 %v16099_v50  ;;  %v7649_v23 = vunpack.c.l.b16 %v16100_v57  ;;  %v6739_v8 = vmax.f32 %v6737_v20, %v6738_v22  ;;  %v6745_v60 = vrot.slane %v6744_v34, 4  ;;  %v19598_v22 = vpop.f32.mrb[203].mxu0 }
 0x381   : > { %v16101_v56 = vpack.c.bf16 %v7330_v24, %v7330_v24  ;;  %v6727_v31 = vmax.f32 %v6725_v51, %v6726_v14  ;;  %v6733_v19 = vrot.slane %v6732_v3, 2  ;;  %v5946_v43 = vcombine.high %v5690_v59, %v5690_v59 }
 0x382   : > { %v7713_v27 = vsel %vm7695_vm13, %v7648_v40, %v7647_v0  ;;  %v6740_v28 = vrot.slane %v6739_v8, 2  ;;  %v6746_v18 = vmax.f32 %v6744_v34, %v6745_v60  ;;  %v5953_v63 = vrot.slane %v5690_v59, %v19177_v16 }
 0x383   : > { %v7650_v47 = vunpack.c.l.b16 %v16101_v56  ;;  %v7714_v5 = vsel %vm22417_vm14, %v7649_v23, %v7713_v27  ;;  %v6728_v46 = vrot.slane %v6727_v31, 1  ;;  %v6734_v29 = vmax.f32 %v6732_v3, %v6733_v19 }
 0x384   : > { %v6741_v62 = vmax.f32 %v6739_v8, %v6740_v28  ;;  %v6747_v36 = vrot.slane %v6746_v18, 2  ;;  %v5960_v54 = vrot.slane %v5946_v43, %v19177_v16  ;;  %v5961_v48 = vcombine.high %v5953_v63, %v5953_v63 }
 0x385   : > { %v6729_v33 = vmax.f32 %v6727_v31, %v6728_v46  ;;  %v6735_v58 = vrot.slane %v6734_v29, 1  ;;  %v7715_v41 = vsel %vm632_vm15, %v7650_v47, %v7714_v5  ;;  %v6751_v1 = vsel %vm6414_vm12, %v5953_v63, -inf }
 0x386   : > { %v6742_v10 = vrot.slane %v6741_v62, 1  ;;  %v6748_v20 = vmax.f32 %v6746_v18, %v6747_v36  ;;  %v5962_v38 = vcombine.high %v5960_v54, %v5960_v54  ;;  %v6752_v59 = vrot.slane %v6751_v1, 4 }
 0x387   : > { %v6736_v51 = vmax.f32 %v6734_v29, %v6735_v58  ;;  %v7331_v12 = vmax.f32 %v19531_v52, %v6729_v33  ;;  %v6758_v50 = vsel %vm6414_vm12, %v5961_v48, -inf  ;;  %v6765_v57 = vsel %vm6414_vm12, %v5960_v54, -inf  ;;  %v7797_v29 = vld [vmem:[#allocation4 + $0x1c] sm:$0x1] }
 0x388   : > { %v6743_v34 = vmax.f32 %v6741_v62, %v6742_v10  ;;  %v6749_v24 = vrot.slane %v6748_v20, 1  ;;  %v6753_v0 = vmax.f32 %v6751_v1, %v6752_v59  ;;  %v6759_v14 = vrot.slane %v6758_v50, 4 }
 0x389   : > { %v7332_v3 = vmax.f32 %v19533_v45, %v6736_v51  ;;  %v16102_v40 = vpack.c.bf16 %v7331_v12, %v7331_v12  ;;  %v6766_v23 = vrot.slane %v6765_v57, 4  ;;  %v6772_v8 = vsel %vm6414_vm12, %v5962_v38, -inf  ;;  %v609_v38 = vld [vmem:[#allocation4 + $0x24] sm:$0x1]  ;;  %v7794_v51 = vld [vmem:[#allocation4 + $0x18] sm:$0xf] }
 0x38a   : > { %v6750_v60 = vmax.f32 %v6748_v20, %v6749_v24  ;;  %v7333_v56 = vmax.f32 %v19545_v26, %v6743_v34  ;;  %v6754_v52 = vrot.slane %v6753_v0, 2  ;;  %v6760_v31 = vmax.f32 %v6758_v50, %v6759_v14  ;;  %v579_v20 = vld [vmem:[#allocation4 + $0x20] sm:$0x1] }
 0x38b   : > { %v16103_v19 = vpack.c.bf16 %v7332_v3, %v7332_v3  ;;  %v7651_v43 = vunpack.c.l.b16 %v16102_v40  ;;  %v6767_v27 = vmax.f32 %v6765_v57, %v6766_v23  ;;  %v6773_v28 = vrot.slane %v6772_v8, 4  ;;  %v19622_v23 = vpop.f32.mrb[204].mxu0 }
 0x38c   : > { %v7334_v18 = vmax.f32 %v19547_v15, %v6750_v60  ;;  %v16104_v63 = vpack.c.bf16 %v7333_v56, %v7333_v56  ;;  %v6755_v47 = vmax.f32 %v6753_v0, %v6754_v52  ;;  %v6761_v5 = vrot.slane %v6760_v31, 2 }
 0x38d   : > { %v7652_v46 = vunpack.c.l.b16 %v16103_v19  ;;  %v7716_v45 = vsel %vm7701_vm0, %v7651_v43, %v7715_v41  ;;  %v6768_v62 = vrot.slane %v6767_v27, 2  ;;  %v6774_v36 = vmax.f32 %v6772_v8, %v6773_v28  ;;  %v22516_v19 = vld [vmem:[#allocation55_spill] sm:$0xff]  ;;  %v22517_v43 = vld [vmem:[#allocation16_spill] sm:$0xff] }
 0x38e   : > { %v7653_v54 = vunpack.c.l.b16 %v16104_v63  ;;  %v16148_v48 = vpack.c.bf16 %v7334_v18, %v7334_v18  ;;  %v6756_v26 = vrot.slane %v6755_v47, 1  ;;  %v6762_v33 = vmax.f32 %v6760_v31, %v6761_v5  ;;  %v19628_v31 = vpop.f32.mrb[205].mxu0  ;;  %v22518_v18 = vld [vmem:[#allocation56_spill] sm:$0xff]  ;;  %v22519_v63 = vld [vmem:[#allocation17_spill] sm:$0xff] }
 0x38f   : > { %v7717_v58 = vsel %vm7703_vm1, %v7652_v46, %v7716_v45  ;;  %v6769_v1 = vmax.f32 %v6767_v27, %v6768_v62  ;;  %v6775_v10 = vrot.slane %v6774_v36, 2  ;;  %v5620_v15 = vmul.f32 %v19541_v39, %v19576_v6 }
 0x390   : > { %v7718_v59 = vsel %vm22416_vm2, %v7653_v54, %v7717_v58  ;;  %v7798_v41 = vsel %vm18198_vm3, %v16148_v48, %v7797_v29  ;;  %v19611_v12 = vmax.f32 %v6755_v47, %v6756_v26  ;;  %v6763_v50 = vrot.slane %v6762_v33, 1  ;;  %v22520_v54 = vld [vmem:[#allocation57_spill] sm:$0xff]  ;;  %v22521_v48 = vld [vmem:[#allocation18_spill] sm:$0xff] }
 0x391   : > { %v7753_v57 = vpack.c.b16 %v7718_v59, %v7718_v59  ;;  %7799 = vst [vmem:[#allocation4 + $0x1c] sm:$0x1] %v7798_v41  ;;  %v6770_v34 = vrot.slane %v6769_v1, 1  ;;  %v6776_v24 = vmax.f32 %v6774_v36, %v6775_v10  ;;  %v5659_v0 = vadd.f32 %v19501_v2, %v5620_v15  ;;  %v22523_v41 = vld [vmem:[#allocation43_spill] sm:$0xff] }
 0x392   : > { %v19614_v14 = vmax.f32 %v6762_v33, %v6763_v50  ;;  %v5369_v6 = vadd.f32 %v19571_v42, %v19561_v13  ;;  %v580_v3 = vsel %vm18198_vm3, 0, %v579_v20  ;;  %v610_v40 = vsel %vm18236_vm5, 0, %v609_v38  ;;  %v22515_v13 = vld [vmem:[#allocation38_spill] sm:$0xff]  ;;  %v22522_v20 = vld [vmem:[#allocation40_spill] sm:$0xff] }
 0x393   : > { %v7795_v8 = vsel %vm18412_vm9, %v7753_v57, %v7794_v51  ;;  %v19626_v60 = vmax.f32 %v6769_v1, %v6770_v34  ;;  %v6777_v56 = vrot.slane %v6776_v24, 1  ;;  %v5691_v52 = vmax.f32 %v5659_v0, 0.0  ;;  %581 = vst [vmem:[#allocation4 + $0x20] sm:$0x1] %v580_v3  ;;  %611 = vst [vmem:[#allocation4 + $0x24] sm:$0x1] %v610_v40 }
 0x394   : > { %7796 = vst [vmem:[#allocation4 + $0x18] sm:$0xf] %v7795_v8  ;;  %v5530_v42 = vadd.f32 %v22515_v13, %v5369_v6  ;;  %v5211_v27 = vadd.f32 %v22517_v43, %v22516_v19  ;;  %v16578_v28 = vadd.f32 %v19365_v17, %v19357_v30  ;;  %v5216_v47 = vadd.f32 %v22519_v63, %v22518_v18  ;;  %v22524_v3 = vld [vmem:[#allocation45_spill] sm:$0xff] }
 0x395   : > { %v19637_v5 = vmax.f32 %v6776_v24, %v6777_v56  ;;  %v5963_v46 = vcombine.high %v5691_v52, %v5691_v52  ;;  %v5970_v45 = vrot.slane %v5691_v52, %v19177_v16  ;;  %v16581_v29 = vadd.f32 %v19419_v49, %v19412_v11 }
 0x396   : > { %v5621_v62 = vmul.f32 %v19541_v39, %v5530_v42  ;;  %v5372_v36 = vadd.f32 %v16578_v28, %v5211_v27  ;;  %v5219_v26 = vadd.f32 %v22521_v48, %v22520_v54  ;;  %v16584_v30 = vadd.f32 %v19438_v9, %v19425_v55 }
 0x397   : > { %v5977_v17 = vrot.slane %v5963_v46, %v19177_v16  ;;  %v5978_v33 = vcombine.high %v5970_v45, %v5970_v45  ;;  %v6779_v58 = vsel %vm6414_vm12, %v5970_v45, -inf  ;;  %v5377_v1 = vadd.f32 %v16581_v29, %v5216_v47  ;;  %v19663_v46 = vpop.f32.mrb[206].mxu0 }
 0x398   : > { %v6780_v10 = vrot.slane %v6779_v58, 4  ;;  %v5660_v15 = vadd.f32 %v19501_v2, %v5621_v62  ;;  %v5533_v11 = vadd.f32 %v22522_v20, %v5372_v36  ;;  %v5380_v49 = vadd.f32 %v16584_v30, %v5219_v26  ;;  %v19667_v54 = vpop.f32.mrb[207].mxu0 }
 0x399   : > { %v5979_v38 = vcombine.high %v5977_v17, %v5977_v17  ;;  %v6786_v59 = vsel %vm6414_vm12, %v5978_v33, -inf  ;;  %v6793_v51 = vsel %vm6414_vm12, %v5977_v17, -inf  ;;  %v5538_v50 = vadd.f32 %v22523_v41, %v5377_v1 }
 0x39a   : > { %v6781_v55 = vmax.f32 %v6779_v58, %v6780_v10  ;;  %v6787_v9 = vrot.slane %v6786_v59, 4  ;;  %v6794_v57 = vrot.slane %v6793_v51, 4  ;;  %v5692_v34 = vmax.f32 %v5660_v15, 0.0 }
 0x39b   : > { %v6800_v24 = vsel %vm6414_vm12, %v5979_v38, -inf  ;;  %v5622_v0 = vmul.f32 %v19541_v39, %v5533_v11  ;;  %v5623_v6 = vmul.f32 %v19541_v39, %v5538_v50  ;;  %v19658_v40 = vadd.f32 %v22524_v3, %v5380_v49 }
 0x39c   : > { %v6782_v8 = vrot.slane %v6781_v55, 2  ;;  %v6788_v56 = vmax.f32 %v6786_v59, %v6787_v9  ;;  %v6795_v52 = vmax.f32 %v6793_v51, %v6794_v57  ;;  %v6801_v13 = vrot.slane %v6800_v24, 4 }
 0x39d   : > { %v5980_v42 = vcombine.high %v5692_v34, %v5692_v34  ;;  %v5987_v19 = vrot.slane %v5692_v34, %v19177_v16  ;;  %v5661_v43 = vadd.f32 %v19501_v2, %v5622_v0  ;;  %v5662_v27 = vadd.f32 %v19501_v2, %v5623_v6 }
 0x39e   : > { %v6783_v28 = vmax.f32 %v6781_v55, %v6782_v8  ;;  %v6789_v18 = vrot.slane %v6788_v56, 2  ;;  %v6796_v63 = vrot.slane %v6795_v52, 2  ;;  %v6802_v47 = vmax.f32 %v6800_v24, %v6801_v13 }
 0x39f   : > { %v5994_v45 = vrot.slane %v5980_v42, %v19177_v16  ;;  %v5995_v29 = vcombine.high %v5987_v19, %v5987_v19  ;;  %v6807_v62 = vsel %vm6414_vm12, %v5987_v19, -inf  ;;  %v5693_v36 = vmax.f32 %v5661_v43, 0.0 }
 0x3a0   : > { %v6784_v48 = vrot.slane %v6783_v28, 1  ;;  %v6790_v26 = vmax.f32 %v6788_v56, %v6789_v18  ;;  %v6797_v30 = vmax.f32 %v6795_v52, %v6796_v63  ;;  %v6803_v17 = vrot.slane %v6802_v47, 2 }
 0x3a1   : > { %v5996_v33 = vcombine.high %v5994_v45, %v5994_v45  ;;  %v6808_v58 = vrot.slane %v6807_v62, 4  ;;  %v6814_v1 = vsel %vm6414_vm12, %v5995_v29, -inf  ;;  %v6821_v10 = vsel %vm6414_vm12, %v5994_v45, -inf }
 0x3a2   : > { %v19671_v15 = vmax.f32 %v6783_v28, %v6784_v48  ;;  %v6791_v20 = vrot.slane %v6790_v26, 1  ;;  %v6798_v11 = vrot.slane %v6797_v30, 1  ;;  %v6804_v49 = vmax.f32 %v6802_v47, %v6803_v17 }
 0x3a3   : > { %v6809_v38 = vmax.f32 %v6807_v62, %v6808_v58  ;;  %v6815_v59 = vrot.slane %v6814_v1, 4  ;;  %v6822_v51 = vrot.slane %v6821_v10, 4  ;;  %v6828_v41 = vsel %vm6414_vm12, %v5996_v33, -inf }
 0x3a4   : > { %v19674_v50 = vmax.f32 %v6790_v26, %v6791_v20  ;;  %v19676_v55 = vmax.f32 %v6797_v30, %v6798_v11  ;;  %v6805_v9 = vrot.slane %v6804_v49, 1  ;;  %v6829_v57 = vrot.slane %v6828_v41, 4 }
 0x3a5   : > { %v6810_v34 = vrot.slane %v6809_v38, 2  ;;  %v6816_v24 = vmax.f32 %v6814_v1, %v6815_v59  ;;  %v6823_v0 = vmax.f32 %v6821_v10, %v6822_v51  ;;  %v5997_v6 = vcombine.high %v5693_v36, %v5693_v36 }
 0x3a6   : > { %v19678_v3 = vmax.f32 %v6804_v49, %v6805_v9  ;;  %v6830_v8 = vmax.f32 %v6828_v41, %v6829_v57  ;;  %v6004_v56 = vrot.slane %v5693_v36, %v19177_v16  ;;  %v19681_v52 = vmax.f32 %v5662_v27, 0.0 }
 0x3a7   : > { %v6811_v13 = vmax.f32 %v6809_v38, %v6810_v34  ;;  %v6817_v42 = vrot.slane %v6816_v24, 2  ;;  %v6824_v19 = vrot.slane %v6823_v0, 2  ;;  %v6011_v43 = vrot.slane %v5997_v6, %v19177_v16 }
 0x3a8   : > { %v6831_v28 = vrot.slane %v6830_v8, 2  ;;  %v6012_v18 = vcombine.high %v6004_v56, %v6004_v56  ;;  %v6835_v63 = vsel %vm6414_vm12, %v6004_v56, -inf  ;;  %v6014_v47 = vcombine.high %v19681_v52, %v19681_v52 }
 0x3a9   : > { %v6812_v45 = vrot.slane %v6811_v13, 1  ;;  %v6818_v29 = vmax.f32 %v6816_v24, %v6817_v42  ;;  %v6825_v62 = vmax.f32 %v6823_v0, %v6824_v19  ;;  %v6013_v48 = vcombine.high %v6011_v43, %v6011_v43 }
 0x3aa   : > { %v6832_v26 = vmax.f32 %v6830_v8, %v6831_v28  ;;  %v6836_v36 = vrot.slane %v6835_v63, 4  ;;  %v6842_v27 = vsel %vm6414_vm12, %v6012_v18, -inf  ;;  %v6849_v30 = vsel %vm6414_vm12, %v6011_v43, -inf }
 0x3ab   : > { %v6813_v17 = vmax.f32 %v6811_v13, %v6812_v45  ;;  %v6819_v33 = vrot.slane %v6818_v29, 1  ;;  %v6826_v58 = vrot.slane %v6825_v62, 1  ;;  %v6843_v1 = vrot.slane %v6842_v27, 4  ;;  %v19693_v13 = vpop.f32.mrb[208].mxu0 }
 0x3ac   : > { %v6833_v10 = vrot.slane %v6832_v26, 1  ;;  %v6837_v20 = vmax.f32 %v6835_v63, %v6836_v36  ;;  %v6850_v11 = vrot.slane %v6849_v30, 4  ;;  %v6856_v49 = vsel %vm6414_vm12, %v6013_v48, -inf  ;;  %v19696_v18 = vpop.f32.mrb[209].mxu0 }
 0x3ad   : > { %v6820_v38 = vmax.f32 %v6818_v29, %v6819_v33  ;;  %v6827_v59 = vmax.f32 %v6825_v62, %v6826_v58  ;;  %v7335_v51 = vmax.f32 %v19611_v12, %v6813_v17  ;;  %v6844_v41 = vmax.f32 %v6842_v27, %v6843_v1  ;;  %v19698_v62 = vpop.f32.mrb[210].mxu0 }
 0x3ae   : > { %v6834_v9 = vmax.f32 %v6832_v26, %v6833_v10  ;;  %v6838_v57 = vrot.slane %v6837_v20, 2  ;;  %v6851_v34 = vmax.f32 %v6849_v30, %v6850_v11  ;;  %v6857_v24 = vrot.slane %v6856_v49, 4  ;;  %v19700_v36 = vpop.f32.mrb[211].mxu0 }
 0x3af   : > { %v7336_v0 = vmax.f32 %v19614_v14, %v6820_v38  ;;  %v7337_v6 = vmax.f32 %v19626_v60, %v6827_v59  ;;  %v16106_v8 = vpack.c.bf16 %v7335_v51, %v7335_v51  ;;  %v6845_v56 = vrot.slane %v6844_v41, 2 }
 0x3b0   : > { %v7338_v42 = vmax.f32 %v19637_v5, %v6834_v9  ;;  %v6839_v19 = vmax.f32 %v6837_v20, %v6838_v57  ;;  %v6852_v43 = vrot.slane %v6851_v34, 2  ;;  %v6858_v28 = vmax.f32 %v6856_v49, %v6857_v24 }
 0x3b1   : > { %v16107_v12 = vpack.c.bf16 %v7336_v0, %v7336_v0  ;;  %v16108_v63 = vpack.c.bf16 %v7337_v6, %v7337_v6  ;;  %v7655_v45 = vunpack.c.l.b16 %v16106_v8  ;;  %v6846_v29 = vmax.f32 %v6844_v41, %v6845_v56 }
 0x3b2   : > { %v16109_v14 = vpack.c.bf16 %v7338_v42, %v7338_v42  ;;  %v6840_v48 = vrot.slane %v6839_v19, 1  ;;  %v6853_v60 = vmax.f32 %v6851_v34, %v6852_v43  ;;  %v6859_v26 = vrot.slane %v6858_v28, 2 }
 0x3b3   : > { %v7656_v27 = vunpack.c.l.b16 %v16107_v12  ;;  %v7657_v30 = vunpack.c.l.b16 %v16108_v63  ;;  %v6847_v5 = vrot.slane %v6846_v29, 1  ;;  %v6021_v17 = vrot.slane %v19681_v52, %v19177_v16 }
 0x3b4   : > { %v7658_v33 = vunpack.c.l.b16 %v16109_v14  ;;  %v6841_v58 = vmax.f32 %v6839_v19, %v6840_v48  ;;  %v6854_v1 = vrot.slane %v6853_v60, 1  ;;  %v6860_v10 = vmax.f32 %v6858_v28, %v6859_v26 }
 0x3b5   : > { %v7719_v20 = vsel %vm7695_vm13, %v7656_v27, %v7655_v45  ;;  %v6848_v11 = vmax.f32 %v6846_v29, %v6847_v5  ;;  %v6028_v49 = vrot.slane %v6014_v47, %v19177_v16  ;;  %v6029_v38 = vcombine.high %v6021_v17, %v6021_v17  ;;  %v7803_v45 = vld [vmem:[#allocation4 + $0x24] sm:$0x1] }
 0x3b6   : > { %v7720_v59 = vsel %vm22417_vm14, %v7657_v30, %v7719_v20  ;;  %v6855_v51 = vmax.f32 %v6853_v60, %v6854_v1  ;;  %v6861_v41 = vrot.slane %v6860_v10, 1  ;;  %v7339_v9 = vmax.f32 %v19671_v15, %v6841_v58  ;;  %v19718_v58 = vpop.f32.mrb[212].mxu0  ;;  %v7800_v1 = vld [vmem:[#allocation4 + $0x20] sm:$0xf] }
 0x3b7   : > { %v7340_v57 = vmax.f32 %v19674_v50, %v6848_v11  ;;  %v7721_v52 = vsel %vm632_vm15, %v7658_v33, %v7720_v59  ;;  %v6030_v34 = vcombine.high %v6028_v49, %v6028_v49  ;;  %v6863_v24 = vsel %vm6414_vm12, %v6021_v17, -inf }
 0x3b8   : > { %v6862_v0 = vmax.f32 %v6860_v10, %v6861_v41  ;;  %v7341_v6 = vmax.f32 %v19676_v55, %v6855_v51  ;;  %v16110_v8 = vpack.c.bf16 %v7339_v9, %v7339_v9  ;;  %v6864_v56 = vrot.slane %v6863_v24, 4  ;;  %v582_v9 = vld [vmem:[#allocation4 + $0x28] sm:$0x1] }
 0x3b9   : > { %v16111_v47 = vpack.c.bf16 %v7340_v57, %v7340_v57  ;;  %v6870_v42 = vsel %vm6414_vm12, %v6029_v38, -inf  ;;  %v6877_v19 = vsel %vm6414_vm12, %v6028_v49, -inf  ;;  %v6884_v43 = vsel %vm6414_vm12, %v6030_v34, -inf  ;;  %v19725_v49 = vpop.f32.mrb[213].mxu0  ;;  %v22525_v34 = vld [vmem:[#allocation58_spill] sm:$0xff] }
 0x3ba   : > { %v7342_v15 = vmax.f32 %v19678_v3, %v6862_v0  ;;  %v16112_v50 = vpack.c.bf16 %v7341_v6, %v7341_v6  ;;  %v7659_v28 = vunpack.c.l.b16 %v16110_v8  ;;  %v6865_v12 = vmax.f32 %v6863_v24, %v6864_v56  ;;  %v22526_v24 = vld [vmem:[#allocation19_spill] sm:$0xff] }
 0x3bb   : > { %v7660_v63 = vunpack.c.l.b16 %v16111_v47  ;;  %v6871_v29 = vrot.slane %v6870_v42, 4  ;;  %v6878_v14 = vrot.slane %v6877_v19, 4  ;;  %v6885_v48 = vrot.slane %v6884_v43, 4  ;;  %v612_v8 = vld [vmem:[#allocation4 + $0x2c] sm:$0x1] }
 0x3bc   : > { %v7661_v55 = vunpack.c.l.b16 %v16112_v50  ;;  %v7722_v60 = vsel %vm7701_vm0, %v7659_v28, %v7721_v52  ;;  %v16149_v26 = vpack.c.bf16 %v7342_v15, %v7342_v15  ;;  %v6866_v27 = vrot.slane %v6865_v12, 2 }
 0x3bd   : > { %v7723_v30 = vsel %vm7703_vm1, %v7660_v63, %v7722_v60  ;;  %v6872_v5 = vmax.f32 %v6870_v42, %v6871_v29  ;;  %v6879_v17 = vmax.f32 %v6877_v19, %v6878_v14  ;;  %v6886_v33 = vmax.f32 %v6884_v43, %v6885_v48  ;;  %v22528_v14 = vld [vmem:[#allocation59_spill] sm:$0xff]  ;;  %v22529_v48 = vld [vmem:[#allocation20_spill] sm:$0xff] }
 0x3be   : > { %v7724_v3 = vsel %vm22416_vm2, %v7661_v55, %v7723_v30  ;;  %v7804_v10 = vsel %vm18198_vm3, %v16149_v26, %v7803_v45  ;;  %v6867_v20 = vmax.f32 %v6865_v12, %v6866_v27  ;;  %v5624_v11 = vmul.f32 %v19541_v39, %v19658_v40  ;;  %v22527_v45 = vld [vmem:[#allocation42_spill] sm:$0xff] }
 0x3bf   : > { %v7755_v38 = vpack.c.b16 %v7724_v3, %v7724_v3  ;;  %7805 = vst [vmem:[#allocation4 + $0x24] sm:$0x1] %v7804_v10  ;;  %v6873_v59 = vrot.slane %v6872_v5, 2  ;;  %v6880_v51 = vrot.slane %v6879_v17, 2  ;;  %v6887_v41 = vrot.slane %v6886_v33, 2 }
 0x3c0   : > { %v6868_v57 = vrot.slane %v6867_v20, 1  ;;  %v5663_v52 = vadd.f32 %v19501_v2, %v5624_v11  ;;  %v5224_v0 = vadd.f32 %v22526_v24, %v22525_v34  ;;  %v16587_v6 = vadd.f32 %v19462_v25, %v19459_v44  ;;  %v22531_v11 = vld [vmem:[#allocation21_spill] sm:$0xff] }
 0x3c1   : > { %v7801_v40 = vsel %vm18412_vm9, %v7755_v38, %v7800_v1  ;;  %v6874_v56 = vmax.f32 %v6872_v5, %v6873_v59  ;;  %v6881_v47 = vmax.f32 %v6879_v17, %v6880_v51  ;;  %v19734_v42 = vmax.f32 %v6886_v33, %v6887_v41  ;;  %v567_v51 = vld [vmem:[#allocation4] sm:$0x1]  ;;  %v19760_v41 = vpop.f32.mrb[214].mxu0 }
 0x3c2   : > { %7802 = vst [vmem:[#allocation4 + $0x20] sm:$0xf] %v7801_v40  ;;  %v5695_v19 = vmax.f32 %v5663_v52, 0.0  ;;  %v5385_v43 = vadd.f32 %v16587_v6, %v5224_v0  ;;  %v583_v15 = vsel %vm18198_vm3, 0, %v582_v9  ;;  %v19738_v50 = vmax.f32 %v6867_v20, %v6868_v57  ;;  %v22530_v20 = vld [vmem:[#allocation60_spill] sm:$0xff]  ;;  %v19765_v52 = vpop.f32.mrb[215].mxu0 }
 0x3c3   : > { %v6875_v28 = vrot.slane %v6874_v56, 1  ;;  %v6882_v12 = vrot.slane %v6881_v47, 1  ;;  %584 = vst [vmem:[#allocation4 + $0x28] sm:$0x1] %v583_v15  ;;  %v613_v44 = vsel %vm18236_vm5, 0, %v612_v8  ;;  %v5227_v55 = vadd.f32 %v22529_v48, %v22528_v14  ;;  %v22532_v6 = vld [vmem:[#allocation44_spill] sm:$0xff] }
 0x3c4   : > { %v6031_v25 = vcombine.high %v5695_v19, %v5695_v19  ;;  %v6038_v63 = vrot.slane %v5695_v19, %v19177_v16  ;;  %v5546_v29 = vadd.f32 %v22527_v45, %v5385_v43  ;;  %614 = vst [vmem:[#allocation4 + $0x2c] sm:$0x1] %v613_v44  ;;  %v6889_v27 = vrot.slane %v19734_v42, 1 }
 0x3c5   : > { %v19746_v60 = vmax.f32 %v6874_v56, %v6875_v28  ;;  %v19748_v26 = vmax.f32 %v6881_v47, %v6882_v12  ;;  %v16590_v30 = vadd.f32 %v19516_v7, %v19494_v61  ;;  %v5232_v38 = vadd.f32 %v22531_v11, %v22530_v20 }
 0x3c6   : > { %v6045_v5 = vrot.slane %v6031_v25, %v19177_v16  ;;  %v6046_v17 = vcombine.high %v6038_v63, %v6038_v63  ;;  %v6891_v33 = vsel %vm6414_vm12, %v6038_v63, -inf  ;;  %v5625_v3 = vmul.f32 %v19541_v39, %v5546_v29  ;;  %v22533_v25 = vld [vmem:[#allocation47_spill] sm:$0xff] }
 0x3c7   : > { %v6892_v1 = vrot.slane %v6891_v33, 4  ;;  %v5388_v10 = vadd.f32 %v16590_v30, %v5227_v55  ;;  %v16593_v59 = vadd.f32 %v19566_v4, %v19563_v53  ;;  %v568_v56 = vsel %vm18198_vm3, 0, %v567_v51 }
 0x3c8   : > { %v6047_v9 = vcombine.high %v6045_v5, %v6045_v5  ;;  %v6898_v61 = vsel %vm6414_vm12, %v6046_v17, -inf  ;;  %v6905_v7 = vsel %vm6414_vm12, %v6045_v5, -inf  ;;  %v5664_v57 = vadd.f32 %v19501_v2, %v5625_v3  ;;  %569 = vst [vmem:[#allocation4] sm:$0x1] %v568_v56 }
 0x3c9   : > { %v6893_v34 = vmax.f32 %v6891_v33, %v6892_v1  ;;  %v6899_v24 = vrot.slane %v6898_v61, 4  ;;  %v6906_v0 = vrot.slane %v6905_v7, 4  ;;  %v5549_v8 = vadd.f32 %v22532_v6, %v5388_v10 }
 0x3ca   : > { %v6912_v40 = vsel %vm6414_vm12, %v6047_v9, -inf  ;;  %v5696_v53 = vmax.f32 %v5664_v57, 0.0  ;;  %v5393_v4 = vadd.f32 %v16593_v59, %v5232_v38  ;;  %v19780_v51 = vmax.f32 %v19734_v42, %v6889_v27  ;;  %v597_v57 = vld [vmem:[#allocation4 + $0x4] sm:$0x1] }
 0x3cb   : > { %v6894_v47 = vrot.slane %v6893_v34, 2  ;;  %v6900_v19 = vmax.f32 %v6898_v61, %v6899_v24  ;;  %v6907_v43 = vmax.f32 %v6905_v7, %v6906_v0  ;;  %v6913_v15 = vrot.slane %v6912_v40, 4 }
 0x3cc   : > { %v6048_v28 = vcombine.high %v5696_v53, %v5696_v53  ;;  %v6055_v12 = vrot.slane %v5696_v53, %v19177_v16  ;;  %v5626_v44 = vmul.f32 %v19541_v39, %v5549_v8  ;;  %v5554_v63 = vadd.f32 %v22533_v25, %v5393_v4 }
 0x3cd   : > { %v6895_v45 = vmax.f32 %v6893_v34, %v6894_v47  ;;  %v6901_v29 = vrot.slane %v6900_v19, 2  ;;  %v6908_v14 = vrot.slane %v6907_v43, 2  ;;  %v6914_v48 = vmax.f32 %v6912_v40, %v6913_v15 }
 0x3ce   : > { %v6062_v55 = vrot.slane %v6048_v28, %v19177_v16  ;;  %v6063_v30 = vcombine.high %v6055_v12, %v6055_v12  ;;  %v6919_v5 = vsel %vm6414_vm12, %v6055_v12, -inf  ;;  %v5665_v17 = vadd.f32 %v19501_v2, %v5626_v44 }
 0x3cf   : > { %v6896_v33 = vrot.slane %v6895_v45, 1  ;;  %v6902_v3 = vmax.f32 %v6900_v19, %v6901_v29  ;;  %v6909_v1 = vmax.f32 %v6907_v43, %v6908_v14  ;;  %v6915_v10 = vrot.slane %v6914_v48, 2  ;;  %v7830_v8 = vld [vmem:[#allocation4] sm:$0xf] }
 0x3d0   : > { %v6064_v20 = vcombine.high %v6062_v55, %v6062_v55  ;;  %v6920_v11 = vrot.slane %v6919_v5, 4  ;;  %v6926_v38 = vsel %vm6414_vm12, %v6063_v30, -inf  ;;  %v6933_v59 = vsel %vm6414_vm12, %v6062_v55, -inf  ;;  %7838 = vst [vmem:[#allocation5] sm:$0xf] %v7830_v8 }
 0x3d1   : > { %v6903_v9 = vrot.slane %v6902_v3, 1  ;;  %v6910_v61 = vrot.slane %v6909_v1, 1  ;;  %v6916_v7 = vmax.f32 %v6914_v48, %v6915_v10  ;;  %v6927_v24 = vrot.slane %v6926_v38, 4 }
 0x3d2   : > { %v6921_v34 = vmax.f32 %v6919_v5, %v6920_v11  ;;  %v6934_v0 = vrot.slane %v6933_v59, 4  ;;  %v6940_v6 = vsel %vm6414_vm12, %v6064_v20, -inf  ;;  %v19783_v40 = vmax.f32 %v6895_v45, %v6896_v33 }
 0x3d3   : > { %v19785_v53 = vmax.f32 %v6902_v3, %v6903_v9  ;;  %v6917_v4 = vrot.slane %v6916_v7, 1  ;;  %v6941_v56 = vrot.slane %v6940_v6, 4  ;;  %v6928_v42 = vmax.f32 %v6926_v38, %v6927_v24 }
 0x3d4   : > { %v6922_v47 = vrot.slane %v6921_v34, 2  ;;  %v6935_v27 = vmax.f32 %v6933_v59, %v6934_v0  ;;  %v5697_v19 = vmax.f32 %v5665_v17, 0.0  ;;  %v19787_v43 = vmax.f32 %v6909_v1, %v6910_v61 }
 0x3d5   : > { %v6942_v15 = vmax.f32 %v6940_v6, %v6941_v56  ;;  %v5627_v28 = vmul.f32 %v19541_v39, %v5554_v63  ;;  %v598_v12 = vsel %vm18236_vm5, 0, %v597_v57  ;;  %v6929_v25 = vrot.slane %v6928_v42, 2 }
 0x3d6   : > { %v6923_v44 = vmax.f32 %v6921_v34, %v6922_v47  ;;  %v6936_v45 = vrot.slane %v6935_v27, 2  ;;  %v6065_v29 = vcombine.high %v5697_v19, %v5697_v19  ;;  %599 = vst [vmem:[#allocation4 + $0x4] sm:$0x1] %v598_v12  ;;  %v19792_v14 = vmax.f32 %v6916_v7, %v6917_v4  ;;  %v19802_v47 = vpop.f32.mrb[216].mxu0 }
 0x3d7   : > { %v6943_v48 = vrot.slane %v6942_v15, 2  ;;  %v6072_v55 = vrot.slane %v5697_v19, %v19177_v16  ;;  %v5666_v30 = vadd.f32 %v19501_v2, %v5627_v28  ;;  %v6930_v17 = vmax.f32 %v6928_v42, %v6929_v25  ;;  %v19804_v42 = vpop.f32.mrb[92].mxu1  ;;  %v19808_v12 = vpop.f32.mrb[217].mxu0 }
 0x3d8   : > { %v6924_v5 = vrot.slane %v6923_v44, 1  ;;  %v6937_v33 = vmax.f32 %v6935_v27, %v6936_v45  ;;  %v6079_v39 = vrot.slane %v6065_v29, %v19177_v16  ;;  %v19810_v25 = vpop.f32.mrb[93].mxu1 }
 0x3d9   : > { %v6944_v63 = vmax.f32 %v6942_v15, %v6943_v48  ;;  %v6080_v3 = vcombine.high %v6072_v55, %v6072_v55  ;;  %v6947_v1 = vsel %vm6414_vm12, %v6072_v55, -inf  ;;  %v5698_v10 = vmax.f32 %v5666_v30, 0.0 }
 0x3da   : > { %v6925_v20 = vmax.f32 %v6923_v44, %v6924_v5  ;;  %v6931_v11 = vrot.slane %v6930_v17, 1  ;;  %v6938_v38 = vrot.slane %v6937_v33, 1  ;;  %v6081_v59 = vcombine.high %v6079_v39, %v6079_v39  ;;  %v7832_v44 = vld [vmem:[#allocation4 + $0x10] sm:$0xf] }
 0x3db   : > { %v6945_v9 = vrot.slane %v6944_v63, 1  ;;  %v6948_v61 = vrot.slane %v6947_v1, 4  ;;  %v6954_v7 = vsel %vm6414_vm12, %v6080_v3, -inf  ;;  %v6961_v2 = vsel %vm6414_vm12, %v6079_v39, -inf  ;;  %7840 = vst [vmem:[#allocation5 + $0x48] sm:$0xf] %v7832_v44 }
 0x3dc   : > { %v6932_v57 = vmax.f32 %v6930_v17, %v6931_v11  ;;  %v6939_v34 = vmax.f32 %v6937_v33, %v6938_v38  ;;  %v7343_v24 = vmax.f32 %v19738_v50, %v6925_v20  ;;  %v6955_v0 = vrot.slane %v6954_v7, 4  ;;  %v7833_v50 = vld [vmem:[#allocation4 + $0x18] sm:$0xf] }
 0x3dd   : > { %v6946_v6 = vmax.f32 %v6944_v63, %v6945_v9  ;;  %v6949_v8 = vmax.f32 %v6947_v1, %v6948_v61  ;;  %v6962_v4 = vrot.slane %v6961_v2, 4  ;;  %v6968_v56 = vsel %vm6414_vm12, %v6081_v59, -inf  ;;  %7841 = vst [vmem:[#allocation5 + $0x6c] sm:$0xf] %v7833_v50 }
 0x3de   : > { %v7344_v27 = vmax.f32 %v19746_v60, %v6932_v57  ;;  %v7345_v19 = vmax.f32 %v19748_v26, %v6939_v34  ;;  %v16114_v15 = vpack.c.bf16 %v7343_v24, %v7343_v24  ;;  %v6956_v28 = vmax.f32 %v6954_v7, %v6955_v0  ;;  %v19813_v26 = vpop.f32.mrb[218].mxu0 }
 0x3df   : > { %v7346_v45 = vmax.f32 %v19780_v51, %v6946_v6  ;;  %v6950_v29 = vrot.slane %v6949_v8, 2  ;;  %v6963_v48 = vmax.f32 %v6961_v2, %v6962_v4  ;;  %v6969_v55 = vrot.slane %v6968_v56, 4  ;;  %v19815_v1 = vpop.f32.mrb[219].mxu0 }
 0x3e0   : > { %v16115_v30 = vpack.c.bf16 %v7344_v27, %v7344_v27  ;;  %v16116_v5 = vpack.c.bf16 %v7345_v19, %v7345_v19  ;;  %v7663_v60 = vunpack.c.l.b16 %v16114_v15  ;;  %v6957_v17 = vrot.slane %v6956_v28, 2 }
 0x3e1   : > { %v16117_v33 = vpack.c.bf16 %v7346_v45, %v7346_v45  ;;  %v6951_v39 = vmax.f32 %v6949_v8, %v6950_v29  ;;  %v6964_v63 = vrot.slane %v6963_v48, 2  ;;  %v6970_v3 = vmax.f32 %v6968_v56, %v6969_v55 }
 0x3e2   : > { %v7664_v20 = vunpack.c.l.b16 %v16115_v30  ;;  %v7665_v11 = vunpack.c.l.b16 %v16116_v5  ;;  %v6958_v51 = vmax.f32 %v6956_v28, %v6957_v17  ;;  %v6082_v38 = vcombine.high %v5698_v10, %v5698_v10  ;;  %v19827_v30 = vpop.f32.mrb[94].mxu1 }
 0x3e3   : > { %v7666_v59 = vunpack.c.l.b16 %v16117_v33  ;;  %v6952_v9 = vrot.slane %v6951_v39, 1  ;;  %v6965_v61 = vmax.f32 %v6963_v48, %v6964_v63  ;;  %v6971_v7 = vrot.slane %v6970_v3, 2 }
 0x3e4   : > { %v7725_v2 = vsel %vm7695_vm13, %v7664_v20, %v7663_v60  ;;  %v6959_v57 = vrot.slane %v6958_v51, 1  ;;  %v6089_v34 = vrot.slane %v5698_v10, %v19177_v16  ;;  %v6096_v24 = vrot.slane %v6082_v38, %v19177_v16 }
 0x3e5   : > { %v7726_v0 = vsel %vm22417_vm14, %v7665_v11, %v7725_v2  ;;  %v6953_v6 = vmax.f32 %v6951_v39, %v6952_v9  ;;  %v6966_v8 = vrot.slane %v6965_v61, 1  ;;  %v6972_v4 = vmax.f32 %v6970_v3, %v6971_v7  ;;  %v19830_v39 = vpop.f32.mrb[95].mxu1 }
 0x3e6   : > { %v6960_v56 = vmax.f32 %v6958_v51, %v6959_v57  ;;  %v7727_v27 = vsel %vm632_vm15, %v7666_v59, %v7726_v0  ;;  %v6097_v19 = vcombine.high %v6089_v34, %v6089_v34  ;;  %v6098_v15 = vcombine.high %v6096_v24, %v6096_v24  ;;  %v19834_v59 = vpop.f32.mrb[220].mxu0 }
 0x3e7   : > { %v6967_v28 = vmax.f32 %v6965_v61, %v6966_v8  ;;  %v6973_v44 = vrot.slane %v6972_v4, 1  ;;  %v7347_v50 = vmax.f32 %v19783_v40, %v6953_v6  ;;  %v6975_v45 = vsel %vm6414_vm12, %v6089_v34, -inf  ;;  %v7809_v61 = vld [vmem:[#allocation4 + $0x2c] sm:$0x1]  ;;  %v19836_v57 = vpop.f32.mrb[221].mxu0 }
 0x3e8   : > { %v7348_v10 = vmax.f32 %v19785_v53, %v6960_v56  ;;  %v6976_v29 = vrot.slane %v6975_v45, 4  ;;  %v6982_v48 = vsel %vm6414_vm12, %v6097_v19, -inf  ;;  %v6989_v55 = vsel %vm6414_vm12, %v6096_v24, -inf  ;;  %v7846_v19 = vld [vmem:[#allocation4] sm:$0xf] }
 0x3e9   : > { %v6974_v5 = vmax.f32 %v6972_v4, %v6973_v44  ;;  %v7349_v60 = vmax.f32 %v19787_v43, %v6967_v28  ;;  %v16118_v17 = vpack.c.bf16 %v7347_v50, %v7347_v50  ;;  %v6983_v33 = vrot.slane %v6982_v48, 4  ;;  %v7806_v44 = vld [vmem:[#allocation4 + $0x28] sm:$0xf] }
 0x3ea   : > { %v16119_v63 = vpack.c.bf16 %v7348_v10, %v7348_v10  ;;  %v6977_v40 = vmax.f32 %v6975_v45, %v6976_v29  ;;  %v6990_v3 = vrot.slane %v6989_v55, 4  ;;  %v6996_v20 = vsel %vm6414_vm12, %v6098_v15, -inf  ;;  %v7847_v15 = vld [vmem:[#allocation4 + $0x4] sm:$0x1] }
 0x3eb   : > { %v7350_v53 = vmax.f32 %v19792_v14, %v6974_v5  ;;  %v16120_v11 = vpack.c.bf16 %v7349_v60, %v7349_v60  ;;  %v7667_v51 = vunpack.c.l.b16 %v16118_v17  ;;  %v6984_v38 = vmax.f32 %v6982_v48, %v6983_v33  ;;  %v7848_v5 = vld [vmem:[#allocation4 + $0x8] sm:$0xf] }
 0x3ec   : > { %v7668_v9 = vunpack.c.l.b16 %v16119_v63  ;;  %v6978_v43 = vrot.slane %v6977_v40, 2  ;;  %v6991_v7 = vmax.f32 %v6989_v55, %v6990_v3  ;;  %v6997_v2 = vrot.slane %v6996_v20, 4 }
 0x3ed   : > { %v7669_v34 = vunpack.c.l.b16 %v16120_v11  ;;  %v7728_v24 = vsel %vm7701_vm0, %v7667_v51, %v7727_v27  ;;  %v16150_v0 = vpack.c.bf16 %v7350_v53, %v7350_v53  ;;  %v6985_v6 = vrot.slane %v6984_v38, 2  ;;  %v7849_v53 = vld [vmem:[#allocation4 + $0xc] sm:$0x1] }
 0x3ee   : > { %v7729_v14 = vsel %vm7703_vm1, %v7668_v9, %v7728_v24  ;;  %v6979_v8 = vmax.f32 %v6977_v40, %v6978_v43  ;;  %v6992_v4 = vrot.slane %v6991_v7, 2  ;;  %v6998_v56 = vmax.f32 %v6996_v20, %v6997_v2 }
 0x3ef   : > { %v7730_v28 = vsel %vm22416_vm2, %v7669_v34, %v7729_v14  ;;  %v7810_v50 = vsel %vm18198_vm3, %v16150_v0, %v7809_v61  ;;  %v6986_v45 = vmax.f32 %v6984_v38, %v6985_v6  ;;  %v7866_v60 = vshrl.u32 %v7846_v19, 16  ;;  %v22534_v0 = vld [vmem:[#allocation61_spill] sm:$0xff]  ;;  %v22535_v6 = vld [vmem:[#allocation22_spill] sm:$0xff] }
 0x3f0   : > { %v7757_v10 = vpack.c.b16 %v7730_v28, %v7730_v28  ;;  %7811 = vst [vmem:[#allocation4 + $0x2c] sm:$0x1] %v7810_v50  ;;  %v6980_v27 = vrot.slane %v6979_v8, 1  ;;  %v6993_v29 = vmax.f32 %v6991_v7, %v6992_v4  ;;  %v6999_v48 = vrot.slane %v6998_v56, 2  ;;  %v585_v4 = vld [vmem:[#allocation4 + $0x30] sm:$0x1] }
 0x3f1   : > { %v6987_v55 = vrot.slane %v6986_v45, 1  ;;  %v7869_v17 = vshll.u32 %v7846_v19, 16  ;;  %v7875_v33 = vshll.u32 %v7847_v15, 16  ;;  %v7868_v51 = vrot.slane %v7866_v60, 4  ;;  %v22538_v50 = vld [vmem:[#allocation62_spill] sm:$0xff]  ;;  %v22540_v60 = vld [vmem:[#allocation63_spill] sm:$0xff] }
 0x3f2   : > { %v7807_v63 = vsel %vm18412_vm9, %v7757_v10, %v7806_v44  ;;  %v19845_v40 = vmax.f32 %v6979_v8, %v6980_v27  ;;  %v6994_v3 = vrot.slane %v6993_v29, 1  ;;  %v7000_v20 = vmax.f32 %v6998_v56, %v6999_v48  ;;  %v615_v56 = vld [vmem:[#allocation4 + $0x34] sm:$0x1] }
 0x3f3   : > { %7808 = vst [vmem:[#allocation4 + $0x28] sm:$0xf] %v7807_v63  ;;  %v19847_v11 = vmax.f32 %v6986_v45, %v6987_v55  ;;  %v7871_v38 = vrot.slane %v7869_v17, 5  ;;  %v7877_v9 = vrot.slane %v7875_v33, 5  ;;  %v7880_v7 = vshrl.u32 %v7848_v5, 16  ;;  %v22539_v45 = vld [vmem:[#allocation23_spill] sm:$0xff] }
 0x3f4   : > { %v19849_v61 = vmax.f32 %v6993_v29, %v6994_v3  ;;  %v7001_v43 = vrot.slane %v7000_v20, 1  ;;  %v7883_v2 = vshll.u32 %v7848_v5, 16  ;;  %v7889_v24 = vshll.u32 %v7849_v53, 16  ;;  %v22541_v17 = vld [vmem:[#allocation24_spill] sm:$0xff]  ;;  %v22542_v3 = vld [vmem:[#allocation49_spill] sm:$0xff] }
 0x3f5   : > { %v7872_v34 = vor.u32 %v7871_v38, %v7868_v51  ;;  %v5235_v14 = vadd.f32 %v22535_v6, %v22534_v0  ;;  %v16596_v8 = vadd.f32 %v19598_v22, %v19593_v32  ;;  %v7882_v28 = vrot.slane %v7880_v7, 4  ;;  %v22543_v51 = vld [vmem:[#allocation64_spill] sm:$0xff]  ;;  %v22544_v38 = vld [vmem:[#allocation25_spill] sm:$0xff]  ;;  %v22547_v6 = vld [vmem:[#allocation46_spill] sm:$0xff] }
 0x3f6   : > { %v19855_v19 = vmax.f32 %v7000_v20, %v7001_v43  ;;  %v7885_v44 = vrot.slane %v7883_v2, 5  ;;  %v5240_v10 = vadd.f32 %v22539_v45, %v22538_v50  ;;  %v7891_v29 = vrot.slane %v7889_v24, 5  ;;  %v22545_v2 = vld [vmem:[#allocation65_spill] sm:$0xff]  ;;  %v19902_v45 = vld [vmem:[%s22404_s6] ss:$0 sm:$0xff] }
 0x3f7   : > { %v7873_v27 = vrot.slane %v7872_v34, 4  ;;  %v5396_v48 = vadd.f32 %v16596_v8, %v5235_v14  ;;  %v16599_v32 = vadd.f32 %v19628_v31, %v19622_v23  ;;  %v586_v55 = vsel %vm18198_vm3, 0, %v585_v4  ;;  %v22546_v34 = vld [vmem:[#allocation26_spill] sm:$0xff]  ;;  %v588_v8 = vld [vmem:[#allocation4 + $0x38] sm:$0x1] }
 0x3f8   : > { %v7886_v22 = vor.u32 %v7885_v44, %v7882_v28  ;;  %v616_v5 = vsel %vm18236_vm5, 0, %v615_v56  ;;  %v5243_v33 = vadd.f32 %v22541_v17, %v22540_v60  ;;  %587 = vst [vmem:[#allocation4 + $0x30] sm:$0x1] %v586_v55  ;;  %v16602_v23 = vadd.f32 %v19667_v54, %v19663_v46  ;;  %v618_v4 = vld [vmem:[#allocation4 + $0x3c] sm:$0x1]  ;;  %v22548_v56 = vld [vmem:[#allocation66_spill] sm:$0xff] }
 0x3f9   : > { %v7878_v63 = vsel %vm19859_vm7, %v7873_v27, %v7877_v9  ;;  %v5557_v20 = vadd.f32 %v22542_v3, %v5396_v48  ;;  %v5401_v53 = vadd.f32 %v16599_v32, %v5240_v10  ;;  %617 = vst [vmem:[#allocation4 + $0x34] sm:$0x1] %v616_v5  ;;  %v5248_v43 = vadd.f32 %v22544_v38, %v22543_v51  ;;  %v19887_v9 = vld [vmem:[%s22403_s5] ss:$0 sm:$0xff]  ;;  %v22550_v10 = vld [vmem:[#allocation48_spill] sm:$0xff]  ;;  %v22552_v17 = vld [vmem:[#allocation54_spill] sm:$0xff] }
 0x3fa   : > { %v7887_v31 = vrot.slane %v7886_v22, 4  ;;  %7985 = vst [vmem:[#allocation5 + $0x4] sm:$0xf] %v7878_v63  ;;  %v16605_v7 = vadd.f32 %v19696_v18, %v19693_v13  ;;  %v5251_v24 = vadd.f32 %v22546_v34, %v22545_v2  ;;  %v5404_v54 = vadd.f32 %v16602_v23, %v5243_v33  ;;  %v22549_v28 = vld [vmem:[#allocation27_spill] sm:$0xff]  ;;  %v22553_v3 = vld [vmem:[#allocation50_spill] sm:$0xff]  ;;  %v22555_v23 = vld [vmem:[#allocation29_spill] sm:$0xff] }
 0x3fb   : > { %v5628_v0 = vmul.f32 %v19887_v9, %v5557_v20  ;;  %v5562_v46 = vadd.f32 %v22547_v6, %v5401_v53  ;;  %v16608_v14 = vadd.f32 %v19700_v36, %v19698_v62  ;;  %v5256_v44 = vadd.f32 %v22549_v28, %v22548_v56  ;;  %v22551_v48 = vld [vmem:[#allocation51_spill] sm:$0xff] }
 0x3fc   : > { %v7892_v13 = vsel %vm19859_vm7, %v7887_v31, %v7891_v29  ;;  %v5409_v18 = vadd.f32 %v16605_v7, %v5248_v43  ;;  %v16611_v50 = vadd.f32 %v19725_v49, %v19718_v58  ;;  %v5565_v27 = vadd.f32 %v22550_v10, %v5404_v54  ;;  %v22554_v53 = vld [vmem:[#allocation67_spill] sm:$0xff] }
 0x3fd   : > { %7986 = vst [vmem:[#allocation5 + $0x28] sm:$0xf] %v7892_v13  ;;  %v5667_v62 = vadd.f32 %v19902_v45, %v5628_v0  ;;  %v5629_v36 = vmul.f32 %v19887_v9, %v5562_v46  ;;  %v5412_v29 = vadd.f32 %v16608_v14, %v5251_v24  ;;  %v589_v55 = vsel %vm18198_vm3, 0, %v588_v8  ;;  %v17352_v34 = vld [vmem:[%s22405_s7 + $0x104] ss:$8 sps:$4 sm:$0xff]   ;;  %v19928_v24 = vpop.f32.mrb[222].mxu0 }
 0x3fe   : > { %v5570_v32 = vadd.f32 %v22551_v48, %v5409_v18  ;;  %v5417_v22 = vadd.f32 %v16611_v50, %v5256_v44  ;;  %v619_v58 = vsel %vm18236_vm5, 0, %v618_v4  ;;  %v5630_v60 = vmul.f32 %v19887_v9, %v5565_v27  ;;  %590 = vst [vmem:[#allocation4 + $0x38] sm:$0x1] %v589_v55  ;;  %v19937_v46 = vpop.f32.mrb[223].mxu0  ;;  %v17350_v13 = vld [vmem:[%s22405_s7 + $0x100] ss:$8 sps:$4 sm:$0xff]   ;;  %9718 = vmatprep.subr.bf16.mxu0 %v17352_v34 }
 0x3ff   : > { %v5699_v49 = vmax.f32 %v5667_v62, 0.0  ;;  %v5668_v5 = vadd.f32 %v19902_v45, %v5629_v36  ;;  %v5573_v33 = vadd.f32 %v22552_v17, %v5412_v29  ;;  %620 = vst [vmem:[#allocation4 + $0x3c] sm:$0x1] %v619_v58  ;;  %v5259_v31 = vadd.f32 %v22555_v23, %v22554_v53  ;;  %v17344_v18 = vld [vmem:[#allocation5] ss:$36 sps:$4 sm:$0xff]  }
 0x400   : > { %v5631_v63 = vmul.f32 %v19887_v9, %v5570_v32  ;;  %v5578_v20 = vadd.f32 %v22553_v3, %v5417_v22  ;;  %v16614_v51 = vadd.f32 %v19765_v52, %v19760_v41  ;;  %v19923_v2 = vadd.f32 %v19902_v45, %v5630_v60 }
 0x401   : > { %v6099_v38 = vcombine.high %v5699_v49, %v5699_v49  ;;  %v6106_v43 = vrot.slane %v5699_v49, %v19177_v16  ;;  %v5700_v7 = vmax.f32 %v5668_v5, 0.0  ;;  %v5632_v6 = vmul.f32 %v19887_v9, %v5573_v33 }
 0x402   : > { %v19931_v0 = vadd.f32 %v19902_v45, %v5631_v63  ;;  %v5633_v41 = vmul.f32 %v19887_v9, %v5578_v20  ;;  %v19935_v52 = vadd.f32 %v16614_v51, %v5259_v31 }
 0x403   : > { %v6113_v54 = vrot.slane %v6099_v38, %v19177_v16  ;;  %v6114_v14 = vcombine.high %v6106_v43, %v6106_v43  ;;  %v7003_v8 = vsel %vm6414_vm12, %v6106_v43, -inf  ;;  %v6116_v4 = vcombine.high %v5700_v7, %v5700_v7 }
 0x404   : > { %v17346_v56 = vld [vmem:[#allocation5 + $0x4] ss:$36 sps:$4 sm:$0xff]   ;;  %v7004_v28 = vrot.slane %v7003_v8, 4  ;;  %v6123_v44 = vrot.slane %v5700_v7, %v19177_v16  ;;  %v19946_v50 = vadd.f32 %v19902_v45, %v5632_v6  ;;  %v19949_v62 = vadd.f32 %v19902_v45, %v5633_v41 }
 0x405   : > { %v6115_v36 = vcombine.high %v6113_v54, %v6113_v54  ;;  %v7010_v10 = vsel %vm6414_vm12, %v6114_v14, -inf  ;;  %v7017_v27 = vsel %vm6414_vm12, %v6113_v54, -inf  ;;  %v6130_v29 = vrot.slane %v6116_v4, %v19177_v16  ;;  %9677 = vmatprep.mubr.bf16.mxu0 %v17346_v56 }
 0x406   : > { %v7005_v48 = vmax.f32 %v7003_v8, %v7004_v28  ;;  %v7011_v32 = vrot.slane %v7010_v10, 4  ;;  %v7018_v22 = vrot.slane %v7017_v27, 4  ;;  %v6131_v55 = vcombine.high %v6123_v44, %v6123_v44  ;;  %9678 = vmatmul.mubr.bf16.vlgmr.msra.gmra.mrb[224].mxu0 %v17344_v18 }
 0x407   : > { %v7024_v58 = vsel %vm6414_vm12, %v6115_v36, -inf  ;;  %v6132_v49 = vcombine.high %v6130_v29, %v6130_v29  ;;  %v7031_v5 = vsel %vm6414_vm12, %v6123_v44, -inf  ;;  %v7045_v60 = vsel %vm6414_vm12, %v6130_v29, -inf  ;;  %9719 = vmatpush1.bf16.msra.mxu0 %v17350_v13 }
 0x408   : > { %v7006_v17 = vrot.slane %v7005_v48, 2  ;;  %v7012_v33 = vmax.f32 %v7010_v10, %v7011_v32  ;;  %v7019_v63 = vmax.f32 %v7017_v27, %v7018_v22  ;;  %v7025_v3 = vrot.slane %v7024_v58, 4 }
 0x409   : > { %v7032_v20 = vrot.slane %v7031_v5, 4  ;;  %v7038_v53 = vsel %vm6414_vm12, %v6131_v55, -inf  ;;  %v7046_v23 = vrot.slane %v7045_v60, 4  ;;  %v7052_v31 = vsel %vm6414_vm12, %v6132_v49, -inf }
 0x40a   : > { %v7007_v51 = vmax.f32 %v7005_v48, %v7006_v17  ;;  %v7013_v38 = vrot.slane %v7012_v33, 2  ;;  %v7020_v43 = vrot.slane %v7019_v63, 2  ;;  %v7026_v7 = vmax.f32 %v7024_v58, %v7025_v3 }
 0x40b   : > { %v7033_v34 = vmax.f32 %v7031_v5, %v7032_v20  ;;  %v7039_v6 = vrot.slane %v7038_v53, 4  ;;  %v7047_v41 = vmax.f32 %v7045_v60, %v7046_v23  ;;  %v7053_v54 = vrot.slane %v7052_v31, 4 }
 0x40c   : > { %v7008_v14 = vrot.slane %v7007_v51, 1  ;;  %v7014_v8 = vmax.f32 %v7012_v33, %v7013_v38  ;;  %v7021_v4 = vmax.f32 %v7019_v63, %v7020_v43  ;;  %v7027_v18 = vrot.slane %v7026_v7, 2 }
 0x40d   : > { %v7034_v56 = vrot.slane %v7033_v34, 2  ;;  %v7040_v13 = vmax.f32 %v7038_v53, %v7039_v6  ;;  %v7048_v28 = vrot.slane %v7047_v41, 2  ;;  %v7054_v44 = vmax.f32 %v7052_v31, %v7053_v54 }
 0x40e   : > { %v19959_v36 = vmax.f32 %v7007_v51, %v7008_v14  ;;  %v7015_v10 = vrot.slane %v7014_v8, 1  ;;  %v7022_v27 = vrot.slane %v7021_v4, 1  ;;  %v7028_v29 = vmax.f32 %v7026_v7, %v7027_v18 }
 0x40f   : > { %v7035_v48 = vmax.f32 %v7033_v34, %v7034_v56  ;;  %v7041_v32 = vrot.slane %v7040_v13, 2  ;;  %v7049_v22 = vmax.f32 %v7047_v41, %v7048_v28  ;;  %v7055_v55 = vrot.slane %v7054_v44, 2  ;;  %v17353_v34 = vld [vmem:[%s22405_s7 + $0x110] ss:$8 sps:$4 sm:$0xff]  }
 0x410   : > { %v19961_v58 = vmax.f32 %v7014_v8, %v7015_v10  ;;  %v19963_v49 = vmax.f32 %v7021_v4, %v7022_v27  ;;  %v7029_v5 = vrot.slane %v7028_v29, 1  ;;  %v5701_v60 = vmax.f32 %v19923_v2, 0.0  ;;  %v17355_v2 = vld [vmem:[%s22405_s7 + $0x114] ss:$8 sps:$4 sm:$0xff]   ;;  %v17356_v27 = vld [vmem:[%s22405_s7 + $0x120] ss:$8 sps:$4 sm:$0xff]  }
 0x411   : > { %v7036_v17 = vrot.slane %v7035_v48, 1  ;;  %v7042_v33 = vmax.f32 %v7040_v13, %v7041_v32  ;;  %v7050_v63 = vrot.slane %v7049_v22, 1  ;;  %v7056_v3 = vmax.f32 %v7054_v44, %v7055_v55  ;;  %9720 = vmatprep.subr.bf16.mxu0 %v17355_v2 }
 0x412   : > { %v19966_v20 = vmax.f32 %v7028_v29, %v7029_v5  ;;  %v6133_v53 = vcombine.high %v5701_v60, %v5701_v60  ;;  %v6140_v23 = vrot.slane %v5701_v60, %v19177_v16  ;;  %v5702_v31 = vmax.f32 %v19931_v0, 0.0  ;;  %v17358_v0 = vld [vmem:[%s22405_s7 + $0x124] ss:$8 sps:$4 sm:$0xff]   ;;  %9721 = vmatpush1.bf16.msra.mxu0 %v17353_v34 }
 0x413   : > { %v7037_v51 = vmax.f32 %v7035_v48, %v7036_v17  ;;  %v7043_v38 = vrot.slane %v7042_v33, 1  ;;  %v7051_v43 = vmax.f32 %v7049_v22, %v7050_v63  ;;  %v7057_v7 = vrot.slane %v7056_v3, 1  ;;  %9722 = vmatprep.subr.bf16.mxu0 %v17358_v0  ;;  %v7834_v22 = vld [vmem:[#allocation4 + $0x20] sm:$0xf] }
 0x414   : > { %v6147_v6 = vrot.slane %v6133_v53, %v19177_v16  ;;  %v6148_v41 = vcombine.high %v6140_v23, %v6140_v23  ;;  %v7059_v54 = vsel %vm6414_vm12, %v6140_v23, -inf  ;;  %v6150_v14 = vcombine.high %v5702_v31, %v5702_v31  ;;  %7842 = vst [vmem:[#allocation5 + $0x90] sm:$0xf] %v7834_v22 }
 0x415   : > { %v7044_v8 = vmax.f32 %v7042_v33, %v7043_v38  ;;  %v7058_v4 = vmax.f32 %v7056_v3, %v7057_v7  ;;  %v7351_v18 = vmax.f32 %v19845_v40, %v7037_v51  ;;  %v7353_v56 = vmax.f32 %v19849_v61, %v7051_v43  ;;  %v17361_v61 = vld [vmem:[%s22405_s7 + $0x134] ss:$8 sps:$4 sm:$0xff]   ;;  %v7835_v33 = vld [vmem:[#allocation4 + $0x28] sm:$0xf]  ;;  %v17359_v43 = vld [vmem:[%s22405_s7 + $0x130] ss:$8 sps:$4 sm:$0xff]  }
 0x416   : > { %v6149_v13 = vcombine.high %v6147_v6, %v6147_v6  ;;  %v7060_v28 = vrot.slane %v7059_v54, 4  ;;  %v7066_v44 = vsel %vm6414_vm12, %v6148_v41, -inf  ;;  %v7073_v10 = vsel %vm6414_vm12, %v6147_v6, -inf  ;;  %7843 = vst [vmem:[#allocation5 + $0xb4] sm:$0xf] %v7835_v33  ;;  %9723 = vmatpush1.bf16.msra.mxu0 %v17356_v27 }
 0x417   : > { %v7352_v29 = vmax.f32 %v19847_v11, %v7044_v8  ;;  %v7354_v48 = vmax.f32 %v19855_v19, %v7058_v4  ;;  %v16122_v32 = vpack.c.bf16 %v7351_v18, %v7351_v18  ;;  %v16124_v40 = vpack.c.bf16 %v7353_v56, %v7353_v56  ;;  %9724 = vmatprep.subr.bf16.mxu0 %v17361_v61  ;;  %v17364_v41 = vld [vmem:[%s22405_s7 + $0x144] ss:$8 sps:$4 sm:$0xff]   ;;  %v17362_v27 = vld [vmem:[%s22405_s7 + $0x140] ss:$8 sps:$4 sm:$0xff]   ;;  %v17367_v61 = vld [vmem:[%s22405_s7 + $0x154] ss:$8 sps:$4 sm:$0xff]  }
 0x418   : > { %v7061_v55 = vmax.f32 %v7059_v54, %v7060_v28  ;;  %v7067_v5 = vrot.slane %v7066_v44, 4  ;;  %v7074_v60 = vrot.slane %v7073_v10, 4  ;;  %v7080_v17 = vsel %vm6414_vm12, %v6149_v13, -inf }
 0x419   : > { %v16123_v63 = vpack.c.bf16 %v7352_v29, %v7352_v29  ;;  %v16125_v3 = vpack.c.bf16 %v7354_v48, %v7354_v48  ;;  %v7671_v11 = vunpack.c.l.b16 %v16122_v32  ;;  %v7673_v53 = vunpack.c.l.b16 %v16124_v40 }
 0x41a   : > { %v7062_v19 = vrot.slane %v7061_v55, 2  ;;  %v7068_v23 = vmax.f32 %v7066_v44, %v7067_v5  ;;  %v7075_v51 = vmax.f32 %v7073_v10, %v7074_v60  ;;  %v7081_v38 = vrot.slane %v7080_v17, 4  ;;  %9725 = vmatpush1.bf16.msra.mxu0 %v17359_v43 }
 0x41b   : > { %v7672_v7 = vunpack.c.l.b16 %v16123_v63  ;;  %v7674_v34 = vunpack.c.l.b16 %v16125_v3  ;;  %v6157_v2 = vrot.slane %v5702_v31, %v19177_v16  ;;  %v6164_v6 = vrot.slane %v6150_v14, %v19177_v16  ;;  %9726 = vmatprep.subr.bf16.mxu0 %v17364_v41 }
 0x41c   : > { %v7063_v54 = vmax.f32 %v7061_v55, %v7062_v19  ;;  %v7069_v0 = vrot.slane %v7068_v23, 2  ;;  %v7076_v8 = vrot.slane %v7075_v51, 2  ;;  %v7082_v4 = vmax.f32 %v7080_v17, %v7081_v38 }
 0x41d   : > { %v7731_v18 = vsel %vm7695_vm13, %v7672_v7, %v7671_v11  ;;  %v6165_v56 = vcombine.high %v6157_v2, %v6157_v2  ;;  %v6166_v13 = vcombine.high %v6164_v6, %v6164_v6  ;;  %v7087_v28 = vsel %vm6414_vm12, %v6157_v2, -inf  ;;  %v17372_v2 = vld [vmem:[%s22405_s7 + $0x164] ss:$8 sps:$4 sm:$0xff]  }
 0x41e   : > { %v7732_v44 = vsel %vm22417_vm14, %v7673_v53, %v7731_v18  ;;  %v7064_v31 = vrot.slane %v7063_v54, 1  ;;  %v7070_v10 = vmax.f32 %v7068_v23, %v7069_v0  ;;  %v7077_v14 = vmax.f32 %v7075_v51, %v7076_v8  ;;  %9727 = vmatpush1.bf16.msra.mxu0 %v17362_v27  ;;  %v17365_v51 = vld [vmem:[%s22405_s7 + $0x150] ss:$8 sps:$4 sm:$0xff]  }
 0x41f   : > { %v7083_v29 = vrot.slane %v7082_v4, 2  ;;  %v7733_v48 = vsel %vm632_vm15, %v7674_v34, %v7732_v44  ;;  %v7088_v32 = vrot.slane %v7087_v28, 4  ;;  %v7094_v40 = vsel %vm6414_vm12, %v6165_v56, -inf  ;;  %9728 = vmatprep.subr.bf16.mxu0 %v17367_v61  ;;  %v8076_v56 = vld [vmem:[#allocation4 + $0x8] sm:$0xf] }
 0x420   : > { %v7065_v22 = vmax.f32 %v7063_v54, %v7064_v31  ;;  %v7071_v55 = vrot.slane %v7070_v10, 1  ;;  %v7078_v5 = vrot.slane %v7077_v14, 1  ;;  %v7095_v60 = vrot.slane %v7094_v40, 4  ;;  %8084 = vst [vmem:[#allocation5 + $0xc] sm:$0xf] %v8076_v56 }
 0x421   : > { %v7084_v17 = vmax.f32 %v7082_v4, %v7083_v29  ;;  %v7089_v33 = vmax.f32 %v7087_v28, %v7088_v32  ;;  %v7101_v63 = vsel %vm6414_vm12, %v6164_v6, -inf  ;;  %v7108_v3 = vsel %vm6414_vm12, %v6166_v13, -inf  ;;  %v17376_v32 = vld [vmem:[%s22405_s7 + $0x174] ss:$8 sps:$4 sm:$0xff]  }
 0x422   : > { %v7072_v11 = vmax.f32 %v7070_v10, %v7071_v55  ;;  %v7079_v53 = vmax.f32 %v7077_v14, %v7078_v5  ;;  %v7355_v19 = vmax.f32 %v19959_v36, %v7065_v22  ;;  %v7096_v23 = vmax.f32 %v7094_v40, %v7095_v60  ;;  %9729 = vmatpush1.bf16.msra.mxu0 %v17365_v51  ;;  %v17370_v10 = vld [vmem:[%s22405_s7 + $0x160] ss:$8 sps:$4 sm:$0xff]   ;;  %v7815_v55 = vld [vmem:[#allocation4 + $0x34] sm:$0x1] }
 0x423   : > { %v7085_v38 = vrot.slane %v7084_v17, 1  ;;  %v7090_v43 = vrot.slane %v7089_v33, 2  ;;  %v7102_v7 = vrot.slane %v7101_v63, 4  ;;  %v7109_v34 = vrot.slane %v7108_v3, 4  ;;  %v8077_v14 = vld [vmem:[#allocation4 + $0x10] sm:$0xf]  ;;  %9730 = vmatprep.subr.bf16.mxu0 %v17372_v2 }
 0x424   : > { %v7356_v6 = vmax.f32 %v19961_v58, %v7072_v11  ;;  %v7357_v41 = vmax.f32 %v19963_v49, %v7079_v53  ;;  %v16126_v36 = vpack.c.bf16 %v7355_v19, %v7355_v19  ;;  %v7097_v54 = vrot.slane %v7096_v23, 2  ;;  %8085 = vst [vmem:[#allocation5 + $0x30] sm:$0xf] %v8077_v14  ;;  %v17379_v2 = vld [vmem:[%s22405_s7 + $0x184] ss:$8 sps:$4 sm:$0xff]  }
 0x425   : > { %v7086_v0 = vmax.f32 %v7084_v17, %v7085_v38  ;;  %v7091_v8 = vmax.f32 %v7089_v33, %v7090_v43  ;;  %v7103_v4 = vmax.f32 %v7101_v63, %v7102_v7  ;;  %v7110_v18 = vmax.f32 %v7108_v3, %v7109_v34  ;;  %v17374_v63 = vld [vmem:[%s22405_s7 + $0x170] ss:$8 sps:$4 sm:$0xff]   ;;  %v7812_v38 = vld [vmem:[#allocation4 + $0x30] sm:$0xf] }
 0x426   : > { %v16127_v13 = vpack.c.bf16 %v7356_v6, %v7356_v6  ;;  %v16128_v28 = vpack.c.bf16 %v7357_v41, %v7357_v41  ;;  %v7675_v44 = vunpack.c.l.b16 %v16126_v36  ;;  %v7098_v31 = vmax.f32 %v7096_v23, %v7097_v54  ;;  %9731 = vmatpush1.bf16.msra.mxu0 %v17370_v10  ;;  %v8079_v23 = vld [vmem:[#allocation4 + $0x20] sm:$0xf] }
 0x427   : > { %v7358_v58 = vmax.f32 %v19966_v20, %v7086_v0  ;;  %v7092_v49 = vrot.slane %v7091_v8, 1  ;;  %v7104_v27 = vrot.slane %v7103_v4, 2  ;;  %v7111_v29 = vrot.slane %v7110_v18, 2  ;;  %9732 = vmatprep.subr.bf16.mxu0 %v17376_v32  ;;  %8087 = vst [vmem:[#allocation5 + $0x78] sm:$0xf] %v8079_v23 }
 0x428   : > { %v7676_v40 = vunpack.c.l.b16 %v16127_v13  ;;  %v7677_v61 = vunpack.c.l.b16 %v16128_v28  ;;  %v7734_v22 = vsel %vm7701_vm0, %v7675_v44, %v7733_v48  ;;  %v7099_v5 = vrot.slane %v7098_v31, 1  ;;  %v8078_v48 = vld [vmem:[#allocation4 + $0x18] sm:$0xf]  ;;  %v17377_v44 = vld [vmem:[%s22405_s7 + $0x180] ss:$8 sps:$4 sm:$0xff]  }
 0x429   : > { %v16151_v60 = vpack.c.bf16 %v7358_v58, %v7358_v58  ;;  %v20032_v17 = vmax.f32 %v7091_v8, %v7092_v49  ;;  %v7105_v33 = vmax.f32 %v7103_v4, %v7104_v27  ;;  %v7112_v20 = vmax.f32 %v7110_v18, %v7111_v29  ;;  %8086 = vst [vmem:[#allocation5 + $0x54] sm:$0xf] %v8078_v48  ;;  %v22556_v8 = vld [vmem:[#allocation53_spill] sm:$0xff] }
 0x42a   : > { %v7735_v3 = vsel %vm7703_vm1, %v7676_v40, %v7734_v22  ;;  %v20038_v11 = vmax.f32 %v7098_v31, %v7099_v5  ;;  %v5703_v53 = vmax.f32 %v19946_v50, 0.0  ;;  %v5704_v19 = vmax.f32 %v19949_v62, 0.0  ;;  %9733 = vmatpush1.bf16.msra.mxu0 %v17374_v63  ;;  %v8080_v31 = vld [vmem:[#allocation4 + $0x28] sm:$0xf]  ;;  %v17382_v49 = vld [vmem:[%s22405_s7 + $0x194] ss:$8 sps:$4 sm:$0xff]  }
 0x42b   : > { %v7736_v51 = vsel %vm22416_vm2, %v7677_v61, %v7735_v3  ;;  %v7816_v43 = vsel %vm18198_vm3, %v16151_v60, %v7815_v55  ;;  %v7106_v7 = vrot.slane %v7105_v33, 1  ;;  %v7113_v34 = vrot.slane %v7112_v20, 1  ;;  %9734 = vmatprep.subr.bf16.mxu0 %v17379_v2  ;;  %8088 = vst [vmem:[#allocation5 + $0x9c] sm:$0xf] %v8080_v31  ;;  %v17380_v3 = vld [vmem:[%s22405_s7 + $0x190] ss:$8 sps:$4 sm:$0xff]  }
 0x42c   : > { %v7759_v50 = vpack.c.b16 %v7736_v51, %v7736_v51  ;;  %7817 = vst [vmem:[#allocation4 + $0x34] sm:$0x1] %v7816_v43  ;;  %v6167_v62 = vcombine.high %v5703_v53, %v5703_v53  ;;  %v6174_v6 = vrot.slane %v5703_v53, %v19177_v16  ;;  %v6184_v41 = vcombine.high %v5704_v19, %v5704_v19  ;;  %v17385_v51 = vld [vmem:[%s22405_s7 + $0x1a4] ss:$8 sps:$4 sm:$0xff]  }
 0x42d   : > { %v20049_v36 = vmax.f32 %v7105_v33, %v7106_v7  ;;  %v20051_v54 = vmax.f32 %v7112_v20, %v7113_v34  ;;  %v6191_v0 = vrot.slane %v5704_v19, %v19177_v16  ;;  %v20056_v4 = vadd.f32 %v22556_v8, %v19935_v52 }
 0x42e   : > { %v7813_v18 = vsel %vm18412_vm9, %v7759_v50, %v7812_v38  ;;  %v6181_v56 = vrot.slane %v6167_v62, %v19177_v16  ;;  %v6182_v13 = vcombine.high %v6174_v6, %v6174_v6  ;;  %v7115_v28 = vsel %vm6414_vm12, %v6174_v6, -inf  ;;  %9735 = vmatpush1.bf16.msra.mxu0 %v17377_v44 }
 0x42f   : > { %7814 = vst [vmem:[#allocation4 + $0x30] sm:$0xf] %v7813_v18  ;;  %v7116_v10 = vrot.slane %v7115_v28, 4  ;;  %v6198_v14 = vrot.slane %v6184_v41, %v19177_v16  ;;  %v6199_v52 = vcombine.high %v6191_v0, %v6191_v0  ;;  %v7143_v58 = vsel %vm6414_vm12, %v6191_v0, -inf  ;;  %9736 = vmatprep.subr.bf16.mxu0 %v17382_v49 }
 0x430   : > { %v6183_v27 = vcombine.high %v6181_v56, %v6181_v56  ;;  %v7122_v29 = vsel %vm6414_vm12, %v6182_v13, -inf  ;;  %v7129_v32 = vsel %vm6414_vm12, %v6181_v56, -inf  ;;  %v7144_v40 = vrot.slane %v7143_v58, 4  ;;  %v17383_v56 = vld [vmem:[%s22405_s7 + $0x1a0] ss:$8 sps:$4 sm:$0xff]  }
 0x431   : > { %v7117_v61 = vmax.f32 %v7115_v28, %v7116_v10  ;;  %v7123_v22 = vrot.slane %v7122_v29, 4  ;;  %v7130_v55 = vrot.slane %v7129_v32, 4  ;;  %v6200_v5 = vcombine.high %v6198_v14, %v6198_v14 }
 0x432   : > { %v7136_v60 = vsel %vm6414_vm12, %v6183_v27, -inf  ;;  %v7145_v33 = vmax.f32 %v7143_v58, %v7144_v40  ;;  %v7150_v20 = vsel %vm6414_vm12, %v6199_v52, -inf  ;;  %v7157_v63 = vsel %vm6414_vm12, %v6198_v14, -inf  ;;  %9737 = vmatpush1.bf16.msra.mxu0 %v17380_v3  ;;  %v17388_v14 = vld [vmem:[%s22405_s7 + $0x1b4] ss:$8 sps:$4 sm:$0xff]  }
 0x433   : > { %v7118_v53 = vrot.slane %v7117_v61, 2  ;;  %v7124_v19 = vmax.f32 %v7122_v29, %v7123_v22  ;;  %v7131_v48 = vmax.f32 %v7129_v32, %v7130_v55  ;;  %v7137_v23 = vrot.slane %v7136_v60, 4  ;;  %9738 = vmatprep.subr.bf16.mxu0 %v17385_v51 }
 0x434   : > { %v7146_v38 = vrot.slane %v7145_v33, 2  ;;  %v7151_v43 = vrot.slane %v7150_v20, 4  ;;  %v7158_v7 = vrot.slane %v7157_v63, 4  ;;  %v7164_v34 = vsel %vm6414_vm12, %v6200_v5, -inf }
 0x435   : > { %v7119_v2 = vmax.f32 %v7117_v61, %v7118_v53  ;;  %v7125_v50 = vrot.slane %v7124_v19, 2  ;;  %v7132_v62 = vrot.slane %v7131_v48, 2  ;;  %v7138_v6 = vmax.f32 %v7136_v60, %v7137_v23  ;;  %v17391_v23 = vld [vmem:[%s22405_s7 + $0x1c4] ss:$8 sps:$4 sm:$0xff]  }
 0x436   : > { %v7147_v41 = vmax.f32 %v7145_v33, %v7146_v38  ;;  %v7152_v0 = vmax.f32 %v7150_v20, %v7151_v43  ;;  %v7159_v8 = vmax.f32 %v7157_v63, %v7158_v7  ;;  %v7165_v18 = vrot.slane %v7164_v34, 4  ;;  %v7836_v13 = vld [vmem:[#allocation4 + $0x30] sm:$0xf]  ;;  %9739 = vmatpush1.bf16.msra.mxu0 %v17383_v56  ;;  %v17386_v63 = vld [vmem:[%s22405_s7 + $0x1b0] ss:$8 sps:$4 sm:$0xff]  }
 0x437   : > { %v7120_v28 = vrot.slane %v7119_v2, 1  ;;  %v7126_v44 = vmax.f32 %v7124_v19, %v7125_v50  ;;  %v7133_v31 = vmax.f32 %v7131_v48, %v7132_v62  ;;  %v7139_v10 = vrot.slane %v7138_v6, 2  ;;  %7844 = vst [vmem:[#allocation5 + $0xd8] sm:$0xf] %v7836_v13  ;;  %v8081_v52 = vld [vmem:[#allocation4 + $0x30] sm:$0xf]  ;;  %9740 = vmatprep.subr.bf16.mxu0 %v17388_v14 }
 0x438   : > { %v7148_v58 = vrot.slane %v7147_v41, 1  ;;  %v7153_v49 = vrot.slane %v7152_v0, 2  ;;  %v7160_v27 = vrot.slane %v7159_v8, 2  ;;  %v7166_v29 = vmax.f32 %v7164_v34, %v7165_v18  ;;  %8089 = vst [vmem:[#allocation5 + $0xc0] sm:$0xf] %v8081_v52 }
 0x439   : > { %v20088_v32 = vmax.f32 %v7119_v2, %v7120_v28  ;;  %v7127_v40 = vrot.slane %v7126_v44, 1  ;;  %v7134_v61 = vrot.slane %v7133_v31, 1  ;;  %v7140_v22 = vmax.f32 %v7138_v6, %v7139_v10  ;;  %v7850_v20 = vld [vmem:[#allocation4 + $0x10] sm:$0xf]  ;;  %v7851_v34 = vld [vmem:[#allocation4 + $0x14] sm:$0x1] }
 0x43a   : > { %v7149_v55 = vmax.f32 %v7147_v41, %v7148_v58  ;;  %v7154_v5 = vmax.f32 %v7152_v0, %v7153_v49  ;;  %v7161_v60 = vmax.f32 %v7159_v8, %v7160_v27  ;;  %v7167_v33 = vrot.slane %v7166_v29, 2  ;;  %v8317_v6 = vld [vmem:[#allocation4 + $0x10] sm:$0xf]  ;;  %v20110_v56 = vld [vmem:[#allocation4 + $0x18] sm:$0xf]  ;;  %9741 = vmatpush1.bf16.msra.mxu0 %v17386_v63 }
 0x43b   : > { %v20093_v3 = vmax.f32 %v7126_v44, %v7127_v40  ;;  %v20095_v53 = vmax.f32 %v7133_v31, %v7134_v61  ;;  %v7141_v19 = vrot.slane %v7140_v22, 1  ;;  %v5634_v48 = vmul.f32 %v19887_v9, %v20056_v4  ;;  %8325 = vst [vmem:[#allocation5 + $0x18] sm:$0xf] %v8317_v6  ;;  %9742 = vmatprep.subr.bf16.mxu0 %v17391_v23 }
 0x43c   : > { %v7155_v51 = vrot.slane %v7154_v5, 1  ;;  %v7162_v38 = vrot.slane %v7161_v60, 1  ;;  %v7168_v43 = vmax.f32 %v7166_v29, %v7167_v33  ;;  %v7359_v7 = vmax.f32 %v20032_v17, %v7149_v55  ;;  %v17389_v17 = vld [vmem:[%s22405_s7 + $0x1c0] ss:$8 sps:$4 sm:$0xff]  }
 0x43d   : > { %v20103_v2 = vmax.f32 %v7140_v22, %v7141_v19  ;;  %v5673_v50 = vadd.f32 %v19902_v45, %v5634_v48  ;;  %v20108_v62 = vadd.f32 %v19808_v12, %v19802_v47  ;;  %v7894_v4 = vshrl.u32 %v7850_v20, 16  ;;  %v17394_v47 = vld [vmem:[%s22405_s7 + $0x1d4] ss:$8 sps:$4 sm:$0xff]  }
 0x43e   : > { %v7156_v41 = vmax.f32 %v7154_v5, %v7155_v51  ;;  %v7163_v0 = vmax.f32 %v7161_v60, %v7162_v38  ;;  %v7169_v8 = vrot.slane %v7168_v43, 1  ;;  %v16130_v18 = vpack.c.bf16 %v7359_v7, %v7359_v7  ;;  %9743 = vmatpush1.bf16.msra.mxu0 %v17389_v17  ;;  %v17392_v5 = vld [vmem:[%s22405_s7 + $0x1d0] ss:$8 sps:$4 sm:$0xff]  }
 0x43f   : > { %v5705_v13 = vmax.f32 %v5673_v50, 0.0  ;;  %v7896_v28 = vrot.slane %v7894_v4, 4  ;;  %v7897_v44 = vshll.u32 %v7850_v20, 16  ;;  %v7903_v31 = vshll.u32 %v7851_v34, 16  ;;  %9744 = vmatprep.subr.bf16.mxu0 %v17394_v47 }
 0x440   : > { %v7170_v12 = vmax.f32 %v7168_v43, %v7169_v8  ;;  %v7360_v10 = vmax.f32 %v20038_v11, %v7156_v41  ;;  %v7361_v14 = vmax.f32 %v20049_v36, %v7163_v0  ;;  %v7679_v52 = vunpack.c.l.b16 %v16130_v18  ;;  %v7853_v43 = vld [vmem:[#allocation4 + $0x1c] sm:$0x1]  ;;  %v17397_v41 = vld [vmem:[%s22405_s7 + $0x1e0] ss:$8 sps:$4 sm:$0xff]   ;;  %v8318_v0 = vld [vmem:[#allocation4 + $0x18] sm:$0xf] }
 0x441   : > { %v6201_v58 = vcombine.high %v5705_v13, %v5705_v13  ;;  %v6208_v49 = vrot.slane %v5705_v13, %v19177_v16  ;;  %v7899_v27 = vrot.slane %v7897_v44, 5  ;;  %v7905_v29 = vrot.slane %v7903_v31, 5  ;;  %8326 = vst [vmem:[#allocation5 + $0x3c] sm:$0xf] %v8318_v0 }
 0x442   : > { %v7362_v40 = vmax.f32 %v20051_v54, %v7170_v12  ;;  %v16131_v61 = vpack.c.bf16 %v7360_v10, %v7360_v10  ;;  %v16132_v22 = vpack.c.bf16 %v7361_v14, %v7361_v14  ;;  %v7908_v55 = vshrl.u32 %v20110_v56, 16  ;;  %v17399_v54 = vld [vmem:[%s22405_s7 + $0x1e4] ss:$8 sps:$4 sm:$0xff]   ;;  %9745 = vmatpush1.bf16.msra.mxu0 %v17392_v5 }
 0x443   : > { %v6215_v11 = vrot.slane %v6201_v58, %v19177_v16  ;;  %v6216_v36 = vcombine.high %v6208_v49, %v6208_v49  ;;  %v7171_v60 = vsel %vm6414_vm12, %v6208_v49, -inf  ;;  %v7900_v33 = vor.u32 %v7899_v27, %v7896_v28  ;;  %9746 = vmatprep.subr.bf16.mxu0 %v17399_v54  ;;  %v17406_v28 = vld [vmem:[%s22405_s7 + $0x1f4] ss:$8 sps:$4 sm:$0xff]  }
 0x444   : > { %v16133_v20 = vpack.c.bf16 %v7362_v40, %v7362_v40  ;;  %v7680_v63 = vunpack.c.l.b16 %v16131_v61  ;;  %v7681_v19 = vunpack.c.l.b16 %v16132_v22  ;;  %v7172_v48 = vrot.slane %v7171_v60, 4  ;;  %v17404_v61 = vld [vmem:[%s22405_s7 + $0x1f0] ss:$8 sps:$4 sm:$0xff]  }
 0x445   : > { %v6217_v23 = vcombine.high %v6215_v11, %v6215_v11  ;;  %v7178_v51 = vsel %vm6414_vm12, %v6216_v36, -inf  ;;  %v7185_v38 = vsel %vm6414_vm12, %v6215_v11, -inf  ;;  %v7901_v7 = vrot.slane %v7900_v33, 4  ;;  %v22557_v36 = vld [vmem:[#allocation68_spill] sm:$0xff] }
 0x446   : > { %v7682_v34 = vunpack.c.l.b16 %v16133_v20  ;;  %v7737_v50 = vsel %vm7695_vm13, %v7680_v63, %v7679_v52  ;;  %v7173_v4 = vmax.f32 %v7171_v60, %v7172_v48  ;;  %v7179_v6 = vrot.slane %v7178_v51, 4  ;;  %9747 = vmatpush1.bf16.msra.mxu0 %v17397_v41  ;;  %v22558_v60 = vld [vmem:[#allocation31_spill] sm:$0xff] }
 0x447   : > { %v7738_v8 = vsel %vm22417_vm14, %v7681_v19, %v7737_v50  ;;  %v7186_v18 = vrot.slane %v7185_v38, 4  ;;  %v7192_v17 = vsel %vm6414_vm12, %v6217_v23, -inf  ;;  %v7906_v13 = vsel %vm19859_vm7, %v7901_v7, %v7905_v29  ;;  %9748 = vmatprep.subr.bf16.mxu0 %v17406_v28  ;;  %v591_v28 = vld [vmem:[#allocation4 + $0x40] sm:$0x1] }
 0x448   : > { %v7174_v44 = vrot.slane %v7173_v4, 2  ;;  %v7180_v31 = vmax.f32 %v7178_v51, %v7179_v6  ;;  %v7193_v47 = vrot.slane %v7192_v17, 4  ;;  %v20145_v12 = vsel %vm632_vm15, %v7682_v34, %v7738_v8  ;;  %7987 = vst [vmem:[#allocation5 + $0x4c] sm:$0xf] %v7906_v13  ;;  %v22561_v51 = vld [vmem:[#allocation28_spill] sm:$0xff] }
 0x449   : > { %v7187_v10 = vmax.f32 %v7185_v38, %v7186_v18  ;;  %v7910_v14 = vrot.slane %v7908_v55, 4  ;;  %v7911_v52 = vshll.u32 %v20110_v56, 16  ;;  %v7917_v58 = vshll.u32 %v7853_v43, 16  ;;  %v17409_v56 = vld [vmem:[%s22405_s7 + $0x204] ss:$8 sps:$4 sm:$0xff]   ;;  %v22562_v38 = vld [vmem:[#allocation34_spill] sm:$0xff] }
 0x44a   : > { %v7175_v49 = vmax.f32 %v7173_v4, %v7174_v44  ;;  %v7181_v27 = vrot.slane %v7180_v31, 2  ;;  %v7194_v29 = vmax.f32 %v7192_v17, %v7193_v47  ;;  %v16620_v40 = vadd.f32 %v19815_v1, %v19813_v26  ;;  %v22559_v26 = vld [vmem:[#allocation9_spill] sm:$0xff]  ;;  %9749 = vmatpush1.bf16.msra.mxu0 %v17404_v61 }
 0x44b   : > { %v7188_v22 = vrot.slane %v7187_v10, 2  ;;  %v7913_v5 = vrot.slane %v7911_v52, 5  ;;  %v7919_v11 = vrot.slane %v7917_v58, 5  ;;  %v5264_v55 = vadd.f32 %v22558_v60, %v22557_v36  ;;  %v22560_v1 = vld [vmem:[#allocation33_spill] sm:$0xff]  ;;  %9791 = vmatprep.subr.bf16.mxu0 %v17409_v56 }
 0x44c   : > { %v7176_v33 = vrot.slane %v7175_v49, 1  ;;  %v7182_v54 = vmax.f32 %v7180_v31, %v7181_v27  ;;  %v7195_v20 = vrot.slane %v7194_v29, 2  ;;  %v5267_v63 = vadd.f32 %v22560_v1, %v22559_v26  ;;  %v7818_v26 = vld [vmem:[#allocation4 + $0x38] sm:$0xf] }
 0x44d   : > { %v7189_v19 = vmax.f32 %v7187_v10, %v7188_v22  ;;  %v7914_v48 = vor.u32 %v7913_v5, %v7910_v14  ;;  %v5425_v23 = vadd.f32 %v20108_v62, %v5264_v55  ;;  %v5272_v43 = vadd.f32 %v22562_v38, %v22561_v51  ;;  %v7821_v22 = vld [vmem:[#allocation4 + $0x3c] sm:$0x1] }
 0x44e   : > { %v7177_v7 = vmax.f32 %v7175_v49, %v7176_v33  ;;  %v7183_v34 = vrot.slane %v7182_v54, 1  ;;  %v7196_v50 = vmax.f32 %v7194_v29, %v7195_v20  ;;  %v5428_v4 = vadd.f32 %v16620_v40, %v5267_v63 }
 0x44f   : > { %v7190_v6 = vrot.slane %v7189_v19, 1  ;;  %v7915_v41 = vrot.slane %v7914_v48, 4  ;;  %v5586_v0 = vadd.f32 %v19810_v25, %v5425_v23  ;;  %v16623_v8 = vadd.f32 %v19836_v57, %v19834_v59  ;;  %v621_v57 = vld [vmem:[#allocation4 + $0x44] sm:$0x1]  ;;  %v17349_v23 = vld [vmem:[#allocation5 + $0x48] ss:$36 sps:$4 sm:$0xff]  }
 0x450   : > { %v7184_v18 = vmax.f32 %v7182_v54, %v7183_v34  ;;  %v7197_v17 = vrot.slane %v7196_v50, 1  ;;  %v7363_v62 = vmax.f32 %v20088_v32, %v7177_v7  ;;  %v5589_v13 = vadd.f32 %v19830_v39, %v5428_v4 }
 0x451   : > { %v7191_v44 = vmax.f32 %v7189_v19, %v7190_v6  ;;  %v7920_v31 = vsel %vm19859_vm7, %v7915_v41, %v7919_v11  ;;  %v5635_v47 = vmul.f32 %v19887_v9, %v5586_v0  ;;  %v5433_v10 = vadd.f32 %v16623_v8, %v5272_v43 }
 0x452   : > { %v7198_v14 = vmax.f32 %v7196_v50, %v7197_v17  ;;  %v7364_v25 = vmax.f32 %v20093_v3, %v7184_v18  ;;  %v16134_v52 = vpack.c.bf16 %v7363_v62, %v7363_v62  ;;  %7988 = vst [vmem:[#allocation5 + $0x70] sm:$0xf] %v7920_v31  ;;  %v5636_v59 = vmul.f32 %v19887_v9, %v5589_v13 }
 0x453   : > { %v7365_v32 = vmax.f32 %v20095_v53, %v7191_v44  ;;  %v5674_v39 = vadd.f32 %v19902_v45, %v5635_v47  ;;  %v5594_v58 = vadd.f32 %v19804_v42, %v5433_v10  ;;  %v592_v49 = vsel %vm18198_vm3, 0, %v591_v28 }
 0x454   : > { %v7366_v27 = vmax.f32 %v20103_v2, %v7198_v14  ;;  %v16135_v29 = vpack.c.bf16 %v7364_v25, %v7364_v25  ;;  %v7683_v40 = vunpack.c.l.b16 %v16134_v52  ;;  %v5675_v3 = vadd.f32 %v19902_v45, %v5636_v59  ;;  %593 = vst [vmem:[#allocation4 + $0x40] sm:$0x1] %v592_v49  ;;  %v8319_v2 = vld [vmem:[#allocation4 + $0x20] sm:$0xf] }
 0x455   : > { %v16136_v61 = vpack.c.bf16 %v7365_v32, %v7365_v32  ;;  %v5706_v5 = vmax.f32 %v5674_v39, 0.0  ;;  %v5637_v11 = vmul.f32 %v19887_v9, %v5594_v58  ;;  %v622_v53 = vsel %vm18236_vm5, 0, %v621_v57  ;;  %8327 = vst [vmem:[#allocation5 + $0x60] sm:$0xf] %v8319_v2 }
 0x456   : > { %v7684_v36 = vunpack.c.l.b16 %v16135_v29  ;;  %v7740_v42 = vsel %vm7701_vm0, %v7683_v40, %v20145_v12  ;;  %v16152_v60 = vpack.c.bf16 %v7366_v27, %v7366_v27  ;;  %v5707_v55 = vmax.f32 %v5675_v3, 0.0  ;;  %623 = vst [vmem:[#allocation4 + $0x44] sm:$0x1] %v622_v53 }
 0x457   : > { %v7685_v56 = vunpack.c.l.b16 %v16136_v61  ;;  %v6218_v33 = vcombine.high %v5706_v5, %v5706_v5  ;;  %v6225_v54 = vrot.slane %v5706_v5, %v19177_v16  ;;  %v20187_v20 = vadd.f32 %v19902_v45, %v5637_v11 }
 0x458   : > { %v7741_v9 = vsel %vm7703_vm1, %v7684_v36, %v7740_v42  ;;  %v7822_v1 = vsel %vm18198_vm3, %v16152_v60, %v7821_v22  ;;  %v6235_v63 = vcombine.high %v5707_v55, %v5707_v55  ;;  %v6242_v12 = vrot.slane %v5707_v55, %v19177_v16 }
 0x459   : > { %v7742_v19 = vsel %vm22416_vm2, %v7685_v56, %v7741_v9  ;;  %7823 = vst [vmem:[#allocation4 + $0x3c] sm:$0x1] %v7822_v1  ;;  %v17347_v48 = vld [vmem:[#allocation5 + $0x4c] ss:$36 sps:$4 sm:$0xff]   ;;  %v6232_v51 = vrot.slane %v6218_v33, %v19177_v16  ;;  %v6233_v38 = vcombine.high %v6225_v54, %v6225_v54  ;;  %v7199_v45 = vsel %vm6414_vm12, %v6225_v54, -inf }
 0x45a   : > { %v7761_v43 = vpack.c.b16 %v7742_v19, %v7742_v19  ;;  %v7200_v7 = vrot.slane %v7199_v45, 4  ;;  %v6249_v34 = vrot.slane %v6235_v63, %v19177_v16  ;;  %v6250_v50 = vcombine.high %v6242_v12, %v6242_v12  ;;  %9687 = vmatprep.mubr.bf16.mxu0 %v17347_v48 }
 0x45b   : > { %v6234_v4 = vcombine.high %v6232_v51, %v6232_v51  ;;  %v7206_v6 = vsel %vm6414_vm12, %v6233_v38, -inf  ;;  %v7213_v41 = vsel %vm6414_vm12, %v6232_v51, -inf  ;;  %v7227_v0 = vsel %vm6414_vm12, %v6242_v12, -inf  ;;  %9688 = vmatmul.mubr.bf16.gmra.mrb[228].mxu0 %v17349_v23 }
 0x45c   : > { %v7819_v8 = vsel %vm18412_vm9, %v7761_v43, %v7818_v26  ;;  %v7201_v18 = vmax.f32 %v7199_v45, %v7200_v7  ;;  %v7207_v17 = vrot.slane %v7206_v6, 4  ;;  %v7214_v62 = vrot.slane %v7213_v41, 4 }
 0x45d   : > { %7820 = vst [vmem:[#allocation4 + $0x38] sm:$0xf] %v7819_v8  ;;  %v7220_v13 = vsel %vm6414_vm12, %v6234_v4, -inf  ;;  %v6251_v28 = vcombine.high %v6249_v34, %v6249_v34  ;;  %v7228_v44 = vrot.slane %v7227_v0, 4  ;;  %v7234_v31 = vsel %vm6414_vm12, %v6250_v50, -inf  ;;  %v22564_v8 = vld [vmem:[#allocation35_spill] sm:$0xff] }
 0x45e   : > { %v7202_v47 = vrot.slane %v7201_v18, 2  ;;  %v7208_v10 = vmax.f32 %v7206_v6, %v7207_v17  ;;  %v7215_v14 = vmax.f32 %v7213_v41, %v7214_v62  ;;  %v7221_v25 = vrot.slane %v7220_v13, 4  ;;  %v7854_v50 = vld [vmem:[#allocation4 + $0x20] sm:$0xf] }
 0x45f   : > { %v7229_v52 = vmax.f32 %v7227_v0, %v7228_v44  ;;  %v7235_v59 = vrot.slane %v7234_v31, 4  ;;  %v7241_v57 = vsel %vm6414_vm12, %v6249_v34, -inf  ;;  %v7248_v32 = vsel %vm6414_vm12, %v6251_v28, -inf  ;;  %v22563_v0 = vld [vmem:[#allocation10_spill] sm:$0xff] }
 0x460   : > { %v7203_v39 = vmax.f32 %v7201_v18, %v7202_v47  ;;  %v7209_v58 = vrot.slane %v7208_v10, 2  ;;  %v7216_v49 = vrot.slane %v7215_v14, 2  ;;  %v7222_v27 = vmax.f32 %v7220_v13, %v7221_v25  ;;  %v7855_v47 = vld [vmem:[#allocation4 + $0x24] sm:$0x1] }
 0x461   : > { %v7230_v29 = vrot.slane %v7229_v52, 2  ;;  %v7236_v40 = vmax.f32 %v7234_v31, %v7235_v59  ;;  %v7242_v3 = vrot.slane %v7241_v57, 4  ;;  %v7249_v61 = vrot.slane %v7248_v32, 4 }
 0x462   : > { %v7204_v22 = vrot.slane %v7203_v39, 1  ;;  %v7210_v5 = vmax.f32 %v7208_v10, %v7209_v58  ;;  %v7217_v11 = vmax.f32 %v7215_v14, %v7216_v49  ;;  %v7223_v53 = vrot.slane %v7222_v27, 2 }
 0x463   : > { %v7231_v36 = vmax.f32 %v7229_v52, %v7230_v29  ;;  %v7237_v42 = vrot.slane %v7236_v40, 2  ;;  %v7243_v60 = vmax.f32 %v7241_v57, %v7242_v3  ;;  %v7250_v55 = vmax.f32 %v7248_v32, %v7249_v61  ;;  %v7856_v57 = vld [vmem:[#allocation4 + $0x28] sm:$0xf] }
 0x464   : > { %v20206_v2 = vmax.f32 %v7203_v39, %v7204_v22  ;;  %v7211_v56 = vrot.slane %v7210_v5, 1  ;;  %v7218_v33 = vrot.slane %v7217_v11, 1  ;;  %v7224_v54 = vmax.f32 %v7222_v27, %v7223_v53  ;;  %v7837_v9 = vld [vmem:[#allocation4 + $0x38] sm:$0xf]  ;;  %v8320_v32 = vld [vmem:[#allocation4 + $0x28] sm:$0xf] }
 0x465   : > { %v7232_v26 = vrot.slane %v7231_v36, 1  ;;  %v7238_v1 = vmax.f32 %v7236_v40, %v7237_v42  ;;  %v7244_v63 = vrot.slane %v7243_v60, 2  ;;  %v7251_v12 = vrot.slane %v7250_v55, 2  ;;  %7845 = vst [vmem:[#allocation5 + $0xfc] sm:$0xf] %v7837_v9 }
 0x466   : > { %v20208_v19 = vmax.f32 %v7210_v5, %v7211_v56  ;;  %v20210_v48 = vmax.f32 %v7217_v11, %v7218_v33  ;;  %v7225_v23 = vrot.slane %v7224_v54, 1  ;;  %v5708_v51 = vmax.f32 %v20187_v20, 0.0  ;;  %v8082_v38 = vld [vmem:[#allocation4 + $0x38] sm:$0xf]  ;;  %8328 = vst [vmem:[#allocation5 + $0x84] sm:$0xf] %v8320_v32 }
 0x467   : > { %v20213_v45 = vmax.f32 %v7231_v36, %v7232_v26  ;;  %v7239_v43 = vrot.slane %v7238_v1, 1  ;;  %v7245_v7 = vmax.f32 %v7243_v60, %v7244_v63  ;;  %v7252_v34 = vmax.f32 %v7250_v55, %v7251_v12  ;;  %8090 = vst [vmem:[#allocation5 + $0xe4] sm:$0xf] %v8082_v38  ;;  %v7857_v60 = vld [vmem:[#allocation4 + $0x2c] sm:$0x1] }
 0x468   : > { %v20215_v4 = vmax.f32 %v7224_v54, %v7225_v23  ;;  %v6252_v6 = vcombine.high %v5708_v51, %v5708_v51  ;;  %v6259_v41 = vrot.slane %v5708_v51, %v19177_v16  ;;  %v5275_v18 = vadd.f32 %v22564_v8, %v22563_v0  ;;  %v18016_v55 = vld [vmem:[%s22403_s5] ss:$0 sm:$0xff] }
 0x469   : > { %v20220_v17 = vmax.f32 %v7238_v1, %v7239_v43  ;;  %v7246_v62 = vrot.slane %v7245_v7, 1  ;;  %v7253_v20 = vrot.slane %v7252_v34, 1  ;;  %v16626_v13 = vadd.f32 %v19937_v46, %v19928_v24  ;;  %v18017_v12 = vld [vmem:[%s22404_s6] ss:$0 sm:$0xff] }
 0x46a   : > { %v6266_v28 = vrot.slane %v6252_v6, %v19177_v16  ;;  %v6267_v44 = vcombine.high %v6259_v41, %v6259_v41  ;;  %v7255_v31 = vsel %vm6414_vm12, %v6259_v41, -inf  ;;  %v7922_v10 = vshrl.u32 %v7854_v50, 16 }
 0x46b   : > { %v20226_v14 = vmax.f32 %v7245_v7, %v7246_v62  ;;  %v20228_v25 = vmax.f32 %v7252_v34, %v7253_v20  ;;  %v7256_v52 = vrot.slane %v7255_v31, 4  ;;  %v5436_v59 = vadd.f32 %v16626_v13, %v5275_v18 }
 0x46c   : > { %v6268_v39 = vcombine.high %v6266_v28, %v6266_v28  ;;  %v7262_v58 = vsel %vm6414_vm12, %v6267_v44, -inf  ;;  %v7269_v24 = vsel %vm6414_vm12, %v6266_v28, -inf  ;;  %v7924_v46 = vrot.slane %v7922_v10, 4  ;;  %v8321_v44 = vld [vmem:[#allocation4 + $0x30] sm:$0xf] }
 0x46d   : > { %v7257_v49 = vmax.f32 %v7255_v31, %v7256_v52  ;;  %v7263_v27 = vrot.slane %v7262_v58, 4  ;;  %v7270_v29 = vrot.slane %v7269_v24, 4  ;;  %v5597_v40 = vadd.f32 %v19827_v30, %v5436_v59  ;;  %8329 = vst [vmem:[#allocation5 + $0xa8] sm:$0xf] %v8321_v44 }
 0x46e   : > { %v7276_v3 = vsel %vm6414_vm12, %v6268_v39, -inf  ;;  %v7925_v61 = vshll.u32 %v7854_v50, 16  ;;  %v7931_v22 = vshll.u32 %v7855_v47, 16  ;;  %v7936_v5 = vshrl.u32 %v7856_v57, 16 }
 0x46f   : > { %v7258_v11 = vrot.slane %v7257_v49, 2  ;;  %v7264_v53 = vmax.f32 %v7262_v58, %v7263_v27  ;;  %v7271_v36 = vmax.f32 %v7269_v24, %v7270_v29  ;;  %v7277_v42 = vrot.slane %v7276_v3, 4 }
 0x470   : > { %v5638_v56 = vmul.f32 %v18016_v55, %v5597_v40  ;;  %v7927_v33 = vrot.slane %v7925_v61, 5  ;;  %v7933_v54 = vrot.slane %v7931_v22, 5  ;;  %v7938_v9 = vrot.slane %v7936_v5, 4 }
 0x471   : > { %v7259_v26 = vmax.f32 %v7257_v49, %v7258_v11  ;;  %v7265_v30 = vrot.slane %v7264_v53, 2  ;;  %v7272_v1 = vrot.slane %v7271_v36, 2  ;;  %v7278_v63 = vmax.f32 %v7276_v3, %v7277_v42 }
 0x472   : > { %v5677_v23 = vadd.f32 %v18017_v12, %v5638_v56  ;;  %v7928_v51 = vor.u32 %v7927_v33, %v7924_v46  ;;  %v7939_v38 = vshll.u32 %v7856_v57, 16  ;;  %v7945_v43 = vshll.u32 %v7857_v60, 16 }
 0x473   : > { %v7260_v7 = vrot.slane %v7259_v26, 1  ;;  %v7266_v34 = vmax.f32 %v7264_v53, %v7265_v30  ;;  %v7273_v50 = vmax.f32 %v7271_v36, %v7272_v1  ;;  %v7279_v6 = vrot.slane %v7278_v63, 2 }
 0x474   : > { %v5709_v41 = vmax.f32 %v5677_v23, 0.0  ;;  %v7929_v0 = vrot.slane %v7928_v51, 4  ;;  %v7941_v8 = vrot.slane %v7939_v38, 5  ;;  %v7947_v18 = vrot.slane %v7945_v43, 5  ;;  %v7859_v38 = vld [vmem:[#allocation4 + $0x34] sm:$0x1] }
 0x475   : > { %v7261_v62 = vmax.f32 %v7259_v26, %v7260_v7  ;;  %v7267_v20 = vrot.slane %v7266_v34, 1  ;;  %v7274_v13 = vrot.slane %v7273_v50, 1  ;;  %v7280_v28 = vmax.f32 %v7278_v63, %v7279_v6 }
 0x476   : > { %v6269_v31 = vcombine.high %v5709_v41, %v5709_v41  ;;  %v6276_v47 = vrot.slane %v5709_v41, %v19177_v16  ;;  %v7934_v10 = vsel %vm19859_vm7, %v7929_v0, %v7933_v54  ;;  %v7942_v52 = vor.u32 %v7941_v8, %v7938_v9  ;;  %v7860_v41 = vld [vmem:[#allocation4 + $0x38] sm:$0xf] }
 0x477   : > { %v7268_v59 = vmax.f32 %v7266_v34, %v7267_v20  ;;  %v7275_v57 = vmax.f32 %v7273_v50, %v7274_v13  ;;  %v7281_v32 = vrot.slane %v7280_v28, 1  ;;  %v7367_v39 = vmax.f32 %v20206_v2, %v7261_v62  ;;  %7989 = vst [vmem:[#allocation5 + $0x94] sm:$0xf] %v7934_v10 }
 0x478   : > { %v6283_v58 = vrot.slane %v6269_v31, %v19177_v16  ;;  %v6284_v24 = vcombine.high %v6276_v47, %v6276_v47  ;;  %v7283_v46 = vsel %vm6414_vm12, %v6276_v47, -inf  ;;  %v7943_v49 = vrot.slane %v7942_v52, 4  ;;  %v7861_v47 = vld [vmem:[#allocation4 + $0x3c] sm:$0x1] }
 0x479   : > { %v7282_v27 = vmax.f32 %v7280_v28, %v7281_v32  ;;  %v7368_v29 = vmax.f32 %v20208_v19, %v7268_v59  ;;  %v7369_v40 = vmax.f32 %v20210_v48, %v7275_v57  ;;  %v16138_v3 = vpack.c.bf16 %v7367_v39, %v7367_v39  ;;  %v7858_v19 = vld [vmem:[#allocation4 + $0x30] sm:$0xf] }
 0x47a   : > { %v6285_v61 = vcombine.high %v6283_v58, %v6283_v58  ;;  %v7284_v22 = vrot.slane %v7283_v46, 4  ;;  %v7290_v5 = vsel %vm6414_vm12, %v6284_v24, -inf  ;;  %v7297_v11 = vsel %vm6414_vm12, %v6283_v58, -inf }
 0x47b   : > { %v7370_v2 = vmax.f32 %v20215_v4, %v7282_v27  ;;  %v16139_v53 = vpack.c.bf16 %v7368_v29, %v7368_v29  ;;  %v16140_v36 = vpack.c.bf16 %v7369_v40, %v7369_v40  ;;  %v7687_v42 = vunpack.c.l.b16 %v16138_v3  ;;  %v7993_v29 = vld [vmem:[#allocation4] sm:$0xe]  ;;  %v8322_v40 = vld [vmem:[#allocation4 + $0x38] sm:$0xf] }
 0x47c   : > { %v7285_v60 = vmax.f32 %v7283_v46, %v7284_v22  ;;  %v7291_v55 = vrot.slane %v7290_v5, 4  ;;  %v7298_v56 = vrot.slane %v7297_v11, 4  ;;  %v7304_v33 = vsel %vm6414_vm12, %v6285_v61, -inf  ;;  %8330 = vst [vmem:[#allocation5 + $0xcc] sm:$0xf] %v8322_v40 }
 0x47d   : > { %v16141_v54 = vpack.c.bf16 %v7370_v2, %v7370_v2  ;;  %v7688_v48 = vunpack.c.l.b16 %v16139_v53  ;;  %v7689_v9 = vunpack.c.l.b16 %v16140_v36  ;;  %v7305_v26 = vrot.slane %v7304_v33, 4  ;;  %v8008_v40 = vld [vmem:[#allocation4 + $0x3c] sm:$0x1] }
 0x47e   : > { %v7286_v30 = vrot.slane %v7285_v60, 2  ;;  %v7292_v1 = vmax.f32 %v7290_v5, %v7291_v55  ;;  %v7299_v63 = vmax.f32 %v7297_v11, %v7298_v56  ;;  %v7948_v12 = vsel %vm19859_vm7, %v7943_v49, %v7947_v18  ;;  %v17373_v11 = vld [vmem:[#allocation5 + $0x90] ss:$36 sps:$4 sm:$0xff]   ;;  %v7995_v55 = vld [vmem:[#allocation4 + $0x8] sm:$0xe] }
 0x47f   : > { %v7690_v4 = vunpack.c.l.b16 %v16141_v54  ;;  %v7743_v23 = vsel %vm7695_vm13, %v7688_v48, %v7687_v42  ;;  %v7306_v51 = vmax.f32 %v7304_v33, %v7305_v26  ;;  %7990 = vst [vmem:[#allocation5 + $0xb8] sm:$0xf] %v7948_v12  ;;  %v7950_v43 = vshrl.u32 %v7858_v19, 16  ;;  %v7996_v48 = vld [vmem:[#allocation4 + $0xc] sm:$0x1] }
 0x480   : > { %v7744_v7 = vsel %vm22417_vm14, %v7689_v9, %v7743_v23  ;;  %v7287_v34 = vmax.f32 %v7285_v60, %v7286_v30  ;;  %v7293_v50 = vrot.slane %v7292_v1, 2  ;;  %v7300_v6 = vrot.slane %v7299_v63, 2  ;;  %v7994_v60 = vld [vmem:[#allocation4 + $0x4] sm:$0x1]  ;;  %v7997_v9 = vld [vmem:[#allocation4 + $0x10] sm:$0xe] }
 0x481   : > { %v7307_v0 = vrot.slane %v7306_v51, 2  ;;  %v20257_v8 = vsel %vm632_vm15, %v7690_v4, %v7744_v7  ;;  %v7952_v62 = vrot.slane %v7950_v43, 4  ;;  %v7953_v20 = vshll.u32 %v7858_v19, 16  ;;  %v7827_v23 = vld [vmem:[#allocation4 + $0x44] sm:$0x1] }
 0x482   : > { %v7288_v18 = vrot.slane %v7287_v34, 1  ;;  %v7294_v13 = vmax.f32 %v7292_v1, %v7293_v50  ;;  %v7301_v28 = vmax.f32 %v7299_v63, %v7300_v6  ;;  %v7959_v44 = vshll.u32 %v7859_v38, 16  ;;  %v7998_v1 = vld [vmem:[#allocation4 + $0x14] sm:$0x1]  ;;  %v7999_v63 = vld [vmem:[#allocation4 + $0x18] sm:$0xe] }
 0x483   : > { %v7308_v31 = vmax.f32 %v7306_v51, %v7307_v0  ;;  %v7955_v10 = vrot.slane %v7953_v20, 5  ;;  %v7964_v52 = vshrl.u32 %v7860_v41, 16  ;;  %v7967_v59 = vshll.u32 %v7860_v41, 16  ;;  %v8001_v50 = vld [vmem:[#allocation4 + $0x20] sm:$0xe] }
 0x484   : > { %v7289_v57 = vmax.f32 %v7287_v34, %v7288_v18  ;;  %v7295_v32 = vrot.slane %v7294_v13, 1  ;;  %v7302_v39 = vrot.slane %v7301_v28, 1  ;;  %v7961_v58 = vrot.slane %v7959_v44, 5  ;;  %v8002_v6 = vld [vmem:[#allocation4 + $0x24] sm:$0x1] }
 0x485   : > { %v7309_v24 = vrot.slane %v7308_v31, 1  ;;  %v7956_v46 = vor.u32 %v7955_v10, %v7952_v62  ;;  %v7966_v49 = vrot.slane %v7964_v52, 4  ;;  %v7969_v27 = vrot.slane %v7967_v59, 5  ;;  %v8003_v18 = vld [vmem:[#allocation4 + $0x28] sm:$0xe] }
 0x486   : > { %v7296_v3 = vmax.f32 %v7294_v13, %v7295_v32  ;;  %v7303_v61 = vmax.f32 %v7301_v28, %v7302_v39  ;;  %v7371_v22 = vmax.f32 %v20213_v45, %v7289_v57  ;;  %v17368_v5 = vld [vmem:[#allocation5 + $0x94] ss:$36 sps:$4 sm:$0xff]   ;;  %v7973_v2 = vshll.u32 %v7861_v47, 16  ;;  %v8004_v13 = vld [vmem:[#allocation4 + $0x2c] sm:$0x1] }
 0x487   : > { %v7310_v53 = vmax.f32 %v7308_v31, %v7309_v24  ;;  %v7957_v36 = vrot.slane %v7956_v46, 4  ;;  %v7970_v42 = vor.u32 %v7969_v27, %v7966_v49  ;;  %9697 = vmatprep.mubr.bf16.mxu0 %v17368_v5  ;;  %v15450_v51 = vrot.slane %v7993_v29, 9  ;;  %v8006_v10 = vld [vmem:[#allocation4 + $0x34] sm:$0x1]  ;;  %v8092_v52 = vld [vmem:[#allocation4 + $0x8] sm:$0xf] }
 0x488   : > { %v7372_v56 = vmax.f32 %v20220_v17, %v7296_v3  ;;  %v7373_v33 = vmax.f32 %v20226_v14, %v7303_v61  ;;  %v16142_v19 = vpack.c.bf16 %v7371_v22, %v7371_v22  ;;  %v7975_v54 = vrot.slane %v7973_v2, 5  ;;  %9698 = vmatmul.mubr.bf16.gmra.mrb[232].mxu0 %v17373_v11  ;;  %v8005_v39 = vld [vmem:[#allocation4 + $0x30] sm:$0xe]  ;;  %v7824_v46 = vld [vmem:[#allocation4 + $0x40] sm:$0xf] }
 0x489   : > { %v7374_v45 = vmax.f32 %v20228_v25, %v7310_v53  ;;  %v7962_v26 = vsel %vm19859_vm7, %v7957_v36, %v7961_v58  ;;  %v7971_v30 = vrot.slane %v7970_v42, 4  ;;  %v8000_v25 = vld [vmem:[#allocation4 + $0x1c] sm:$0x1]  ;;  %v8030_v7 = vrot.slane %v7994_v60, 5  ;;  %v8007_v58 = vld [vmem:[#allocation4 + $0x38] sm:$0xe] }
 0x48a   : > { %v16143_v12 = vpack.c.bf16 %v7372_v56, %v7372_v56  ;;  %v16144_v4 = vpack.c.bf16 %v7373_v33, %v7373_v33  ;;  %v7691_v17 = vunpack.c.l.b16 %v16142_v19  ;;  %7991 = vst [vmem:[#allocation5 + $0xdc] sm:$0xf] %v7962_v26  ;;  %v15451_v34 = vrot.slane %v7995_v55, 9  ;;  %v8093_v11 = vld [vmem:[#allocation4 + $0xc] sm:$0x1] }
 0x48b   : > { %v16153_v38 = vpack.c.bf16 %v7374_v45, %v7374_v45  ;;  %v7976_v43 = vsel %vm19859_vm7, %v7971_v30, %v7975_v54  ;;  %v8034_v20 = vrot.slane %v7996_v48, 5  ;;  %v8031_v44 = vsel %vm20266_vm11, %v15450_v51, %v8030_v7  ;;  %v8094_v60 = vld [vmem:[#allocation4 + $0x10] sm:$0xf]  ;;  %v8095_v19 = vld [vmem:[#allocation4 + $0x14] sm:$0x1] }
 0x48c   : > { %v7692_v41 = vunpack.c.l.b16 %v16143_v12  ;;  %v7693_v0 = vunpack.c.l.b16 %v16144_v4  ;;  %v7746_v62 = vsel %vm7701_vm0, %v7691_v17, %v20257_v8  ;;  %7992 = vst [vmem:[#allocation5 + $0x100] sm:$0xf] %v7976_v43  ;;  %v15452_v31 = vrot.slane %v7997_v9, 9  ;;  %8068 = vst [vmem:[#allocation5 + $0x8] sm:$0xf] %v8031_v44 }
 0x48d   : > { %v7828_v28 = vsel %vm18198_vm3, %v16153_v38, %v7827_v23  ;;  %v8038_v47 = vrot.slane %v7998_v1, 5  ;;  %v8035_v8 = vsel %vm20266_vm11, %v15451_v34, %v8034_v20  ;;  %v15453_v57 = vrot.slane %v7999_v63, 9  ;;  %v8236_v48 = vld [vmem:[#allocation4 + $0x8] sm:$0xe]  ;;  %v8237_v1 = vld [vmem:[#allocation4 + $0xc] sm:$0x1] }
 0x48e   : > { %v7747_v59 = vsel %vm7703_vm1, %v7692_v41, %v7746_v62  ;;  %7829 = vst [vmem:[#allocation4 + $0x44] sm:$0x1] %v7828_v28  ;;  %v8042_v32 = vrot.slane %v8000_v25, 5  ;;  %8069 = vst [vmem:[#allocation5 + $0x2c] sm:$0xf] %v8035_v8  ;;  %v15454_v27 = vrot.slane %v8001_v50, 9 }
 0x48f   : > { %v7748_v24 = vsel %vm22416_vm2, %v7693_v0, %v7747_v59  ;;  %v8039_v49 = vsel %vm20266_vm11, %v15452_v31, %v8038_v47  ;;  %v8046_v29 = vrot.slane %v8002_v6, 5  ;;  %v15455_v22 = vrot.slane %v8003_v18, 9  ;;  %v17400_v45 = vld [vmem:[#allocation5 + $0xd8] ss:$36 sps:$4 sm:$0xff]   ;;  %v8238_v23 = vld [vmem:[#allocation4 + $0x10] sm:$0xe]  ;;  %vm667_vm2 = vmand %vm632_vm15, %vm666_vm6 }
 0x490   : > { %v7763_v3 = vpack.c.b16 %v7748_v24, %v7748_v24  ;;  %v8043_v61 = vsel %vm20266_vm11, %v15453_v57, %v8042_v32  ;;  %8070 = vst [vmem:[#allocation5 + $0x50] sm:$0xf] %v8039_v49  ;;  %v8050_v5 = vrot.slane %v8004_v13, 5  ;;  %v15456_v53 = vrot.slane %v8005_v39, 9  ;;  %v8239_v38 = vld [vmem:[#allocation4 + $0x14] sm:$0x1]  ;;  %vm20716_vm14 = vmor %vm667_vm2, %vm18236_vm5 }
 0x491   : > { %8071 = vst [vmem:[#allocation5 + $0x74] sm:$0xf] %v8043_v61  ;;  %v8047_v2 = vsel %vm20266_vm11, %v15454_v27, %v8046_v29  ;;  %v8054_v36 = vrot.slane %v8006_v10, 5  ;;  %v15457_v42 = vrot.slane %v8007_v58, 9  ;;  %v8058_v33 = vrot.slane %v8008_v40, 5 }
 0x492   : > { %v7825_v55 = vsel %vm18412_vm9, %v7763_v3, %v7824_v46  ;;  %v8051_v56 = vsel %vm20266_vm11, %v15455_v22, %v8050_v5  ;;  %8072 = vst [vmem:[#allocation5 + $0x98] sm:$0xf] %v8047_v2  ;;  %v8109_v54 = vshrl.u32 %v8092_v52, 16  ;;  %v8112_v30 = vshll.u32 %v8092_v52, 16  ;;  %v17403_v43 = vld [vmem:[#allocation5 + $0xc] ss:$36 sps:$4 sm:$0xff]  }
 0x493   : > { %7826 = vst [vmem:[#allocation4 + $0x40] sm:$0xf] %v7825_v55  ;;  %v17395_v9 = vld [vmem:[#allocation5 + $0xdc] ss:$36 sps:$4 sm:$0xff]   ;;  %8073 = vst [vmem:[#allocation5 + $0xbc] sm:$0xf] %v8051_v56  ;;  %v8055_v26 = vsel %vm20266_vm11, %v15456_v53, %v8054_v36  ;;  %v8059_v63 = vsel %vm20266_vm11, %v15457_v42, %v8058_v33 }
 0x494   : > { %8074 = vst [vmem:[#allocation5 + $0xe0] sm:$0xf] %v8055_v26  ;;  %v8111_v12 = vrot.slane %v8109_v54, 4  ;;  %v8118_v4 = vshll.u32 %v8093_v11, 16  ;;  %v8123_v17 = vshrl.u32 %v8094_v60, 16  ;;  %9707 = vmatprep.mubr.bf16.mxu0 %v17395_v9  ;;  %v8114_v51 = vrot.slane %v8112_v30, 5 }
 0x495   : > { %8075 = vst [vmem:[#allocation5 + $0x104] sm:$0xf] %v8059_v63  ;;  %v8126_v25 = vshll.u32 %v8094_v60, 16  ;;  %9708 = vmatmul.mubr.bf16.gmra.mrb[236].mxu0 %v17400_v45  ;;  %v8132_v7 = vshll.u32 %v8095_v19, 16  ;;  %v15458_v34 = vrot.slane %v8236_v48, 9  ;;  %v8270_v18 = vrot.slane %v8237_v1, 5 }
 0x496   : > { %v8115_v50 = vor.u32 %v8114_v51, %v8111_v12  ;;  %v8125_v6 = vrot.slane %v8123_v17, 4  ;;  %v8096_v0 = vld [vmem:[#allocation4 + $0x18] sm:$0xf]  ;;  %v8097_v62 = vld [vmem:[#allocation4 + $0x1c] sm:$0x1]  ;;  %9750 = vmatprep.mubr.bf16.mxu0 %v17403_v43  ;;  %v8120_v20 = vrot.slane %v8118_v4, 5 }
 0x497   : > { %v8128_v41 = vrot.slane %v8126_v25, 5  ;;  %v8099_v13 = vld [vmem:[#allocation4 + $0x24] sm:$0x1]  ;;  %v8240_v28 = vld [vmem:[#allocation4 + $0x18] sm:$0xe]  ;;  %v15459_v10 = vrot.slane %v8238_v23, 9  ;;  %v8271_v39 = vsel %vm20266_vm11, %v15458_v34, %v8270_v18 }
 0x498   : > { %v17407_v44 = vld [vmem:[%s22405_s7 + $0x200] ss:$8 sps:$4 sm:$0xff]   ;;  %v8116_v31 = vrot.slane %v8115_v50, 4  ;;  %v8274_v52 = vrot.slane %v8239_v38, 5  ;;  %v8098_v59 = vld [vmem:[#allocation4 + $0x20] sm:$0xf] }
 0x499   : > { %v8129_v47 = vor.u32 %v8128_v41, %v8125_v6  ;;  %v8241_v8 = vld [vmem:[#allocation4 + $0x1c] sm:$0x1]  ;;  %v8134_v32 = vrot.slane %v8132_v7, 5  ;;  %v8137_v58 = vshrl.u32 %v8096_v0, 16  ;;  %v8242_v24 = vld [vmem:[#allocation4 + $0x20] sm:$0xe] }
 0x49a   : > { %v17414_v57 = vld [vmem:[%s22405_s7 + $0x214] ss:$8 sps:$4 sm:$0xff]   ;;  %v8083_v49 = vld [vmem:[#allocation4 + $0x40] sm:$0xf]  ;;  %v8121_v27 = vsel %vm19859_vm7, %v8116_v31, %v8120_v20  ;;  %v8275_v40 = vsel %vm20266_vm11, %v15459_v10, %v8274_v52  ;;  %8308 = vst [vmem:[#allocation5 + $0x14] sm:$0xf] %v8271_v39 }
 0x49b   : > { %v8243_v46 = vld [vmem:[#allocation4 + $0x24] sm:$0x1]  ;;  %v8130_v29 = vrot.slane %v8129_v47, 4  ;;  %v8140_v3 = vshll.u32 %v8096_v0, 16  ;;  %v8100_v61 = vld [vmem:[#allocation4 + $0x28] sm:$0xf] }
 0x49c   : > { %v17401_v22 = vld [vmem:[#allocation5 + $0x8] ss:$36 sps:$4 sm:$0xff]   ;;  %8091 = vst [vmem:[#allocation5 + $0x108] sm:$0xf] %v8083_v49  ;;  %8228 = vst [vmem:[#allocation5 + $0x10] sm:$0xf] %v8121_v27 }
 0x49d   : > { %8309 = vst [vmem:[#allocation5 + $0x38] sm:$0xf] %v8275_v40  ;;  %v8139_v5 = vrot.slane %v8137_v58, 4  ;;  %v8146_v11 = vshll.u32 %v8097_v62, 16  ;;  %v8151_v2 = vshrl.u32 %v8098_v59, 16  ;;  %v8154_v53 = vshll.u32 %v8098_v59, 16  ;;  %9751 = vmatmul.mubr.bf16.vlgmr.msra.gmra.mrb[224].mxu0 %v17401_v22 }
 0x49e   : > { %v8101_v36 = vld [vmem:[#allocation4 + $0x2c] sm:$0x1]  ;;  %v17410_v42 = vld [vmem:[#allocation5 + $0x54] ss:$36 sps:$4 sm:$0xff]   ;;  %v8135_v60 = vsel %vm19859_vm7, %v8130_v29, %v8134_v32  ;;  %v8142_v55 = vrot.slane %v8140_v3, 5  ;;  %v8160_v56 = vshll.u32 %v8099_v13, 16  ;;  %9792 = vmatpush1.bf16.msra.mxu0 %v17407_v44 }
 0x49f   : > { %v15460_v33 = vrot.slane %v8240_v28, 9  ;;  %8229 = vst [vmem:[#allocation5 + $0x34] sm:$0xf] %v8135_v60  ;;  %v8148_v19 = vrot.slane %v8146_v11, 5  ;;  %v8153_v54 = vrot.slane %v8151_v2, 4  ;;  %v8156_v48 = vrot.slane %v8154_v53, 5  ;;  %9760 = vmatprep.mubr.bf16.mxu0 %v17410_v42  ;;  %9793 = vmatprep.subr.bf16.mxu0 %v17414_v57 }
 0x4a0   : > { %v8278_v9 = vrot.slane %v8241_v8, 5  ;;  %v8102_v45 = vld [vmem:[#allocation4 + $0x30] sm:$0xf]  ;;  %v17412_v26 = vld [vmem:[%s22405_s7 + $0x210] ss:$8 sps:$4 sm:$0xff]   ;;  %v8143_v30 = vor.u32 %v8142_v55, %v8139_v5  ;;  %v8162_v1 = vrot.slane %v8160_v56, 5 }
 0x4a1   : > { %v15461_v63 = vrot.slane %v8242_v24, 9  ;;  %v8282_v12 = vrot.slane %v8243_v46, 5  ;;  %v17417_v4 = vld [vmem:[%s22405_s7 + $0x224] ss:$8 sps:$4 sm:$0xff]   ;;  %v8157_v17 = vor.u32 %v8156_v48, %v8153_v54  ;;  %v8165_v25 = vshrl.u32 %v8100_v61, 16 }
 0x4a2   : > { %v8279_v23 = vsel %vm20266_vm11, %v15460_v33, %v8278_v9  ;;  %v8103_v51 = vld [vmem:[#allocation4 + $0x34] sm:$0x1]  ;;  %v8168_v38 = vshll.u32 %v8100_v61, 16  ;;  %v17415_v43 = vld [vmem:[%s22405_s7 + $0x220] ss:$8 sps:$4 sm:$0xff]   ;;  %v8144_v7 = vrot.slane %v8143_v30, 4  ;;  %9794 = vmatpush1.bf16.msra.mxu0 %v17412_v26 }
 0x4a3   : > { %v8283_v34 = vsel %vm20266_vm11, %v15461_v63, %v8282_v12  ;;  %8310 = vst [vmem:[#allocation5 + $0x5c] sm:$0xf] %v8279_v23  ;;  %v8174_v50 = vshll.u32 %v8101_v36, 16  ;;  %v8179_v6 = vshrl.u32 %v8102_v45, 16  ;;  %v8244_v41 = vld [vmem:[#allocation4 + $0x28] sm:$0xe]  ;;  %9795 = vmatprep.subr.bf16.mxu0 %v17417_v4 }
 0x4a4   : > { %v8245_v0 = vld [vmem:[#allocation4 + $0x2c] sm:$0x1]  ;;  %v17423_v62 = vld [vmem:[%s22405_s7 + $0x234] ss:$8 sps:$4 sm:$0xff]   ;;  %v8158_v20 = vrot.slane %v8157_v17, 4  ;;  %v8167_v18 = vrot.slane %v8165_v25, 4  ;;  %v8149_v31 = vsel %vm19859_vm7, %v8144_v7, %v8148_v19 }
 0x4a5   : > { %8311 = vst [vmem:[#allocation5 + $0x80] sm:$0xf] %v8283_v34  ;;  %v8170_v13 = vrot.slane %v8168_v38, 5  ;;  %v8182_v28 = vshll.u32 %v8102_v45, 16  ;;  %v8246_v44 = vld [vmem:[#allocation4 + $0x30] sm:$0xe] }
 0x4a6   : > { %v8247_v47 = vld [vmem:[#allocation4 + $0x34] sm:$0x1]  ;;  %v8104_v10 = vld [vmem:[#allocation4 + $0x38] sm:$0xf]  ;;  %v17418_v52 = vld [vmem:[#allocation5 + $0x50] ss:$36 sps:$4 sm:$0xff]   ;;  %v8163_v59 = vsel %vm19859_vm7, %v8158_v20, %v8162_v1  ;;  %9796 = vmatpush1.bf16.msra.mxu0 %v17415_v43 }
 0x4a7   : > { %8230 = vst [vmem:[#allocation5 + $0x58] sm:$0xf] %v8149_v31  ;;  %v8171_v8 = vor.u32 %v8170_v13, %v8167_v18  ;;  %v8181_v57 = vrot.slane %v8179_v6, 4  ;;  %v8184_v32 = vrot.slane %v8182_v28, 5  ;;  %v8105_v39 = vld [vmem:[#allocation4 + $0x3c] sm:$0x1]  ;;  %9761 = vmatmul.mubr.bf16.gmra.mrb[228].mxu0 %v17418_v52  ;;  %9797 = vmatprep.subr.bf16.mxu0 %v17423_v62 }
 0x4a8   : > { %v17419_v58 = vld [vmem:[#allocation5 + $0x9c] ss:$36 sps:$4 sm:$0xff]   ;;  %v17421_v24 = vld [vmem:[%s22405_s7 + $0x230] ss:$8 sps:$4 sm:$0xff]   ;;  %8231 = vst [vmem:[#allocation5 + $0x7c] sm:$0xf] %v8163_v59 }
 0x4a9   : > { %v8176_v46 = vrot.slane %v8174_v50, 5  ;;  %v8188_v49 = vshll.u32 %v8103_v51, 16  ;;  %v17426_v27 = vld [vmem:[%s22405_s7 + $0x244] ss:$8 sps:$4 sm:$0xff]   ;;  %v8172_v29 = vrot.slane %v8171_v8, 4  ;;  %v8185_v40 = vor.u32 %v8184_v32, %v8181_v57  ;;  %9770 = vmatprep.mubr.bf16.mxu0 %v17419_v58 }
 0x4aa   : > { %v15462_v3 = vrot.slane %v8244_v41, 9  ;;  %v8286_v61 = vrot.slane %v8245_v0, 5  ;;  %v8106_v22 = vld [vmem:[#allocation4 + $0x40] sm:$0xf]  ;;  %v8248_v5 = vld [vmem:[#allocation4 + $0x38] sm:$0xe]  ;;  %9798 = vmatpush1.bf16.msra.mxu0 %v17421_v24 }
 0x4ab   : > { %v8190_v11 = vrot.slane %v8188_v49, 5  ;;  %v15463_v2 = vrot.slane %v8246_v44, 9  ;;  %v8290_v53 = vrot.slane %v8247_v47, 5  ;;  %v8107_v36 = vld [vmem:[#allocation4 + $0x44] sm:$0x1]  ;;  %v8193_v42 = vshrl.u32 %v8104_v10, 16  ;;  %9799 = vmatprep.subr.bf16.mxu0 %v17426_v27 }
 0x4ac   : > { %v8177_v60 = vsel %vm19859_vm7, %v8172_v29, %v8176_v46  ;;  %v8186_v55 = vrot.slane %v8185_v40, 4  ;;  %v8287_v56 = vsel %vm20266_vm11, %v15462_v3, %v8286_v61  ;;  %v8196_v33 = vshll.u32 %v8104_v10, 16  ;;  %v8249_v19 = vld [vmem:[#allocation4 + $0x3c] sm:$0x1]  ;;  %v8251_v54 = vld [vmem:[#allocation4 + $0x44] sm:$0x1] }
 0x4ad   : > { %v17424_v48 = vld [vmem:[%s22405_s7 + $0x240] ss:$8 sps:$4 sm:$0xff]   ;;  %8232 = vst [vmem:[#allocation5 + $0xa0] sm:$0xf] %v8177_v60  ;;  %v8291_v9 = vsel %vm20266_vm11, %v15463_v2, %v8290_v53  ;;  %8312 = vst [vmem:[#allocation5 + $0xa4] sm:$0xf] %v8287_v56 }
 0x4ae   : > { %v8195_v45 = vrot.slane %v8193_v42, 4  ;;  %v8202_v26 = vshll.u32 %v8105_v39, 16  ;;  %v8207_v30 = vshrl.u32 %v8106_v22, 16  ;;  %v8333_v1 = vld [vmem:[#allocation4 + $0x10] sm:$0xf]  ;;  %v8191_v4 = vsel %vm19859_vm7, %v8186_v55, %v8190_v11  ;;  %9800 = vmatpush1.bf16.msra.mxu0 %v17424_v48 }
 0x4af   : > { %v8323_v63 = vld [vmem:[#allocation4 + $0x40] sm:$0xf]  ;;  %v17432_v12 = vld [vmem:[%s22405_s7 + $0x254] ss:$8 sps:$4 sm:$0xff]   ;;  %8313 = vst [vmem:[#allocation5 + $0xc8] sm:$0xf] %v8291_v9 }
 0x4b0   : > { %v8198_v17 = vrot.slane %v8196_v33, 5  ;;  %v8210_v23 = vshll.u32 %v8106_v22, 16  ;;  %v8216_v51 = vshll.u32 %v8107_v36, 16  ;;  %v8250_v25 = vld [vmem:[#allocation4 + $0x40] sm:$0xe]  ;;  %v8209_v43 = vrot.slane %v8207_v30, 4  ;;  %9801 = vmatprep.subr.bf16.mxu0 %v17432_v12 }
 0x4b1   : > { %v8334_v38 = vld [vmem:[#allocation4 + $0x14] sm:$0x1]  ;;  %8331 = vst [vmem:[#allocation5 + $0xf0] sm:$0xf] %v8323_v63  ;;  %8233 = vst [vmem:[#allocation5 + $0xc4] sm:$0xf] %v8191_v4 }
 0x4b2   : > { %v15464_v7 = vrot.slane %v8248_v5, 9  ;;  %v8294_v34 = vrot.slane %v8249_v19, 5  ;;  %v8335_v50 = vld [vmem:[#allocation4 + $0x18] sm:$0xf]  ;;  %v17427_v6 = vld [vmem:[#allocation5 + $0x98] ss:$36 sps:$4 sm:$0xff]   ;;  %v8199_v41 = vor.u32 %v8198_v17, %v8195_v45 }
 0x4b3   : > { %v8204_v0 = vrot.slane %v8202_v26, 5  ;;  %v8212_v62 = vrot.slane %v8210_v23, 5  ;;  %v17428_v20 = vld [vmem:[#allocation5 + $0xe4] ss:$36 sps:$4 sm:$0xff]   ;;  %v8218_v13 = vrot.slane %v8216_v51, 5  ;;  %v15465_v44 = vrot.slane %v8250_v25, 9  ;;  %9771 = vmatmul.mubr.bf16.gmra.mrb[232].mxu0 %v17427_v6 }
 0x4b4   : > { %v17430_v18 = vld [vmem:[%s22405_s7 + $0x250] ss:$8 sps:$4 sm:$0xff]   ;;  %v8295_v28 = vsel %vm20266_vm11, %v15464_v7, %v8294_v34  ;;  %v8298_v31 = vrot.slane %v8251_v54, 5  ;;  %v17435_v47 = vld [vmem:[%s22405_s7 + $0x264] ss:$8 sps:$4 sm:$0xff]   ;;  %v8200_v10 = vrot.slane %v8199_v41, 4  ;;  %9780 = vmatprep.mubr.bf16.mxu0 %v17428_v20 }
 0x4b5   : > { %v8213_v52 = vor.u32 %v8212_v62, %v8209_v43  ;;  %8314 = vst [vmem:[#allocation5 + $0xec] sm:$0xf] %v8295_v28  ;;  %v8336_v59 = vld [vmem:[#allocation4 + $0x1c] sm:$0x1]  ;;  %v8350_v8 = vshrl.u32 %v8333_v1, 16  ;;  %v8353_v57 = vshll.u32 %v8333_v1, 16  ;;  %9802 = vmatpush1.bf16.msra.mxu0 %v17430_v18 }
 0x4b6   : > { %v8299_v32 = vsel %vm20266_vm11, %v15465_v44, %v8298_v31  ;;  %v8359_v39 = vshll.u32 %v8334_v38, 16  ;;  %v8364_v58 = vshrl.u32 %v8335_v50, 16  ;;  %v8367_v24 = vshll.u32 %v8335_v50, 16  ;;  %v8337_v46 = vld [vmem:[#allocation4 + $0x20] sm:$0xf]  ;;  %9803 = vmatprep.subr.bf16.mxu0 %v17435_v47 }
 0x4b7   : > { %v8205_v49 = vsel %vm19859_vm7, %v8200_v10, %v8204_v0  ;;  %v8214_v27 = vrot.slane %v8213_v52, 4  ;;  %8315 = vst [vmem:[#allocation5 + $0x110] sm:$0xf] %v8299_v32  ;;  %v8352_v29 = vrot.slane %v8350_v8, 4  ;;  %v8355_v40 = vrot.slane %v8353_v57, 5 }
 0x4b8   : > { %v8338_v3 = vld [vmem:[#allocation4 + $0x24] sm:$0x1]  ;;  %v17433_v61 = vld [vmem:[%s22405_s7 + $0x260] ss:$8 sps:$4 sm:$0xff]   ;;  %8234 = vst [vmem:[#allocation5 + $0xe8] sm:$0xf] %v8205_v49 }
 0x4b9   : > { %v8366_v22 = vrot.slane %v8364_v58, 4  ;;  %v8369_v5 = vrot.slane %v8367_v24, 5  ;;  %v8373_v11 = vshll.u32 %v8336_v59, 16  ;;  %v8339_v2 = vld [vmem:[#allocation4 + $0x28] sm:$0xf]  ;;  %v8219_v36 = vsel %vm19859_vm7, %v8214_v27, %v8218_v13  ;;  %9804 = vmatpush1.bf16.msra.mxu0 %v17433_v61 }
 0x4ba   : > { %v17442_v53 = vld [vmem:[%s22405_s7 + $0x274] ss:$8 sps:$4 sm:$0xff]   ;;  %v8356_v42 = vor.u32 %v8355_v40, %v8352_v29  ;;  %v8340_v60 = vld [vmem:[#allocation4 + $0x2c] sm:$0x1]  ;;  %v8378_v55 = vshrl.u32 %v8337_v46, 16  ;;  %v8361_v33 = vrot.slane %v8359_v39, 5 }
 0x4bb   : > { %v8341_v56 = vld [vmem:[#allocation4 + $0x30] sm:$0xf]  ;;  %8235 = vst [vmem:[#allocation5 + $0x10c] sm:$0xf] %v8219_v36  ;;  %v8370_v19 = vor.u32 %v8369_v5, %v8366_v22  ;;  %v8375_v54 = vrot.slane %v8373_v11, 5  ;;  %v8381_v48 = vshll.u32 %v8337_v46, 16  ;;  %9805 = vmatprep.subr.bf16.mxu0 %v17442_v53 }
 0x4bc   : > { %v8342_v9 = vld [vmem:[#allocation4 + $0x34] sm:$0x1]  ;;  %v8343_v45 = vld [vmem:[#allocation4 + $0x38] sm:$0xf]  ;;  %v8357_v30 = vrot.slane %v8356_v42, 4  ;;  %v8380_v1 = vrot.slane %v8378_v55, 4 }
 0x4bd   : > { %v17436_v26 = vld [vmem:[#allocation5 + $0xe0] ss:$36 sps:$4 sm:$0xff]   ;;  %v8392_v63 = vshrl.u32 %v8339_v2, 16  ;;  %v8395_v12 = vshll.u32 %v8339_v2, 16  ;;  %v17439_v4 = vld [vmem:[#allocation5 + $0x14] ss:$36 sps:$4 sm:$0xff]  }
 0x4be   : > { %v8371_v17 = vrot.slane %v8370_v19, 4  ;;  %v8383_v23 = vrot.slane %v8381_v48, 5  ;;  %v8387_v51 = vshll.u32 %v8338_v3, 16  ;;  %v8401_v25 = vshll.u32 %v8340_v60, 16  ;;  %9781 = vmatmul.mubr.bf16.gmra.mrb[236].mxu0 %v17436_v26  ;;  %v17440_v38 = vld [vmem:[%s22405_s7 + $0x270] ss:$8 sps:$4 sm:$0xff]  }
 0x4bf   : > { %v8362_v43 = vsel %vm19859_vm7, %v8357_v30, %v8361_v33  ;;  %v8394_v7 = vrot.slane %v8392_v63, 4  ;;  %v8397_v34 = vrot.slane %v8395_v12, 5  ;;  %v8406_v50 = vshrl.u32 %v8341_v56, 16  ;;  %9823 = vmatprep.mubr.bf16.mxu0 %v17439_v4  ;;  %v17445_v6 = vld [vmem:[%s22405_s7 + $0x284] ss:$8 sps:$4 sm:$0xff]   ;;  %9806 = vmatpush1.bf16.msra.mxu0 %v17440_v38 }
 0x4c0   : > { %v8376_v41 = vsel %vm19859_vm7, %v8371_v17, %v8375_v54  ;;  %8469 = vst [vmem:[#allocation5 + $0x1c] sm:$0xf] %v8362_v43  ;;  %v8384_v0 = vor.u32 %v8383_v23, %v8380_v1  ;;  %v8344_v62 = vld [vmem:[#allocation4 + $0x3c] sm:$0x1]  ;;  %v8409_v20 = vshll.u32 %v8341_v56, 16  ;;  %v8415_v28 = vshll.u32 %v8342_v9, 16  ;;  %9807 = vmatprep.subr.bf16.mxu0 %v17445_v6 }
 0x4c1   : > { %8470 = vst [vmem:[#allocation5 + $0x40] sm:$0xf] %v8376_v41  ;;  %v8398_v18 = vor.u32 %v8397_v34, %v8394_v7  ;;  %v8408_v13 = vrot.slane %v8406_v50, 4  ;;  %v8420_v44 = vshrl.u32 %v8343_v45, 16  ;;  %v594_v31 = vld [vmem:[#allocation4 + $0x48] sm:$0x1] }
 0x4c2   : > { %v17443_v47 = vld [vmem:[%s22405_s7 + $0x280] ss:$8 sps:$4 sm:$0xff]   ;;  %v8385_v10 = vrot.slane %v8384_v0, 4  ;;  %v8389_v52 = vrot.slane %v8387_v51, 5  ;;  %v8411_v59 = vrot.slane %v8409_v20, 5  ;;  %v8423_v8 = vshll.u32 %v8343_v45, 16 }
 0x4c3   : > { %v624_v57 = vld [vmem:[#allocation4 + $0x4c] sm:$0x1]  ;;  %v17448_v32 = vld [vmem:[%s22405_s7 + $0x294] ss:$8 sps:$4 sm:$0xff]   ;;  %v8399_v39 = vrot.slane %v8398_v18, 4  ;;  %v8403_v58 = vrot.slane %v8401_v25, 5  ;;  %9808 = vmatpush1.bf16.msra.mxu0 %v17443_v47 }
 0x4c4   : > { %v8345_v24 = vld [vmem:[#allocation4 + $0x40] sm:$0xf]  ;;  %v8390_v46 = vsel %vm19859_vm7, %v8385_v10, %v8389_v52  ;;  %v8412_v49 = vor.u32 %v8411_v59, %v8408_v13  ;;  %v8422_v27 = vrot.slane %v8420_v44, 4  ;;  %v8429_v29 = vshll.u32 %v8344_v62, 16  ;;  %v8477_v40 = vld [vmem:[#allocation4 + $0x10] sm:$0xe]  ;;  %9809 = vmatprep.subr.bf16.mxu0 %v17448_v32 }
 0x4c5   : > { %v8478_v3 = vld [vmem:[#allocation4 + $0x14] sm:$0x1]  ;;  %v8404_v61 = vsel %vm19859_vm7, %v8399_v39, %v8403_v58  ;;  %8471 = vst [vmem:[#allocation5 + $0x64] sm:$0xf] %v8390_v46  ;;  %v8417_v22 = vrot.slane %v8415_v28, 5  ;;  %v8425_v5 = vrot.slane %v8423_v8, 5 }
 0x4c6   : > { %v595_v11 = vsel %vm18198_vm3, 0, %v594_v31  ;;  %v8479_v2 = vld [vmem:[#allocation4 + $0x18] sm:$0xe]  ;;  %v8480_v53 = vld [vmem:[#allocation4 + $0x1c] sm:$0x1]  ;;  %v8413_v55 = vrot.slane %v8412_v49, 4 }
 0x4c7   : > { %v8481_v36 = vld [vmem:[#allocation4 + $0x20] sm:$0xe]  ;;  %v8482_v42 = vld [vmem:[#allocation4 + $0x24] sm:$0x1]  ;;  %8472 = vst [vmem:[#allocation5 + $0x88] sm:$0xf] %v8404_v61  ;;  %v8426_v45 = vor.u32 %v8425_v5, %v8422_v27 }
 0x4c8   : > { %v17446_v60 = vld [vmem:[%s22405_s7 + $0x290] ss:$8 sps:$4 sm:$0xff]   ;;  %596 = vst [vmem:[#allocation4 + $0x48] sm:$0x1] %v595_v11  ;;  %v625_v56 = vsel %vm18236_vm5, 0, %v624_v57  ;;  %v8434_v19 = vshrl.u32 %v8345_v24, 16  ;;  %v8418_v63 = vsel %vm19859_vm7, %v8413_v55, %v8417_v22 }
 0x4c9   : > { %v8346_v33 = vld [vmem:[#allocation4 + $0x44] sm:$0x1]  ;;  %v8437_v54 = vshll.u32 %v8345_v24, 16  ;;  %v8484_v48 = vld [vmem:[#allocation4 + $0x2c] sm:$0x1]  ;;  %v15466_v26 = vrot.slane %v8477_v40, 9  ;;  %9810 = vmatpush1.bf16.msra.mxu0 %v17446_v60 }
 0x4ca   : > { %v17451_v9 = vld [vmem:[%s22405_s7 + $0x2a4] ss:$8 sps:$4 sm:$0xff]   ;;  %626 = vst [vmem:[#allocation4 + $0x4c] sm:$0x1] %v625_v56  ;;  %v8511_v30 = vrot.slane %v8478_v3, 5  ;;  %v8431_v12 = vrot.slane %v8429_v29, 5 }
 0x4cb   : > { %v8483_v1 = vld [vmem:[#allocation4 + $0x28] sm:$0xe]  ;;  %v8436_v4 = vrot.slane %v8434_v19, 4  ;;  %v8486_v17 = vld [vmem:[#allocation4 + $0x34] sm:$0x1]  ;;  %v8427_v23 = vrot.slane %v8426_v45, 4  ;;  %9811 = vmatprep.subr.bf16.mxu0 %v17451_v9 }
 0x4cc   : > { %8473 = vst [vmem:[#allocation5 + $0xac] sm:$0xf] %v8418_v63  ;;  %v8439_v51 = vrot.slane %v8437_v54, 5  ;;  %v8443_v25 = vshll.u32 %v8346_v33, 16  ;;  %v8512_v38 = vsel %vm20266_vm11, %v15466_v26, %v8511_v30  ;;  %v8485_v43 = vld [vmem:[#allocation4 + $0x30] sm:$0xe] }
 0x4cd   : > { %v17449_v7 = vld [vmem:[%s22405_s7 + $0x2a0] ss:$8 sps:$4 sm:$0xff]   ;;  %v15467_v34 = vrot.slane %v8479_v2, 9  ;;  %v8515_v50 = vrot.slane %v8480_v53, 5  ;;  %8549 = vst [vmem:[#allocation5 + $0x20] sm:$0xf] %v8512_v38  ;;  %v8432_v62 = vsel %vm19859_vm7, %v8427_v23, %v8431_v12 }
 0x4ce   : > { %v15468_v6 = vrot.slane %v8481_v36, 9  ;;  %v8519_v41 = vrot.slane %v8482_v42, 5  ;;  %v17454_v0 = vld [vmem:[%s22405_s7 + $0x2b4] ss:$8 sps:$4 sm:$0xff]   ;;  %v8440_v20 = vor.u32 %v8439_v51, %v8436_v4  ;;  %v15469_v18 = vrot.slane %v8483_v1, 9  ;;  %9812 = vmatpush1.bf16.msra.mxu0 %v17449_v7 }
 0x4cf   : > { %v8523_v13 = vrot.slane %v8484_v48, 5  ;;  %v8487_v28 = vld [vmem:[#allocation4 + $0x38] sm:$0xe]  ;;  %v8488_v44 = vld [vmem:[#allocation4 + $0x3c] sm:$0x1]  ;;  %v8516_v47 = vsel %vm20266_vm11, %v15467_v34, %v8515_v50  ;;  %v15470_v52 = vrot.slane %v8485_v43, 9  ;;  %9813 = vmatprep.subr.bf16.mxu0 %v17454_v0 }
 0x4d0   : > { %v8489_v31 = vld [vmem:[#allocation4 + $0x40] sm:$0xe]  ;;  %8474 = vst [vmem:[#allocation5 + $0xd0] sm:$0xf] %v8432_v62  ;;  %v8520_v10 = vsel %vm20266_vm11, %v15468_v6, %v8519_v41  ;;  %v8527_v59 = vrot.slane %v8486_v17, 5  ;;  %v8441_v57 = vrot.slane %v8440_v20, 4 }
 0x4d1   : > { %v8490_v8 = vld [vmem:[#allocation4 + $0x44] sm:$0x1]  ;;  %v8445_v32 = vrot.slane %v8443_v25, 5  ;;  %8550 = vst [vmem:[#allocation5 + $0x44] sm:$0xf] %v8516_v47  ;;  %v8524_v39 = vsel %vm20266_vm11, %v15469_v18, %v8523_v13  ;;  %v15471_v2 = vrot.slane %v8487_v28, 9 }
 0x4d2   : > { %8551 = vst [vmem:[#allocation5 + $0x68] sm:$0xf] %v8520_v10  ;;  %v8491_v58 = vld [vmem:[#allocation4 + $0x48] sm:$0xe]  ;;  %v17452_v24 = vld [vmem:[%s22405_s7 + $0x2b0] ss:$8 sps:$4 sm:$0xff]   ;;  %v8528_v29 = vsel %vm20266_vm11, %v15470_v52, %v8527_v59 }
 0x4d3   : > { %v8324_v46 = vld [vmem:[#allocation4 + $0x48] sm:$0xf]  ;;  %v8348_v27 = vld [vmem:[#allocation4 + $0x4c] sm:$0x1]  ;;  %8552 = vst [vmem:[#allocation5 + $0x8c] sm:$0xf] %v8524_v39  ;;  %v8446_v3 = vsel %vm19859_vm7, %v8441_v57, %v8445_v32  ;;  %9814 = vmatpush1.bf16.msra.mxu0 %v17452_v24 }
 0x4d4   : > { %v8347_v49 = vld [vmem:[#allocation4 + $0x48] sm:$0xf]  ;;  %v17457_v40 = vld [vmem:[%s22405_s7 + $0x2c4] ss:$8 sps:$4 sm:$0xff]   ;;  %8332 = vst [vmem:[#allocation5 + $0x114] sm:$0xf] %v8324_v46 }
 0x4d5   : > { %v8448_v61 = vshrl.u32 %v8347_v49, 16  ;;  %v8451_v22 = vshll.u32 %v8347_v49, 16  ;;  %v8457_v5 = vshll.u32 %v8348_v27, 16  ;;  %8553 = vst [vmem:[#allocation5 + $0xb0] sm:$0xf] %v8528_v29  ;;  %v8531_v53 = vrot.slane %v8488_v44, 5  ;;  %9815 = vmatprep.subr.bf16.mxu0 %v17457_v40 }
 0x4d6   : > { %v8492_v11 = vld [vmem:[#allocation4 + $0x4c] sm:$0x1]  ;;  %8475 = vst [vmem:[#allocation5 + $0xf4] sm:$0xf] %v8446_v3  ;;  %v15472_v36 = vrot.slane %v8489_v31, 9  ;;  %v8535_v42 = vrot.slane %v8490_v8, 5 }
 0x4d7   : > { %v8450_v60 = vrot.slane %v8448_v61, 4  ;;  %v8453_v55 = vrot.slane %v8451_v22, 5  ;;  %v15473_v56 = vrot.slane %v8491_v58, 9  ;;  %v8532_v33 = vsel %vm20266_vm11, %v15471_v2, %v8531_v53  ;;  %v17455_v45 = vld [vmem:[%s22405_s7 + $0x2c0] ss:$8 sps:$4 sm:$0xff]  }
 0x4d8   : > { %v8536_v19 = vsel %vm20266_vm11, %v15472_v36, %v8535_v42  ;;  %v8539_v54 = vrot.slane %v8492_v11, 5  ;;  %v8459_v9 = vrot.slane %v8457_v5, 5  ;;  %8554 = vst [vmem:[#allocation5 + $0xd4] sm:$0xf] %v8532_v33  ;;  %v17460_v30 = vld [vmem:[%s22405_s7 + $0x2d4] ss:$8 sps:$4 sm:$0xff]   ;;  %9816 = vmatpush1.bf16.msra.mxu0 %v17455_v45 }
 0x4d9   : > { %v8454_v48 = vor.u32 %v8453_v55, %v8450_v60  ;;  %8555 = vst [vmem:[#allocation5 + $0xf8] sm:$0xf] %v8536_v19  ;;  %v17458_v12 = vld [vmem:[%s22405_s7 + $0x2d0] ss:$8 sps:$4 sm:$0xff]   ;;  %9817 = vmatprep.subr.bf16.mxu0 %v17460_v30  ;;  %v17463_v4 = vld [vmem:[%s22405_s7 + $0x2e4] ss:$8 sps:$4 sm:$0xff]  }
 0x4da   : > { %v8540_v26 = vsel %vm20266_vm11, %v15473_v56, %v8539_v54  ;;  %v17461_v17 = vld [vmem:[%s22405_s7 + $0x2e0] ss:$8 sps:$4 sm:$0xff]   ;;  %v17466_v23 = vld [vmem:[%s22405_s7 + $0x2f4] ss:$8 sps:$4 sm:$0xff]   ;;  %v17464_v51 = vld [vmem:[%s22405_s7 + $0x2f0] ss:$8 sps:$4 sm:$0xff]  }
 0x4db   : > { %v8455_v1 = vrot.slane %v8454_v48, 4  ;;  %8556 = vst [vmem:[#allocation5 + $0x11c] sm:$0xf] %v8540_v26  ;;  %v17564_v25 = vld [vmem:[%s22408_s10] ss:$8 sps:$4 sm:$0xff]   ;;  %vm10219_vm3 = vcmask 1047556  }
 0x4dc   : > { %9818 = vmatpush1.bf16.msra.mxu0 %v17458_v12  ;;  %v17566_v38 = vld [vmem:[%s22408_s10 + $0x4] ss:$8 sps:$4 sm:$0xff]   ;;  %v17569_v7 = vld [vmem:[%s22408_s10 + $0x14] ss:$8 sps:$4 sm:$0xff]   ;;  %v17567_v34 = vld [vmem:[%s22408_s10 + $0x10] ss:$8 sps:$4 sm:$0xff]  }
 0x4dd   : > { %v8460_v63 = vsel %vm19859_vm7, %v8455_v1, %v8459_v9  ;;  %9819 = vmatprep.subr.bf16.mxu0 %v17463_v4  ;;  %v17469_v43 = vld [vmem:[%s22405_s7 + $0x304] ss:$8 sps:$4 sm:$0xff]   ;;  %13151 = vmatprep.subr.bf16.mxu1 %v17566_v38  ;;  %v17467_v50 = vld [vmem:[%s22405_s7 + $0x300] ss:$8 sps:$4 sm:$0xff]   ;;  %v17437_v6 = vld [vmem:[#allocation5 + $0x10] ss:$36 sps:$4 sm:$0xff]  }
 0x4de   : > { %8476 = vst [vmem:[#allocation5 + $0x118] sm:$0xf] %v8460_v63  ;;  %13152 = vmatpush1.bf16.msra.mxu1 %v17564_v25  ;;  %v17474_v41 = vld [vmem:[%s22405_s7 + $0x314] ss:$8 sps:$4 sm:$0xff]   ;;  %v17572_v0 = vld [vmem:[%s22408_s10 + $0x24] ss:$8 sps:$4 sm:$0xff]   ;;  %vm10220_vm5 = vmand %vm10219_vm3, %vm666_vm6 }
 0x4df   : > { %13153 = vmatprep.subr.bf16.mxu1 %v17569_v7  ;;  %v17470_v62 = vld [vmem:[#allocation5 + $0x5c] ss:$36 sps:$4 sm:$0xff]   ;;  %v17472_v18 = vld [vmem:[%s22405_s7 + $0x310] ss:$8 sps:$4 sm:$0xff]   ;;  %v17575_v13 = vld [vmem:[%s22408_s10 + $0x34] ss:$8 sps:$4 sm:$0xff]  }
 0x4e0   : > { %9820 = vmatpush1.bf16.msra.mxu0 %v17461_v17  ;;  %v17570_v20 = vld [vmem:[%s22408_s10 + $0x20] ss:$8 sps:$4 sm:$0xff]   ;;  %v17478_v28 = vld [vmem:[%s22405_s7 + $0x324] ss:$8 sps:$4 sm:$0xff]   ;;  %v17573_v44 = vld [vmem:[%s22408_s10 + $0x30] ss:$8 sps:$4 sm:$0xff]  }
 0x4e1   : > { %9821 = vmatprep.subr.bf16.mxu0 %v17466_v23  ;;  %v17476_v31 = vld [vmem:[%s22405_s7 + $0x320] ss:$8 sps:$4 sm:$0xff]   ;;  %v17483_v10 = vld [vmem:[%s22405_s7 + $0x334] ss:$8 sps:$4 sm:$0xff]   ;;  %v17581_v52 = vld [vmem:[%s22408_s10 + $0x44] ss:$8 sps:$4 sm:$0xff]  }
 0x4e2   : > { %13154 = vmatpush1.bf16.msra.mxu1 %v17567_v34  ;;  %v17475_v47 = vld [vmem:[#allocation5 + $0x58] ss:$36 sps:$4 sm:$0xff]   ;;  %v17479_v59 = vld [vmem:[#allocation5 + $0xa4] ss:$36 sps:$4 sm:$0xff]   ;;  %v17587_v32 = vld [vmem:[%s22408_s10 + $0x54] ss:$8 sps:$4 sm:$0xff]  }
 0x4e3   : > { %13155 = vmatprep.subr.bf16.mxu1 %v17572_v0  ;;  %v17579_v8 = vld [vmem:[%s22408_s10 + $0x40] ss:$8 sps:$4 sm:$0xff]   ;;  %v17481_v57 = vld [vmem:[%s22405_s7 + $0x330] ss:$8 sps:$4 sm:$0xff]   ;;  %v17487_v39 = vld [vmem:[%s22405_s7 + $0x344] ss:$8 sps:$4 sm:$0xff]  }
 0x4e4   : > { %9822 = vmatpush1.bf16.msra.mxu0 %v17464_v51  ;;  %v17585_v58 = vld [vmem:[%s22408_s10 + $0x50] ss:$8 sps:$4 sm:$0xff]   ;;  %v17485_v24 = vld [vmem:[%s22405_s7 + $0x340] ss:$8 sps:$4 sm:$0xff]   ;;  %v17492_v49 = vld [vmem:[%s22405_s7 + $0x354] ss:$8 sps:$4 sm:$0xff]  }
 0x4e5   : > { %9864 = vmatprep.subr.bf16.mxu0 %v17469_v43  ;;  %v17484_v46 = vld [vmem:[#allocation5 + $0xa0] ss:$36 sps:$4 sm:$0xff]   ;;  %v17488_v29 = vld [vmem:[#allocation5 + $0xec] ss:$36 sps:$4 sm:$0xff]   ;;  %v17497_v34 = vld [vmem:[#allocation5 + $0x18] ss:$36 sps:$4 sm:$0xff]  }
 0x4e6   : > { %13156 = vmatpush1.bf16.msra.mxu1 %v17570_v20  ;;  %v17593_v27 = vld [vmem:[%s22408_s10 + $0x64] ss:$8 sps:$4 sm:$0xff]   ;;  %v17591_v40 = vld [vmem:[%s22408_s10 + $0x60] ss:$8 sps:$4 sm:$0xff]   ;;  %v17490_v3 = vld [vmem:[%s22405_s7 + $0x350] ss:$8 sps:$4 sm:$0xff]  }
 0x4e7   : > { %9824 = vmatmul.mubr.bf16.vlgmr.msra.gmra.mrb[224].mxu0 %v17437_v6  ;;  %13157 = vmatprep.subr.bf16.mxu1 %v17575_v13  ;;  %v17599_v61 = vld [vmem:[%s22408_s10 + $0x74] ss:$8 sps:$4 sm:$0xff]   ;;  %v17496_v22 = vld [vmem:[%s22405_s7 + $0x364] ss:$8 sps:$4 sm:$0xff]   ;;  %v17597_v5 = vld [vmem:[%s22408_s10 + $0x70] ss:$8 sps:$4 sm:$0xff]  }
 0x4e8   : > { %9833 = vmatprep.mubr.bf16.mxu0 %v17470_v62  ;;  %9865 = vmatpush1.bf16.msra.mxu0 %v17467_v50  ;;  %v17494_v11 = vld [vmem:[%s22405_s7 + $0x360] ss:$8 sps:$4 sm:$0xff]   ;;  %v17493_v2 = vld [vmem:[#allocation5 + $0xe8] ss:$36 sps:$4 sm:$0xff]   ;;  %v17605_v36 = vld [vmem:[%s22408_s10 + $0x84] ss:$8 sps:$4 sm:$0xff]  }
 0x4e9   : > { %9866 = vmatprep.subr.bf16.mxu0 %v17474_v41  ;;  %v17502_v53 = vld [vmem:[%s22405_s7 + $0x374] ss:$8 sps:$4 sm:$0xff]   ;;  %v17499_v42 = vld [vmem:[#allocation5 + $0x1c] ss:$36 sps:$4 sm:$0xff]   ;;  %v17500_v55 = vld [vmem:[%s22405_s7 + $0x370] ss:$8 sps:$4 sm:$0xff]  }
 0x4ea   : > { %13158 = vmatpush1.bf16.msra.mxu1 %v17573_v44  ;;  %v17603_v60 = vld [vmem:[%s22408_s10 + $0x80] ss:$8 sps:$4 sm:$0xff]   ;;  %v17611_v56 = vld [vmem:[%s22408_s10 + $0x94] ss:$8 sps:$4 sm:$0xff]   ;;  %v17505_v33 = vld [vmem:[%s22405_s7 + $0x384] ss:$8 sps:$4 sm:$0xff]  }
 0x4eb   : > { %13159 = vmatprep.subr.bf16.mxu1 %v17581_v52  ;;  %v17609_v19 = vld [vmem:[%s22408_s10 + $0x90] ss:$8 sps:$4 sm:$0xff]   ;;  %v17503_v54 = vld [vmem:[%s22405_s7 + $0x380] ss:$8 sps:$4 sm:$0xff]   ;;  %v17508_v48 = vld [vmem:[%s22405_s7 + $0x394] ss:$8 sps:$4 sm:$0xff]  }
 0x4ec   : > { %9867 = vmatpush1.bf16.msra.mxu0 %v17472_v18  ;;  %v17506_v9 = vld [vmem:[%s22405_s7 + $0x390] ss:$8 sps:$4 sm:$0xff]   ;;  %v17511_v45 = vld [vmem:[%s22405_s7 + $0x3a4] ss:$8 sps:$4 sm:$0xff]   ;;  %v17509_v26 = vld [vmem:[%s22405_s7 + $0x3a0] ss:$8 sps:$4 sm:$0xff]  }
 0x4ed   : > { %9868 = vmatprep.subr.bf16.mxu0 %v17478_v28  ;;  %v17514_v30 = vld [vmem:[%s22405_s7 + $0x3b4] ss:$8 sps:$4 sm:$0xff]   ;;  %v17512_v1 = vld [vmem:[%s22405_s7 + $0x3b0] ss:$8 sps:$4 sm:$0xff]   ;;  %v17517_v63 = vld [vmem:[%s22405_s7 + $0x3c4] ss:$8 sps:$4 sm:$0xff]  }
 0x4ee   : > { %13160 = vmatpush1.bf16.msra.mxu1 %v17579_v8  ;;  %v17515_v12 = vld [vmem:[%s22405_s7 + $0x3c0] ss:$8 sps:$4 sm:$0xff]   ;;  %v17520_v4 = vld [vmem:[%s22405_s7 + $0x3d4] ss:$8 sps:$4 sm:$0xff]   ;;  %v17518_v17 = vld [vmem:[%s22405_s7 + $0x3d0] ss:$8 sps:$4 sm:$0xff]  }
 0x4ef   : > { %9834 = vmatmul.mubr.bf16.gmra.mrb[228].mxu0 %v17475_v47  ;;  %13161 = vmatprep.subr.bf16.mxu1 %v17587_v32  ;;  %v17523_v23 = vld [vmem:[%s22405_s7 + $0x3e4] ss:$8 sps:$4 sm:$0xff]   ;;  %v17521_v51 = vld [vmem:[%s22405_s7 + $0x3e0] ss:$8 sps:$4 sm:$0xff]   ;;  %v17526_v25 = vld [vmem:[%s22405_s7 + $0x3f4] ss:$8 sps:$4 sm:$0xff]  }
 0x4f0   : > { %9843 = vmatprep.mubr.bf16.mxu0 %v17479_v59  ;;  %9869 = vmatpush1.bf16.msra.mxu0 %v17476_v31  ;;  %v17524_v38 = vld [vmem:[%s22405_s7 + $0x3f0] ss:$8 sps:$4 sm:$0xff]   ;;  %v17529_v43 = vld [vmem:[%s22405_s7 + $0x404] ss:$8 sps:$4 sm:$0xff]   ;;  %v17527_v7 = vld [vmem:[%s22405_s7 + $0x400] ss:$8 sps:$4 sm:$0xff]  }
 0x4f1   : > { %9870 = vmatprep.subr.bf16.mxu0 %v17483_v10  ;;  %v17534_v50 = vld [vmem:[%s22405_s7 + $0x414] ss:$8 sps:$4 sm:$0xff]   ;;  %v17530_v6 = vld [vmem:[#allocation5 + $0x64] ss:$36 sps:$4 sm:$0xff]   ;;  %v17536_v62 = vld [vmem:[%s22405_s7 + $0x420] ss:$8 sps:$4 sm:$0xff]  }
 0x4f2   : > { %13162 = vmatpush1.bf16.msra.mxu1 %v17585_v58  ;;  %v17532_v41 = vld [vmem:[%s22405_s7 + $0x410] ss:$8 sps:$4 sm:$0xff]   ;;  %v17538_v0 = vld [vmem:[%s22405_s7 + $0x424] ss:$8 sps:$4 sm:$0xff]   ;;  %v17543_v18 = vld [vmem:[%s22405_s7 + $0x434] ss:$8 sps:$4 sm:$0xff]  }
 0x4f3   : > { %13163 = vmatprep.subr.bf16.mxu1 %v17593_v27  ;;  %v17535_v20 = vld [vmem:[#allocation5 + $0x60] ss:$36 sps:$4 sm:$0xff]   ;;  %v17539_v13 = vld [vmem:[#allocation5 + $0xac] ss:$36 sps:$4 sm:$0xff]   ;;  %v17548_v52 = vld [vmem:[#allocation5 + $0xf4] ss:$36 sps:$4 sm:$0xff]  }
 0x4f4   : > { %9871 = vmatpush1.bf16.msra.mxu0 %v17481_v57  ;;  %v17541_v28 = vld [vmem:[%s22405_s7 + $0x430] ss:$8 sps:$4 sm:$0xff]   ;;  %v17547_v44 = vld [vmem:[%s22405_s7 + $0x444] ss:$8 sps:$4 sm:$0xff]   ;;  %v17545_v31 = vld [vmem:[%s22405_s7 + $0x440] ss:$8 sps:$4 sm:$0xff]  }
 0x4f5   : > { %9872 = vmatprep.subr.bf16.mxu0 %v17487_v39  ;;  %v17544_v47 = vld [vmem:[#allocation5 + $0xa8] ss:$36 sps:$4 sm:$0xff]   ;;  %v17556_v8 = vld [vmem:[%s22405_s7 + $0x464] ss:$8 sps:$4 sm:$0xff]   ;;  %v17554_v57 = vld [vmem:[%s22405_s7 + $0x460] ss:$8 sps:$4 sm:$0xff]  }
 0x4f6   : > { %13164 = vmatpush1.bf16.msra.mxu1 %v17591_v40  ;;  %v17552_v10 = vld [vmem:[%s22405_s7 + $0x454] ss:$8 sps:$4 sm:$0xff]   ;;  %v17550_v59 = vld [vmem:[%s22405_s7 + $0x450] ss:$8 sps:$4 sm:$0xff]   ;;  %v17560_v27 = vld [vmem:[#allocation5 + $0x20] ss:$36 sps:$4 sm:$0xff]  }
 0x4f7   : > { %9844 = vmatmul.mubr.bf16.gmra.mrb[232].mxu0 %v17484_v46  ;;  %13165 = vmatprep.subr.bf16.mxu1 %v17599_v61  ;;  %v17553_v32 = vld [vmem:[#allocation5 + $0xf0] ss:$36 sps:$4 sm:$0xff]   ;;  %v17578_v46 = vld [vmem:[%s22408_s10 + $0x804] ss:$8 sps:$4 sm:$0xff]   ;;  %v17588_v61 = vld [vmem:[%s22408_s10 + $0x820] ss:$8 sps:$4 sm:$0xff]  }
 0x4f8   : > { %9853 = vmatprep.mubr.bf16.mxu0 %v17488_v29  ;;  %9873 = vmatpush1.bf16.msra.mxu0 %v17485_v24  ;;  %v17559_v39 = vld [vmem:[%s22405_s7 + $0x474] ss:$8 sps:$4 sm:$0xff]   ;;  %v17557_v58 = vld [vmem:[%s22405_s7 + $0x470] ss:$8 sps:$4 sm:$0xff]   ;;  %v18018_v24 = vld [vmem:[#allocation6] sm:$0xff]  ;;  %vm22575_vm2 = vcmask 1047559  }
 0x4f9   : > { %9874 = vmatprep.subr.bf16.mxu0 %v17492_v49  ;;  %v17576_v49 = vld [vmem:[%s22408_s10 + $0x800] ss:$8 sps:$4 sm:$0xff]   ;;  %v17584_v29 = vld [vmem:[%s22408_s10 + $0x814] ss:$8 sps:$4 sm:$0xff]   ;;  %v17582_v40 = vld [vmem:[%s22408_s10 + $0x810] ss:$8 sps:$4 sm:$0xff]  }
 0x4fa   : > { %13166 = vmatpush1.bf16.msra.mxu1 %v17597_v5  ;;  %v17596_v5 = vld [vmem:[%s22408_s10 + $0x834] ss:$8 sps:$4 sm:$0xff]   ;;  %vm20891_vm15 = vmor %vm10220_vm5, %vm18412_vm9  ;;  %vm14889_vm9 = vcmask 1041409  }
 0x4fb   : > { %13167 = vmatprep.subr.bf16.mxu1 %v17605_v36  ;;  %v17562_v36 = vld [vmem:[#allocation5 + $0xb0] ss:$36 sps:$4 sm:$0xff]   ;;  %vm22579_vm6 = vmmov %vm22575_vm2 }
 0x4fc   : > { %9875 = vmatpush1.bf16.msra.mxu0 %v17490_v3  ;;  %v17590_v3 = vld [vmem:[%s22408_s10 + $0x824] ss:$8 sps:$4 sm:$0xff]   ;;  %vm22581_vm8 = vmmov %vm22575_vm2 }
 0x4fd   : > { %9876 = vmatprep.subr.bf16.mxu0 %v17496_v22  ;;  %v17561_v22 = vld [vmem:[#allocation5 + $0x68] ss:$36 sps:$4 sm:$0xff]  }
 0x4fe   : > { %13168 = vmatpush1.bf16.msra.mxu1 %v17603_v60  ;;  %v17606_v60 = vld [vmem:[%s22408_s10 + $0x850] ss:$8 sps:$4 sm:$0xff]  }
 0x4ff   : > { %9854 = vmatmul.mubr.bf16.gmra.mrb[236].mxu0 %v17493_v2  ;;  %13169 = vmatprep.subr.bf16.mxu1 %v17611_v56  ;;  %v17602_v2 = vld [vmem:[%s22408_s10 + $0x844] ss:$8 sps:$4 sm:$0xff]   ;;  %v17612_v56 = vld [vmem:[%s22408_s10 + $0x860] ss:$8 sps:$4 sm:$0xff]  }
 0x500   : > { %9877 = vmatpush1.bf16.msra.mxu0 %v17494_v11  ;;  %9896 = vmatprep.mubr.bf16.mxu0 %v17499_v42  ;;  %v17594_v11 = vld [vmem:[%s22408_s10 + $0x830] ss:$8 sps:$4 sm:$0xff]   ;;  %v17608_v42 = vld [vmem:[%s22408_s10 + $0x854] ss:$8 sps:$4 sm:$0xff]  }
 0x501   : > { %9878 = vmatprep.subr.bf16.mxu0 %v17502_v53  ;;  %v17600_v53 = vld [vmem:[%s22408_s10 + $0x840] ss:$8 sps:$4 sm:$0xff]  }
 0x502   : > { %13170 = vmatpush1.bf16.msra.mxu1 %v17609_v19  ;;  %v639_v19 = vld [vmem:[#allocation6 + $0x10] sm:$0x11] }
 0x504   : > { %9879 = vmatpush1.bf16.msra.mxu0 %v17500_v55  ;;  %v17614_v55 = vld [vmem:[%s22408_s10 + $0x864] ss:$8 sps:$4 sm:$0xff]  }
 0x505   : > { %9880 = vmatprep.subr.bf16.mxu0 %v17505_v33  ;;  %v17563_v33 = vld [vmem:[#allocation5 + $0xf8] ss:$36 sps:$4 sm:$0xff]  }
 0x508   : > { %9881 = vmatpush1.bf16.msra.mxu0 %v17503_v54 }
 0x509   : > { %9882 = vmatprep.subr.bf16.mxu0 %v17508_v48  ;;  %v672_v48 = vld [vmem:[#allocation6 + $0x18] sm:$0x11] }
 0x50a   : > { %v673_v21 = vsel %vm20716_vm14, 0, %v672_v48  ;;  %v17654_v48 = vld [vmem:[%s22408_s10 + $0x8d0] ss:$8 sps:$4 sm:$0xff]  }
 0x50b   : > { %674 = vst [vmem:[#allocation6 + $0x18] sm:$0x11] %v673_v21  ;;  %v17662_v21 = vld [vmem:[%s22408_s10 + $0x8e4] ss:$8 sps:$4 sm:$0xff]  }
 0x50c   : > { %9883 = vmatpush1.bf16.msra.mxu0 %v17506_v9  ;;  %v640_v9 = vsel %vm20706_vm10, 0, %v639_v19  ;;  %v17653_v19 = vld [vmem:[%s22408_s10 + $0x104] ss:$8 sps:$4 sm:$0xff]  }
 0x50d   : > { %9884 = vmatprep.subr.bf16.mxu0 %v17511_v45  ;;  %641 = vst [vmem:[#allocation6 + $0x10] sm:$0x11] %v640_v9  ;;  %v17656_v9 = vld [vmem:[%s22408_s10 + $0x8d4] ss:$8 sps:$4 sm:$0xff]   ;;  %v17740_v45 = vld [vmem:[%s22408_s10 + $0x2a4] ss:$8 sps:$4 sm:$0xff]  }
 0x510   : > { %9885 = vmatpush1.bf16.msra.mxu0 %v17509_v26  ;;  %v642_v26 = vld [vmem:[#allocation6 + $0x20] sm:$0x11] }
 0x511   : > { %9886 = vmatprep.subr.bf16.mxu0 %v17514_v30  ;;  %v675_v30 = vld [vmem:[#allocation6 + $0x28] sm:$0x11] }
 0x514   : > { %9887 = vmatpush1.bf16.msra.mxu0 %v17512_v1  ;;  %v643_v1 = vsel %vm20706_vm10, 0, %v642_v26  ;;  %v17660_v26 = vld [vmem:[%s22408_s10 + $0x8e0] ss:$8 sps:$4 sm:$0xff]  }
 0x515   : > { %9888 = vmatprep.subr.bf16.mxu0 %v17517_v63  ;;  %v676_v63 = vsel %vm20716_vm14, 0, %v675_v30  ;;  %644 = vst [vmem:[#allocation6 + $0x20] sm:$0x11] %v643_v1  ;;  %v17668_v30 = vld [vmem:[%s22408_s10 + $0x8f4] ss:$8 sps:$4 sm:$0xff]  }
 0x516   : > { %677 = vst [vmem:[#allocation6 + $0x28] sm:$0x11] %v676_v63  ;;  %v17666_v1 = vld [vmem:[%s22408_s10 + $0x8f0] ss:$8 sps:$4 sm:$0xff]  }
 0x517   : > { %v669_v63 = vld [vmem:[#allocation6 + $0x8] sm:$0x11] }
 0x518   : > { %9889 = vmatpush1.bf16.msra.mxu0 %v17515_v12  ;;  %v17617_v12 = vld [vmem:[%s22408_s10 + $0xa4] ss:$8 sps:$4 sm:$0xff]  }
 0x519   : > { %9890 = vmatprep.subr.bf16.mxu0 %v17520_v4  ;;  %v17618_v4 = vld [vmem:[%s22408_s10 + $0x870] ss:$8 sps:$4 sm:$0xff]   ;;  %13171 = vmatprep.subr.bf16.mxu1 %v17617_v12 }
 0x51a   : > { %13172 = vmatpush1.bf16.msra.mxu1 %v17615_v37  ;;  %v670_v37 = vsel %vm20716_vm14, 0, %v669_v63  ;;  %v22571_v12 = vld [vmem:[#allocation30_spill] sm:$0xff] }
 0x51b   : > { %671 = vst [vmem:[#allocation6 + $0x8] sm:$0x11] %v670_v37 }
 0x51c   : > { %9891 = vmatpush1.bf16.msra.mxu0 %v17518_v17  ;;  %v17620_v17 = vld [vmem:[%s22408_s10 + $0x874] ss:$8 sps:$4 sm:$0xff]  }
 0x51d   : > { %9892 = vmatprep.subr.bf16.mxu0 %v17523_v23  ;;  %v17623_v23 = vld [vmem:[%s22408_s10 + $0xb4] ss:$8 sps:$4 sm:$0xff]  }
 0x51e   : > { %13173 = vmatprep.subr.bf16.mxu1 %v17623_v23  ;;  %v20854_v23 = vsub.s32 1, %v22571_v12 }
 0x520   : > { %9893 = vmatpush1.bf16.msra.mxu0 %v17521_v51  ;;  %v17626_v51 = vld [vmem:[%s22408_s10 + $0x884] ss:$8 sps:$4 sm:$0xff]  }
 0x521   : > { %9894 = vmatprep.subr.bf16.mxu0 %v17526_v25  ;;  %v645_v25 = vld [vmem:[#allocation6 + $0x30] sm:$0x11] }
 0x524   : > { %9895 = vmatpush1.bf16.msra.mxu0 %v17524_v38  ;;  %v17621_v38 = vld [vmem:[%s22408_s10 + $0xb0] ss:$8 sps:$4 sm:$0xff]  }
 0x525   : > { %9937 = vmatprep.subr.bf16.mxu0 %v17529_v43  ;;  %v646_v43 = vsel %vm20706_vm10, 0, %v645_v25  ;;  %13174 = vmatpush1.bf16.msra.mxu1 %v17621_v38 }
 0x526   : > { %647 = vst [vmem:[#allocation6 + $0x30] sm:$0x11] %v646_v43 }
 0x527   : > { %9897 = vmatmul.mubr.bf16.vlgmr.msra.gmra.mrb[224].mxu0 %v17497_v34  ;;  %v17624_v34 = vld [vmem:[%s22408_s10 + $0x880] ss:$8 sps:$4 sm:$0xff]  }
 0x528   : > { %9906 = vmatprep.mubr.bf16.mxu0 %v17530_v6  ;;  %9938 = vmatpush1.bf16.msra.mxu0 %v17527_v7  ;;  %v678_v7 = vld [vmem:[#allocation6 + $0x38] sm:$0x11]  ;;  %v648_v6 = vld [vmem:[#allocation6 + $0x40] sm:$0x11] }
 0x529   : > { %9939 = vmatprep.subr.bf16.mxu0 %v17534_v50  ;;  %v679_v50 = vsel %vm20716_vm14, 0, %v678_v7 }
 0x52a   : > { %680 = vst [vmem:[#allocation6 + $0x38] sm:$0x11] %v679_v50 }
 0x52c   : > { %9940 = vmatpush1.bf16.msra.mxu0 %v17532_v41  ;;  %v649_v41 = vsel %vm20706_vm10, 0, %v648_v6 }
 0x52d   : > { %9941 = vmatprep.subr.bf16.mxu0 %v17538_v0  ;;  %v681_v0 = vld [vmem:[#allocation6 + $0x48] sm:$0x11]  ;;  %650 = vst [vmem:[#allocation6 + $0x40] sm:$0x11] %v649_v41 }
 0x52f   : > { %9907 = vmatmul.mubr.bf16.gmra.mrb[228].mxu0 %v17535_v20  ;;  %v17627_v20 = vld [vmem:[%s22408_s10 + $0xc0] ss:$8 sps:$4 sm:$0xff]  }
 0x530   : > { %9916 = vmatprep.mubr.bf16.mxu0 %v17539_v13  ;;  %9942 = vmatpush1.bf16.msra.mxu0 %v17536_v62  ;;  %v682_v62 = vsel %vm20716_vm14, 0, %v681_v0  ;;  %v17630_v13 = vld [vmem:[%s22408_s10 + $0x890] ss:$8 sps:$4 sm:$0xff]  }
 0x531   : > { %9943 = vmatprep.subr.bf16.mxu0 %v17543_v18  ;;  %v17629_v18 = vld [vmem:[%s22408_s10 + $0xc4] ss:$8 sps:$4 sm:$0xff]   ;;  %683 = vst [vmem:[#allocation6 + $0x48] sm:$0x11] %v682_v62 }
 0x532   : > { %13175 = vmatprep.subr.bf16.mxu1 %v17629_v18 }
 0x533   : > { %13176 = vmatpush1.bf16.msra.mxu1 %v17627_v20 }
 0x534   : > { %9944 = vmatpush1.bf16.msra.mxu0 %v17541_v28  ;;  %v17632_v28 = vld [vmem:[%s22408_s10 + $0x894] ss:$8 sps:$4 sm:$0xff]  }
 0x535   : > { %9945 = vmatprep.subr.bf16.mxu0 %v17547_v44  ;;  %v17635_v44 = vld [vmem:[%s22408_s10 + $0xd4] ss:$8 sps:$4 sm:$0xff]  }
 0x536   : > { %13177 = vmatprep.subr.bf16.mxu1 %v17635_v44 }
 0x537   : > { %9917 = vmatmul.mubr.bf16.gmra.mrb[232].mxu0 %v17544_v47  ;;  %v17638_v47 = vld [vmem:[%s22408_s10 + $0x8a4] ss:$8 sps:$4 sm:$0xff]  }
 0x538   : > { %9926 = vmatprep.mubr.bf16.mxu0 %v17548_v52  ;;  %9946 = vmatpush1.bf16.msra.mxu0 %v17545_v31  ;;  %v17633_v31 = vld [vmem:[%s22408_s10 + $0xd0] ss:$8 sps:$4 sm:$0xff]   ;;  %v17636_v52 = vld [vmem:[%s22408_s10 + $0x8a0] ss:$8 sps:$4 sm:$0xff]  }
 0x539   : > { %9947 = vmatprep.subr.bf16.mxu0 %v17552_v10  ;;  %v651_v10 = vld [vmem:[#allocation6 + $0x50] sm:$0x11]  ;;  %13178 = vmatpush1.bf16.msra.mxu1 %v17633_v31 }
 0x53c   : > { %9948 = vmatpush1.bf16.msra.mxu0 %v17550_v59  ;;  %v652_v59 = vsel %vm20706_vm10, 0, %v651_v10 }
 0x53d   : > { %9949 = vmatprep.subr.bf16.mxu0 %v17556_v8  ;;  %v684_v8 = vld [vmem:[#allocation6 + $0x58] sm:$0x11]  ;;  %653 = vst [vmem:[#allocation6 + $0x50] sm:$0x11] %v652_v59 }
 0x53f   : > { %9927 = vmatmul.mubr.bf16.gmra.mrb[236].mxu0 %v17553_v32  ;;  %v654_v32 = vld [vmem:[#allocation6 + $0x60] sm:$0x11] }
 0x540   : > { %9950 = vmatpush1.bf16.msra.mxu0 %v17554_v57  ;;  %9969 = vmatprep.mubr.bf16.mxu0 %v18018_v24  ;;  %v685_v57 = vsel %vm20716_vm14, 0, %v684_v8 }
 0x541   : > { %9951 = vmatprep.subr.bf16.mxu0 %v17559_v39  ;;  %v687_v39 = vld [vmem:[#allocation6 + $0x68] sm:$0x11]  ;;  %686 = vst [vmem:[#allocation6 + $0x58] sm:$0x11] %v685_v57 }
 0x544   : > { %9952 = vmatpush1.bf16.msra.mxu0 %v17557_v58  ;;  %v655_v58 = vsel %vm20706_vm10, 0, %v654_v32 }
 0x545   : > { %13735 = vmatprep.subr.bf16.mxu0 %v17578_v46  ;;  %656 = vst [vmem:[#allocation6 + $0x60] sm:$0x11] %v655_v58  ;;  %v17639_v46 = vld [vmem:[%s22408_s10 + $0xe0] ss:$8 sps:$4 sm:$0xff]  }
 0x547   : > { %9970 = vmatmul.mubr.bf16.vlgmr.msra.gmra.mrb[224].mxu0 %v17560_v27  ;;  %v17642_v27 = vld [vmem:[%s22408_s10 + $0x8b0] ss:$8 sps:$4 sm:$0xff]  }
 0x548   : > { %9979 = vmatprep.mubr.bf16.mxu0 %v18018_v24  ;;  %13736 = vmatpush1.bf16.msra.mxu0 %v17576_v49  ;;  %v17641_v49 = vld [vmem:[%s22408_s10 + $0xe4] ss:$8 sps:$4 sm:$0xff]  }
 0x549   : > { %13737 = vmatprep.subr.bf16.mxu0 %v17584_v29  ;;  %v17644_v29 = vld [vmem:[%s22408_s10 + $0x8b4] ss:$8 sps:$4 sm:$0xff]   ;;  %13179 = vmatprep.subr.bf16.mxu1 %v17641_v49 }
 0x54a   : > { %13180 = vmatpush1.bf16.msra.mxu1 %v17639_v46  ;;  %v10287_v49 = vld [vmem:[#allocation6 + $0x8] sm:$0x11] }
 0x54c   : > { %13738 = vmatpush1.bf16.msra.mxu0 %v17582_v40  ;;  %v17647_v40 = vld [vmem:[%s22408_s10 + $0xf4] ss:$8 sps:$4 sm:$0xff]  }
 0x54d   : > { %13739 = vmatprep.subr.bf16.mxu0 %v17590_v3  ;;  %v17650_v3 = vld [vmem:[%s22408_s10 + $0x8c4] ss:$8 sps:$4 sm:$0xff]   ;;  %13181 = vmatprep.subr.bf16.mxu1 %v17647_v40 }
 0x54f   : > { %9980 = vmatmul.mubr.bf16.gmra.mrb[228].mxu0 %v17561_v22  ;;  %v690_v22 = vld [vmem:[#allocation6 + $0x78] sm:$0x11] }
 0x550   : > { %9989 = vmatprep.mubr.bf16.mxu0 %v18018_v24  ;;  %13740 = vmatpush1.bf16.msra.mxu0 %v17588_v61  ;;  %v657_v61 = vld [vmem:[#allocation6 + $0x70] sm:$0x11] }
 0x551   : > { %13741 = vmatprep.subr.bf16.mxu0 %v17596_v5  ;;  %v17645_v5 = vld [vmem:[%s22408_s10 + $0xf0] ss:$8 sps:$4 sm:$0xff]  }
 0x552   : > { %13182 = vmatpush1.bf16.msra.mxu1 %v17645_v5 }
 0x553   : > { %13224 = vmatprep.subr.bf16.mxu1 %v17653_v19  ;;  %v10222_v19 = vld [vmem:[#allocation6 + $0x10] sm:$0xff] }
 0x554   : > { %13742 = vmatpush1.bf16.msra.mxu0 %v17594_v11  ;;  %v658_v11 = vsel %vm20706_vm10, 0, %v657_v61 }
 0x555   : > { %13743 = vmatprep.subr.bf16.mxu0 %v17602_v2  ;;  %v691_v2 = vsel %vm20716_vm14, 0, %v690_v22  ;;  %659 = vst [vmem:[#allocation6 + $0x70] sm:$0x11] %v658_v11 }
 0x556   : > { %692 = vst [vmem:[#allocation6 + $0x78] sm:$0x11] %v691_v2 }
 0x557   : > { %9990 = vmatmul.mubr.bf16.gmra.mrb[232].mxu0 %v17562_v36  ;;  %v660_v36 = vld [vmem:[#allocation6 + $0x80] sm:$0x11] }
 0x558   : > { %9999 = vmatprep.mubr.bf16.mxu0 %v18018_v24  ;;  %13744 = vmatpush1.bf16.msra.mxu0 %v17600_v53  ;;  %v688_v24 = vsel %vm20716_vm14, 0, %v687_v39  ;;  %v17648_v53 = vld [vmem:[%s22408_s10 + $0x8c0] ss:$8 sps:$4 sm:$0xff]  }
 0x559   : > { %13745 = vmatprep.subr.bf16.mxu0 %v17608_v42  ;;  %689 = vst [vmem:[#allocation6 + $0x68] sm:$0x11] %v688_v24  ;;  %v661_v42 = vsel %vm20706_vm10, 0, %v660_v36  ;;  %v10312_v36 = vshll.u32 %v10287_v49, 16 }
 0x55a   : > { %662 = vst [vmem:[#allocation6 + $0x80] sm:$0x11] %v661_v42 }
 0x55c   : > { %13746 = vmatpush1.bf16.msra.mxu0 %v17606_v60  ;;  %v693_v60 = vld [vmem:[#allocation6 + $0x88] sm:$0x11] }
 0x55d   : > { %13747 = vmatprep.subr.bf16.mxu0 %v17614_v55  ;;  %v694_v55 = vsel %vm20716_vm14, 0, %v693_v60 }
 0x55e   : > { %695 = vst [vmem:[#allocation6 + $0x88] sm:$0x11] %v694_v55 }
 0x55f   : > { %10000 = vmatmul.mubr.bf16.gmra.mrb[236].mxu0 %v17563_v33 }
 0x560   : > { %13748 = vmatpush1.bf16.msra.mxu0 %v17612_v56  ;;  %v636_v56 = vld [vmem:[#allocation6] sm:$0x11] }
 0x561   : > { %13749 = vmatprep.subr.bf16.mxu0 %v17620_v17  ;;  %v637_v33 = vsel %vm20706_vm10, 0, %v636_v56  ;;  %v10010_v17 = vld [vmem:[%s22406_s8] sm:$0x3] }
 0x562   : > { %638 = vst [vmem:[#allocation6] sm:$0x11] %v637_v33  ;;  %v20863_v38 = vrot.slane %v10010_v17, %v20854_v23 }
 0x564   : > { %13750 = vmatpush1.bf16.msra.mxu0 %v17618_v4  ;;  %v20848_v4 = vsub.s32 0, %v22571_v12 }
 0x565   : > { %13751 = vmatprep.subr.bf16.mxu0 %v17626_v51  ;;  %v10038_v51 = vld [vmem:[%s22407_s9] sm:$0x3] }
 0x566   : > { %v20860_v25 = vrot.slane %v10010_v17, %v20848_v4  ;;  %v20866_v43 = vrot.slane %v10038_v51, %v20848_v4  ;;  %v10228_v17 = vld [vmem:[#allocation6 + $0x20] sm:$0xff] }
 0x568   : > { %13752 = vmatpush1.bf16.msra.mxu0 %v17624_v34  ;;  %v20869_v34 = vrot.slane %v10038_v51, %v20854_v23  ;;  %v10231_v51 = vld [vmem:[#allocation6 + $0x28] sm:$0x11] }
 0x569   : > { %13753 = vmatprep.subr.bf16.mxu0 %v17632_v28  ;;  %v20873_v62 = vld [vmem:[#allocation6] sm:$0xff] }
 0x56a   : > { %v10303_v28 = vshrl.u32 %v20873_v62, 16  ;;  %v10306_v44 = vshll.u32 %v20873_v62, 16 }
 0x56c   : > { %13754 = vmatpush1.bf16.msra.mxu0 %v17630_v13  ;;  %v10305_v32 = vrot.slane %v10303_v28, 4  ;;  %v10308_v39 = vrot.slane %v10306_v44, 5 }
 0x56d   : > { %13755 = vmatprep.subr.bf16.mxu0 %v17638_v47 }
 0x570   : > { %13756 = vmatpush1.bf16.msra.mxu0 %v17636_v52 }
 0x571   : > { %13757 = vmatprep.subr.bf16.mxu0 %v17644_v29 }
 0x574   : > { %13758 = vmatpush1.bf16.msra.mxu0 %v17642_v27 }
 0x575   : > { %13759 = vmatprep.subr.bf16.mxu0 %v17650_v3 }
 0x578   : > { %13760 = vmatpush1.bf16.msra.mxu0 %v17648_v53  ;;  %v10309_v53 = vor.u32 %v10308_v39, %v10305_v32  ;;  %v17651_v39 = vld [vmem:[%s22408_s10 + $0x100] ss:$8 sps:$4 sm:$0xff]  }
 0x579   : > { %13761 = vmatprep.subr.bf16.mxu0 %v17656_v9 }
 0x57c   : > { %13762 = vmatpush1.bf16.msra.mxu0 %v17654_v48  ;;  %v10225_v48 = vld [vmem:[#allocation6 + $0x18] sm:$0x11] }
 0x57d   : > { %13763 = vmatprep.subr.bf16.mxu0 %v17662_v21 }
 0x580   : > { %13764 = vmatpush1.bf16.msra.mxu0 %v17660_v26 }
 0x581   : > { %13765 = vmatprep.subr.bf16.mxu0 %v17668_v30 }
 0x584   : > { %13766 = vmatpush1.bf16.msra.mxu0 %v17666_v1 }
 0x61a   : > { %v9971_v7 = vpop.f32.mrb[224].mxu0 }
 0x61b   : > { %v10022_v50 = vmul.f32 %v20860_v25, %v9971_v7  ;;  %v9973_v6 = vpop.f32.mrb[225].mxu0 }
 0x61c   : > { %v10023_v41 = vmul.f32 %v20863_v38, %v9973_v6  ;;  %v9975_v0 = vpop.f32.mrb[226].mxu0  ;;  %v10314_v6 = vrot.slane %v10312_v36, 5  ;;  %v10237_v36 = vld [vmem:[#allocation6 + $0x38] sm:$0x11] }
 0x61d   : > { %v10050_v20 = vadd.f32 %v20866_v43, %v10022_v50  ;;  %v10024_v18 = vmul.f32 %v20860_v25, %v9975_v0  ;;  %v9977_v13 = vpop.f32.mrb[227].mxu0  ;;  %v10310_v50 = vrot.slane %v10309_v53, 4 }
 0x61e   : > { %v10051_v31 = vadd.f32 %v20869_v34, %v10023_v41  ;;  %v10025_v47 = vmul.f32 %v20863_v38, %v9977_v13 }
 0x61f   : > { %v10066_v10 = vmax.f32 %v10050_v20, 0.0  ;;  %v10052_v52 = vadd.f32 %v20866_v43, %v10024_v18 }
 0x620   : > { %v10067_v59 = vmax.f32 %v10051_v31, 0.0  ;;  %v10053_v8 = vadd.f32 %v20869_v34, %v10025_v47 }
 0x621   : > { %v10068_v57 = vmax.f32 %v10052_v52, 0.0 }
 0x622   : > { %v16154_v58 = vpack.c.bf16 %v10067_v59, %v10066_v10  ;;  %v10069_v24 = vmax.f32 %v10053_v8, 0.0  ;;  %v9981_v46 = vpop.f32.mrb[228].mxu0 }
 0x623   : > { %v10026_v27 = vmul.f32 %v20860_v25, %v9981_v46  ;;  %v9983_v29 = vpop.f32.mrb[229].mxu0 }
 0x624   : > { %v10139_v40 = vshrl.u32 %v16154_v58, 16  ;;  %v16155_v3 = vpack.c.bf16 %v10069_v24, %v10068_v57  ;;  %v10027_v61 = vmul.f32 %v20863_v38, %v9983_v29  ;;  %v9985_v22 = vpop.f32.mrb[230].mxu0  ;;  %v10142_v60 = vshll.u32 %v16154_v58, 16 }
 0x625   : > { %v10054_v5 = vadd.f32 %v20866_v43, %v10026_v27  ;;  %v10028_v11 = vmul.f32 %v20860_v25, %v9985_v22  ;;  %v9987_v2 = vpop.f32.mrb[231].mxu0  ;;  %v17659_v27 = vld [vmem:[%s22408_s10 + $0x114] ss:$8 sps:$4 sm:$0xff]   ;;  %v20927_v29 = vsel %vm19859_vm7, %v10310_v50, %v10314_v6 }
 0x626   : > { %v10141_v42 = vrot.slane %v10139_v40, 7  ;;  %v10147_v55 = vshrl.u32 %v16155_v3, 16  ;;  %v10055_v56 = vadd.f32 %v20869_v34, %v10027_v61  ;;  %v10150_v9 = vshll.u32 %v16155_v3, 16 }
 0x627   : > { %v10070_v21 = vmax.f32 %v10054_v5, 0.0  ;;  %v10056_v26 = vadd.f32 %v20866_v43, %v10028_v11  ;;  %v10029_v30 = vmul.f32 %v20863_v38, %v9987_v2  ;;  %v10234_v11 = vld [vmem:[#allocation6 + $0x30] sm:$0xff] }
 0x628   : > { %v10144_v1 = vor.u32 %v10142_v60, %v10141_v42  ;;  %v10145_v63 = vrot.slane %v10141_v42, 4  ;;  %v10149_v37 = vrot.slane %v10147_v55, 7  ;;  %v10071_v12 = vmax.f32 %v10055_v56, 0.0 }
 0x629   : > { %v10072_v7 = vmax.f32 %v10056_v26, 0.0  ;;  %v10057_v35 = vadd.f32 %v20869_v34, %v10029_v30  ;;  %v10240_v26 = vld [vmem:[#allocation6 + $0x40] sm:$0xff] }
 0x62a   : > { %v20900_v41 = vsel %vm20891_vm15, %v10144_v1, %v10222_v19  ;;  %v10226_v0 = vsel %vm20706_vm10, %v10145_v63, %v10225_v48  ;;  %v10152_v20 = vor.u32 %v10150_v9, %v10149_v37  ;;  %v10153_v18 = vrot.slane %v10149_v37, 4  ;;  %v9991_v13 = vpop.f32.mrb[232].mxu0  ;;  %v17657_v19 = vld [vmem:[%s22408_s10 + $0x110] ss:$8 sps:$4 sm:$0xff]   ;;  %v17665_v30 = vld [vmem:[%s22408_s10 + $0x124] ss:$8 sps:$4 sm:$0xff]  }
 0x62b   : > { %10224 = vst [vmem:[#allocation6 + $0x10] sm:$0xff] %v20900_v41  ;;  %10227 = vst [vmem:[#allocation6 + $0x18] sm:$0x11] %v10226_v0  ;;  %v16156_v28 = vpack.c.bf16 %v10071_v12, %v10070_v21  ;;  %v10073_v44 = vmax.f32 %v10057_v35, 0.0  ;;  %v10030_v31 = vmul.f32 %v20860_v25, %v9991_v13  ;;  %v9993_v47 = vpop.f32.mrb[233].mxu0  ;;  %v15686_v10 = vcombine.low %v20873_v62, %v20900_v41 }
 0x62c   : > { %v20910_v52 = vsel %vm20891_vm15, %v10152_v20, %v10228_v17  ;;  %v10232_v59 = vsel %vm20706_vm10, %v10153_v18, %v10231_v51  ;;  %v10031_v8 = vmul.f32 %v20863_v38, %v9993_v47  ;;  %v9995_v57 = vpop.f32.mrb[234].mxu0  ;;  %v15687_v32 = vcombine.high %v20873_v62, %v20900_v41  ;;  %v10243_v63 = vld [vmem:[#allocation6 + $0x48] sm:$0x11]  ;;  %v17663_v47 = vld [vmem:[%s22408_s10 + $0x120] ss:$8 sps:$4 sm:$0xff]  }
 0x62d   : > { %10230 = vst [vmem:[#allocation6 + $0x20] sm:$0xff] %v20910_v52  ;;  %10233 = vst [vmem:[#allocation6 + $0x28] sm:$0x11] %v10232_v59  ;;  %v10155_v58 = vshrl.u32 %v16156_v28, 16  ;;  %v16157_v24 = vpack.c.bf16 %v10073_v44, %v10072_v7  ;;  %v10058_v46 = vadd.f32 %v20866_v43, %v10030_v31  ;;  %v9997_v49 = vpop.f32.mrb[235].mxu0  ;;  %v10032_v40 = vmul.f32 %v20860_v25, %v9995_v57 }
 0x62e   : > { %v10059_v62 = vadd.f32 %v20869_v34, %v10031_v8  ;;  %v10033_v3 = vmul.f32 %v20863_v38, %v9997_v49  ;;  %13183 = vmatprep.mubr.bf16.mxu1 %v15687_v32  ;;  %v10317_v61 = vshrl.u32 %v20900_v41, 16  ;;  %v10158_v5 = vshll.u32 %v16156_v28, 16 }
 0x62f   : > { %v10157_v22 = vrot.slane %v10155_v58, 7  ;;  %v10163_v2 = vshrl.u32 %v16157_v24, 16  ;;  %v10074_v53 = vmax.f32 %v10058_v46, 0.0  ;;  %13184 = vmatmul.mubr.bf16.vlgmr.msra.gmra.mrb[96].mxu1 %v15686_v10  ;;  %v10166_v42 = vshll.u32 %v16157_v24, 16  ;;  %v10246_v24 = vld [vmem:[#allocation6 + $0x50] sm:$0xff] }
 0x630   : > { %v10075_v60 = vmax.f32 %v10059_v62, 0.0  ;;  %v10060_v55 = vadd.f32 %v20866_v43, %v10032_v40  ;;  %v10061_v56 = vadd.f32 %v20869_v34, %v10033_v3  ;;  %13225 = vmatpush1.bf16.msra.mxu1 %v17651_v39  ;;  %v20941_v1 = vrot.slane %v10317_v61, 4  ;;  %v17671_v39 = vld [vmem:[%s22408_s10 + $0x134] ss:$8 sps:$4 sm:$0xff]   ;;  %v10249_v62 = vld [vmem:[#allocation6 + $0x58] sm:$0x11] }
 0x631   : > { %v10160_v48 = vor.u32 %v10158_v5, %v10157_v22  ;;  %v10161_v9 = vrot.slane %v10157_v22, 4  ;;  %v10165_v21 = vrot.slane %v10163_v2, 7  ;;  %13226 = vmatprep.subr.bf16.mxu1 %v17659_v27  ;;  %v10320_v7 = vshll.u32 %v20900_v41, 16  ;;  %v10255_v40 = vld [vmem:[#allocation6 + $0x68] sm:$0x11] }
 0x632   : > { %v16158_v37 = vpack.c.bf16 %v10075_v60, %v10074_v53  ;;  %v10076_v12 = vmax.f32 %v10060_v55, 0.0  ;;  %v10077_v17 = vmax.f32 %v10061_v56, 0.0  ;;  %v10001_v51 = vpop.f32.mrb[236].mxu0  ;;  %v17669_v5 = vld [vmem:[%s22408_s10 + $0x130] ss:$8 sps:$4 sm:$0xff]  }
 0x633   : > { %v20946_v35 = vsel %vm20891_vm15, %v10160_v48, %v10234_v11  ;;  %v10238_v50 = vsel %vm20706_vm10, %v10161_v9, %v10237_v36  ;;  %v10168_v6 = vor.u32 %v10166_v42, %v10165_v21  ;;  %v10169_v0 = vrot.slane %v10165_v21, 4  ;;  %v10003_v20 = vpop.f32.mrb[237].mxu0  ;;  %v10252_v36 = vld [vmem:[#allocation6 + $0x60] sm:$0xff]  ;;  %v17675_v41 = vld [vmem:[%s22408_s10 + $0x150] ss:$8 sps:$4 sm:$0xff]  }
 0x634   : > { %10236 = vst [vmem:[#allocation6 + $0x30] sm:$0xff] %v20946_v35  ;;  %10239 = vst [vmem:[#allocation6 + $0x38] sm:$0x11] %v10238_v50  ;;  %v10171_v18 = vshrl.u32 %v16158_v37, 16  ;;  %v10174_v13 = vshll.u32 %v16158_v37, 16  ;;  %v16159_v28 = vpack.c.bf16 %v10077_v17, %v10076_v12  ;;  %v10034_v44 = vmul.f32 %v20860_v25, %v10001_v51  ;;  %v10005_v31 = vpop.f32.mrb[238].mxu0  ;;  %13227 = vmatpush1.bf16.msra.mxu1 %v17657_v19 }
 0x635   : > { %v20957_v10 = vsel %vm20891_vm15, %v10168_v6, %v10240_v26  ;;  %v10244_v59 = vsel %vm20706_vm10, %v10169_v0, %v10243_v63  ;;  %v10035_v8 = vmul.f32 %v20863_v38, %v10003_v20  ;;  %v10036_v57 = vmul.f32 %v20860_v25, %v10005_v31  ;;  %v10007_v32 = vpop.f32.mrb[239].mxu0  ;;  %13228 = vmatprep.subr.bf16.mxu1 %v17665_v30  ;;  %v10911_v60 = vld [vmem:[#allocation6 + $0x20] sm:$0xee]  ;;  %v10912_v19 = vld [vmem:[#allocation6 + $0x28] sm:$0x11] }
 0x636   : > { %10242 = vst [vmem:[#allocation6 + $0x40] sm:$0xff] %v20957_v10  ;;  %10245 = vst [vmem:[#allocation6 + $0x48] sm:$0x11] %v10244_v59  ;;  %v10173_v58 = vrot.slane %v10171_v18, 7  ;;  %v10179_v46 = vshrl.u32 %v16159_v28, 16  ;;  %v10182_v49 = vshll.u32 %v16159_v28, 16  ;;  %v10062_v27 = vadd.f32 %v20866_v43, %v10034_v44 }
 0x637   : > { %v10063_v3 = vadd.f32 %v20869_v34, %v10035_v8  ;;  %v10064_v25 = vadd.f32 %v20866_v43, %v10036_v57  ;;  %v10037_v61 = vmul.f32 %v20863_v38, %v10007_v32  ;;  %v15705_v22 = vcombine.high %v20910_v52, %v20946_v35  ;;  %v17674_v48 = vld [vmem:[%s22408_s10 + $0x144] ss:$8 sps:$4 sm:$0xff]  }
 0x638   : > { %v10176_v11 = vor.u32 %v10174_v13, %v10173_v58  ;;  %v10177_v2 = vrot.slane %v10173_v58, 4  ;;  %v10181_v53 = vrot.slane %v10179_v46, 7  ;;  %v10078_v42 = vmax.f32 %v10062_v27, 0.0  ;;  %13229 = vmatpush1.bf16.msra.mxu1 %v17663_v47  ;;  %v17672_v13 = vld [vmem:[%s22408_s10 + $0x140] ss:$8 sps:$4 sm:$0xff]  }
 0x639   : > { %v10079_v55 = vmax.f32 %v10063_v3, 0.0  ;;  %v10080_v56 = vmax.f32 %v10064_v25, 0.0  ;;  %v10065_v43 = vadd.f32 %v20869_v34, %v10037_v61  ;;  %13193 = vmatprep.mubr.bf16.mxu1 %v15705_v22  ;;  %v15704_v38 = vcombine.low %v20910_v52, %v20946_v35  ;;  %13230 = vmatprep.subr.bf16.mxu1 %v17671_v39  ;;  %v10289_v34 = vld [vmem:[#allocation6 + $0x18] sm:$0x11]  ;;  %v17677_v47 = vld [vmem:[%s22408_s10 + $0x154] ss:$8 sps:$4 sm:$0xff]  }
 0x63a   : > { %v20984_v9 = vsel %vm20891_vm15, %v10176_v11, %v10246_v24  ;;  %v10250_v21 = vsel %vm20706_vm10, %v10177_v2, %v10249_v62  ;;  %v10184_v26 = vor.u32 %v10182_v49, %v10181_v53  ;;  %v10185_v30 = vrot.slane %v10181_v53, 4  ;;  %v10261_v24 = vld [vmem:[#allocation6 + $0x78] sm:$0x11]  ;;  %v10258_v62 = vld [vmem:[#allocation6 + $0x70] sm:$0xff]  ;;  %v10264_v53 = vld [vmem:[#allocation6 + $0x80] sm:$0xff] }
 0x63b   : > { %10248 = vst [vmem:[#allocation6 + $0x50] sm:$0xff] %v20984_v9  ;;  %10251 = vst [vmem:[#allocation6 + $0x58] sm:$0x11] %v10250_v21  ;;  %v16160_v63 = vpack.c.bf16 %v10079_v55, %v10078_v42  ;;  %v10081_v37 = vmax.f32 %v10065_v43, 0.0  ;;  %13194 = vmatmul.mubr.bf16.gmra.mrb[100].mxu1 %v15704_v38  ;;  %v10913_v12 = vld [vmem:[#allocation6 + $0x30] sm:$0xee]  ;;  %v15723_v50 = vcombine.high %v20957_v10, %v20984_v9 }
 0x63c   : > { %v10914_v17 = vld [vmem:[#allocation6 + $0x38] sm:$0x11]  ;;  %v15678_v51 = vrot.slane %v10911_v60, 9  ;;  %v20993_v6 = vsel %vm20891_vm15, %v10184_v26, %v10252_v36  ;;  %v10256_v0 = vsel %vm20706_vm10, %v10185_v30, %v10255_v40  ;;  %v10945_v20 = vrot.slane %v10912_v19, 5  ;;  %13231 = vmatpush1.bf16.msra.mxu1 %v17669_v5  ;;  %v10267_v40 = vld [vmem:[#allocation6 + $0x88] sm:$0x11] }
 0x63d   : > { %v15679_v18 = vrot.slane %v10913_v12, 9  ;;  %10254 = vst [vmem:[#allocation6 + $0x60] sm:$0xff] %v20993_v6  ;;  %10257 = vst [vmem:[#allocation6 + $0x68] sm:$0x11] %v10256_v0  ;;  %v10187_v28 = vshrl.u32 %v16160_v63, 16  ;;  %v16161_v44 = vpack.c.bf16 %v10081_v37, %v10080_v56  ;;  %v10949_v31 = vrot.slane %v10914_v17, 5  ;;  %13203 = vmatprep.mubr.bf16.mxu1 %v15723_v50  ;;  %13232 = vmatprep.subr.bf16.mxu1 %v17674_v48 }
 0x63e   : > { %v10331_v59 = vshrl.u32 %v20910_v52, 16  ;;  %v10190_v8 = vshll.u32 %v16160_v63, 16  ;;  %v15722_v57 = vcombine.low %v20957_v10, %v20984_v9  ;;  %v10322_v32 = vrot.slane %v10320_v7, 5  ;;  %v17680_v36 = vld [vmem:[%s22408_s10 + $0x164] ss:$8 sps:$4 sm:$0xff]  }
 0x63f   : > { %v10326_v39 = vshll.u32 %v10289_v34, 16  ;;  %v10189_v58 = vrot.slane %v10187_v28, 7  ;;  %v10195_v46 = vshrl.u32 %v16161_v44, 16  ;;  %v10946_v49 = vsel %vm20266_vm11, %v15678_v51, %v10945_v20  ;;  %v10291_v60 = vld [vmem:[#allocation6 + $0x28] sm:$0x11] }
 0x640   : > { %v10950_v27 = vsel %vm20266_vm11, %v15679_v18, %v10949_v31  ;;  %13233 = vmatpush1.bf16.msra.mxu1 %v17672_v13  ;;  %v10323_v7 = vor.u32 %v10322_v32, %v20941_v1  ;;  %v10198_v2 = vshll.u32 %v16161_v44, 16  ;;  %v10333_v55 = vrot.slane %v10331_v59, 4  ;;  %v17678_v21 = vld [vmem:[%s22408_s10 + $0x160] ss:$8 sps:$4 sm:$0xff]   ;;  %v17683_v17 = vld [vmem:[%s22408_s10 + $0x174] ss:$8 sps:$4 sm:$0xff]  }
 0x641   : > { %v15702_v3 = vcombine.low %v10946_v49, %v10950_v27  ;;  %v15703_v25 = vcombine.high %v10946_v49, %v10950_v27  ;;  %v10328_v61 = vrot.slane %v10326_v39, 5  ;;  %v10192_v22 = vor.u32 %v10190_v8, %v10189_v58  ;;  %13234 = vmatprep.subr.bf16.mxu1 %v17677_v47  ;;  %v10293_v34 = vld [vmem:[#allocation6 + $0x38] sm:$0x11]  ;;  %v10295_v50 = vld [vmem:[#allocation6 + $0x48] sm:$0x11] }
 0x642   : > { %v10193_v5 = vrot.slane %v10189_v58, 4  ;;  %v10197_v11 = vrot.slane %v10195_v46, 7  ;;  %v10324_v42 = vrot.slane %v10323_v7, 4  ;;  %v10334_v56 = vshll.u32 %v20910_v52, 16  ;;  %v17681_v13 = vld [vmem:[%s22408_s10 + $0x170] ss:$8 sps:$4 sm:$0xff]  }
 0x643   : > { %13767 = vmatprep.mubr.bf16.mxu0 %v15703_v25  ;;  %v10345_v43 = vshrl.u32 %v20946_v35, 16  ;;  %v21024_v1 = vsel %vm20891_vm15, %v10192_v22, %v10258_v62  ;;  %13204 = vmatmul.mubr.bf16.gmra.mrb[104].mxu1 %v15722_v57  ;;  %v10340_v51 = vshll.u32 %v10291_v60, 16  ;;  %v10348_v18 = vshll.u32 %v20946_v35, 16  ;;  %v10297_v59 = vld [vmem:[#allocation6 + $0x58] sm:$0x11] }
 0x644   : > { %v10262_v38 = vsel %vm20706_vm10, %v10193_v5, %v10261_v24  ;;  %v10200_v19 = vor.u32 %v10198_v2, %v10197_v11  ;;  %v10201_v48 = vrot.slane %v10197_v11, 4  ;;  %13768 = vmatmul.mubr.bf16.vlgmr.msra.gmra.mrb[240].mxu0 %v15702_v3  ;;  %10260 = vst [vmem:[#allocation6 + $0x70] sm:$0xff] %v21024_v1  ;;  %13235 = vmatpush1.bf16.msra.mxu1 %v17675_v41  ;;  %v10336_v63 = vrot.slane %v10334_v56, 5  ;;  %v17686_v32 = vld [vmem:[%s22408_s10 + $0x184] ss:$8 sps:$4 sm:$0xff]  }
 0x645   : > { %10263 = vst [vmem:[#allocation6 + $0x78] sm:$0x11] %v10262_v38  ;;  %v15741_v52 = vcombine.high %v20993_v6, %v21024_v1  ;;  %v15740_v26 = vcombine.low %v20993_v6, %v21024_v1  ;;  %v21038_v30 = vsel %vm19859_vm7, %v10324_v42, %v10328_v61  ;;  %13236 = vmatprep.subr.bf16.mxu1 %v17680_v36  ;;  %v10347_v20 = vrot.slane %v10345_v43, 4  ;;  %v10299_v5 = vld [vmem:[#allocation6 + $0x68] sm:$0x11] }
 0x646   : > { %v10265_v37 = vsel %vm20891_vm15, %v10200_v19, %v10264_v53  ;;  %v10268_v12 = vsel %vm20706_vm10, %v10201_v48, %v10267_v40  ;;  %v10337_v0 = vor.u32 %v10336_v63, %v10333_v55  ;;  %v15689_v33 = vcombine.high %v20927_v29, %v21038_v30  ;;  %v17684_v40 = vld [vmem:[%s22408_s10 + $0x180] ss:$8 sps:$4 sm:$0xff]   ;;  %v17689_v2 = vld [vmem:[%s22408_s10 + $0x194] ss:$8 sps:$4 sm:$0xff]  }
 0x647   : > { %10266 = vst [vmem:[#allocation6 + $0x80] sm:$0xff] %v10265_v37  ;;  %10269 = vst [vmem:[#allocation6 + $0x88] sm:$0x11] %v10268_v12  ;;  %13213 = vmatprep.mubr.bf16.mxu1 %v15741_v52  ;;  %v10354_v28 = vshll.u32 %v10293_v34, 16  ;;  %v10359_v44 = vshrl.u32 %v20957_v10, 16  ;;  %v10362_v31 = vshll.u32 %v20957_v10, 16 }
 0x648   : > { %13237 = vmatpush1.bf16.msra.mxu1 %v17678_v21  ;;  %v10350_v47 = vrot.slane %v10348_v18, 5  ;;  %v10368_v8 = vshll.u32 %v10295_v50, 16  ;;  %v10373_v57 = vshrl.u32 %v20984_v9, 16  ;;  %v10376_v35 = vshll.u32 %v20984_v9, 16  ;;  %v17687_v21 = vld [vmem:[%s22408_s10 + $0x190] ss:$8 sps:$4 sm:$0xff]  }
 0x649   : > { %13238 = vmatprep.subr.bf16.mxu1 %v17683_v17  ;;  %v10338_v39 = vrot.slane %v10337_v0, 4  ;;  %v10342_v58 = vrot.slane %v10340_v51, 5  ;;  %v10361_v24 = vrot.slane %v10359_v44, 4  ;;  %v10364_v46 = vrot.slane %v10362_v31, 5  ;;  %v17692_v12 = vld [vmem:[%s22408_s10 + $0x1a4] ss:$8 sps:$4 sm:$0xff]  }
 0x64a   : > { %v10351_v49 = vor.u32 %v10350_v47, %v10347_v20  ;;  %v10356_v27 = vrot.slane %v10354_v28, 5  ;;  %v10375_v10 = vrot.slane %v10373_v57, 4  ;;  %v10378_v62 = vrot.slane %v10376_v35, 5  ;;  %v17690_v20 = vld [vmem:[%s22408_s10 + $0x1a0] ss:$8 sps:$4 sm:$0xff]  }
 0x64b   : > { %13214 = vmatmul.mubr.bf16.gmra.mrb[108].mxu1 %v15740_v26  ;;  %v10365_v3 = vor.u32 %v10364_v46, %v10361_v24  ;;  %v10382_v9 = vshll.u32 %v10297_v59, 16  ;;  %v10387_v25 = vshrl.u32 %v20993_v6, 16  ;;  %v10390_v41 = vshll.u32 %v20993_v6, 16  ;;  %v17693_v31 = vld [vmem:[%s22408_s10 + $0x1b0] ss:$8 sps:$4 sm:$0xff]  }
 0x64c   : > { %13256 = vmatprep.mubr.bf16.mxu1 %v15689_v33  ;;  %13239 = vmatpush1.bf16.msra.mxu1 %v17681_v13  ;;  %v10352_v7 = vrot.slane %v10351_v49, 4  ;;  %v10370_v61 = vrot.slane %v10368_v8, 5  ;;  %v10379_v22 = vor.u32 %v10378_v62, %v10375_v10  ;;  %v10401_v11 = vshrl.u32 %v21024_v1, 16  ;;  %v10301_v6 = vld [vmem:[#allocation6 + $0x78] sm:$0x11]  ;;  %v21140_v10 = vld [vmem:[#allocation6 + $0x40] sm:$0xff] }
 0x64d   : > { %13240 = vmatprep.subr.bf16.mxu1 %v17686_v32  ;;  %v21071_v53 = vsel %vm19859_vm7, %v10338_v39, %v10342_v58  ;;  %v10366_v36 = vrot.slane %v10365_v3, 4  ;;  %v10384_v42 = vrot.slane %v10382_v9, 5  ;;  %v10389_v56 = vrot.slane %v10387_v25, 4  ;;  %v17695_v13 = vld [vmem:[%s22408_s10 + $0x1b4] ss:$8 sps:$4 sm:$0xff]   ;;  %v21126_v39 = vld [vmem:[#allocation6 + $0x20] sm:$0xff] }
 0x64e   : > { %v21075_v60 = vsel %vm19859_vm7, %v10352_v7, %v10356_v27  ;;  %v10380_v55 = vrot.slane %v10379_v22, 4  ;;  %v10392_v43 = vrot.slane %v10390_v41, 5  ;;  %v10396_v48 = vshll.u32 %v10299_v5, 16  ;;  %v17698_v8 = vld [vmem:[%s22408_s10 + $0x1c4] ss:$8 sps:$4 sm:$0xff]   ;;  %v21124_v32 = vld [vmem:[#allocation6 + $0x30] sm:$0xff] }
 0x64f   : > { %v15707_v38 = vcombine.high %v21071_v53, %v21075_v60  ;;  %v15706_v19 = vcombine.low %v21071_v53, %v21075_v60  ;;  %v10403_v52 = vrot.slane %v10401_v11, 4  ;;  %v21086_v26 = vsel %vm19859_vm7, %v10366_v36, %v10370_v61  ;;  %v17696_v58 = vld [vmem:[%s22408_s10 + $0x1c0] ss:$8 sps:$4 sm:$0xff]   ;;  %v17701_v49 = vld [vmem:[%s22408_s10 + $0x1d4] ss:$8 sps:$4 sm:$0xff]  }
 0x650   : > { %13241 = vmatpush1.bf16.msra.mxu1 %v17684_v40  ;;  %v21090_v34 = vsel %vm19859_vm7, %v10380_v55, %v10384_v42  ;;  %v10404_v63 = vshll.u32 %v21024_v1, 16  ;;  %v10410_v37 = vshll.u32 %v10301_v6, 16  ;;  %v10393_v50 = vor.u32 %v10392_v43, %v10389_v56  ;;  %v21138_v27 = vld [vmem:[#allocation6 + $0x50] sm:$0xff]  ;;  %v17704_v9 = vld [vmem:[%s22408_s10 + $0x1e4] ss:$8 sps:$4 sm:$0xff]  }
 0x651   : > { %13242 = vmatprep.subr.bf16.mxu1 %v17689_v2  ;;  %v15725_v17 = vcombine.high %v21086_v26, %v21090_v34  ;;  %v15724_v51 = vcombine.low %v21086_v26, %v21090_v34  ;;  %v10398_v1 = vrot.slane %v10396_v48, 5  ;;  %v15698_v24 = vcombine.low %v21126_v39, %v21124_v32  ;;  %v17699_v62 = vld [vmem:[%s22408_s10 + $0x1d0] ss:$8 sps:$4 sm:$0xff]   ;;  %v21154_v41 = vld [vmem:[#allocation6 + $0x60] sm:$0xff]  ;;  %v17707_v5 = vld [vmem:[%s22408_s10 + $0x1f4] ss:$8 sps:$4 sm:$0xff]  }
 0x652   : > { %v10406_v0 = vrot.slane %v10404_v63, 5  ;;  %v10412_v33 = vrot.slane %v10410_v37, 5  ;;  %v10394_v28 = vrot.slane %v10393_v50, 4  ;;  %v15699_v46 = vcombine.high %v21126_v39, %v21124_v32  ;;  %v21152_v25 = vld [vmem:[#allocation6 + $0x70] sm:$0xff]  ;;  %v17702_v7 = vld [vmem:[%s22408_s10 + $0x1e0] ss:$8 sps:$4 sm:$0xff]  }
 0x653   : > { %v15717_v40 = vcombine.high %v21140_v10, %v21138_v27  ;;  %v15716_v3 = vcombine.low %v21140_v10, %v21138_v27  ;;  %v15735_v61 = vcombine.high %v21154_v41, %v21152_v25  ;;  %v15734_v22 = vcombine.low %v21154_v41, %v21152_v25  ;;  %v17705_v11 = vld [vmem:[%s22408_s10 + $0x1f0] ss:$8 sps:$4 sm:$0xff]   ;;  %v17710_v2 = vld [vmem:[%s22408_s10 + $0x204] ss:$8 sps:$4 sm:$0xff]   ;;  %v17708_v36 = vld [vmem:[%s22408_s10 + $0x200] ss:$8 sps:$4 sm:$0xff]  }
 0x654   : > { %13243 = vmatpush1.bf16.msra.mxu1 %v17687_v21  ;;  %v10407_v18 = vor.u32 %v10406_v0, %v10403_v52  ;;  %v21111_v47 = vsel %vm19859_vm7, %v10394_v28, %v10398_v1  ;;  %v15688_v42 = vcombine.low %v20927_v29, %v21038_v30  ;;  %v17713_v6 = vld [vmem:[%s22408_s10 + $0x214] ss:$8 sps:$4 sm:$0xff]   ;;  %v17711_v55 = vld [vmem:[%s22408_s10 + $0x210] ss:$8 sps:$4 sm:$0xff]   ;;  %v17716_v29 = vld [vmem:[%s22408_s10 + $0x224] ss:$8 sps:$4 sm:$0xff]  }
 0x655   : > { %13244 = vmatprep.subr.bf16.mxu1 %v17692_v12  ;;  %v17714_v30 = vld [vmem:[%s22408_s10 + $0x220] ss:$8 sps:$4 sm:$0xff]   ;;  %v17719_v56 = vld [vmem:[%s22408_s10 + $0x234] ss:$8 sps:$4 sm:$0xff]   ;;  %v17722_v48 = vld [vmem:[%s22408_s10 + $0x244] ss:$8 sps:$4 sm:$0xff]  }
 0x656   : > { %v10408_v44 = vrot.slane %v10407_v18, 4  ;;  %v663_v43 = vld [vmem:[#allocation6 + $0x90] sm:$0x11]  ;;  %v17720_v53 = vld [vmem:[%s22408_s10 + $0x240] ss:$8 sps:$4 sm:$0xff]  }
 0x657   : > { %v664_v52 = vsel %vm20706_vm10, 0, %v663_v43  ;;  %v10430_v60 = vld [vmem:[#allocation6] sm:$0xee]  ;;  %v10432_v21 = vld [vmem:[#allocation6 + $0x10] sm:$0xee] }
 0x658   : > { %13245 = vmatpush1.bf16.msra.mxu1 %v17690_v20  ;;  %v21115_v59 = vsel %vm19859_vm7, %v10408_v44, %v10412_v33  ;;  %665 = vst [vmem:[#allocation6 + $0x90] sm:$0x11] %v664_v52  ;;  %v10433_v63 = vld [vmem:[#allocation6 + $0x18] sm:$0x11]  ;;  %v17725_v37 = vld [vmem:[%s22408_s10 + $0x254] ss:$8 sps:$4 sm:$0xff]  }
 0x659   : > { %13246 = vmatprep.subr.bf16.mxu1 %v17695_v13  ;;  %v15743_v57 = vcombine.high %v21111_v47, %v21115_v59  ;;  %v15742_v35 = vcombine.low %v21111_v47, %v21115_v59  ;;  %v15662_v54 = vrot.slane %v10430_v60, 9  ;;  %v10468_v50 = vrot.slane %v10433_v63, 5  ;;  %v17723_v0 = vld [vmem:[%s22408_s10 + $0x250] ss:$8 sps:$4 sm:$0xff]   ;;  %v17728_v20 = vld [vmem:[%s22408_s10 + $0x264] ss:$8 sps:$4 sm:$0xff]  }
 0x65a   : > { %v17731_v1 = vld [vmem:[%s22408_s10 + $0x274] ss:$8 sps:$4 sm:$0xff]   ;;  %v696_v33 = vld [vmem:[#allocation6 + $0x98] sm:$0x11]  ;;  %v17729_v13 = vld [vmem:[%s22408_s10 + $0x270] ss:$8 sps:$4 sm:$0xff]  }
 0x65b   : > { %v17734_v28 = vld [vmem:[%s22408_s10 + $0x284] ss:$8 sps:$4 sm:$0xff]   ;;  %v697_v44 = vsel %vm20716_vm14, 0, %v696_v33  ;;  %v17737_v47 = vld [vmem:[%s22408_s10 + $0x294] ss:$8 sps:$4 sm:$0xff]   ;;  %vm22574_vm14 = vcmask 1043459  }
 0x65c   : > { %13247 = vmatpush1.bf16.msra.mxu1 %v17693_v31  ;;  %698 = vst [vmem:[#allocation6 + $0x98] sm:$0x11] %v697_v44  ;;  %v17732_v31 = vld [vmem:[%s22408_s10 + $0x280] ss:$8 sps:$4 sm:$0xff]   ;;  %v17735_v59 = vld [vmem:[%s22408_s10 + $0x290] ss:$8 sps:$4 sm:$0xff]  }
 0x65d   : > { %13248 = vmatprep.subr.bf16.mxu1 %v17698_v8  ;;  %v17738_v8 = vld [vmem:[%s22408_s10 + $0x2a0] ss:$8 sps:$4 sm:$0xff]   ;;  %v17761_v63 = vld [vmem:[%s22408_s10 + $0x314] ss:$8 sps:$4 sm:$0xff]  }
 0x65e   : > { %v17756_v52 = vld [vmem:[%s22408_s10 + $0x300] ss:$8 sps:$4 sm:$0xff]   ;;  %v17767_v44 = vld [vmem:[%s22408_s10 + $0x334] ss:$8 sps:$4 sm:$0xff]  }
 0x65f   : > { %v10441_v60 = vld [vmem:[#allocation6 + $0x58] sm:$0x11] }
 0x660   : > { %13249 = vmatpush1.bf16.msra.mxu1 %v17696_v58  ;;  %v17746_v58 = vld [vmem:[%s22408_s10 + $0x2c4] ss:$8 sps:$4 sm:$0xff]  }
 0x661   : > { %13250 = vmatprep.subr.bf16.mxu1 %v17701_v49  ;;  %v17744_v49 = vld [vmem:[%s22408_s10 + $0x2c0] ss:$8 sps:$4 sm:$0xff]  }
 0x662   : > { %v10445_v33 = vld [vmem:[#allocation6 + $0x78] sm:$0x11] }
 0x664   : > { %13251 = vmatpush1.bf16.msra.mxu1 %v17699_v62  ;;  %v17749_v62 = vld [vmem:[%s22408_s10 + $0x2d4] ss:$8 sps:$4 sm:$0xff]  }
 0x665   : > { %13252 = vmatprep.subr.bf16.mxu1 %v17704_v9  ;;  %v17747_v9 = vld [vmem:[%s22408_s10 + $0x2d0] ss:$8 sps:$4 sm:$0xff]  }
 0x668   : > { %13253 = vmatpush1.bf16.msra.mxu1 %v17702_v7  ;;  %v17752_v7 = vld [vmem:[%s22408_s10 + $0x2e4] ss:$8 sps:$4 sm:$0xff]  }
 0x669   : > { %13254 = vmatprep.subr.bf16.mxu1 %v17707_v5  ;;  %v17750_v5 = vld [vmem:[%s22408_s10 + $0x2e0] ss:$8 sps:$4 sm:$0xff]  }
 0x66c   : > { %13255 = vmatpush1.bf16.msra.mxu1 %v17705_v11  ;;  %v10436_v11 = vld [vmem:[#allocation6 + $0x30] sm:$0xee] }
 0x66d   : > { %13297 = vmatprep.subr.bf16.mxu1 %v17710_v2  ;;  %v10437_v2 = vld [vmem:[#allocation6 + $0x38] sm:$0x11] }
 0x66f   : > { %13257 = vmatmul.mubr.bf16.vlgmr.msra.gmra.mrb[96].mxu1 %v15688_v42  ;;  %v10434_v42 = vld [vmem:[#allocation6 + $0x20] sm:$0xee] }
 0x670   : > { %13266 = vmatprep.mubr.bf16.mxu1 %v15707_v38  ;;  %13298 = vmatpush1.bf16.msra.mxu1 %v17708_v36  ;;  %v17717_v38 = vld [vmem:[%s22408_s10 + $0x230] ss:$8 sps:$4 sm:$0xff]   ;;  %v17755_v36 = vld [vmem:[%s22408_s10 + $0x2f4] ss:$8 sps:$4 sm:$0xff]   ;;  %v15664_v43 = vrot.slane %v10434_v42, 9 }
 0x671   : > { %13299 = vmatprep.subr.bf16.mxu1 %v17713_v6  ;;  %v10435_v6 = vld [vmem:[#allocation6 + $0x28] sm:$0x11]  ;;  %v17776_v42 = vld [vmem:[%s22408_s10 + $0x364] ss:$8 sps:$4 sm:$0xff]  }
 0x674   : > { %13300 = vmatpush1.bf16.msra.mxu1 %v17711_v55  ;;  %v15665_v55 = vrot.slane %v10436_v11, 9  ;;  %v17773_v11 = vld [vmem:[%s22408_s10 + $0x354] ss:$8 sps:$4 sm:$0xff]  }
 0x675   : > { %13301 = vmatprep.subr.bf16.mxu1 %v17716_v29  ;;  %v10476_v29 = vrot.slane %v10437_v2, 5 }
 0x677   : > { %13267 = vmatmul.mubr.bf16.gmra.mrb[100].mxu1 %v15706_v19  ;;  %v10431_v19 = vld [vmem:[#allocation6 + $0x8] sm:$0x11] }
 0x678   : > { %13276 = vmatprep.mubr.bf16.mxu1 %v15725_v17  ;;  %13302 = vmatpush1.bf16.msra.mxu1 %v17714_v30  ;;  %v10464_v12 = vrot.slane %v10431_v19, 5  ;;  %v15663_v17 = vrot.slane %v10432_v21, 9  ;;  %v17753_v30 = vld [vmem:[%s22408_s10 + $0x2f0] ss:$8 sps:$4 sm:$0xff]  }
 0x679   : > { %13303 = vmatprep.subr.bf16.mxu1 %v17719_v56  ;;  %v17758_v56 = vld [vmem:[%s22408_s10 + $0x304] ss:$8 sps:$4 sm:$0xff]  }
 0x67a   : > { %v21229_v26 = vsel %vm20266_vm11, %v15662_v54, %v10464_v12  ;;  %v21233_v34 = vsel %vm20266_vm11, %v15663_v17, %v10468_v50  ;;  %v10438_v54 = vld [vmem:[#allocation6 + $0x40] sm:$0xee]  ;;  %v10439_v12 = vld [vmem:[#allocation6 + $0x48] sm:$0x11]  ;;  %v10484_v50 = vrot.slane %v10441_v60, 5 }
 0x67b   : > { %v15691_v18 = vcombine.high %v21229_v26, %v21233_v34  ;;  %v15690_v19 = vcombine.low %v21229_v26, %v21233_v34  ;;  %v15666_v26 = vrot.slane %v10438_v54, 9  ;;  %v10480_v34 = vrot.slane %v10439_v12, 5  ;;  %v17790_v60 = vld [vmem:[%s22408_s10 + $0x3a4] ss:$8 sps:$4 sm:$0xff]   ;;  %v17794_v54 = vld [vmem:[%s22408_s10 + $0x3c0] ss:$8 sps:$4 sm:$0xff]  }
 0x67c   : > { %13304 = vmatpush1.bf16.msra.mxu1 %v17717_v38  ;;  %v10472_v38 = vrot.slane %v10435_v6, 5  ;;  %v17774_v6 = vld [vmem:[%s22408_s10 + $0x360] ss:$8 sps:$4 sm:$0xff]   ;;  %v17799_v12 = vld [vmem:[%s22408_s10 + $0x3d4] ss:$8 sps:$4 sm:$0xff]  }
 0x67d   : > { %13305 = vmatprep.subr.bf16.mxu1 %v17722_v48  ;;  %v10477_v48 = vsel %vm20266_vm11, %v15665_v55, %v10476_v29  ;;  %v21355_v29 = vld [vmem:[#allocation6 + $0x10] sm:$0xff] }
 0x67e   : > { %v10473_v21 = vsel %vm20266_vm11, %v15664_v43, %v10472_v38  ;;  %v17779_v43 = vld [vmem:[%s22408_s10 + $0x370] ss:$8 sps:$4 sm:$0xff]   ;;  %v17784_v38 = vld [vmem:[%s22408_s10 + $0x384] ss:$8 sps:$4 sm:$0xff]  }
 0x67f   : > { %13277 = vmatmul.mubr.bf16.gmra.mrb[104].mxu1 %v15724_v51  ;;  %v17726_v51 = vld [vmem:[%s22408_s10 + $0x260] ss:$8 sps:$4 sm:$0xff]  }
 0x680   : > { %13286 = vmatprep.mubr.bf16.mxu1 %v15743_v57  ;;  %13306 = vmatpush1.bf16.msra.mxu1 %v17720_v53  ;;  %v17743_v57 = vld [vmem:[%s22408_s10 + $0x2b4] ss:$8 sps:$4 sm:$0xff]  }
 0x681   : > { %13307 = vmatprep.subr.bf16.mxu1 %v17725_v37  ;;  %v10440_v53 = vld [vmem:[#allocation6 + $0x50] sm:$0xee]  ;;  %v15709_v37 = vcombine.high %v10473_v21, %v10477_v48 }
 0x682   : > { %v15667_v17 = vrot.slane %v10440_v53, 9  ;;  %v17785_v53 = vld [vmem:[%s22408_s10 + $0x390] ss:$8 sps:$4 sm:$0xff]  }
 0x684   : > { %13308 = vmatpush1.bf16.msra.mxu1 %v17723_v0  ;;  %v17759_v0 = vld [vmem:[%s22408_s10 + $0x310] ss:$8 sps:$4 sm:$0xff]  }
 0x685   : > { %13309 = vmatprep.subr.bf16.mxu1 %v17728_v20  ;;  %v17764_v20 = vld [vmem:[%s22408_s10 + $0x324] ss:$8 sps:$4 sm:$0xff]  }
 0x687   : > { %13287 = vmatmul.mubr.bf16.gmra.mrb[108].mxu1 %v15742_v35  ;;  %v17741_v35 = vld [vmem:[%s22408_s10 + $0x2b0] ss:$8 sps:$4 sm:$0xff]  }
 0x688   : > { %13310 = vmatpush1.bf16.msra.mxu1 %v17726_v51  ;;  %13329 = vmatprep.mubr.bf16.mxu1 %v15691_v18  ;;  %v10485_v51 = vsel %vm20266_vm11, %v15667_v17, %v10484_v50  ;;  %v10444_v18 = vld [vmem:[#allocation6 + $0x70] sm:$0xee]  ;;  %v17802_v50 = vld [vmem:[%s22408_s10 + $0x3e4] ss:$8 sps:$4 sm:$0xff]  }
 0x689   : > { %13311 = vmatprep.subr.bf16.mxu1 %v17731_v1  ;;  %v17762_v1 = vld [vmem:[%s22408_s10 + $0x320] ss:$8 sps:$4 sm:$0xff]   ;;  %v17797_v17 = vld [vmem:[%s22408_s10 + $0x3d0] ss:$8 sps:$4 sm:$0xff]  }
 0x68c   : > { %13312 = vmatpush1.bf16.msra.mxu1 %v17729_v13  ;;  %v15708_v13 = vcombine.low %v10473_v21, %v10477_v48  ;;  %v17782_v48 = vld [vmem:[%s22408_s10 + $0x380] ss:$8 sps:$4 sm:$0xff]   ;;  %v17793_v21 = vld [vmem:[%s22408_s10 + $0x3b4] ss:$8 sps:$4 sm:$0xff]  }
 0x68d   : > { %13313 = vmatprep.subr.bf16.mxu1 %v17734_v28  ;;  %v10481_v28 = vsel %vm20266_vm11, %v15666_v26, %v10480_v34  ;;  %v17803_v26 = vld [vmem:[%s22408_s10 + $0x3f0] ss:$8 sps:$4 sm:$0xff]   ;;  %v17808_v34 = vld [vmem:[%s22408_s10 + $0x404] ss:$8 sps:$4 sm:$0xff]  }
 0x690   : > { %13314 = vmatpush1.bf16.msra.mxu1 %v17732_v31  ;;  %v15727_v31 = vcombine.high %v10481_v28, %v10485_v51 }
 0x691   : > { %13315 = vmatprep.subr.bf16.mxu1 %v17737_v47  ;;  %v10442_v47 = vld [vmem:[#allocation6 + $0x60] sm:$0xee] }
 0x694   : > { %13316 = vmatpush1.bf16.msra.mxu1 %v17735_v59  ;;  %v10443_v59 = vld [vmem:[#allocation6 + $0x68] sm:$0x11] }
 0x695   : > { %13317 = vmatprep.subr.bf16.mxu1 %v17740_v45  ;;  %v15669_v45 = vrot.slane %v10444_v18, 9  ;;  %v17812_v18 = vld [vmem:[%s22408_s10 + $0x414] ss:$8 sps:$4 sm:$0xff]  }
 0x698   : > { %13318 = vmatpush1.bf16.msra.mxu1 %v17738_v8  ;;  %v10492_v8 = vrot.slane %v10445_v33, 5  ;;  %v15711_v33 = vcombine.high %v21124_v32, %v21140_v10 }
 0x699   : > { %13319 = vmatprep.subr.bf16.mxu1 %v17743_v57  ;;  %v17765_v57 = vld [vmem:[%s22408_s10 + $0x330] ss:$8 sps:$4 sm:$0xff]  }
 0x69c   : > { %13320 = vmatpush1.bf16.msra.mxu1 %v17741_v35  ;;  %v17770_v35 = vld [vmem:[%s22408_s10 + $0x344] ss:$8 sps:$4 sm:$0xff]  }
 0x69d   : > { %13321 = vmatprep.subr.bf16.mxu1 %v17746_v58  ;;  %v15668_v58 = vrot.slane %v10442_v47, 9  ;;  %v17814_v47 = vld [vmem:[%s22408_s10 + $0x420] ss:$8 sps:$4 sm:$0xff]  }
 0x6a0   : > { %13322 = vmatpush1.bf16.msra.mxu1 %v17744_v49  ;;  %v10488_v49 = vrot.slane %v10443_v59, 5  ;;  %v15710_v59 = vcombine.low %v21124_v32, %v21140_v10 }
 0x6a1   : > { %13323 = vmatprep.subr.bf16.mxu1 %v17749_v62  ;;  %v10493_v62 = vsel %vm20266_vm11, %v15669_v45, %v10492_v8  ;;  %v17820_v45 = vld [vmem:[%s22408_s10 + $0x434] ss:$8 sps:$4 sm:$0xff]   ;;  %v10543_v8 = vshrl.u32 %v21355_v29, 16 }
 0x6a4   : > { %13324 = vmatpush1.bf16.msra.mxu1 %v17747_v9  ;;  %v17768_v9 = vld [vmem:[%s22408_s10 + $0x340] ss:$8 sps:$4 sm:$0xff]  }
 0x6a5   : > { %13325 = vmatprep.subr.bf16.mxu1 %v17752_v7  ;;  %v15726_v7 = vcombine.low %v10481_v28, %v10485_v51  ;;  %v17806_v51 = vld [vmem:[%s22408_s10 + $0x400] ss:$8 sps:$4 sm:$0xff]   ;;  %v17816_v28 = vld [vmem:[%s22408_s10 + $0x424] ss:$8 sps:$4 sm:$0xff]  }
 0x6a8   : > { %13326 = vmatpush1.bf16.msra.mxu1 %v17750_v5  ;;  %v10489_v5 = vsel %vm20266_vm11, %v15668_v58, %v10488_v49 }
 0x6a9   : > { %13327 = vmatprep.subr.bf16.mxu1 %v17755_v36  ;;  %v15745_v2 = vcombine.high %v10489_v5, %v10493_v62  ;;  %v17771_v36 = vld [vmem:[%s22408_s10 + $0x350] ss:$8 sps:$4 sm:$0xff]   ;;  %v15744_v55 = vcombine.low %v10489_v5, %v10493_v62 }
 0x6aa   : > { %v17818_v62 = vld [vmem:[%s22408_s10 + $0x430] ss:$8 sps:$4 sm:$0xff]  }
 0x6ac   : > { %13328 = vmatpush1.bf16.msra.mxu1 %v17753_v30  ;;  %v17781_v30 = vld [vmem:[%s22408_s10 + $0x374] ss:$8 sps:$4 sm:$0xff]  }
 0x6ad   : > { %13370 = vmatprep.subr.bf16.mxu1 %v17758_v56  ;;  %v15693_v56 = vcombine.high %v21355_v29, %v21126_v39 }
 0x6af   : > { %13330 = vmatmul.mubr.bf16.vlgmr.msra.gmra.mrb[96].mxu1 %v15690_v19  ;;  %v17788_v19 = vld [vmem:[%s22408_s10 + $0x3a0] ss:$8 sps:$4 sm:$0xff]  }
 0x6b0   : > { %13339 = vmatprep.mubr.bf16.mxu1 %v15709_v37  ;;  %13371 = vmatpush1.bf16.msra.mxu1 %v17756_v52  ;;  %v17787_v52 = vld [vmem:[%s22408_s10 + $0x394] ss:$8 sps:$4 sm:$0xff]   ;;  %v17796_v37 = vld [vmem:[%s22408_s10 + $0x3c4] ss:$8 sps:$4 sm:$0xff]  }
 0x6b1   : > { %13372 = vmatprep.subr.bf16.mxu1 %v17761_v63  ;;  %v17791_v63 = vld [vmem:[%s22408_s10 + $0x3b0] ss:$8 sps:$4 sm:$0xff]  }
 0x6b4   : > { %13373 = vmatpush1.bf16.msra.mxu1 %v17759_v0  ;;  %v17800_v0 = vld [vmem:[%s22408_s10 + $0x3e0] ss:$8 sps:$4 sm:$0xff]  }
 0x6b5   : > { %13374 = vmatprep.subr.bf16.mxu1 %v17764_v20  ;;  %v17805_v20 = vld [vmem:[%s22408_s10 + $0x3f4] ss:$8 sps:$4 sm:$0xff]  }
 0x6b7   : > { %13340 = vmatmul.mubr.bf16.gmra.mrb[100].mxu1 %v15708_v13  ;;  %v17810_v13 = vld [vmem:[%s22408_s10 + $0x410] ss:$8 sps:$4 sm:$0xff]  }
 0x6b8   : > { %13349 = vmatprep.mubr.bf16.mxu1 %v15727_v31  ;;  %13375 = vmatpush1.bf16.msra.mxu1 %v17762_v1  ;;  %v15692_v1 = vcombine.low %v21355_v29, %v21126_v39  ;;  %v10560_v31 = vshll.u32 %v21126_v39, 16 }
 0x6b9   : > { %13376 = vmatprep.subr.bf16.mxu1 %v17767_v44  ;;  %v10557_v44 = vshrl.u32 %v21126_v39, 16  ;;  %v17972_v39 = vld [vmem:[%s22408_s10 + $0x734] ss:$8 sps:$4 sm:$0xff]  }
 0x6ba   : > { %v10562_v49 = vrot.slane %v10560_v31, 5  ;;  %v17845_v31 = vld [vmem:[%s22408_s10 + $0x4b0] ss:$8 sps:$4 sm:$0xff]  }
 0x6bb   : > { %v10559_v58 = vrot.slane %v10557_v44, 4 }
 0x6bc   : > { %13377 = vmatpush1.bf16.msra.mxu1 %v17765_v57  ;;  %v10546_v57 = vshll.u32 %v21355_v29, 16  ;;  %v17828_v29 = vld [vmem:[%s22408_s10 + $0x454] ss:$8 sps:$4 sm:$0xff]  }
 0x6bd   : > { %13378 = vmatprep.subr.bf16.mxu1 %v17770_v35  ;;  %v15729_v35 = vcombine.high %v21138_v27, %v21154_v41 }
 0x6be   : > { %v10548_v5 = vrot.slane %v10546_v57, 5  ;;  %v17848_v57 = vld [vmem:[%s22408_s10 + $0x4c0] ss:$8 sps:$4 sm:$0xff]  }
 0x6bf   : > { %13350 = vmatmul.mubr.bf16.gmra.mrb[104].mxu1 %v15726_v7  ;;  %v10545_v7 = vrot.slane %v10543_v8, 4  ;;  %v10588_v8 = vshll.u32 %v21140_v10, 16 }
 0x6c0   : > { %13359 = vmatprep.mubr.bf16.mxu1 %v15745_v2  ;;  %13379 = vmatpush1.bf16.msra.mxu1 %v17768_v9  ;;  %v17824_v9 = vld [vmem:[%s22408_s10 + $0x444] ss:$8 sps:$4 sm:$0xff]  }
 0x6c1   : > { %13380 = vmatprep.subr.bf16.mxu1 %v17773_v11  ;;  %v10529_v11 = vld [vmem:[#allocation6 + $0x28] sm:$0x11]  ;;  %v21452_v2 = vld [vmem:[#allocation6 + $0x80] sm:$0xff] }
 0x6c4   : > { %13381 = vmatpush1.bf16.msra.mxu1 %v17771_v36  ;;  %v10563_v36 = vor.u32 %v10562_v49, %v10559_v58  ;;  %v10574_v58 = vshll.u32 %v21124_v32, 16  ;;  %v17853_v49 = vld [vmem:[%s22408_s10 + $0x4d4] ss:$8 sps:$4 sm:$0xff]  }
 0x6c5   : > { %13382 = vmatprep.subr.bf16.mxu1 %v17776_v42  ;;  %v17822_v42 = vld [vmem:[%s22408_s10 + $0x440] ss:$8 sps:$4 sm:$0xff]  }
 0x6c7   : > { %13360 = vmatmul.mubr.bf16.gmra.mrb[108].mxu1 %v15744_v55  ;;  %v15728_v55 = vcombine.low %v21138_v27, %v21154_v41 }
 0x6c8   : > { %13383 = vmatpush1.bf16.msra.mxu1 %v17774_v6  ;;  %13402 = vmatprep.mubr.bf16.mxu1 %v15693_v56  ;;  %v10527_v6 = vld [vmem:[#allocation6 + $0x18] sm:$0x11]  ;;  %v10566_v56 = vshll.u32 %v10529_v11, 16  ;;  %v10576_v11 = vrot.slane %v10574_v58, 5 }
 0x6c9   : > { %13384 = vmatprep.subr.bf16.mxu1 %v17781_v30  ;;  %v10549_v30 = vor.u32 %v10548_v5, %v10545_v7  ;;  %v17851_v7 = vld [vmem:[%s22408_s10 + $0x4d0] ss:$8 sps:$4 sm:$0xff]  }
 0x6cc   : > { %13385 = vmatpush1.bf16.msra.mxu1 %v17779_v43  ;;  %v15747_v43 = vcombine.high %v21152_v25, %v21452_v2 }
 0x6cd   : > { %13386 = vmatprep.subr.bf16.mxu1 %v17784_v38  ;;  %v10552_v38 = vshll.u32 %v10527_v6, 16  ;;  %v10531_v6 = vld [vmem:[#allocation6 + $0x38] sm:$0x11] }
 0x6d0   : > { %13387 = vmatpush1.bf16.msra.mxu1 %v17782_v48  ;;  %v10564_v48 = vrot.slane %v10563_v36, 4  ;;  %v17856_v36 = vld [vmem:[%s22408_s10 + $0x4e4] ss:$8 sps:$4 sm:$0xff]  }
 0x6d1   : > { %13388 = vmatprep.subr.bf16.mxu1 %v17787_v52  ;;  %v17826_v52 = vld [vmem:[%s22408_s10 + $0x450] ss:$8 sps:$4 sm:$0xff]  }
 0x6d4   : > { %13389 = vmatpush1.bf16.msra.mxu1 %v17785_v53  ;;  %v17832_v53 = vld [vmem:[%s22408_s10 + $0x464] ss:$8 sps:$4 sm:$0xff]  }
 0x6d5   : > { %13390 = vmatprep.subr.bf16.mxu1 %v17790_v60  ;;  %v10550_v60 = vrot.slane %v10549_v30, 4  ;;  %v10616_v30 = vshll.u32 %v21154_v41, 16 }
 0x6d8   : > { %13391 = vmatpush1.bf16.msra.mxu1 %v17788_v19  ;;  %v10568_v19 = vrot.slane %v10566_v56, 5  ;;  %v17854_v56 = vld [vmem:[%s22408_s10 + $0x4e0] ss:$8 sps:$4 sm:$0xff]  }
 0x6d9   : > { %13392 = vmatprep.subr.bf16.mxu1 %v17793_v21  ;;  %v10554_v21 = vrot.slane %v10552_v38, 5  ;;  %v17859_v38 = vld [vmem:[%s22408_s10 + $0x4f4] ss:$8 sps:$4 sm:$0xff]  }
 0x6dc   : > { %13393 = vmatpush1.bf16.msra.mxu1 %v17791_v63  ;;  %v21472_v63 = vsel %vm19859_vm7, %v10564_v48, %v10568_v19 }
 0x6dd   : > { %13394 = vmatprep.subr.bf16.mxu1 %v17796_v37  ;;  %v17830_v37 = vld [vmem:[%s22408_s10 + $0x460] ss:$8 sps:$4 sm:$0xff]  }
 0x6e0   : > { %13395 = vmatpush1.bf16.msra.mxu1 %v17794_v54  ;;  %v15746_v54 = vcombine.low %v21152_v25, %v21452_v2 }
 0x6e1   : > { %13396 = vmatprep.subr.bf16.mxu1 %v17799_v12  ;;  %v21481_v12 = vsel %vm19859_vm7, %v10550_v60, %v10554_v21  ;;  %v10580_v60 = vshll.u32 %v10531_v6, 16 }
 0x6e4   : > { %13397 = vmatpush1.bf16.msra.mxu1 %v17797_v17  ;;  %v17835_v17 = vld [vmem:[%s22408_s10 + $0x474] ss:$8 sps:$4 sm:$0xff]  }
 0x6e5   : > { %13398 = vmatprep.subr.bf16.mxu1 %v17802_v50  ;;  %v15695_v50 = vcombine.high %v21481_v12, %v21472_v63 }
 0x6e8   : > { %13399 = vmatpush1.bf16.msra.mxu1 %v17800_v0  ;;  %v17833_v0 = vld [vmem:[%s22408_s10 + $0x470] ss:$8 sps:$4 sm:$0xff]  }
 0x6e9   : > { %13400 = vmatprep.subr.bf16.mxu1 %v17805_v20  ;;  %v17838_v20 = vld [vmem:[%s22408_s10 + $0x484] ss:$8 sps:$4 sm:$0xff]  }
 0x6ec   : > { %13401 = vmatpush1.bf16.msra.mxu1 %v17803_v26  ;;  %v17836_v26 = vld [vmem:[%s22408_s10 + $0x480] ss:$8 sps:$4 sm:$0xff]  }
 0x6ed   : > { %13443 = vmatprep.subr.bf16.mxu1 %v17808_v34  ;;  %v17841_v34 = vld [vmem:[%s22408_s10 + $0x494] ss:$8 sps:$4 sm:$0xff]  }
 0x6ef   : > { %13403 = vmatmul.mubr.bf16.vlgmr.msra.gmra.mrb[96].mxu1 %v15692_v1  ;;  %v17844_v1 = vld [vmem:[%s22408_s10 + $0x4a4] ss:$8 sps:$4 sm:$0xff]  }
 0x6f0   : > { %13412 = vmatprep.mubr.bf16.mxu1 %v15711_v33  ;;  %13444 = vmatpush1.bf16.msra.mxu1 %v17806_v51  ;;  %v17839_v51 = vld [vmem:[%s22408_s10 + $0x490] ss:$8 sps:$4 sm:$0xff]   ;;  %v17847_v33 = vld [vmem:[%s22408_s10 + $0x4b4] ss:$8 sps:$4 sm:$0xff]  }
 0x6f1   : > { %13445 = vmatprep.subr.bf16.mxu1 %v17812_v18  ;;  %v17842_v18 = vld [vmem:[%s22408_s10 + $0x4a0] ss:$8 sps:$4 sm:$0xff]  }
 0x6f4   : > { %13446 = vmatpush1.bf16.msra.mxu1 %v17810_v13 }
 0x6f5   : > { %13447 = vmatprep.subr.bf16.mxu1 %v17816_v28 }
 0x6f7   : > { %13413 = vmatmul.mubr.bf16.gmra.mrb[100].mxu1 %v15710_v59  ;;  %v17850_v59 = vld [vmem:[%s22408_s10 + $0x4c4] ss:$8 sps:$4 sm:$0xff]  }
 0x6f8   : > { %13422 = vmatprep.mubr.bf16.mxu1 %v15729_v35  ;;  %13448 = vmatpush1.bf16.msra.mxu1 %v17814_v47  ;;  %v10571_v35 = vshrl.u32 %v21124_v32, 16  ;;  %v17966_v32 = vld [vmem:[%s22408_s10 + $0x720] ss:$8 sps:$4 sm:$0xff]  }
 0x6f9   : > { %13449 = vmatprep.subr.bf16.mxu1 %v17820_v45  ;;  %v10585_v45 = vshrl.u32 %v21140_v10, 16  ;;  %v21827_v10 = vld [vmem:[#allocation6 + $0x90] sm:$0xff] }
 0x6fa   : > { %v10573_v5 = vrot.slane %v10571_v35, 4  ;;  %v17865_v35 = vld [vmem:[%s22408_s10 + $0x514] ss:$8 sps:$4 sm:$0xff]  }
 0x6fc   : > { %13450 = vmatpush1.bf16.msra.mxu1 %v17818_v62  ;;  %v10587_v62 = vrot.slane %v10585_v45, 4  ;;  %v17860_v45 = vld [vmem:[%s22408_s10 + $0x500] ss:$8 sps:$4 sm:$0xff]  }
 0x6fd   : > { %13451 = vmatprep.subr.bf16.mxu1 %v17824_v9  ;;  %v10590_v9 = vrot.slane %v10588_v8, 5 }
 0x6ff   : > { %13423 = vmatmul.mubr.bf16.gmra.mrb[104].mxu1 %v15728_v55  ;;  %v10591_v55 = vor.u32 %v10590_v9, %v10587_v62  ;;  %v10627_v62 = vshrl.u32 %v21152_v25, 16 }
 0x700   : > { %13432 = vmatprep.mubr.bf16.mxu1 %v15747_v43  ;;  %13452 = vmatpush1.bf16.msra.mxu1 %v17822_v42  ;;  %v10533_v42 = vld [vmem:[#allocation6 + $0x48] sm:$0x11]  ;;  %v10577_v43 = vor.u32 %v10576_v11, %v10573_v5 }
 0x701   : > { %13453 = vmatprep.subr.bf16.mxu1 %v17828_v29  ;;  %v10613_v29 = vshrl.u32 %v21154_v41, 16  ;;  %v10594_v48 = vshll.u32 %v10533_v42, 16  ;;  %v10592_v19 = vrot.slane %v10591_v55, 4  ;;  %v17868_v42 = vld [vmem:[%s22408_s10 + $0x524] ss:$8 sps:$4 sm:$0xff]  }
 0x702   : > { %v17980_v41 = vld [vmem:[%s22408_s10 + $0x760] ss:$8 sps:$4 sm:$0xff]  }
 0x703   : > { %v10615_v21 = vrot.slane %v10613_v29, 4  ;;  %v10629_v29 = vrot.slane %v10627_v62, 4 }
 0x704   : > { %13454 = vmatpush1.bf16.msra.mxu1 %v17826_v52  ;;  %v10599_v52 = vshrl.u32 %v21138_v27, 16 }
 0x705   : > { %13455 = vmatprep.subr.bf16.mxu1 %v17832_v53  ;;  %v10602_v53 = vshll.u32 %v21138_v27, 16  ;;  %v10770_v27 = vld [vmem:[#allocation6 + $0x38] sm:$0x11] }
 0x707   : > { %13433 = vmatmul.mubr.bf16.gmra.mrb[108].mxu1 %v15746_v54  ;;  %v17857_v54 = vld [vmem:[%s22408_s10 + $0x4f0] ss:$8 sps:$4 sm:$0xff]  }
 0x708   : > { %13456 = vmatpush1.bf16.msra.mxu1 %v17830_v37  ;;  %13475 = vmatprep.mubr.bf16.mxu1 %v15695_v50  ;;  %v10618_v37 = vrot.slane %v10616_v30, 5  ;;  %v17862_v50 = vld [vmem:[%s22408_s10 + $0x504] ss:$8 sps:$4 sm:$0xff]  }
 0x709   : > { %13457 = vmatprep.subr.bf16.mxu1 %v17835_v17  ;;  %v10578_v17 = vrot.slane %v10577_v43, 4 }
 0x70c   : > { %13458 = vmatpush1.bf16.msra.mxu1 %v17833_v0  ;;  %v10596_v0 = vrot.slane %v10594_v48, 5 }
 0x70d   : > { %13459 = vmatprep.subr.bf16.mxu1 %v17838_v20  ;;  %v10601_v20 = vrot.slane %v10599_v52, 4  ;;  %v17866_v52 = vld [vmem:[%s22408_s10 + $0x520] ss:$8 sps:$4 sm:$0xff]  }
 0x710   : > { %13460 = vmatpush1.bf16.msra.mxu1 %v17836_v26  ;;  %v10604_v26 = vrot.slane %v10602_v53, 5  ;;  %v10539_v53 = vld [vmem:[#allocation6 + $0x78] sm:$0x11] }
 0x711   : > { %13461 = vmatprep.subr.bf16.mxu1 %v17841_v34  ;;  %v10582_v34 = vrot.slane %v10580_v60, 5 }
 0x712   : > { %v10605_v58 = vor.u32 %v10604_v26, %v10601_v20  ;;  %v17869_v20 = vld [vmem:[%s22408_s10 + $0x530] ss:$8 sps:$4 sm:$0xff]   ;;  %v17874_v26 = vld [vmem:[%s22408_s10 + $0x544] ss:$8 sps:$4 sm:$0xff]  }
 0x713   : > { %v10583_v8 = vsel %vm19859_vm7, %v10578_v17, %v10582_v34 }
 0x714   : > { %13462 = vmatpush1.bf16.msra.mxu1 %v17839_v51  ;;  %v10537_v51 = vld [vmem:[#allocation6 + $0x68] sm:$0x11]  ;;  %v10606_v6 = vrot.slane %v10605_v58, 4  ;;  %v10670_v58 = vld [vmem:[#allocation6 + $0x10] sm:$0xee] }
 0x715   : > { %13463 = vmatprep.subr.bf16.mxu1 %v17844_v1  ;;  %v10597_v1 = vsel %vm19859_vm7, %v10592_v19, %v10596_v0 }
 0x716   : > { %v15712_v60 = vcombine.low %v10583_v8, %v10597_v1 }
 0x717   : > { %v21512_v13 = vpop.f32.mrb[240].mxu0 }
 0x718   : > { %v21514_v28 = vpop.f32.mrb[241].mxu0  ;;  %13464 = vmatpush1.bf16.msra.mxu1 %v17842_v18  ;;  %v10619_v18 = vor.u32 %v10618_v37, %v10615_v21  ;;  %v17871_v21 = vld [vmem:[%s22408_s10 + $0x534] ss:$8 sps:$4 sm:$0xff]  }
 0x719   : > { %v21516_v44 = vpop.f32.mrb[242].mxu0  ;;  %13465 = vmatprep.subr.bf16.mxu1 %v17847_v33  ;;  %v10641_v33 = vshrl.u32 %v21452_v2, 16 }
 0x71a   : > { %v21521_v47 = vpop.f32.mrb[243].mxu0 }
 0x71b   : > { %v10643_v5 = vrot.slane %v10641_v33, 4  ;;  %v17872_v33 = vld [vmem:[%s22408_s10 + $0x540] ss:$8 sps:$4 sm:$0xff]  }
 0x71c   : > { %13466 = vmatpush1.bf16.msra.mxu1 %v17845_v31  ;;  %v10644_v31 = vshll.u32 %v21452_v2, 16 }
 0x71d   : > { %13467 = vmatprep.subr.bf16.mxu1 %v17850_v59  ;;  %v15694_v59 = vcombine.low %v21481_v12, %v21472_v63  ;;  %v10630_v63 = vshll.u32 %v21152_v25, 16  ;;  %v15713_v12 = vcombine.high %v10583_v8, %v10597_v1 }
 0x71e   : > { %v10646_v11 = vrot.slane %v10644_v31, 5  ;;  %v10672_v31 = vld [vmem:[#allocation6 + $0x20] sm:$0xee] }
 0x71f   : > { %v10632_v30 = vrot.slane %v10630_v63, 5  ;;  %v15671_v62 = vrot.slane %v10672_v31, 9  ;;  %v17905_v31 = vld [vmem:[%s22408_s10 + $0x5f0] ss:$8 sps:$4 sm:$0xff]  }
 0x720   : > { %13468 = vmatpush1.bf16.msra.mxu1 %v17848_v57  ;;  %v10535_v57 = vld [vmem:[#allocation6 + $0x58] sm:$0x11]  ;;  %v10647_v48 = vor.u32 %v10646_v11, %v10643_v5 }
 0x721   : > { %13469 = vmatprep.subr.bf16.mxu1 %v17853_v49  ;;  %v10622_v49 = vshll.u32 %v10537_v51, 16  ;;  %v10608_v9 = vshll.u32 %v10535_v57, 16  ;;  %v10633_v37 = vor.u32 %v10632_v30, %v10629_v29  ;;  %v17877_v57 = vld [vmem:[%s22408_s10 + $0x554] ss:$8 sps:$4 sm:$0xff]   ;;  %v17881_v30 = vld [vmem:[%s22408_s10 + $0x570] ss:$8 sps:$4 sm:$0xff]  }
 0x722   : > { %v10648_v0 = vrot.slane %v10647_v48, 4  ;;  %v17887_v48 = vld [vmem:[%s22408_s10 + $0x590] ss:$8 sps:$4 sm:$0xff]  }
 0x723   : > { %v10624_v55 = vrot.slane %v10622_v49, 5  ;;  %v10610_v43 = vrot.slane %v10608_v9, 5  ;;  %v10634_v34 = vrot.slane %v10633_v37, 4  ;;  %v10671_v49 = vld [vmem:[#allocation6 + $0x18] sm:$0x11] }
 0x724   : > { %13470 = vmatpush1.bf16.msra.mxu1 %v17851_v7  ;;  %v10620_v7 = vrot.slane %v10619_v18, 4  ;;  %v17880_v9 = vld [vmem:[%s22408_s10 + $0x564] ss:$8 sps:$4 sm:$0xff]   ;;  %v10704_v5 = vrot.slane %v10671_v49, 5  ;;  %v17896_v37 = vld [vmem:[%s22408_s10 + $0x5c0] ss:$8 sps:$4 sm:$0xff]  }
 0x725   : > { %13471 = vmatprep.subr.bf16.mxu1 %v17856_v36  ;;  %v17863_v36 = vld [vmem:[%s22408_s10 + $0x510] ss:$8 sps:$4 sm:$0xff]   ;;  %v10611_v19 = vsel %vm19859_vm7, %v10606_v6, %v10610_v43  ;;  %v17884_v43 = vld [vmem:[%s22408_s10 + $0x580] ss:$8 sps:$4 sm:$0xff]  }
 0x726   : > { %v10681_v49 = vld [vmem:[#allocation6 + $0x68] sm:$0x11] }
 0x728   : > { %13472 = vmatpush1.bf16.msra.mxu1 %v17854_v56  ;;  %v10541_v56 = vld [vmem:[#allocation6 + $0x88] sm:$0x11] }
 0x729   : > { %13473 = vmatprep.subr.bf16.mxu1 %v17859_v38  ;;  %v10625_v38 = vsel %vm19859_vm7, %v10620_v7, %v10624_v55  ;;  %v15670_v7 = vrot.slane %v10670_v58, 9  ;;  %v17883_v55 = vld [vmem:[%s22408_s10 + $0x574] ss:$8 sps:$4 sm:$0xff]   ;;  %v10680_v58 = vld [vmem:[#allocation6 + $0x60] sm:$0xee] }
 0x72a   : > { %v15731_v17 = vcombine.high %v10611_v19, %v10625_v38 }
 0x72b   : > { %v10705_v6 = vsel %vm20266_vm11, %v15670_v7, %v10704_v5  ;;  %v10678_v7 = vld [vmem:[#allocation6 + $0x50] sm:$0xee]  ;;  %v10679_v5 = vld [vmem:[#allocation6 + $0x58] sm:$0x11] }
 0x72c   : > { %13474 = vmatpush1.bf16.msra.mxu1 %v17857_v54  ;;  %v10650_v54 = vshll.u32 %v10541_v56, 16  ;;  %v17886_v56 = vld [vmem:[%s22408_s10 + $0x584] ss:$8 sps:$4 sm:$0xff]  }
 0x72d   : > { %13516 = vmatprep.subr.bf16.mxu1 %v17862_v50  ;;  %v10636_v50 = vshll.u32 %v10539_v53, 16  ;;  %v17890_v53 = vld [vmem:[%s22408_s10 + $0x5a0] ss:$8 sps:$4 sm:$0xff]  }
 0x72e   : > { %v10652_v51 = vrot.slane %v10650_v54, 5  ;;  %v17901_v54 = vld [vmem:[%s22408_s10 + $0x5d4] ss:$8 sps:$4 sm:$0xff]  }
 0x72f   : > { %13476 = vmatmul.mubr.bf16.vlgmr.msra.gmra.mrb[96].mxu1 %v15694_v59  ;;  %v10638_v1 = vrot.slane %v10636_v50, 5  ;;  %v10673_v59 = vld [vmem:[#allocation6 + $0x28] sm:$0x11]  ;;  %v17904_v50 = vld [vmem:[%s22408_s10 + $0x5e4] ss:$8 sps:$4 sm:$0xff]  }
 0x730   : > { %13485 = vmatprep.mubr.bf16.mxu1 %v15713_v12  ;;  %13517 = vmatpush1.bf16.msra.mxu1 %v17860_v45  ;;  %v10653_v18 = vsel %vm19859_vm7, %v10648_v0, %v10652_v51  ;;  %v15730_v45 = vcombine.low %v10611_v19, %v10625_v38  ;;  %v10708_v63 = vrot.slane %v10673_v59, 5  ;;  %v17875_v12 = vld [vmem:[%s22408_s10 + $0x550] ss:$8 sps:$4 sm:$0xff]   ;;  %v17889_v38 = vld [vmem:[%s22408_s10 + $0x594] ss:$8 sps:$4 sm:$0xff]  }
 0x731   : > { %13518 = vmatprep.subr.bf16.mxu1 %v17865_v35  ;;  %v10639_v8 = vsel %vm19859_vm7, %v10634_v34, %v10638_v1  ;;  %v17893_v19 = vld [vmem:[%s22408_s10 + $0x5b0] ss:$8 sps:$4 sm:$0xff]   ;;  %v17902_v0 = vld [vmem:[%s22408_s10 + $0x5e0] ss:$8 sps:$4 sm:$0xff]   ;;  %v17907_v34 = vld [vmem:[%s22408_s10 + $0x5f4] ss:$8 sps:$4 sm:$0xff]  }
 0x732   : > { %v15749_v35 = vcombine.high %v10639_v8, %v10653_v18  ;;  %v21614_v11 = vsel %vm20266_vm11, %v15671_v62, %v10708_v63  ;;  %v10674_v51 = vld [vmem:[#allocation6 + $0x30] sm:$0xee]  ;;  %v10675_v1 = vld [vmem:[#allocation6 + $0x38] sm:$0x11] }
 0x733   : > { %v15697_v29 = vcombine.high %v10705_v6, %v21614_v11  ;;  %v17910_v59 = vld [vmem:[%s22408_s10 + $0x604] ss:$8 sps:$4 sm:$0xff]   ;;  %v15696_v62 = vcombine.low %v10705_v6, %v21614_v11  ;;  %v17911_v11 = vld [vmem:[%s22408_s10 + $0x610] ss:$8 sps:$4 sm:$0xff]  }
 0x734   : > { %13519 = vmatpush1.bf16.msra.mxu1 %v17863_v36  ;;  %v17878_v36 = vld [vmem:[%s22408_s10 + $0x560] ss:$8 sps:$4 sm:$0xff]   ;;  %v17916_v6 = vld [vmem:[%s22408_s10 + $0x624] ss:$8 sps:$4 sm:$0xff]  }
 0x735   : > { %13520 = vmatprep.subr.bf16.mxu1 %v17868_v42  ;;  %v15748_v42 = vcombine.low %v10639_v8, %v10653_v18  ;;  %v10712_v8 = vrot.slane %v10675_v1, 5 }
 0x737   : > { %13486 = vmatmul.mubr.bf16.gmra.mrb[100].mxu1 %v15712_v60  ;;  %v17895_v60 = vld [vmem:[%s22408_s10 + $0x5b4] ss:$8 sps:$4 sm:$0xff]  }
 0x738   : > { %13495 = vmatprep.mubr.bf16.mxu1 %v15731_v17  ;;  %13521 = vmatpush1.bf16.msra.mxu1 %v17866_v52  ;;  %v17892_v52 = vld [vmem:[%s22408_s10 + $0x5a4] ss:$8 sps:$4 sm:$0xff]   ;;  %v17899_v17 = vld [vmem:[%s22408_s10 + $0x5d0] ss:$8 sps:$4 sm:$0xff]  }
 0x739   : > { %13522 = vmatprep.subr.bf16.mxu1 %v17871_v21  ;;  %v17898_v21 = vld [vmem:[%s22408_s10 + $0x5c4] ss:$8 sps:$4 sm:$0xff]  }
 0x73c   : > { %13523 = vmatpush1.bf16.msra.mxu1 %v17869_v20  ;;  %v10676_v20 = vld [vmem:[#allocation6 + $0x40] sm:$0xee] }
 0x73d   : > { %13524 = vmatprep.subr.bf16.mxu1 %v17874_v26  ;;  %v10677_v26 = vld [vmem:[#allocation6 + $0x48] sm:$0x11]  ;;  %v15673_v18 = vrot.slane %v10676_v20, 9 }
 0x73f   : > { %13496 = vmatmul.mubr.bf16.gmra.mrb[104].mxu1 %v15730_v45  ;;  %v15672_v45 = vrot.slane %v10674_v51, 9 }
 0x740   : > { %13505 = vmatprep.mubr.bf16.mxu1 %v15749_v35  ;;  %13525 = vmatpush1.bf16.msra.mxu1 %v17872_v33  ;;  %v10716_v33 = vrot.slane %v10677_v26, 5  ;;  %v17908_v35 = vld [vmem:[%s22408_s10 + $0x600] ss:$8 sps:$4 sm:$0xff]  }
 0x741   : > { %13526 = vmatprep.subr.bf16.mxu1 %v17877_v57  ;;  %v10713_v63 = vsel %vm20266_vm11, %v15672_v45, %v10712_v8  ;;  %v17926_v45 = vld [vmem:[%s22408_s10 + $0x660] ss:$8 sps:$4 sm:$0xff]  }
 0x742   : > { %v10717_v57 = vsel %vm20266_vm11, %v15673_v18, %v10716_v33  ;;  %v17925_v18 = vld [vmem:[%s22408_s10 + $0x654] ss:$8 sps:$4 sm:$0xff]  }
 0x744   : > { %13527 = vmatpush1.bf16.msra.mxu1 %v17875_v12  ;;  %v17913_v12 = vld [vmem:[%s22408_s10 + $0x614] ss:$8 sps:$4 sm:$0xff]  }
 0x745   : > { %13528 = vmatprep.subr.bf16.mxu1 %v17880_v9  ;;  %v15715_v9 = vcombine.high %v10713_v63, %v10717_v57 }
 0x747   : > { %13506 = vmatmul.mubr.bf16.gmra.mrb[108].mxu1 %v15748_v42  ;;  %v10724_v42 = vrot.slane %v10681_v49, 5  ;;  %v17934_v49 = vld [vmem:[%s22408_s10 + $0x680] ss:$8 sps:$4 sm:$0xff]  }
 0x748   : > { %13529 = vmatpush1.bf16.msra.mxu1 %v17878_v36  ;;  %13548 = vmatprep.mubr.bf16.mxu1 %v15697_v29  ;;  %v15675_v36 = vrot.slane %v10680_v58, 9  ;;  %v10720_v29 = vrot.slane %v10679_v5, 5  ;;  %v17936_v58 = vld [vmem:[%s22408_s10 + $0x684] ss:$8 sps:$4 sm:$0xff]  }
 0x749   : > { %13530 = vmatprep.subr.bf16.mxu1 %v17883_v55  ;;  %v15674_v55 = vrot.slane %v10678_v7, 9  ;;  %v17943_v7 = vld [vmem:[%s22408_s10 + $0x6b0] ss:$8 sps:$4 sm:$0xff]   ;;  %v17948_v5 = vld [vmem:[%s22408_s10 + $0x6c4] ss:$8 sps:$4 sm:$0xff]  }
 0x74c   : > { %13531 = vmatpush1.bf16.msra.mxu1 %v17881_v30  ;;  %v10725_v30 = vsel %vm20266_vm11, %v15675_v36, %v10724_v42  ;;  %v17946_v36 = vld [vmem:[%s22408_s10 + $0x6c0] ss:$8 sps:$4 sm:$0xff]   ;;  %v17951_v42 = vld [vmem:[%s22408_s10 + $0x6d4] ss:$8 sps:$4 sm:$0xff]  }
 0x74d   : > { %13532 = vmatprep.subr.bf16.mxu1 %v17886_v56  ;;  %v17914_v56 = vld [vmem:[%s22408_s10 + $0x620] ss:$8 sps:$4 sm:$0xff]  }
 0x750   : > { %13533 = vmatpush1.bf16.msra.mxu1 %v17884_v43  ;;  %v10684_v43 = vld [vmem:[#allocation6 + $0x80] sm:$0xee] }
 0x751   : > { %13534 = vmatprep.subr.bf16.mxu1 %v17889_v38  ;;  %v10685_v38 = vld [vmem:[#allocation6 + $0x88] sm:$0x11] }
 0x754   : > { %13535 = vmatpush1.bf16.msra.mxu1 %v17887_v48  ;;  %v15714_v48 = vcombine.low %v10713_v63, %v10717_v57  ;;  %v17933_v57 = vld [vmem:[%s22408_s10 + $0x674] ss:$8 sps:$4 sm:$0xff]   ;;  %v17942_v63 = vld [vmem:[%s22408_s10 + $0x6a4] ss:$8 sps:$4 sm:$0xff]  }
 0x755   : > { %13536 = vmatprep.subr.bf16.mxu1 %v17892_v52  ;;  %v10721_v52 = vsel %vm20266_vm11, %v15674_v55, %v10720_v29  ;;  %v17952_v55 = vld [vmem:[%s22408_s10 + $0x6e0] ss:$8 sps:$4 sm:$0xff]   ;;  %v17957_v29 = vld [vmem:[%s22408_s10 + $0x6f4] ss:$8 sps:$4 sm:$0xff]  }
 0x756   : > { %v15732_v51 = vcombine.low %v10721_v52, %v10725_v30 }
 0x758   : > { %13537 = vmatpush1.bf16.msra.mxu1 %v17890_v53  ;;  %v17919_v53 = vld [vmem:[%s22408_s10 + $0x634] ss:$8 sps:$4 sm:$0xff]  }
 0x759   : > { %13538 = vmatprep.subr.bf16.mxu1 %v17895_v60  ;;  %v15733_v60 = vcombine.high %v10721_v52, %v10725_v30  ;;  %v17955_v30 = vld [vmem:[%s22408_s10 + $0x6f0] ss:$8 sps:$4 sm:$0xff]  }
 0x75a   : > { %v10769_v52 = vld [vmem:[#allocation6 + $0x30] sm:$0xff] }
 0x75c   : > { %13539 = vmatpush1.bf16.msra.mxu1 %v17893_v19  ;;  %v10682_v19 = vld [vmem:[#allocation6 + $0x70] sm:$0xee] }
 0x75d   : > { %13540 = vmatprep.subr.bf16.mxu1 %v17898_v21  ;;  %v10683_v21 = vld [vmem:[#allocation6 + $0x78] sm:$0x11] }
 0x75e   : > { %v10728_v20 = vrot.slane %v10683_v21, 5  ;;  %v10801_v21 = vshll.u32 %v10769_v52, 16 }
 0x760   : > { %13541 = vmatpush1.bf16.msra.mxu1 %v17896_v37  ;;  %v15677_v37 = vrot.slane %v10684_v43, 9  ;;  %v17958_v43 = vld [vmem:[%s22408_s10 + $0x700] ss:$8 sps:$4 sm:$0xff]  }
 0x761   : > { %13542 = vmatprep.subr.bf16.mxu1 %v17901_v54  ;;  %v10732_v54 = vrot.slane %v10685_v38, 5  ;;  %v17964_v38 = vld [vmem:[%s22408_s10 + $0x714] ss:$8 sps:$4 sm:$0xff]  }
 0x763   : > { %v10733_v26 = vsel %vm20266_vm11, %v15677_v37, %v10732_v54  ;;  %v10803_v54 = vrot.slane %v10801_v21, 5  ;;  %v18006_v21 = vld [vmem:[%s22408_s10 + $0x7e4] ss:$8 sps:$4 sm:$0xff]  }
 0x764   : > { %13543 = vmatpush1.bf16.msra.mxu1 %v17899_v17  ;;  %v17917_v17 = vld [vmem:[%s22408_s10 + $0x630] ss:$8 sps:$4 sm:$0xff]  }
 0x765   : > { %13544 = vmatprep.subr.bf16.mxu1 %v17904_v50  ;;  %v17922_v50 = vld [vmem:[%s22408_s10 + $0x644] ss:$8 sps:$4 sm:$0xff]  }
 0x768   : > { %13545 = vmatpush1.bf16.msra.mxu1 %v17902_v0  ;;  %v15676_v0 = vrot.slane %v10682_v19, 9  ;;  %v10798_v19 = vshrl.u32 %v10769_v52, 16 }
 0x769   : > { %13546 = vmatprep.subr.bf16.mxu1 %v17907_v34  ;;  %v17920_v34 = vld [vmem:[%s22408_s10 + $0x640] ss:$8 sps:$4 sm:$0xff]  }
 0x76a   : > { %v10729_v1 = vsel %vm20266_vm11, %v15676_v0, %v10728_v20  ;;  %v10800_v37 = vrot.slane %v10798_v19, 4  ;;  %v10777_v19 = vld [vmem:[#allocation6 + $0x70] sm:$0xff] }
 0x76b   : > { %v15751_v33 = vcombine.high %v10729_v1, %v10733_v26  ;;  %v15750_v8 = vcombine.low %v10729_v1, %v10733_v26  ;;  %v10768_v26 = vld [vmem:[#allocation6 + $0x28] sm:$0x11]  ;;  %v10807_v1 = vshll.u32 %v10770_v27, 16 }
 0x76c   : > { %13547 = vmatpush1.bf16.msra.mxu1 %v17905_v31  ;;  %v17923_v31 = vld [vmem:[%s22408_s10 + $0x650] ss:$8 sps:$4 sm:$0xff]  }
 0x76d   : > { %13589 = vmatprep.subr.bf16.mxu1 %v17910_v59  ;;  %v17928_v59 = vld [vmem:[%s22408_s10 + $0x664] ss:$8 sps:$4 sm:$0xff]  }
 0x76f   : > { %13549 = vmatmul.mubr.bf16.vlgmr.msra.gmra.mrb[96].mxu1 %v15696_v62  ;;  %v17939_v62 = vld [vmem:[%s22408_s10 + $0x694] ss:$8 sps:$4 sm:$0xff]  }
 0x770   : > { %13558 = vmatprep.mubr.bf16.mxu1 %v15715_v9  ;;  %13590 = vmatpush1.bf16.msra.mxu1 %v17908_v35  ;;  %v17931_v35 = vld [vmem:[%s22408_s10 + $0x670] ss:$8 sps:$4 sm:$0xff]   ;;  %v17945_v9 = vld [vmem:[%s22408_s10 + $0x6b4] ss:$8 sps:$4 sm:$0xff]  }
 0x771   : > { %13591 = vmatprep.subr.bf16.mxu1 %v17913_v12  ;;  %v17940_v12 = vld [vmem:[%s22408_s10 + $0x6a0] ss:$8 sps:$4 sm:$0xff]  }
 0x774   : > { %13592 = vmatpush1.bf16.msra.mxu1 %v17911_v11  ;;  %v17949_v11 = vld [vmem:[%s22408_s10 + $0x6d0] ss:$8 sps:$4 sm:$0xff]  }
 0x775   : > { %13593 = vmatprep.subr.bf16.mxu1 %v17916_v6  ;;  %v17954_v6 = vld [vmem:[%s22408_s10 + $0x6e4] ss:$8 sps:$4 sm:$0xff]  }
 0x777   : > { %13559 = vmatmul.mubr.bf16.gmra.mrb[100].mxu1 %v15714_v48  ;;  %v17962_v48 = vld [vmem:[%s22408_s10 + $0x710] ss:$8 sps:$4 sm:$0xff]  }
 0x778   : > { %13568 = vmatprep.mubr.bf16.mxu1 %v15733_v60  ;;  %13594 = vmatpush1.bf16.msra.mxu1 %v17914_v56  ;;  %v17960_v56 = vld [vmem:[%s22408_s10 + $0x704] ss:$8 sps:$4 sm:$0xff]  }
 0x779   : > { %13595 = vmatprep.subr.bf16.mxu1 %v17919_v53  ;;  %v17968_v53 = vld [vmem:[%s22408_s10 + $0x724] ss:$8 sps:$4 sm:$0xff]  }
 0x77a   : > { %v10767_v60 = vld [vmem:[#allocation6 + $0x20] sm:$0xff] }
 0x77c   : > { %13596 = vmatpush1.bf16.msra.mxu1 %v17917_v17  ;;  %v17970_v17 = vld [vmem:[%s22408_s10 + $0x730] ss:$8 sps:$4 sm:$0xff]  }
 0x77d   : > { %13597 = vmatprep.subr.bf16.mxu1 %v17922_v50  ;;  %v17976_v50 = vld [vmem:[%s22408_s10 + $0x744] ss:$8 sps:$4 sm:$0xff]  }
 0x77f   : > { %13569 = vmatmul.mubr.bf16.gmra.mrb[104].mxu1 %v15732_v51 }
 0x780   : > { %13578 = vmatprep.mubr.bf16.mxu1 %v15751_v33  ;;  %13598 = vmatpush1.bf16.msra.mxu1 %v17920_v34  ;;  %v17979_v34 = vld [vmem:[%s22408_s10 + $0x754] ss:$8 sps:$4 sm:$0xff]   ;;  %v10793_v33 = vshll.u32 %v10768_v26, 16 }
 0x781   : > { %13599 = vmatprep.subr.bf16.mxu1 %v17925_v18  ;;  %v15753_v18 = vcombine.high %v21452_v2, %v21827_v10 }
 0x784   : > { %13600 = vmatpush1.bf16.msra.mxu1 %v17923_v31 }
 0x785   : > { %13601 = vmatprep.subr.bf16.mxu1 %v17928_v59  ;;  %v17977_v59 = vld [vmem:[%s22408_s10 + $0x750] ss:$8 sps:$4 sm:$0xff]  }
 0x787   : > { %13579 = vmatmul.mubr.bf16.gmra.mrb[108].mxu1 %v15750_v8 }
 0x788   : > { %13602 = vmatpush1.bf16.msra.mxu1 %v17926_v45  ;;  %13621 = vmatprep.mubr.bf16.mxu1 %v15699_v46  ;;  %v17937_v46 = vld [vmem:[%s22408_s10 + $0x690] ss:$8 sps:$4 sm:$0xff]   ;;  %v17982_v45 = vld [vmem:[%s22408_s10 + $0x764] ss:$8 sps:$4 sm:$0xff]  }
 0x789   : > { %13603 = vmatprep.subr.bf16.mxu1 %v17933_v57  ;;  %v10809_v57 = vrot.slane %v10807_v1, 5 }
 0x78c   : > { %13604 = vmatpush1.bf16.msra.mxu1 %v17931_v35  ;;  %v10795_v35 = vrot.slane %v10793_v33, 5  ;;  %v10779_v33 = vld [vmem:[#allocation6 + $0x80] sm:$0xff] }
 0x78d   : > { %13605 = vmatprep.subr.bf16.mxu1 %v17936_v58 }
 0x790   : > { %13606 = vmatpush1.bf16.msra.mxu1 %v17934_v49  ;;  %v17985_v49 = vld [vmem:[%s22408_s10 + $0x774] ss:$8 sps:$4 sm:$0xff]  }
 0x791   : > { %13607 = vmatprep.subr.bf16.mxu1 %v17939_v62 }
 0x794   : > { %13608 = vmatpush1.bf16.msra.mxu1 %v17937_v46  ;;  %v17983_v46 = vld [vmem:[%s22408_s10 + $0x770] ss:$8 sps:$4 sm:$0xff]  }
 0x795   : > { %13609 = vmatprep.subr.bf16.mxu1 %v17942_v63  ;;  %v17986_v63 = vld [vmem:[%s22408_s10 + $0x780] ss:$8 sps:$4 sm:$0xff]  }
 0x798   : > { %13610 = vmatpush1.bf16.msra.mxu1 %v17940_v12  ;;  %v17991_v12 = vld [vmem:[%s22408_s10 + $0x794] ss:$8 sps:$4 sm:$0xff]  }
 0x799   : > { %13611 = vmatprep.subr.bf16.mxu1 %v17945_v9  ;;  %v17989_v9 = vld [vmem:[%s22408_s10 + $0x790] ss:$8 sps:$4 sm:$0xff]  }
 0x79c   : > { %13612 = vmatpush1.bf16.msra.mxu1 %v17943_v7  ;;  %v17994_v7 = vld [vmem:[%s22408_s10 + $0x7a4] ss:$8 sps:$4 sm:$0xff]  }
 0x79d   : > { %13613 = vmatprep.subr.bf16.mxu1 %v17948_v5  ;;  %v17992_v5 = vld [vmem:[%s22408_s10 + $0x7a0] ss:$8 sps:$4 sm:$0xff]  }
 0x7a0   : > { %13614 = vmatpush1.bf16.msra.mxu1 %v17946_v36  ;;  %v17997_v36 = vld [vmem:[%s22408_s10 + $0x7b4] ss:$8 sps:$4 sm:$0xff]  }
 0x7a1   : > { %13615 = vmatprep.subr.bf16.mxu1 %v17951_v42  ;;  %v17995_v42 = vld [vmem:[%s22408_s10 + $0x7b0] ss:$8 sps:$4 sm:$0xff]  }
 0x7a4   : > { %13616 = vmatpush1.bf16.msra.mxu1 %v17949_v11  ;;  %v10773_v11 = vld [vmem:[#allocation6 + $0x50] sm:$0xff] }
 0x7a5   : > { %13617 = vmatprep.subr.bf16.mxu1 %v17954_v6  ;;  %v18000_v6 = vld [vmem:[%s22408_s10 + $0x7c4] ss:$8 sps:$4 sm:$0xff]  }
 0x7a8   : > { %13618 = vmatpush1.bf16.msra.mxu1 %v17952_v55  ;;  %v10771_v55 = vld [vmem:[#allocation6 + $0x40] sm:$0xff] }
 0x7a9   : > { %13619 = vmatprep.subr.bf16.mxu1 %v17957_v29  ;;  %v10826_v29 = vshrl.u32 %v10773_v11, 16 }
 0x7ab   : > { %v10828_v52 = vrot.slane %v10826_v29, 4 }
 0x7ac   : > { %13620 = vmatpush1.bf16.msra.mxu1 %v17955_v30  ;;  %v10829_v30 = vshll.u32 %v10773_v11, 16 }
 0x7ad   : > { %13662 = vmatprep.subr.bf16.mxu1 %v17960_v56  ;;  %v17998_v56 = vld [vmem:[%s22408_s10 + $0x7c0] ss:$8 sps:$4 sm:$0xff]  }
 0x7af   : > { %13622 = vmatmul.mubr.bf16.vlgmr.msra.gmra.mrb[96].mxu1 %v15698_v24  ;;  %v10784_v24 = vshrl.u32 %v10767_v60, 16 }
 0x7b0   : > { %13631 = vmatprep.mubr.bf16.mxu1 %v15717_v40  ;;  %13663 = vmatpush1.bf16.msra.mxu1 %v17958_v43  ;;  %v10787_v40 = vshll.u32 %v10767_v60, 16  ;;  %v18003_v43 = vld [vmem:[%s22408_s10 + $0x7d4] ss:$8 sps:$4 sm:$0xff]   ;;  %v18001_v60 = vld [vmem:[%s22408_s10 + $0x7d0] ss:$8 sps:$4 sm:$0xff]  }
 0x7b1   : > { %13664 = vmatprep.subr.bf16.mxu1 %v17964_v38  ;;  %v10786_v0 = vrot.slane %v10784_v24, 4  ;;  %v10812_v38 = vshrl.u32 %v10771_v55, 16  ;;  %v10774_v24 = vld [vmem:[#allocation6 + $0x58] sm:$0x11] }
 0x7b2   : > { %v10789_v20 = vrot.slane %v10787_v40, 5  ;;  %v10775_v40 = vld [vmem:[#allocation6 + $0x60] sm:$0xff] }
 0x7b3   : > { %v10843_v26 = vshll.u32 %v10775_v40, 16 }
 0x7b4   : > { %13665 = vmatpush1.bf16.msra.mxu1 %v17962_v48  ;;  %v10790_v51 = vor.u32 %v10789_v20, %v10786_v0  ;;  %v10815_v48 = vshll.u32 %v10771_v55, 16  ;;  %v18004_v0 = vld [vmem:[%s22408_s10 + $0x7e0] ss:$8 sps:$4 sm:$0xff]   ;;  %v18009_v20 = vld [vmem:[%s22408_s10 + $0x7f4] ss:$8 sps:$4 sm:$0xff]  }
 0x7b5   : > { %13666 = vmatprep.subr.bf16.mxu1 %v17968_v53  ;;  %v10831_v53 = vrot.slane %v10829_v30, 5 }
 0x7b6   : > { %v10791_v8 = vrot.slane %v10790_v51, 4 }
 0x7b7   : > { %13632 = vmatmul.mubr.bf16.gmra.mrb[100].mxu1 %v15716_v3  ;;  %v10804_v3 = vor.u32 %v10803_v54, %v10800_v37  ;;  %v10772_v37 = vld [vmem:[#allocation6 + $0x48] sm:$0x11]  ;;  %v10832_v54 = vor.u32 %v10831_v53, %v10828_v52 }
 0x7b8   : > { %13641 = vmatprep.mubr.bf16.mxu1 %v15735_v61  ;;  %13667 = vmatpush1.bf16.msra.mxu1 %v17966_v32  ;;  %v17974_v61 = vld [vmem:[%s22408_s10 + $0x740] ss:$8 sps:$4 sm:$0xff]   ;;  %v21857_v58 = vsel %vm19859_vm7, %v10791_v8, %v10795_v35  ;;  %v10814_v32 = vrot.slane %v10812_v38, 4  ;;  %v10780_v53 = vld [vmem:[#allocation6 + $0x88] sm:$0x11] }
 0x7b9   : > { %13668 = vmatprep.subr.bf16.mxu1 %v17972_v39  ;;  %v10805_v31 = vrot.slane %v10804_v3, 4  ;;  %v10817_v39 = vrot.slane %v10815_v48, 5  ;;  %v10835_v3 = vshll.u32 %v10774_v24, 16  ;;  %v10833_v51 = vrot.slane %v10832_v54, 4 }
 0x7ba   : > { %v10877_v54 = vshll.u32 %v10780_v53, 16  ;;  %v18047_v53 = vld [vmem:[%s22408_s10 + $0x8e4] ss:$8 sps:$4 sm:$0xff]  }
 0x7bb   : > { %v21848_v25 = vsel %vm19859_vm7, %v10805_v31, %v10809_v57  ;;  %v10818_v27 = vor.u32 %v10817_v39, %v10814_v32  ;;  %v18007_v31 = vld [vmem:[%s22408_s10 + $0x7f0] ss:$8 sps:$4 sm:$0xff]   ;;  %v10845_v57 = vrot.slane %v10843_v26, 5 }
 0x7bc   : > { %13669 = vmatpush1.bf16.msra.mxu1 %v17970_v17  ;;  %v15701_v62 = vcombine.high %v21857_v58, %v21848_v25  ;;  %v10854_v17 = vshrl.u32 %v10777_v19, 16  ;;  %v18022_v39 = vld [vmem:[%s22408_s10 + $0x810] ss:$8 sps:$4 sm:$0xff]  }
 0x7bd   : > { %13670 = vmatprep.subr.bf16.mxu1 %v17976_v50  ;;  %v10857_v50 = vshll.u32 %v10777_v19, 16 }
 0x7be   : > { %v10856_v1 = vrot.slane %v10854_v17, 4 }
 0x7bf   : > { %13642 = vmatmul.mubr.bf16.gmra.mrb[104].mxu1 %v15734_v22  ;;  %v15752_v22 = vcombine.low %v21452_v2, %v21827_v10  ;;  %v17988_v2 = vld [vmem:[%s22408_s10 + $0x784] ss:$8 sps:$4 sm:$0xff]  }
 0x7c0   : > { %13651 = vmatprep.mubr.bf16.mxu1 %v15753_v18  ;;  %13671 = vmatpush1.bf16.msra.mxu1 %v17974_v61  ;;  %v10840_v61 = vshrl.u32 %v10775_v40, 16  ;;  %v10859_v18 = vrot.slane %v10857_v50, 5  ;;  %v18023_v40 = vld [vmem:[%s22408_s10 + $0x824] ss:$8 sps:$4 sm:$0xff]  }
 0x7c1   : > { %13672 = vmatprep.subr.bf16.mxu1 %v17979_v34  ;;  %v10821_v34 = vshll.u32 %v10772_v37, 16 }
 0x7c2   : > { %v10842_v8 = vrot.slane %v10840_v61, 4  ;;  %v10879_v61 = vrot.slane %v10877_v54, 5 }
 0x7c3   : > { %v10823_v35 = vrot.slane %v10821_v34, 5 }
 0x7c4   : > { %13673 = vmatpush1.bf16.msra.mxu1 %v17977_v59  ;;  %v10819_v59 = vrot.slane %v10818_v27, 4  ;;  %v18024_v27 = vld [vmem:[%s22408_s10 + $0x820] ss:$8 sps:$4 sm:$0xff]  }
 0x7c5   : > { %13674 = vmatprep.subr.bf16.mxu1 %v17982_v45  ;;  %v10837_v45 = vrot.slane %v10835_v3, 5  ;;  %v18025_v3 = vld [vmem:[%s22408_s10 + $0x834] ss:$8 sps:$4 sm:$0xff]  }
 0x7c7   : > { %13652 = vmatmul.mubr.bf16.gmra.mrb[108].mxu1 %v15752_v22  ;;  %v10868_v22 = vshrl.u32 %v10779_v33, 16 }
 0x7c8   : > { %13675 = vmatpush1.bf16.msra.mxu1 %v17980_v41  ;;  %13694 = vmatprep.mubr.bf16.mxu1 %v15701_v62  ;;  %v10778_v41 = vld [vmem:[#allocation6 + $0x78] sm:$0x11]  ;;  %v10838_v62 = vsel %vm19859_vm7, %v10833_v51, %v10837_v45  ;;  %v18026_v51 = vld [vmem:[%s22408_s10 + $0x830] ss:$8 sps:$4 sm:$0xff]   ;;  %v10915_v45 = vld [vmem:[#allocation6 + $0x40] sm:$0xee] }
 0x7c9   : > { %13676 = vmatprep.subr.bf16.mxu1 %v17985_v49  ;;  %v10871_v49 = vshll.u32 %v10779_v33, 16  ;;  %v10870_v55 = vrot.slane %v10868_v22, 4  ;;  %v15680_v22 = vrot.slane %v10915_v45, 9 }
 0x7cc   : > { %13677 = vmatpush1.bf16.msra.mxu1 %v17983_v46  ;;  %v10776_v46 = vld [vmem:[#allocation6 + $0x68] sm:$0x11] }
 0x7cd   : > { %13678 = vmatprep.subr.bf16.mxu1 %v17988_v2  ;;  %v10860_v2 = vor.u32 %v10859_v18, %v10856_v1  ;;  %v10917_v1 = vld [vmem:[#allocation6 + $0x50] sm:$0xee]  ;;  %v10918_v18 = vld [vmem:[#allocation6 + $0x58] sm:$0x11] }
 0x7ce   : > { %v10957_v15 = vrot.slane %v10918_v18, 5 }
 0x7cf   : > { %v10861_v29 = vrot.slane %v10860_v2, 4 }
 0x7d0   : > { %13679 = vmatpush1.bf16.msra.mxu1 %v17986_v63  ;;  %v10882_v63 = vshrl.u32 %v21827_v10, 16 }
 0x7d1   : > { %13680 = vmatprep.subr.bf16.mxu1 %v17991_v12  ;;  %v10885_v12 = vshll.u32 %v21827_v10, 16  ;;  %v10873_v10 = vrot.slane %v10871_v49, 5 }
 0x7d2   : > { %v10884_v30 = vrot.slane %v10882_v63, 4  ;;  %v18031_v63 = vld [vmem:[%s22408_s10 + $0x864] ss:$8 sps:$4 sm:$0xff]  }
 0x7d3   : > { %v10874_v19 = vor.u32 %v10873_v10, %v10870_v55  ;;  %v18038_v55 = vld [vmem:[%s22408_s10 + $0x890] ss:$8 sps:$4 sm:$0xff]   ;;  %v18040_v10 = vld [vmem:[%s22408_s10 + $0x8a0] ss:$8 sps:$4 sm:$0xff]  }
 0x7d4   : > { %13681 = vmatpush1.bf16.msra.mxu1 %v17989_v9  ;;  %v15700_v9 = vcombine.low %v21857_v58, %v21848_v25  ;;  %v18020_v25 = vld [vmem:[%s22408_s10 + $0x800] ss:$8 sps:$4 sm:$0xff]  }
 0x7d5   : > { %13682 = vmatprep.subr.bf16.mxu1 %v17994_v7  ;;  %v18019_v7 = vld [vmem:[%s22408_s10 + $0x804] ss:$8 sps:$4 sm:$0xff]   ;;  %v10875_v50 = vrot.slane %v10874_v19, 4  ;;  %v10920_v19 = vld [vmem:[#allocation6 + $0x68] sm:$0x11] }
 0x7d6   : > { %v10782_v58 = vld [vmem:[#allocation6 + $0x98] sm:$0x11] }
 0x7d7   : > { %v10891_v32 = vshll.u32 %v10782_v58, 16  ;;  %v10880_v26 = vsel %vm19859_vm7, %v10875_v50, %v10879_v61  ;;  %v18044_v58 = vld [vmem:[%s22408_s10 + $0x8c0] ss:$8 sps:$4 sm:$0xff]   ;;  %v18050_v50 = vld [vmem:[%s22408_s10 + $0x8f0] ss:$8 sps:$4 sm:$0xff]  }
 0x7d8   : > { %13683 = vmatpush1.bf16.msra.mxu1 %v17992_v5  ;;  %v10824_v5 = vsel %vm19859_vm7, %v10819_v59, %v10823_v35  ;;  %v18028_v35 = vld [vmem:[%s22408_s10 + $0x840] ss:$8 sps:$4 sm:$0xff]  }
 0x7d9   : > { %13684 = vmatprep.subr.bf16.mxu1 %v17997_v36  ;;  %v10846_v36 = vor.u32 %v10845_v57, %v10842_v8  ;;  %v15719_v11 = vcombine.high %v10824_v5, %v10838_v62  ;;  %v15718_v24 = vcombine.low %v10824_v5, %v10838_v62  ;;  %v10916_v8 = vld [vmem:[#allocation6 + $0x48] sm:$0x11]  ;;  %v15681_v57 = vrot.slane %v10917_v1, 9 }
 0x7da   : > { %v10953_v49 = vrot.slane %v10916_v8, 5  ;;  %v18033_v5 = vld [vmem:[%s22408_s10 + $0x874] ss:$8 sps:$4 sm:$0xff]  }
 0x7db   : > { %v10847_v38 = vrot.slane %v10846_v36, 4  ;;  %v21966_v62 = vsel %vm20266_vm11, %v15681_v57, %v10957_v15  ;;  %v18034_v36 = vld [vmem:[%s22408_s10 + $0x870] ss:$8 sps:$4 sm:$0xff]   ;;  %v13808_v57 = vld [vmem:[%s22409_s11] sm:$0x3] }
 0x7dc   : > { %13685 = vmatpush1.bf16.msra.mxu1 %v17995_v42  ;;  %v10863_v42 = vshll.u32 %v10778_v41, 16  ;;  %v18029_v41 = vld [vmem:[%s22408_s10 + $0x854] ss:$8 sps:$4 sm:$0xff]   ;;  %v13836_v15 = vld [vmem:[%s22410_s12] sm:$0x3]  ;;  %v22053_v14 = vrot.slane %v13808_v57, %v20854_v23 }
 0x7dd   : > { %13686 = vmatprep.subr.bf16.mxu1 %v18000_v6  ;;  %v10849_v6 = vshll.u32 %v10776_v46, 16  ;;  %v18030_v46 = vld [vmem:[%s22408_s10 + $0x850] ss:$8 sps:$4 sm:$0xff]  }
 0x7de   : > { %v10865_v48 = vrot.slane %v10863_v42, 5  ;;  %v18035_v42 = vld [vmem:[%s22408_s10 + $0x884] ss:$8 sps:$4 sm:$0xff]  }
 0x7df   : > { %v10851_v52 = vrot.slane %v10849_v6, 5  ;;  %v18037_v6 = vld [vmem:[%s22408_s10 + $0x894] ss:$8 sps:$4 sm:$0xff]  }
 0x7e0   : > { %13687 = vmatpush1.bf16.msra.mxu1 %v17998_v56  ;;  %v10887_v56 = vrot.slane %v10885_v12, 5  ;;  %v10954_v12 = vsel %vm20266_vm11, %v15680_v22, %v10953_v49  ;;  %v22057_v49 = vrot.slane %v13836_v15, %v20848_v4 }
 0x7e1   : > { %13688 = vmatprep.subr.bf16.mxu1 %v18003_v43  ;;  %v18021_v43 = vld [vmem:[%s22408_s10 + $0x814] ss:$8 sps:$4 sm:$0xff]   ;;  %v10852_v37 = vsel %vm19859_vm7, %v10847_v38, %v10851_v52  ;;  %v18046_v38 = vld [vmem:[%s22408_s10 + $0x8d0] ss:$8 sps:$4 sm:$0xff]   ;;  %v10922_v52 = vld [vmem:[#allocation6 + $0x78] sm:$0x11] }
 0x7e4   : > { %13689 = vmatpush1.bf16.msra.mxu1 %v18001_v60  ;;  %v10866_v60 = vsel %vm19859_vm7, %v10861_v29, %v10865_v48  ;;  %v18039_v29 = vld [vmem:[%s22408_s10 + $0x8a4] ss:$8 sps:$4 sm:$0xff]   ;;  %v10921_v48 = vld [vmem:[#allocation6 + $0x70] sm:$0xee] }
 0x7e5   : > { %13690 = vmatprep.subr.bf16.mxu1 %v18006_v21  ;;  %v10888_v21 = vor.u32 %v10887_v56, %v10884_v30  ;;  %v15737_v17 = vcombine.high %v10852_v37, %v10866_v60  ;;  %v15736_v33 = vcombine.low %v10852_v37, %v10866_v60  ;;  %v18041_v30 = vld [vmem:[%s22408_s10 + $0x8b4] ss:$8 sps:$4 sm:$0xff]   ;;  %v18042_v56 = vld [vmem:[%s22408_s10 + $0x8b0] ss:$8 sps:$4 sm:$0xff]   ;;  %v10919_v60 = vld [vmem:[#allocation6 + $0x60] sm:$0xee] }
 0x7e6   : > { %v10961_v37 = vrot.slane %v10920_v19, 5 }
 0x7e8   : > { %13691 = vmatpush1.bf16.msra.mxu1 %v18004_v0  ;;  %v10889_v0 = vrot.slane %v10888_v21, 4  ;;  %v15683_v21 = vrot.slane %v10921_v48, 9 }
 0x7e9   : > { %13692 = vmatprep.subr.bf16.mxu1 %v18009_v20  ;;  %v10893_v20 = vrot.slane %v10891_v32, 5  ;;  %v10965_v32 = vrot.slane %v10922_v52, 5 }
 0x7eb   : > { %v10894_v34 = vsel %vm19859_vm7, %v10889_v0, %v10893_v20  ;;  %v10966_v54 = vsel %vm20266_vm11, %v15683_v21, %v10965_v32  ;;  %v10924_v0 = vld [vmem:[#allocation6 + $0x88] sm:$0x11]  ;;  %v10925_v20 = vld [vmem:[#allocation6 + $0x90] sm:$0xee]  ;;  %vm22576_vm7 = vmmov %vm22574_vm14 }
 0x7ec   : > { %13693 = vmatpush1.bf16.msra.mxu1 %v18007_v31  ;;  %v18027_v31 = vld [vmem:[%s22408_s10 + $0x844] ss:$8 sps:$4 sm:$0xff]   ;;  %v15755_v59 = vcombine.high %v10880_v26, %v10894_v34  ;;  %v15754_v2 = vcombine.low %v10880_v26, %v10894_v34  ;;  %v15685_v1 = vrot.slane %v10925_v20, 9  ;;  %vm22578_vm4 = vmmov %vm22576_vm7 }
 0x7ed   : > { %16733 = vmatprep.subr.bf16.mxu1 %v18019_v7  ;;  %v18032_v7 = vld [vmem:[%s22408_s10 + $0x860] ss:$8 sps:$4 sm:$0xff]  }
 0x7ef   : > { %13695 = vmatmul.mubr.bf16.vlgmr.msra.gmra.mrb[96].mxu1 %v15700_v9  ;;  %v15721_v9 = vcombine.high %v10954_v12, %v21966_v62 }
 0x7f0   : > { %13704 = vmatprep.mubr.bf16.mxu1 %v15719_v11  ;;  %16749 = vmatpush1.bf16.msra.mxu1 %v18020_v25  ;;  %v18036_v11 = vld [vmem:[%s22408_s10 + $0x880] ss:$8 sps:$4 sm:$0xff]   ;;  %v18043_v25 = vld [vmem:[%s22408_s10 + $0x8c4] ss:$8 sps:$4 sm:$0xff]  }
 0x7f1   : > { %16734 = vmatprep.subr.bf16.mxu1 %v18021_v43  ;;  %v18045_v43 = vld [vmem:[%s22408_s10 + $0x8d4] ss:$8 sps:$4 sm:$0xff]  }
 0x7f4   : > { %16750 = vmatpush1.bf16.msra.mxu1 %v18022_v39  ;;  %v18048_v39 = vld [vmem:[%s22408_s10 + $0x8e0] ss:$8 sps:$4 sm:$0xff]  }
 0x7f5   : > { %16735 = vmatprep.subr.bf16.mxu1 %v18023_v40  ;;  %v15682_v40 = vrot.slane %v10919_v60, 9 }
 0x7f7   : > { %13705 = vmatmul.mubr.bf16.gmra.mrb[100].mxu1 %v15718_v24  ;;  %v18049_v24 = vld [vmem:[%s22408_s10 + $0x8f4] ss:$8 sps:$4 sm:$0xff]   ;;  %v10962_v61 = vsel %vm20266_vm11, %v15682_v40, %v10961_v37 }
 0x7f8   : > { %13714 = vmatprep.mubr.bf16.mxu1 %v15737_v17  ;;  %16751 = vmatpush1.bf16.msra.mxu1 %v18024_v27  ;;  %v10923_v17 = vld [vmem:[#allocation6 + $0x80] sm:$0xee]  ;;  %v10926_v27 = vld [vmem:[#allocation6 + $0x98] sm:$0x11]  ;;  %v15739_v26 = vcombine.high %v10962_v61, %v10966_v54 }
 0x7f9   : > { %16736 = vmatprep.subr.bf16.mxu1 %v18025_v3  ;;  %v15720_v3 = vcombine.low %v10954_v12, %v21966_v62  ;;  %v15684_v34 = vrot.slane %v10923_v17, 9  ;;  %v10973_v18 = vrot.slane %v10926_v27, 5 }
 0x7fc   : > { %16752 = vmatpush1.bf16.msra.mxu1 %v18026_v51  ;;  %v10969_v51 = vrot.slane %v10924_v0, 5 }
 0x7fd   : > { %16737 = vmatprep.subr.bf16.mxu1 %v18027_v31  ;;  %v10974_v31 = vsel %vm20266_vm11, %v15685_v1, %v10973_v18 }
 0x7ff   : > { %13715 = vmatmul.mubr.bf16.gmra.mrb[104].mxu1 %v15736_v33  ;;  %v10970_v33 = vsel %vm20266_vm11, %v15684_v34, %v10969_v51  ;;  %vm22577_vm11 = vmmov %vm22575_vm2 }
 0x800   : > { %13724 = vmatprep.mubr.bf16.mxu1 %v15755_v59  ;;  %16753 = vmatpush1.bf16.msra.mxu1 %v18028_v35  ;;  %v15738_v59 = vcombine.low %v10962_v61, %v10966_v54  ;;  %v15757_v45 = vcombine.high %v10970_v33, %v10974_v31  ;;  %v15756_v8 = vcombine.low %v10970_v33, %v10974_v31 }
 0x801   : > { %16738 = vmatprep.subr.bf16.mxu1 %v18029_v41  ;;  %v22050_v35 = vrot.slane %v13808_v57, %v20848_v4 }
 0x804   : > { %16754 = vmatpush1.bf16.msra.mxu1 %v18030_v46 }
 0x805   : > { %16739 = vmatprep.subr.bf16.mxu1 %v18031_v63 }
 0x807   : > { %13725 = vmatmul.mubr.bf16.gmra.mrb[108].mxu1 %v15754_v2  ;;  %v22061_v2 = vrot.slane %v13836_v15, %v20854_v23 }
 0x808   : > { %16755 = vmatpush1.bf16.msra.mxu1 %v18032_v7  ;;  %13777 = vmatprep.mubr.bf16.mxu1 %v15721_v9 }
 0x809   : > { %16740 = vmatprep.subr.bf16.mxu1 %v18033_v5 }
 0x80c   : > { %16756 = vmatpush1.bf16.msra.mxu1 %v18034_v36 }
 0x80d   : > { %16741 = vmatprep.subr.bf16.mxu1 %v18035_v42 }
 0x810   : > { %16757 = vmatpush1.bf16.msra.mxu1 %v18036_v11 }
 0x811   : > { %16742 = vmatprep.subr.bf16.mxu1 %v18037_v6 }
 0x814   : > { %16758 = vmatpush1.bf16.msra.mxu1 %v18038_v55 }
 0x815   : > { %16743 = vmatprep.subr.bf16.mxu1 %v18039_v29 }
 0x818   : > { %16759 = vmatpush1.bf16.msra.mxu1 %v18040_v10 }
 0x819   : > { %16744 = vmatprep.subr.bf16.mxu1 %v18041_v30 }
 0x81c   : > { %16760 = vmatpush1.bf16.msra.mxu1 %v18042_v56 }
 0x81d   : > { %16745 = vmatprep.subr.bf16.mxu1 %v18043_v25 }
 0x820   : > { %16761 = vmatpush1.bf16.msra.mxu1 %v18044_v58 }
 0x821   : > { %16746 = vmatprep.subr.bf16.mxu1 %v18045_v43 }
 0x824   : > { %16762 = vmatpush1.bf16.msra.mxu1 %v18046_v38 }
 0x825   : > { %16747 = vmatprep.subr.bf16.mxu1 %v18047_v53 }
 0x828   : > { %16763 = vmatpush1.bf16.msra.mxu1 %v18048_v39 }
 0x829   : > { %16748 = vmatprep.subr.bf16.mxu1 %v18049_v24 }
 0x82c   : > { %16764 = vmatpush1.bf16.msra.mxu1 %v18050_v50 }
 0x82f   : > { %13778 = vmatmul.mubr.bf16.vlgmr.msra.gmra.mrb[100].mxu1 %v15720_v3 }
 0x830   : > { %13787 = vmatprep.mubr.bf16.mxu1 %v15739_v26 }
 0x837   : > { %13788 = vmatmul.mubr.bf16.gmra.mrb[104].mxu1 %v15738_v59 }
 0x838   : > { %13797 = vmatprep.mubr.bf16.mxu1 %v15757_v45 }
 0x83f   : > { %13798 = vmatmul.mubr.bf16.gmra.mrb[108].mxu1 %v15756_v8 }
 0x8c2   : > { %v13696_v41 = vpop.f32.mrb[96].mxu1 }
 0x8c3   : > { %v16765_v22 = vadd.f32 %v21512_v13, %v13696_v41  ;;  %v13698_v62 = vpop.f32.mrb[97].mxu1 }
 0x8c4   : > { %v16766_v46 = vadd.f32 %v21514_v28, %v13698_v62  ;;  %v13700_v63 = vpop.f32.mrb[98].mxu1 }
 0x8c5   : > { %v13820_v12 = vmul.f32 %v16765_v22, %v22050_v35  ;;  %v16767_v9 = vadd.f32 %v21516_v44, %v13700_v63  ;;  %v13702_v7 = vpop.f32.mrb[99].mxu1 }
 0x8c6   : > { %v13821_v5 = vmul.f32 %v16766_v46, %v22053_v14  ;;  %v16768_v36 = vadd.f32 %v21521_v47, %v13702_v7 }
 0x8c7   : > { %v13848_v13 = vadd.f32 %v22057_v49, %v13820_v12  ;;  %v13822_v4 = vmul.f32 %v16767_v9, %v22050_v35 }
 0x8c8   : > { %v13849_v42 = vadd.f32 %v22061_v2, %v13821_v5  ;;  %v13823_v28 = vmul.f32 %v16768_v36, %v22053_v14 }
 0x8c9   : > { %v13864_v23 = vmax.f32 %v13848_v13, 0.0  ;;  %v13850_v11 = vadd.f32 %v22057_v49, %v13822_v4 }
 0x8ca   : > { %v13865_v6 = vmax.f32 %v13849_v42, 0.0  ;;  %v13851_v55 = vadd.f32 %v22061_v2, %v13823_v28 }
 0x8cb   : > { %v13866_v44 = vmax.f32 %v13850_v11, 0.0 }
 0x8cc   : > { %v13896_v29 = vcombine.low %v13864_v23, %v13865_v6  ;;  %v13897_v10 = vcombine.high %v13864_v23, %v13865_v6  ;;  %v13867_v30 = vmax.f32 %v13851_v55, 0.0 }
 0x8ce   : > { %v13904_v47 = vrot.slane %v13896_v29, %v19177_v16  ;;  %v13911_v56 = vrot.slane %v13897_v10, %v19177_v16  ;;  %v13914_v25 = vcombine.low %v13866_v44, %v13867_v30  ;;  %v13915_v58 = vcombine.high %v13866_v44, %v13867_v30 }
 0x8d0   : > { %v13912_v43 = vcombine.high %v13904_v47, %v13904_v47  ;;  %v13913_v38 = vcombine.high %v13911_v56, %v13911_v56  ;;  %v14046_v48 = vrot.slane %v13904_v47, %v19177_v16  ;;  %v14062_v52 = vrot.slane %v13911_v56, %v19177_v16 }
 0x8d1   : > { %v22078_v53 = vrot.slane %v13914_v25, %v19177_v16  ;;  %v13929_v40 = vrot.slane %v13915_v58, %v19177_v16 }
 0x8d2   : > { %v14047_v60 = vcombine.high %v14046_v48, %v14046_v48  ;;  %v14054_v19 = vrot.slane %v13912_v43, %v19177_v16  ;;  %v14063_v21 = vcombine.high %v14062_v52, %v14062_v52  ;;  %v14070_v32 = vrot.slane %v13913_v38, %v19177_v16 }
 0x8d3   : > { %v14360_v39 = vsel %vm6414_vm12, %v14046_v48, -inf  ;;  %v14388_v24 = vsel %vm6414_vm12, %v14062_v52, -inf  ;;  %v13930_v37 = vcombine.high %v22078_v53, %v22078_v53  ;;  %v13931_v56 = vcombine.high %v13929_v40, %v13929_v40 }
 0x8d4   : > { %v14055_v54 = vcombine.high %v14054_v19, %v14054_v19  ;;  %v14071_v17 = vcombine.high %v14070_v32, %v14070_v32  ;;  %v14361_v50 = vrot.slane %v14360_v39, 4  ;;  %v14367_v0 = vsel %vm6414_vm12, %v14047_v60, -inf }
 0x8d5   : > { %v14368_v20 = vrot.slane %v14367_v0, 4  ;;  %v14374_v27 = vsel %vm6414_vm12, %v14054_v19, -inf  ;;  %v14389_v3 = vrot.slane %v14388_v24, 4  ;;  %v14395_v61 = vsel %vm6414_vm12, %v14063_v21, -inf }
 0x8d6   : > { %v14362_v26 = vmax.f32 %v14360_v39, %v14361_v50  ;;  %v14375_v34 = vrot.slane %v14374_v27, 4  ;;  %v14381_v51 = vsel %vm6414_vm12, %v14055_v54, -inf  ;;  %v14396_v1 = vrot.slane %v14395_v61, 4 }
 0x8d7   : > { %v14369_v18 = vmax.f32 %v14367_v0, %v14368_v20  ;;  %v14382_v33 = vrot.slane %v14381_v51, 4  ;;  %v14390_v31 = vmax.f32 %v14388_v24, %v14389_v3  ;;  %v14402_v59 = vsel %vm6414_vm12, %v14070_v32, -inf }
 0x8d8   : > { %v14363_v45 = vrot.slane %v14362_v26, 2  ;;  %v14376_v8 = vmax.f32 %v14374_v27, %v14375_v34  ;;  %v14397_v57 = vmax.f32 %v14395_v61, %v14396_v1  ;;  %v14403_v15 = vrot.slane %v14402_v59, 4 }
 0x8d9   : > { %v14370_v41 = vrot.slane %v14369_v18, 2  ;;  %v14383_v22 = vmax.f32 %v14381_v51, %v14382_v33  ;;  %v14391_v62 = vrot.slane %v14390_v31, 2  ;;  %v14409_v46 = vsel %vm6414_vm12, %v14071_v17, -inf }
 0x8da   : > { %v14364_v63 = vmax.f32 %v14362_v26, %v14363_v45  ;;  %v14377_v12 = vrot.slane %v14376_v8, 2  ;;  %v14398_v9 = vrot.slane %v14397_v57, 2  ;;  %v14404_v7 = vmax.f32 %v14402_v59, %v14403_v15 }
 0x8db   : > { %v14371_v5 = vmax.f32 %v14369_v18, %v14370_v41  ;;  %v14384_v36 = vrot.slane %v14383_v22, 2  ;;  %v14392_v13 = vmax.f32 %v14390_v31, %v14391_v62  ;;  %v14410_v4 = vrot.slane %v14409_v46, 4 }
 0x8dc   : > { %v14365_v42 = vrot.slane %v14364_v63, 1  ;;  %v14378_v28 = vmax.f32 %v14376_v8, %v14377_v12  ;;  %v14399_v23 = vmax.f32 %v14397_v57, %v14398_v9  ;;  %v14405_v11 = vrot.slane %v14404_v7, 2 }
 0x8dd   : > { %v14372_v6 = vrot.slane %v14371_v5, 1  ;;  %v14385_v55 = vmax.f32 %v14383_v22, %v14384_v36  ;;  %v14393_v44 = vrot.slane %v14392_v13, 1  ;;  %v14411_v29 = vmax.f32 %v14409_v46, %v14410_v4 }
 0x8de   : > { %v14379_v10 = vrot.slane %v14378_v28, 1  ;;  %v14400_v30 = vrot.slane %v14399_v23, 1  ;;  %v22093_v47 = vmax.f32 %v14404_v7, %v14405_v11  ;;  %v22095_v25 = vmax.f32 %v14364_v63, %v14365_v42 }
 0x8df   : > { %v14386_v58 = vrot.slane %v14385_v55, 1  ;;  %v14412_v43 = vrot.slane %v14411_v29, 2  ;;  %v22097_v38 = vmax.f32 %v14371_v5, %v14372_v6  ;;  %v22101_v52 = vmax.f32 %v14392_v13, %v14393_v44 }
 0x8e0   : > { %v22099_v48 = vmax.f32 %v14378_v28, %v14379_v10  ;;  %v14078_v60 = vrot.slane %v22078_v53, %v19177_v16  ;;  %v22105_v19 = vmax.f32 %v14399_v23, %v14400_v30  ;;  %v14086_v32 = vrot.slane %v13930_v37, %v19177_v16 }
 0x8e1   : > { %v22107_v21 = vmax.f32 %v14411_v29, %v14412_v43  ;;  %v14094_v39 = vrot.slane %v13929_v40, %v19177_v16  ;;  %v14407_v24 = vrot.slane %v22093_v47, 1  ;;  %v14102_v17 = vrot.slane %v13931_v56, %v19177_v16 }
 0x8e2   : > { %v14079_v54 = vcombine.high %v14078_v60, %v14078_v60  ;;  %v14416_v50 = vsel %vm6414_vm12, %v14078_v60, -inf  ;;  %v22114_v0 = vmax.f32 %v14385_v55, %v14386_v58  ;;  %v14087_v20 = vcombine.high %v14086_v32, %v14086_v32 }
 0x8e3   : > { %v14095_v27 = vcombine.high %v14094_v39, %v14094_v39  ;;  %v14417_v53 = vrot.slane %v14416_v50, 4  ;;  %v14103_v3 = vcombine.high %v14102_v17, %v14102_v17  ;;  %v14430_v26 = vsel %vm6414_vm12, %v14086_v32, -inf }
 0x8e4   : > { %v14423_v61 = vsel %vm6414_vm12, %v14079_v54, -inf  ;;  %v14444_v37 = vsel %vm6414_vm12, %v14094_v39, -inf  ;;  %v14414_v40 = vrot.slane %v22107_v21, 1  ;;  %v14431_v1 = vrot.slane %v14430_v26, 4 }
 0x8e5   : > { %v14418_v34 = vmax.f32 %v14416_v50, %v14417_v53  ;;  %v14424_v51 = vrot.slane %v14423_v61, 4  ;;  %v14437_v18 = vsel %vm6414_vm12, %v14087_v20, -inf  ;;  %v14445_v33 = vrot.slane %v14444_v37, 4 }
 0x8e6   : > { %v14451_v31 = vsel %vm6414_vm12, %v14095_v27, -inf  ;;  %v14458_v59 = vsel %vm6414_vm12, %v14102_v17, -inf  ;;  %v14432_v57 = vmax.f32 %v14430_v26, %v14431_v1  ;;  %v14438_v15 = vrot.slane %v14437_v18, 4 }
 0x8e7   : > { %v14419_v45 = vrot.slane %v14418_v34, 2  ;;  %v14425_v8 = vmax.f32 %v14423_v61, %v14424_v51  ;;  %v14446_v41 = vmax.f32 %v14444_v37, %v14445_v33  ;;  %v14452_v22 = vrot.slane %v14451_v31, 4 }
 0x8e8   : > { %v14459_v62 = vrot.slane %v14458_v59, 4  ;;  %v14465_v46 = vsel %vm6414_vm12, %v14103_v3, -inf  ;;  %v14433_v9 = vrot.slane %v14432_v57, 2  ;;  %v14439_v7 = vmax.f32 %v14437_v18, %v14438_v15 }
 0x8e9   : > { %v14420_v63 = vmax.f32 %v14418_v34, %v14419_v45  ;;  %v14426_v12 = vrot.slane %v14425_v8, 2  ;;  %v14447_v5 = vrot.slane %v14446_v41, 2  ;;  %v14453_v36 = vmax.f32 %v14451_v31, %v14452_v22 }
 0x8ea   : > { %v14460_v13 = vmax.f32 %v14458_v59, %v14459_v62  ;;  %v14466_v4 = vrot.slane %v14465_v46, 4  ;;  %v14434_v23 = vmax.f32 %v14432_v57, %v14433_v9  ;;  %v14440_v11 = vrot.slane %v14439_v7, 2 }
 0x8eb   : > { %v14421_v42 = vrot.slane %v14420_v63, 1  ;;  %v14427_v28 = vmax.f32 %v14425_v8, %v14426_v12  ;;  %v14448_v6 = vmax.f32 %v14446_v41, %v14447_v5  ;;  %v14454_v55 = vrot.slane %v14453_v36, 2 }
 0x8ec   : > { %v14461_v44 = vrot.slane %v14460_v13, 2  ;;  %v14467_v29 = vmax.f32 %v14465_v46, %v14466_v4  ;;  %v14435_v56 = vrot.slane %v14434_v23, 1  ;;  %v14441_v58 = vmax.f32 %v14439_v7, %v14440_v11 }
 0x8ed   : > { %v14422_v10 = vmax.f32 %v14420_v63, %v14421_v42  ;;  %v14428_v30 = vrot.slane %v14427_v28, 1  ;;  %v14449_v43 = vrot.slane %v14448_v6, 1  ;;  %v14455_v60 = vmax.f32 %v14453_v36, %v14454_v55 }
 0x8ee   : > { %v14462_v32 = vmax.f32 %v14460_v13, %v14461_v44  ;;  %v14468_v39 = vrot.slane %v14467_v29, 2  ;;  %v14436_v17 = vmax.f32 %v14434_v23, %v14435_v56  ;;  %v14442_v50 = vrot.slane %v14441_v58, 1 }
 0x8ef   : > { %v14429_v54 = vmax.f32 %v14427_v28, %v14428_v30  ;;  %v14808_v20 = vmax.f32 %v22095_v25, %v14422_v10  ;;  %v14450_v27 = vmax.f32 %v14448_v6, %v14449_v43  ;;  %v14456_v53 = vrot.slane %v14455_v60, 1 }
 0x8f0   : > { %v14463_v3 = vrot.slane %v14462_v32, 1  ;;  %v14469_v61 = vmax.f32 %v14467_v29, %v14468_v39  ;;  %v14408_v26 = vmax.f32 %v22093_v47, %v14407_v24  ;;  %v14443_v37 = vmax.f32 %v14441_v58, %v14442_v50 }
 0x8f1   : > { %v14809_v34 = vmax.f32 %v22097_v38, %v14429_v54  ;;  %v14810_v51 = vmax.f32 %v22099_v48, %v14436_v17  ;;  %v14457_v1 = vmax.f32 %v14455_v60, %v14456_v53  ;;  %v14812_v31 = vmax.f32 %v22101_v52, %v14450_v27 }
 0x8f2   : > { %v14464_v18 = vmax.f32 %v14462_v32, %v14463_v3  ;;  %v14470_v33 = vrot.slane %v14469_v61, 1  ;;  %v14811_v59 = vmax.f32 %v22114_v0, %v14443_v37  ;;  %v14415_v45 = vmax.f32 %v22107_v21, %v14414_v40 }
 0x8f3   : > { %v14872_v25 = vcombine.low %v14808_v20, %v14809_v34  ;;  %v14813_v57 = vmax.f32 %v22105_v19, %v14457_v1 }
 0x8f4   : > { %v14471_v8 = vmax.f32 %v14469_v61, %v14470_v33  ;;  %v14814_v47 = vmax.f32 %v14408_v26, %v14464_v18  ;;  %v14873_v24 = vcombine.low %v14810_v51, %v14811_v59 }
 0x8f5   : > { %v14874_v38 = vcombine.low %v14812_v31, %v14813_v57 }
 0x8f6   : > { %v14815_v15 = vmax.f32 %v14415_v45, %v14471_v8  ;;  %v14888_v48 = vrot.slane %v14873_v24, 7 }
 0x8f7   : > { %v14892_v62 = vrot.slane %v14874_v38, 6 }
 0x8f8   : > { %v14875_v41 = vcombine.low %v14814_v47, %v14815_v15  ;;  %v14890_v22 = vsel %vm14889_vm9, %v14888_v48, %v14872_v25 }
 0x8f9   : > { %v14891_v52 = vsel %vm7701_vm0, %v14888_v48, %v14890_v22 }
 0x8fa   : > { %v14893_v0 = vsel %vm7695_vm13, %v14892_v62, %v14891_v52  ;;  %v14895_v46 = vrot.slane %v14875_v41, 5 }
 0x8fb   : > { %v14894_v19 = vsel %vm7703_vm1, %v14892_v62, %v14893_v0 }
 0x8fc   : > { %v14896_v21 = vsel %vm22574_vm14, %v14895_v46, %v14894_v19 }
 0x8fd   : > { %v14897_v40 = vsel %vm22575_vm2, %v14895_v46, %v14896_v21 }
 0x8fe   : > { %14929 = vst [vmem:[%s22139_s30] sm:$0xff] %v14897_v40 }
 0x902   : > { %v13779_v63 = vpop.f32.mrb[100].mxu1 }
 0x903   : > { %v13824_v12 = vmul.f32 %v22050_v35, %v13779_v63  ;;  %v13781_v9 = vpop.f32.mrb[101].mxu1 }
 0x904   : > { %v13825_v7 = vmul.f32 %v22053_v14, %v13781_v9  ;;  %v13783_v5 = vpop.f32.mrb[102].mxu1 }
 0x905   : > { %v13852_v36 = vadd.f32 %v22057_v49, %v13824_v12  ;;  %v13826_v13 = vmul.f32 %v22050_v35, %v13783_v5  ;;  %v13785_v4 = vpop.f32.mrb[103].mxu1 }
 0x906   : > { %v13853_v42 = vadd.f32 %v22061_v2, %v13825_v7  ;;  %v13827_v28 = vmul.f32 %v22053_v14, %v13785_v4 }
 0x907   : > { %v13868_v23 = vmax.f32 %v13852_v36, 0.0  ;;  %v13854_v11 = vadd.f32 %v22057_v49, %v13826_v13 }
 0x908   : > { %v13869_v6 = vmax.f32 %v13853_v42, 0.0  ;;  %v13855_v55 = vadd.f32 %v22061_v2, %v13827_v28 }
 0x909   : > { %v13870_v44 = vmax.f32 %v13854_v11, 0.0 }
 0x90a   : > { %v13932_v29 = vcombine.low %v13868_v23, %v13869_v6  ;;  %v13933_v10 = vcombine.high %v13868_v23, %v13869_v6  ;;  %v13871_v30 = vmax.f32 %v13855_v55, 0.0  ;;  %v13789_v56 = vpop.f32.mrb[104].mxu1 }
 0x90b   : > { %v13828_v58 = vmul.f32 %v22050_v35, %v13789_v56  ;;  %v13791_v43 = vpop.f32.mrb[105].mxu1 }
 0x90c   : > { %v13940_v60 = vrot.slane %v13932_v29, %v19177_v16  ;;  %v13947_v32 = vrot.slane %v13933_v10, %v19177_v16  ;;  %v13950_v39 = vcombine.low %v13870_v44, %v13871_v30  ;;  %v13951_v54 = vcombine.high %v13870_v44, %v13871_v30  ;;  %v13793_v17 = vpop.f32.mrb[106].mxu1 }
 0x90d   : > { %v22157_v50 = vadd.f32 %v22057_v49, %v13828_v58  ;;  %v13829_v20 = vmul.f32 %v22053_v14, %v13791_v43  ;;  %v22160_v27 = vpop.f32.mrb[107].mxu1  ;;  %v22172_v1 = vmul.f32 %v22050_v35, %v13793_v17 }
 0x90e   : > { %v13948_v53 = vcombine.high %v13940_v60, %v13940_v60  ;;  %v13949_v3 = vcombine.high %v13947_v32, %v13947_v32  ;;  %v14110_v61 = vrot.slane %v13940_v60, %v19177_v16  ;;  %v14126_v26 = vrot.slane %v13947_v32, %v19177_v16 }
 0x90f   : > { %v22165_v37 = vrot.slane %v13950_v39, %v19177_v16  ;;  %v22168_v34 = vrot.slane %v13951_v54, %v19177_v16  ;;  %v13872_v51 = vmax.f32 %v22157_v50, 0.0  ;;  %v22181_v57 = vadd.f32 %v22061_v2, %v13829_v20 }
 0x910   : > { %v14111_v18 = vcombine.high %v14110_v61, %v14110_v61  ;;  %v14118_v33 = vrot.slane %v13948_v53, %v19177_v16  ;;  %v14127_v31 = vcombine.high %v14126_v26, %v14126_v26  ;;  %v14134_v59 = vrot.slane %v13949_v3, %v19177_v16 }
 0x911   : > { %v14472_v25 = vsel %vm6414_vm12, %v14110_v61, -inf  ;;  %v14500_v45 = vsel %vm6414_vm12, %v14126_v26, -inf  ;;  %v13966_v8 = vcombine.high %v22165_v37, %v22165_v37 }
 0x912   : > { %v14119_v47 = vcombine.high %v14118_v33, %v14118_v33  ;;  %v14135_v24 = vcombine.high %v14134_v59, %v14134_v59  ;;  %v14473_v15 = vrot.slane %v14472_v25, 4  ;;  %v14479_v38 = vsel %vm6414_vm12, %v14111_v18, -inf  ;;  %v22184_v48 = vpop.f32.mrb[108].mxu1 }
 0x913   : > { %v14480_v41 = vrot.slane %v14479_v38, 4  ;;  %v14486_v22 = vsel %vm6414_vm12, %v14118_v33, -inf  ;;  %v14501_v62 = vrot.slane %v14500_v45, 4  ;;  %v14507_v52 = vsel %vm6414_vm12, %v14127_v31, -inf  ;;  %v22188_v0 = vpop.f32.mrb[109].mxu1 }
 0x914   : > { %v14474_v46 = vmax.f32 %v14472_v25, %v14473_v15  ;;  %v14487_v19 = vrot.slane %v14486_v22, 4  ;;  %v14493_v21 = vsel %vm6414_vm12, %v14119_v47, -inf  ;;  %v14508_v40 = vrot.slane %v14507_v52, 4  ;;  %v22191_v63 = vpop.f32.mrb[110].mxu1 }
 0x915   : > { %v14481_v12 = vmax.f32 %v14479_v38, %v14480_v41  ;;  %v14494_v9 = vrot.slane %v14493_v21, 4  ;;  %v14502_v7 = vmax.f32 %v14500_v45, %v14501_v62  ;;  %v14514_v5 = vsel %vm6414_vm12, %v14134_v59, -inf  ;;  %v22194_v36 = vpop.f32.mrb[111].mxu1 }
 0x916   : > { %v14475_v13 = vrot.slane %v14474_v46, 2  ;;  %v14488_v4 = vmax.f32 %v14486_v22, %v14487_v19  ;;  %v14509_v42 = vmax.f32 %v14507_v52, %v14508_v40  ;;  %v14515_v28 = vrot.slane %v14514_v5, 4 }
 0x917   : > { %v14482_v23 = vrot.slane %v14481_v12, 2  ;;  %v14495_v11 = vmax.f32 %v14493_v21, %v14494_v9  ;;  %v14503_v6 = vrot.slane %v14502_v7, 2  ;;  %v14521_v55 = vsel %vm6414_vm12, %v14135_v24, -inf }
 0x918   : > { %v14476_v44 = vmax.f32 %v14474_v46, %v14475_v13  ;;  %v14489_v29 = vrot.slane %v14488_v4, 2  ;;  %v14510_v10 = vrot.slane %v14509_v42, 2  ;;  %v14516_v30 = vmax.f32 %v14514_v5, %v14515_v28 }
 0x919   : > { %v14483_v56 = vmax.f32 %v14481_v12, %v14482_v23  ;;  %v14496_v58 = vrot.slane %v14495_v11, 2  ;;  %v14504_v43 = vmax.f32 %v14502_v7, %v14503_v6  ;;  %v14522_v60 = vrot.slane %v14521_v55, 4 }
 0x91a   : > { %v14477_v32 = vrot.slane %v14476_v44, 1  ;;  %v14490_v39 = vmax.f32 %v14488_v4, %v14489_v29  ;;  %v14511_v54 = vmax.f32 %v14509_v42, %v14510_v10  ;;  %v14517_v17 = vrot.slane %v14516_v30, 2 }
 0x91b   : > { %v14484_v20 = vrot.slane %v14483_v56, 1  ;;  %v14497_v53 = vmax.f32 %v14495_v11, %v14496_v58  ;;  %v14505_v3 = vrot.slane %v14504_v43, 1  ;;  %v14523_v61 = vmax.f32 %v14521_v55, %v14522_v60 }
 0x91c   : > { %v14491_v26 = vrot.slane %v14490_v39, 1  ;;  %v14512_v18 = vrot.slane %v14511_v54, 1  ;;  %v14518_v33 = vmax.f32 %v14516_v30, %v14517_v17  ;;  %v13967_v31 = vcombine.high %v22168_v34, %v22168_v34 }
 0x91d   : > { %v22199_v59 = vmax.f32 %v14476_v44, %v14477_v32  ;;  %v22201_v25 = vmax.f32 %v14483_v56, %v14484_v20  ;;  %v14498_v45 = vrot.slane %v14497_v53, 1  ;;  %v14524_v47 = vrot.slane %v14523_v61, 2 }
 0x91e   : > { %v22203_v24 = vmax.f32 %v14490_v39, %v14491_v26  ;;  %v22205_v15 = vmax.f32 %v14504_v43, %v14505_v3  ;;  %v14519_v38 = vrot.slane %v14518_v33, 1  ;;  %v14142_v41 = vrot.slane %v22165_v37, %v19177_v16 }
 0x91f   : > { %v22209_v22 = vmax.f32 %v14511_v54, %v14512_v18  ;;  %v22211_v62 = vmax.f32 %v14523_v61, %v14524_v47  ;;  %v14150_v52 = vrot.slane %v13966_v8, %v19177_v16  ;;  %v14158_v46 = vrot.slane %v22168_v34, %v19177_v16 }
 0x920   : > { %v22216_v19 = vmax.f32 %v14497_v53, %v14498_v45  ;;  %v14143_v21 = vcombine.high %v14142_v41, %v14142_v41  ;;  %v14166_v40 = vrot.slane %v13967_v31, %v19177_v16  ;;  %v14528_v12 = vsel %vm6414_vm12, %v14142_v41, -inf }
 0x921   : > { %v22220_v9 = vmax.f32 %v14518_v33, %v14519_v38  ;;  %v14151_v7 = vcombine.high %v14150_v52, %v14150_v52  ;;  %v14159_v37 = vcombine.high %v14158_v46, %v14158_v46  ;;  %v14529_v5 = vrot.slane %v14528_v12, 4 }
 0x922   : > { %v14167_v13 = vcombine.high %v14166_v40, %v14166_v40  ;;  %v14535_v4 = vsel %vm6414_vm12, %v14143_v21, -inf  ;;  %v14542_v8 = vsel %vm6414_vm12, %v14150_v52, -inf  ;;  %v14556_v42 = vsel %vm6414_vm12, %v14158_v46, -inf }
 0x923   : > { %v14526_v34 = vrot.slane %v22211_v62, 1  ;;  %v14530_v28 = vmax.f32 %v14528_v12, %v14529_v5  ;;  %v14536_v23 = vrot.slane %v14535_v4, 4  ;;  %v14543_v11 = vrot.slane %v14542_v8, 4 }
 0x924   : > { %v14549_v6 = vsel %vm6414_vm12, %v14151_v7, -inf  ;;  %v14557_v55 = vrot.slane %v14556_v42, 4  ;;  %v14563_v44 = vsel %vm6414_vm12, %v14159_v37, -inf  ;;  %v14570_v29 = vsel %vm6414_vm12, %v14166_v40, -inf }
 0x925   : > { %v14531_v10 = vrot.slane %v14530_v28, 2  ;;  %v14537_v30 = vmax.f32 %v14535_v4, %v14536_v23  ;;  %v14544_v56 = vmax.f32 %v14542_v8, %v14543_v11  ;;  %v14550_v58 = vrot.slane %v14549_v6, 4 }
 0x926   : > { %v14558_v43 = vmax.f32 %v14556_v42, %v14557_v55  ;;  %v14564_v60 = vrot.slane %v14563_v44, 4  ;;  %v14571_v32 = vrot.slane %v14570_v29, 4  ;;  %v14577_v39 = vsel %vm6414_vm12, %v14167_v13, -inf }
 0x927   : > { %v14532_v54 = vmax.f32 %v14530_v28, %v14531_v10  ;;  %v14538_v17 = vrot.slane %v14537_v30, 2  ;;  %v14545_v20 = vrot.slane %v14544_v56, 2  ;;  %v14551_v53 = vmax.f32 %v14549_v6, %v14550_v58 }
 0x928   : > { %v14559_v3 = vrot.slane %v14558_v43, 2  ;;  %v14565_v61 = vmax.f32 %v14563_v44, %v14564_v60  ;;  %v14572_v26 = vmax.f32 %v14570_v29, %v14571_v32  ;;  %v14578_v18 = vrot.slane %v14577_v39, 4 }
 0x929   : > { %v14533_v33 = vrot.slane %v14532_v54, 1  ;;  %v14539_v31 = vmax.f32 %v14537_v30, %v14538_v17  ;;  %v14546_v45 = vmax.f32 %v14544_v56, %v14545_v20  ;;  %v14552_v47 = vrot.slane %v14551_v53, 2 }
 0x92a   : > { %v14560_v38 = vmax.f32 %v14558_v43, %v14559_v3  ;;  %v14566_v41 = vrot.slane %v14565_v61, 2  ;;  %v14573_v52 = vrot.slane %v14572_v26, 2  ;;  %v14579_v46 = vmax.f32 %v14577_v39, %v14578_v18 }
 0x92b   : > { %v14534_v21 = vmax.f32 %v14532_v54, %v14533_v33  ;;  %v14540_v40 = vrot.slane %v14539_v31, 1  ;;  %v14547_v12 = vrot.slane %v14546_v45, 1  ;;  %v14553_v7 = vmax.f32 %v14551_v53, %v14552_v47 }
 0x92c   : > { %v14561_v37 = vrot.slane %v14560_v38, 1  ;;  %v14567_v5 = vmax.f32 %v14565_v61, %v14566_v41  ;;  %v14574_v13 = vmax.f32 %v14572_v26, %v14573_v52  ;;  %v14580_v4 = vrot.slane %v14579_v46, 2 }
 0x92d   : > { %v14541_v8 = vmax.f32 %v14539_v31, %v14540_v40  ;;  %v14548_v42 = vmax.f32 %v14546_v45, %v14547_v12  ;;  %v14554_v28 = vrot.slane %v14553_v7, 1  ;;  %v14816_v23 = vmax.f32 %v22199_v59, %v14534_v21 }
 0x92e   : > { %v14562_v11 = vmax.f32 %v14560_v38, %v14561_v37  ;;  %v14568_v6 = vrot.slane %v14567_v5, 1  ;;  %v14575_v55 = vrot.slane %v14574_v13, 1  ;;  %v14581_v44 = vmax.f32 %v14579_v46, %v14580_v4 }
 0x92f   : > { %v14555_v29 = vmax.f32 %v14553_v7, %v14554_v28  ;;  %v14817_v10 = vmax.f32 %v22201_v25, %v14541_v8  ;;  %v14818_v30 = vmax.f32 %v22203_v24, %v14548_v42  ;;  %v13873_v56 = vmax.f32 %v22181_v57, 0.0 }
 0x930   : > { %v14569_v58 = vmax.f32 %v14567_v5, %v14568_v6  ;;  %v14576_v43 = vmax.f32 %v14574_v13, %v14575_v55  ;;  %v14582_v60 = vrot.slane %v14581_v44, 1  ;;  %v14820_v32 = vmax.f32 %v22205_v15, %v14562_v11 }
 0x931   : > { %v14819_v39 = vmax.f32 %v22216_v19, %v14555_v29  ;;  %v14876_v54 = vcombine.low %v14816_v23, %v14817_v10  ;;  %v13968_v59 = vcombine.low %v13872_v51, %v13873_v56  ;;  %v13969_v17 = vcombine.high %v13872_v51, %v13873_v56 }
 0x932   : > { %v14527_v25 = vmax.f32 %v22211_v62, %v14526_v34  ;;  %v14583_v20 = vmax.f32 %v14581_v44, %v14582_v60  ;;  %v14821_v24 = vmax.f32 %v22209_v22, %v14569_v58  ;;  %v14822_v57 = vmax.f32 %v22220_v9, %v14576_v43 }
 0x933   : > { %v14877_v53 = vcombine.low %v14818_v30, %v14819_v39  ;;  %v13976_v3 = vrot.slane %v13968_v59, %v19177_v16  ;;  %v13983_v15 = vrot.slane %v13969_v17, %v19177_v16  ;;  %v22247_v26 = vadd.f32 %v22057_v49, %v22172_v1 }
 0x934   : > { %v14823_v19 = vmax.f32 %v14527_v25, %v14583_v20  ;;  %v14878_v61 = vcombine.low %v14820_v32, %v14821_v24  ;;  %v13831_v33 = vmul.f32 %v22053_v14, %v22160_v27 }
 0x935   : > { %v14898_v50 = vrot.slane %v14877_v53, 7  ;;  %v13984_v51 = vcombine.high %v13976_v3, %v13976_v3  ;;  %v13985_v18 = vcombine.high %v13983_v15, %v13983_v15  ;;  %v14174_v62 = vrot.slane %v13976_v3, %v19177_v16 }
 0x936   : > { %v14879_v34 = vcombine.low %v14822_v57, %v14823_v19  ;;  %v14901_v22 = vrot.slane %v14878_v61, 6  ;;  %v14190_v9 = vrot.slane %v13983_v15, %v19177_v16  ;;  %v13859_v15 = vadd.f32 %v22061_v2, %v13831_v33 }
 0x937   : > { %v14899_v31 = vsel %vm14889_vm9, %v14898_v50, %v14876_v54  ;;  %v14175_v45 = vcombine.high %v14174_v62, %v14174_v62  ;;  %v14182_v47 = vrot.slane %v13984_v51, %v19177_v16  ;;  %v14198_v1 = vrot.slane %v13985_v18, %v19177_v16 }
 0x938   : > { %v14900_v38 = vsel %vm7701_vm0, %v14898_v50, %v14899_v31  ;;  %v14904_v41 = vrot.slane %v14879_v34, 5  ;;  %v14191_v52 = vcombine.high %v14190_v9, %v14190_v9  ;;  %v14584_v46 = vsel %vm6414_vm12, %v14174_v62, -inf }
 0x939   : > { %v14902_v21 = vsel %vm7695_vm13, %v14901_v22, %v14900_v38  ;;  %v14183_v40 = vcombine.high %v14182_v47, %v14182_v47  ;;  %v14199_v12 = vcombine.high %v14198_v1, %v14198_v1  ;;  %v14585_v7 = vrot.slane %v14584_v46, 4 }
 0x93a   : > { %v14903_v27 = vsel %vm7703_vm1, %v14901_v22, %v14902_v21  ;;  %v14591_v37 = vsel %vm6414_vm12, %v14175_v45, -inf  ;;  %v14598_v5 = vsel %vm6414_vm12, %v14182_v47, -inf  ;;  %v14612_v13 = vsel %vm6414_vm12, %v14190_v9, -inf }
 0x93b   : > { %v14905_v4 = vsel %vm22576_vm7, %v14904_v41, %v14903_v27  ;;  %v14586_v8 = vmax.f32 %v14584_v46, %v14585_v7  ;;  %v14592_v42 = vrot.slane %v14591_v37, 4  ;;  %v14599_v28 = vrot.slane %v14598_v5, 4 }
 0x93c   : > { %v14906_v23 = vsel %vm22577_vm11, %v14904_v41, %v14905_v4  ;;  %v14605_v11 = vsel %vm6414_vm12, %v14183_v40, -inf  ;;  %v14613_v6 = vrot.slane %v14612_v13, 4  ;;  %v14619_v55 = vsel %vm6414_vm12, %v14191_v52, -inf }
 0x93d   : > { %14930 = vst [vmem:[%s22139_s30 + $0x8] sm:$0xff] %v14906_v23  ;;  %v14587_v44 = vrot.slane %v14586_v8, 2  ;;  %v14593_v29 = vmax.f32 %v14591_v37, %v14592_v42  ;;  %v14600_v10 = vmax.f32 %v14598_v5, %v14599_v28  ;;  %v14606_v30 = vrot.slane %v14605_v11, 4 }
 0x93e   : > { %v14614_v56 = vmax.f32 %v14612_v13, %v14613_v6  ;;  %v14620_v58 = vrot.slane %v14619_v55, 4  ;;  %v14626_v43 = vsel %vm6414_vm12, %v14198_v1, -inf  ;;  %v14633_v60 = vsel %vm6414_vm12, %v14199_v12, -inf }
 0x93f   : > { %v14588_v32 = vmax.f32 %v14586_v8, %v14587_v44  ;;  %v14594_v39 = vrot.slane %v14593_v29, 2  ;;  %v14601_v54 = vrot.slane %v14600_v10, 2  ;;  %v14607_v59 = vmax.f32 %v14605_v11, %v14606_v30 }
 0x940   : > { %v14615_v17 = vrot.slane %v14614_v56, 2  ;;  %v14621_v25 = vmax.f32 %v14619_v55, %v14620_v58  ;;  %v14627_v20 = vrot.slane %v14626_v43, 4  ;;  %v14634_v24 = vrot.slane %v14633_v60, 4 }
 0x941   : > { %v14595_v57 = vmax.f32 %v14593_v29, %v14594_v39  ;;  %v14602_v53 = vmax.f32 %v14600_v10, %v14601_v54  ;;  %v14608_v3 = vrot.slane %v14607_v59, 2  ;;  %v14589_v18 = vrot.slane %v14588_v32, 1 }
 0x942   : > { %v14616_v19 = vmax.f32 %v14614_v56, %v14615_v17  ;;  %v14622_v61 = vrot.slane %v14621_v25, 2  ;;  %v14628_v50 = vmax.f32 %v14626_v43, %v14627_v20  ;;  %v14635_v51 = vmax.f32 %v14633_v60, %v14634_v24 }
 0x943   : > { %v14609_v62 = vmax.f32 %v14607_v59, %v14608_v3  ;;  %v13874_v34 = vmax.f32 %v22247_v26, 0.0  ;;  %v13832_v22 = vmul.f32 %v22050_v35, %v22184_v48  ;;  %v14596_v47 = vrot.slane %v14595_v57, 1 }
 0x944   : > { %v14623_v9 = vmax.f32 %v14621_v25, %v14622_v61  ;;  %v14629_v31 = vrot.slane %v14628_v50, 2  ;;  %v14636_v45 = vrot.slane %v14635_v51, 2  ;;  %v14603_v1 = vrot.slane %v14602_v53, 1 }
 0x945   : > { %v13875_v38 = vmax.f32 %v13859_v15, 0.0  ;;  %v14610_v41 = vrot.slane %v14609_v62, 1  ;;  %v14617_v52 = vrot.slane %v14616_v19, 1  ;;  %v22274_v21 = vmax.f32 %v14588_v32, %v14589_v18 }
 0x946   : > { %v14630_v33 = vmax.f32 %v14628_v50, %v14629_v31  ;;  %v14637_v46 = vmax.f32 %v14635_v51, %v14636_v45  ;;  %v13860_v7 = vadd.f32 %v22057_v49, %v13832_v22  ;;  %v14624_v26 = vrot.slane %v14623_v9, 1 }
 0x947   : > { %v13986_v40 = vcombine.low %v13874_v34, %v13875_v38  ;;  %v13987_v12 = vcombine.high %v13874_v34, %v13875_v38  ;;  %v13833_v48 = vmul.f32 %v22053_v14, %v22188_v0  ;;  %v22279_v5 = vmax.f32 %v14595_v57, %v14596_v47 }
 0x948   : > { %v14631_v27 = vrot.slane %v14630_v33, 1  ;;  %v14638_v37 = vrot.slane %v14637_v46, 1  ;;  %v22281_v13 = vmax.f32 %v14602_v53, %v14603_v1  ;;  %v22285_v42 = vmax.f32 %v14609_v62, %v14610_v41 }
 0x949   : > { %v13994_v4 = vrot.slane %v13986_v40, %v19177_v16  ;;  %v14001_v8 = vrot.slane %v13987_v12, %v19177_v16  ;;  %v22287_v28 = vmax.f32 %v14616_v19, %v14617_v52  ;;  %v13876_v23 = vmax.f32 %v13860_v7, 0.0 }
 0x94a   : > { %v13861_v11 = vadd.f32 %v22061_v2, %v13833_v48  ;;  %v22292_v29 = vmax.f32 %v14623_v9, %v14624_v26  ;;  %v22294_v10 = vmax.f32 %v14630_v33, %v14631_v27  ;;  %v22296_v30 = vmax.f32 %v14637_v46, %v14638_v37 }
 0x94b   : > { %v14002_v6 = vcombine.high %v13994_v4, %v13994_v4  ;;  %v14003_v55 = vcombine.high %v14001_v8, %v14001_v8  ;;  %v14206_v44 = vrot.slane %v13994_v4, %v19177_v16  ;;  %v14222_v0 = vrot.slane %v14001_v8, %v19177_v16 }
 0x94c   : > { %v13877_v56 = vmax.f32 %v13861_v11, 0.0 }
 0x94d   : > { %v14207_v58 = vcombine.high %v14206_v44, %v14206_v44  ;;  %v14214_v43 = vrot.slane %v14002_v6, %v19177_v16  ;;  %v14223_v60 = vcombine.high %v14222_v0, %v14222_v0  ;;  %v14230_v32 = vrot.slane %v14003_v55, %v19177_v16 }
 0x94e   : > { %v14640_v39 = vsel %vm6414_vm12, %v14206_v44, -inf  ;;  %v14668_v54 = vsel %vm6414_vm12, %v14222_v0, -inf  ;;  %v14004_v59 = vcombine.low %v13876_v23, %v13877_v56  ;;  %v22302_v17 = vcombine.high %v13876_v23, %v13877_v56 }
 0x94f   : > { %v14215_v25 = vcombine.high %v14214_v43, %v14214_v43  ;;  %v14231_v20 = vcombine.high %v14230_v32, %v14230_v32  ;;  %v14641_v24 = vrot.slane %v14640_v39, 4  ;;  %v14647_v57 = vsel %vm6414_vm12, %v14207_v58, -inf }
 0x950   : > { %v14648_v53 = vrot.slane %v14647_v57, 4  ;;  %v14654_v3 = vsel %vm6414_vm12, %v14214_v43, -inf  ;;  %v14669_v15 = vrot.slane %v14668_v54, 4  ;;  %v14675_v19 = vsel %vm6414_vm12, %v14223_v60, -inf }
 0x951   : > { %v14642_v61 = vmax.f32 %v14640_v39, %v14641_v24  ;;  %v14655_v50 = vrot.slane %v14654_v3, 4  ;;  %v14661_v51 = vsel %vm6414_vm12, %v14215_v25, -inf  ;;  %v14676_v18 = vrot.slane %v14675_v19, 4 }
 0x952   : > { %v14649_v62 = vmax.f32 %v14647_v57, %v14648_v53  ;;  %v14662_v34 = vrot.slane %v14661_v51, 4  ;;  %v14670_v22 = vmax.f32 %v14668_v54, %v14669_v15  ;;  %v14682_v9 = vsel %vm6414_vm12, %v14230_v32, -inf }
 0x953   : > { %v14643_v31 = vrot.slane %v14642_v61, 2  ;;  %v14656_v45 = vmax.f32 %v14654_v3, %v14655_v50  ;;  %v14677_v47 = vmax.f32 %v14675_v19, %v14676_v18  ;;  %v14683_v1 = vrot.slane %v14682_v9, 4 }
 0x954   : > { %v14650_v38 = vrot.slane %v14649_v62, 2  ;;  %v14663_v41 = vmax.f32 %v14661_v51, %v14662_v34  ;;  %v14671_v52 = vrot.slane %v14670_v22, 2  ;;  %v14689_v33 = vsel %vm6414_vm12, %v14231_v20, -inf }
 0x955   : > { %v14644_v46 = vmax.f32 %v14642_v61, %v14643_v31  ;;  %v14657_v40 = vrot.slane %v14656_v45, 2  ;;  %v14678_v12 = vrot.slane %v14677_v47, 2  ;;  %v14684_v7 = vmax.f32 %v14682_v9, %v14683_v1 }
 0x956   : > { %v14651_v26 = vmax.f32 %v14649_v62, %v14650_v38  ;;  %v14664_v27 = vrot.slane %v14663_v41, 2  ;;  %v14672_v37 = vmax.f32 %v14670_v22, %v14671_v52  ;;  %v14690_v48 = vrot.slane %v14689_v33, 4 }
 0x957   : > { %v14645_v4 = vrot.slane %v14644_v46, 1  ;;  %v14658_v8 = vmax.f32 %v14656_v45, %v14657_v40  ;;  %v14679_v23 = vmax.f32 %v14677_v47, %v14678_v12  ;;  %v14685_v11 = vrot.slane %v14684_v7, 2 }
 0x958   : > { %v14652_v6 = vrot.slane %v14651_v26, 1  ;;  %v14665_v55 = vmax.f32 %v14663_v41, %v14664_v27  ;;  %v14673_v44 = vrot.slane %v14672_v37, 1  ;;  %v14691_v0 = vmax.f32 %v14689_v33, %v14690_v48 }
 0x959   : > { %v14646_v56 = vmax.f32 %v14644_v46, %v14645_v4  ;;  %v14659_v58 = vrot.slane %v14658_v8, 1  ;;  %v14680_v43 = vrot.slane %v14679_v23, 1  ;;  %v14686_v60 = vmax.f32 %v14684_v7, %v14685_v11 }
 0x95a   : > { %v14653_v32 = vmax.f32 %v14651_v26, %v14652_v6  ;;  %v14666_v39 = vrot.slane %v14665_v55, 1  ;;  %v14674_v54 = vmax.f32 %v14672_v37, %v14673_v44  ;;  %v14692_v25 = vrot.slane %v14691_v0, 2 }
 0x95b   : > { %v14660_v20 = vmax.f32 %v14658_v8, %v14659_v58  ;;  %v14681_v24 = vmax.f32 %v14679_v23, %v14680_v43  ;;  %v14687_v57 = vrot.slane %v14686_v60, 1  ;;  %v14824_v53 = vmax.f32 %v22274_v21, %v14646_v56 }
 0x95c   : > { %v14667_v3 = vmax.f32 %v14665_v55, %v14666_v39  ;;  %v14693_v15 = vmax.f32 %v14691_v0, %v14692_v25  ;;  %v14825_v19 = vmax.f32 %v22279_v5, %v14653_v32  ;;  %v14828_v61 = vmax.f32 %v22287_v28, %v14674_v54 }
 0x95d   : > { %v14688_v50 = vmax.f32 %v14686_v60, %v14687_v57  ;;  %v14826_v51 = vmax.f32 %v22281_v13, %v14660_v20  ;;  %v14829_v18 = vmax.f32 %v22292_v29, %v14681_v24  ;;  %v14012_v62 = vrot.slane %v14004_v59, %v19177_v16 }
 0x95e   : > { %v14694_v34 = vrot.slane %v14693_v15, 1  ;;  %v14827_v22 = vmax.f32 %v22285_v42, %v14667_v3  ;;  %v14880_v9 = vcombine.low %v14824_v53, %v14825_v19  ;;  %v14019_v21 = vrot.slane %v22302_v17, %v19177_v16 }
 0x95f   : > { %v14830_v31 = vmax.f32 %v22294_v10, %v14688_v50  ;;  %v14882_v45 = vcombine.low %v14828_v61, %v14829_v18  ;;  %v14020_v5 = vcombine.high %v14012_v62, %v14012_v62  ;;  %v14238_v28 = vrot.slane %v14012_v62, %v19177_v16 }
 0x960   : > { %v14695_v47 = vmax.f32 %v14693_v15, %v14694_v34  ;;  %v14881_v1 = vcombine.low %v14826_v51, %v14827_v22  ;;  %v14021_v13 = vcombine.high %v14019_v21, %v14019_v21  ;;  %v14254_v29 = vrot.slane %v14019_v21, %v19177_v16 }
 0x961   : > { %v14239_v38 = vcombine.high %v14238_v28, %v14238_v28  ;;  %v14246_v59 = vrot.slane %v14020_v5, %v19177_v16  ;;  %v14696_v42 = vsel %vm6414_vm12, %v14238_v28, -inf  ;;  %v13834_v41 = vmul.f32 %v22050_v35, %v22191_v63 }
 0x962   : > { %v14831_v17 = vmax.f32 %v22296_v30, %v14695_v47  ;;  %v14907_v10 = vrot.slane %v14881_v1, 7  ;;  %v14910_v52 = vrot.slane %v14882_v45, 6  ;;  %v14262_v33 = vrot.slane %v14021_v13, %v19177_v16 }
 0x963   : > { %v14247_v46 = vcombine.high %v14246_v59, %v14246_v59  ;;  %v14697_v40 = vrot.slane %v14696_v42, 4  ;;  %v14703_v12 = vsel %vm6414_vm12, %v14239_v38, -inf  ;;  %v14710_v7 = vsel %vm6414_vm12, %v14246_v59, -inf }
 0x964   : > { %v14883_v26 = vcombine.low %v14830_v31, %v14831_v17  ;;  %v14908_v27 = vsel %vm14889_vm9, %v14907_v10, %v14880_v9  ;;  %v14255_v37 = vcombine.high %v14254_v29, %v14254_v29  ;;  %v14704_v48 = vrot.slane %v14703_v12, 4 }
 0x965   : > { %v14909_v4 = vsel %vm7701_vm0, %v14907_v10, %v14908_v27  ;;  %v14698_v35 = vmax.f32 %v14696_v42, %v14697_v40  ;;  %v14711_v63 = vrot.slane %v14710_v7, 4  ;;  %v14717_v30 = vsel %vm6414_vm12, %v14247_v46, -inf }
 0x966   : > { %v14911_v8 = vsel %vm7695_vm13, %v14910_v52, %v14909_v4  ;;  %v14913_v23 = vrot.slane %v14883_v26, 5  ;;  %v14705_v11 = vmax.f32 %v14703_v12, %v14704_v48  ;;  %v14718_v6 = vrot.slane %v14717_v30, 4 }
 0x967   : > { %v14912_v55 = vsel %vm7703_vm1, %v14910_v52, %v14911_v8  ;;  %v14263_v44 = vcombine.high %v14262_v33, %v14262_v33  ;;  %v14712_v0 = vmax.f32 %v14710_v7, %v14711_v63  ;;  %v14724_v56 = vsel %vm6414_vm12, %v14254_v29, -inf }
 0x968   : > { %v14914_v58 = vsel %vm22578_vm4, %v14913_v23, %v14912_v55  ;;  %v14719_v43 = vmax.f32 %v14717_v30, %v14718_v6  ;;  %v14725_v60 = vrot.slane %v14724_v56, 4  ;;  %v13835_v32 = vmul.f32 %v22053_v14, %v22194_v36 }
 0x969   : > { %v14915_v39 = vsel %vm22579_vm6, %v14913_v23, %v14914_v58  ;;  %v14699_v54 = vrot.slane %v14698_v35, 2  ;;  %v14706_v25 = vrot.slane %v14705_v11, 2  ;;  %v14731_v20 = vsel %vm6414_vm12, %v14255_v37, -inf }
 0x96a   : > { %14931 = vst [vmem:[%s22139_s30 + $0x10] sm:$0xff] %v14915_v39  ;;  %v14713_v24 = vrot.slane %v14712_v0, 2  ;;  %v14720_v57 = vrot.slane %v14719_v43, 2  ;;  %v14726_v53 = vmax.f32 %v14724_v56, %v14725_v60  ;;  %v14732_v3 = vrot.slane %v14731_v20, 4 }
 0x96b   : > { %v14738_v15 = vsel %vm6414_vm12, %v14262_v33, -inf  ;;  %v14745_v19 = vsel %vm6414_vm12, %v14263_v44, -inf  ;;  %v13862_v61 = vadd.f32 %v22057_v49, %v13834_v41  ;;  %v13863_v14 = vadd.f32 %v22061_v2, %v13835_v32 }
 0x96c   : > { %v14727_v50 = vrot.slane %v14726_v53, 2  ;;  %v14733_v51 = vmax.f32 %v14731_v20, %v14732_v3  ;;  %v14700_v36 = vmax.f32 %v14698_v35, %v14699_v54  ;;  %v14707_v18 = vmax.f32 %v14705_v11, %v14706_v25 }
 0x96d   : > { %v14739_v62 = vrot.slane %v14738_v15, 4  ;;  %v14746_v34 = vrot.slane %v14745_v19, 4  ;;  %v14714_v22 = vmax.f32 %v14712_v0, %v14713_v24  ;;  %v14721_v9 = vmax.f32 %v14719_v43, %v14720_v57 }
 0x96e   : > { %v14734_v21 = vrot.slane %v14733_v51, 2  ;;  %v14728_v31 = vmax.f32 %v14726_v53, %v14727_v50  ;;  %v13878_v28 = vmax.f32 %v13862_v61, 0.0  ;;  %v13879_v1 = vmax.f32 %v13863_v14, 0.0 }
 0x96f   : > { %v14740_v45 = vmax.f32 %v14738_v15, %v14739_v62  ;;  %v14747_v5 = vmax.f32 %v14745_v19, %v14746_v34  ;;  %v14701_v13 = vrot.slane %v14700_v36, 1  ;;  %v14708_v29 = vrot.slane %v14707_v18, 1 }
 0x970   : > { %v14735_v47 = vmax.f32 %v14733_v51, %v14734_v21  ;;  %v14022_v59 = vcombine.low %v13878_v28, %v13879_v1  ;;  %v14023_v42 = vcombine.high %v13878_v28, %v13879_v1  ;;  %v14715_v2 = vrot.slane %v14714_v22, 1 }
 0x971   : > { %v14741_v49 = vrot.slane %v14740_v45, 2  ;;  %v14748_v38 = vrot.slane %v14747_v5, 2  ;;  %v14722_v41 = vrot.slane %v14721_v9, 1  ;;  %v14729_v17 = vrot.slane %v14728_v31, 1 }
 0x972   : > { %v14736_v10 = vrot.slane %v14735_v47, 1  ;;  %v14030_v52 = vrot.slane %v14022_v59, %v19177_v16  ;;  %v14037_v33 = vrot.slane %v14023_v42, %v19177_v16  ;;  %v22348_v46 = vmax.f32 %v14700_v36, %v14701_v13 }
 0x973   : > { %v22350_v40 = vmax.f32 %v14707_v18, %v14708_v29  ;;  %v22352_v12 = vmax.f32 %v14740_v45, %v14741_v49  ;;  %v22354_v7 = vmax.f32 %v14747_v5, %v14748_v38  ;;  %v22358_v4 = vmax.f32 %v14714_v22, %v14715_v2 }
 0x974   : > { %v14038_v26 = vcombine.high %v14030_v52, %v14030_v52  ;;  %v14039_v27 = vcombine.high %v14037_v33, %v14037_v33  ;;  %v14270_v37 = vrot.slane %v14030_v52, %v19177_v16  ;;  %v14286_v48 = vrot.slane %v14037_v33, %v19177_v16 }
 0x975   : > { %v22360_v35 = vmax.f32 %v14721_v9, %v14722_v41  ;;  %v22362_v63 = vmax.f32 %v14728_v31, %v14729_v17  ;;  %v22364_v30 = vmax.f32 %v14735_v47, %v14736_v10  ;;  %v14743_v55 = vrot.slane %v22352_v12, 1 }
 0x976   : > { %v14271_v8 = vcombine.high %v14270_v37, %v14270_v37  ;;  %v14278_v23 = vrot.slane %v14038_v26, %v19177_v16  ;;  %v14287_v11 = vcombine.high %v14286_v48, %v14286_v48  ;;  %v14294_v6 = vrot.slane %v14039_v27, %v19177_v16 }
 0x977   : > { %v14750_v44 = vrot.slane %v22354_v7, 1  ;;  %v14752_v0 = vsel %vm6414_vm12, %v14270_v37, -inf  ;;  %v14780_v56 = vsel %vm6414_vm12, %v14286_v48, -inf }
 0x978   : > { %v14279_v58 = vcombine.high %v14278_v23, %v14278_v23  ;;  %v14295_v43 = vcombine.high %v14294_v6, %v14294_v6  ;;  %v14753_v60 = vrot.slane %v14752_v0, 4  ;;  %v14759_v32 = vsel %vm6414_vm12, %v14271_v8, -inf }
 0x979   : > { %v14760_v39 = vrot.slane %v14759_v32, 4  ;;  %v14766_v54 = vsel %vm6414_vm12, %v14278_v23, -inf  ;;  %v14781_v25 = vrot.slane %v14780_v56, 4  ;;  %v14787_v20 = vsel %vm6414_vm12, %v14287_v11, -inf }
 0x97a   : > { %v14754_v16 = vmax.f32 %v14752_v0, %v14753_v60  ;;  %v14767_v24 = vrot.slane %v14766_v54, 4  ;;  %v14773_v57 = vsel %vm6414_vm12, %v14279_v58, -inf  ;;  %v14788_v53 = vrot.slane %v14787_v20, 4 }
 0x97b   : > { %v14761_v3 = vmax.f32 %v14759_v32, %v14760_v39  ;;  %v14774_v15 = vrot.slane %v14773_v57, 4  ;;  %v14782_v19 = vmax.f32 %v14780_v56, %v14781_v25  ;;  %v14794_v61 = vsel %vm6414_vm12, %v14294_v6, -inf }
 0x97c   : > { %v14755_v50 = vrot.slane %v14754_v16, 2  ;;  %v14768_v51 = vmax.f32 %v14766_v54, %v14767_v24  ;;  %v14789_v14 = vmax.f32 %v14787_v20, %v14788_v53  ;;  %v14795_v36 = vrot.slane %v14794_v61, 4 }
 0x97d   : > { %v14762_v18 = vrot.slane %v14761_v3, 2  ;;  %v14775_v62 = vmax.f32 %v14773_v57, %v14774_v15  ;;  %v14783_v34 = vrot.slane %v14782_v19, 2  ;;  %v14801_v22 = vsel %vm6414_vm12, %v14295_v43, -inf  ;;  %vm22580_vm12 = vmmov %vm22578_vm4 }
 0x97e   : > { %v14756_v9 = vmax.f32 %v14754_v16, %v14755_v50  ;;  %v14769_v21 = vrot.slane %v14768_v51, 2  ;;  %v14790_v31 = vrot.slane %v14789_v14, 2  ;;  %v14796_v45 = vmax.f32 %v14794_v61, %v14795_v36 }
 0x97f   : > { %v14763_v5 = vmax.f32 %v14761_v3, %v14762_v18  ;;  %v14776_v28 = vrot.slane %v14775_v62, 2  ;;  %v14784_v47 = vmax.f32 %v14782_v19, %v14783_v34  ;;  %v14802_v1 = vrot.slane %v14801_v22, 4 }
 0x980   : > { %v14757_v13 = vrot.slane %v14756_v9, 1  ;;  %v14770_v29 = vmax.f32 %v14768_v51, %v14769_v21  ;;  %v14791_v49 = vmax.f32 %v14789_v14, %v14790_v31  ;;  %v14797_v38 = vrot.slane %v14796_v45, 2 }
 0x981   : > { %v14764_v59 = vrot.slane %v14763_v5, 1  ;;  %v14777_v42 = vmax.f32 %v14775_v62, %v14776_v28  ;;  %v14785_v2 = vrot.slane %v14784_v47, 1  ;;  %v14803_v41 = vmax.f32 %v14801_v22, %v14802_v1 }
 0x982   : > { %v14758_v17 = vmax.f32 %v14756_v9, %v14757_v13  ;;  %v14771_v10 = vrot.slane %v14770_v29, 1  ;;  %v14792_v52 = vrot.slane %v14791_v49, 1  ;;  %v14798_v33 = vmax.f32 %v14796_v45, %v14797_v38 }
 0x983   : > { %v14765_v26 = vmax.f32 %v14763_v5, %v14764_v59  ;;  %v14778_v27 = vrot.slane %v14777_v42, 1  ;;  %v14786_v37 = vmax.f32 %v14784_v47, %v14785_v2  ;;  %v14804_v48 = vrot.slane %v14803_v41, 2 }
 0x984   : > { %v14772_v8 = vmax.f32 %v14770_v29, %v14771_v10  ;;  %v14793_v23 = vmax.f32 %v14791_v49, %v14792_v52  ;;  %v14799_v11 = vrot.slane %v14798_v33, 1  ;;  %v14832_v6 = vmax.f32 %v22348_v46, %v14758_v17 }
 0x985   : > { %v14779_v0 = vmax.f32 %v14777_v42, %v14778_v27  ;;  %v14805_v56 = vmax.f32 %v14803_v41, %v14804_v48  ;;  %v14833_v58 = vmax.f32 %v22350_v40, %v14765_v26  ;;  %v14836_v43 = vmax.f32 %v22362_v63, %v14786_v37 }
 0x986   : > { %v14744_v60 = vmax.f32 %v22352_v12, %v14743_v55  ;;  %v14800_v32 = vmax.f32 %v14798_v33, %v14799_v11  ;;  %v14834_v39 = vmax.f32 %v22358_v4, %v14772_v8  ;;  %v14837_v54 = vmax.f32 %v22364_v30, %v14793_v23 }
 0x987   : > { %v14806_v25 = vrot.slane %v14805_v56, 1  ;;  %v14835_v20 = vmax.f32 %v22360_v35, %v14779_v0  ;;  %v14884_v16 = vcombine.low %v14832_v6, %v14833_v58  ;;  %v14751_v40 = vmax.f32 %v22354_v7, %v14750_v44 }
 0x988   : > { %v14838_v24 = vmax.f32 %v14744_v60, %v14800_v32  ;;  %v14886_v46 = vcombine.low %v14836_v43, %v14837_v54 }
 0x989   : > { %v14807_v57 = vmax.f32 %v14805_v56, %v14806_v25  ;;  %v14885_v63 = vcombine.low %v14834_v39, %v14835_v20 }
 0x98a   : > { %v14919_v3 = vrot.slane %v14886_v46, 6 }
 0x98b   : > { %v14839_v53 = vmax.f32 %v14751_v40, %v14807_v57  ;;  %v14916_v12 = vrot.slane %v14885_v63, 7 }
 0x98d   : > { %v14887_v55 = vcombine.low %v14838_v24, %v14839_v53  ;;  %v14917_v4 = vsel %vm14889_vm9, %v14916_v12, %v14884_v16 }
 0x98e   : > { %v14918_v30 = vsel %vm7701_vm0, %v14916_v12, %v14917_v4 }
 0x98f   : > { %v14920_v35 = vsel %vm7695_vm13, %v14919_v3, %v14918_v30  ;;  %v14922_v15 = vrot.slane %v14887_v55, 5 }
 0x990   : > { %v14921_v19 = vsel %vm7703_vm1, %v14919_v3, %v14920_v35 }
 0x991   : > { %v14923_v61 = vsel %vm22580_vm12, %v14922_v15, %v14921_v19 }
 0x992   : > { %v14924_v50 = vsel %vm22581_vm8, %v14922_v15, %v14923_v61 }
 0x993   : > { %14932 = vst [vmem:[%s22139_s30 + $0x18] sm:$0xff] %v14924_v50 }
 0x994 PF: > { %s23_s25 = sadd.s32 1, %s18057_s25  }
 0x995   : > { %p20_p4 = scmp.ge.s32.totalorder %s23_s25, 4  }
 0x997   :  { %22 = sbr.rel (!%p20_p4) target bundleno = 1 (0x1), region = 111 }

</bundles_post_ra>
